<compile_context>
chip_gen: v7x
topology: tpu7x:2x2x1
jax: 0.10.0
libtpu: 0.0.40
codegen_flags: <defaults>
</compile_context>

<pallas_src>
import functools

import jax
import jax.numpy as jnp
from jax.experimental import pallas as pl
from jax.experimental.pallas import tpu as pltpu


def _round_up(x, m):
    return ((x + m - 1) // m) * m


@functools.lru_cache(maxsize=1)
def _vmem_limit_bytes():
    # Generation-aware VMEM limit; conservative fallback is safe on v7x.
    try:
        cap = pltpu.get_tpu_info().vmem_capacity_bytes
        return int(min(cap * 0.85, 112 * 1024 * 1024))
    except Exception:
        return 48 * 1024 * 1024


# ----------------------------------------------------------------------------
# Pallas kernels
# ----------------------------------------------------------------------------
def _base_conv_ln_kernel(x_ref, w_ref, b_ref, o_ref, acc_ref, *,
                         H, W, c_true, apply_ln, eps):
    """Fused 3x3 same-pad conv + ReLU + optional LayerNorm for one sample.

    x_ref   : (1, H+2, W+2, Ci)   bf16  spatially padded input sample
    w_ref   : (9, Ci, Cop)        bf16  weights per tap (Cop = 128-multiple)
    b_ref   : (1, Cop)            f32   bias (zero in padded channels)
    o_ref   : (1, H+2, W+2, Cop)  bf16  output, zero halo + zero pad channels
    acc_ref : (H*W, Cop)          f32   VMEM scratch accumulator
    """
    Ci = x_ref.shape[-1]
    Cop = o_ref.shape[-1]
    x = x_ref[0]                                        # (H+2, W+2, Ci) bf16

    if Ci % 128 == 0:
        # Single fused-K matmul (K = 9*Ci) — lane-aligned in-VMEM im2col.
        taps = [x[dy:dy + H, dx:dx + W, :].reshape(H * W, Ci)
                for dy in range(3) for dx in range(3)]
        a = jnp.concatenate(taps, axis=-1)              # (H*W, 9*Ci) bf16
        y = jnp.dot(a, w_ref[...].reshape(9 * Ci, Cop),
                    preferred_element_type=jnp.float32)
    else:
        # Low-channel path (stem): 9 short-K matmuls into a VMEM accumulator.
        acc_ref[...] = jnp.zeros_like(acc_ref)
        for t in range(9):
            dy, dx = divmod(t, 3)
            a = x[dy:dy + H, dx:dx + W, :].reshape(H * W, Ci)
            acc_ref[...] += jnp.dot(a, w_ref[t],
                                    preferred_element_type=jnp.float32)
        y = acc_ref[...]

    y = jnp.maximum(y + b_ref[...], 0.0)                # bias + ReLU, f32

    if apply_ln:
        # LayerNorm over all non-batch dims (no affine).  Padded channels are
        # exactly zero, so plain sums are correct as long as we divide by the
        # true element count; the centered pass masks padded lanes so they
        # stay exactly zero downstream.
        d = float(H * W * c_true)
        mean = jnp.sum(y, axis=(0, 1), keepdims=True) / d
        lane = jax.lax.broadcasted_iota(jnp.int32, y.shape, 1)
        yc = jnp.where(lane < c_true, y - mean, 0.0)
        var = jnp.sum(yc * yc, axis=(0, 1), keepdims=True) / d
        y = yc * jax.lax.rsqrt(var + eps)

    # Store with a zero spatial halo so the next conv consumes it directly.
    o_ref[0] = jnp.zeros((H + 2, W + 2, Cop), o_ref.dtype)
    o_ref[0, pl.ds(1, H), pl.ds(1, W), :] = y.reshape(H, W, Cop).astype(o_ref.dtype)


def _autoenc_kernel(f_ref, we_ref, be_ref, wd_ref, bd_ref,
                    enc_ref, dec_ref, enc_pad_ref, *, H, W):
    """Fused encoder(conv3x3+ReLU) + decoder(conv3x3 linear) for one sample.

    f_ref       : (1, H+2, W+2, Cfp) bf16  padded features (zero halo)
    we_ref      : (9*Cfp, Cenc)      bf16  encoder weights (im2col layout)
    be_ref      : (1, Cenc)          f32
    wd_ref      : (9, Cenc, Cdec)    bf16  decoder weights per tap
    bd_ref      : (1, Cdec)          f32
    enc_ref     : (1, H*W, Cenc)     bf16  compact encoded output
    dec_ref     : (1, H*W, Cdec)     f32   compact decoded output
    enc_pad_ref : (H+2, W+2, Cenc)   bf16  VMEM scratch (padded encoded map)
    """
    Cfp = f_ref.shape[-1]
    Cenc = enc_ref.shape[-1]
    Cdec = dec_ref.shape[-1]
    x = f_ref[0]                                        # (H+2, W+2, Cfp) bf16

    # ---- encoder: one fused-K matmul (K = 9*Cfp), bias + ReLU ----
    taps = [x[dy:dy + H, dx:dx + W, :].reshape(H * W, Cfp)
            for dy in range(3) for dx in range(3)]
    a = jnp.concatenate(taps, axis=-1)                  # (H*W, 9*Cfp) bf16
    enc = jnp.dot(a, we_ref[...], preferred_element_type=jnp.float32)
    enc = jnp.maximum(enc + be_ref[...], 0.0)
    enc_bf = enc.astype(jnp.bfloat16)
    enc_ref[0] = enc_bf                                 # compact store (true Cenc)

    # Encoded map never round-trips HBM: keep it (zero-haloed) in VMEM.
    enc_pad_ref[...] = jnp.zeros_like(enc_pad_ref)
    enc_pad_ref[pl.ds(1, H), pl.ds(1, W), :] = enc_bf.reshape(H, W, Cenc)

    # ---- decoder: 9-tap accumulate (K = Cenc is tiny), linear ----
    ep = enc_pad_ref[...]                               # (H+2, W+2, Cenc) bf16
    dec = jnp.zeros((H * W, Cdec), jnp.float32)
    for t in range(9):
        dy, dx = divmod(t, 3)
        a = ep[dy:dy + H, dx:dx + W, :].reshape(H * W, Cenc)
        dec += jnp.dot(a, wd_ref[t], preferred_element_type=jnp.float32)
    dec_ref[0] = (dec + bd_ref[...]).astype(dec_ref.dtype)


# ----------------------------------------------------------------------------
# Wrappers
# ----------------------------------------------------------------------------
def base_conv_ln(x_nhwc, w_oihw, bias, *, apply_ln, eps=1e-5):
    """base_model conv3x3 + ReLU (+ fused LayerNorm).

    Returns a bf16 (N, H+2, W+2, Cop) map: spatial halo = 0, channels padded
    to a 128-multiple (padded channels exactly 0), ready for the next conv.
    """
    N, H, W, Ci = x_nhwc.shape
    Co = w_oihw.shape[0]
    Cop = _round_up(Co, 128)

    # Stem glue only: spatial zero-pad + bf16 cast of the (tiny) input image.
    xp = jnp.pad(x_nhwc.astype(jnp.bfloat16), ((0, 0), (1, 1), (1, 1), (0, 0)))

    # (Co, Ci, 3, 3) -> (3, 3, Ci, Co) -> (9, Ci, Cop)  (pad Co, cast bf16)
    # TODO(synk): precompute the padded bf16 weights once outside the forward
    #             if params are reused across many steps.
    w = jnp.transpose(w_oihw, (2, 3, 1, 0)).reshape(9, Ci, Co)
    w = jnp.pad(w, ((0, 0), (0, 0), (0, Cop - Co))).astype(jnp.bfloat16)
    b = jnp.pad(bias, (0, Cop - Co)).astype(jnp.float32).reshape(1, Cop)

    return pl.pallas_call(
        functools.partial(_base_conv_ln_kernel, H=H, W=W, c_true=Co,
                          apply_ln=apply_ln, eps=eps),
        out_shape=jax.ShapeDtypeStruct((N, H + 2, W + 2, Cop), jnp.bfloat16),
        grid=(N,),
        in_specs=[
            pl.BlockSpec((1, H + 2, W + 2, Ci), lambda n: (n, 0, 0, 0)),
            pl.BlockSpec((9, Ci, Cop), lambda n: (0, 0, 0)),
            pl.BlockSpec((1, Cop), lambda n: (0, 0)),
        ],
        out_specs=pl.BlockSpec((1, H + 2, W + 2, Cop), lambda n: (n, 0, 0, 0)),
        scratch_shapes=[pltpu.VMEM((H * W, Cop), jnp.float32)],
        compiler_params=pltpu.CompilerParams(
            dimension_semantics=("parallel",),
            vmem_limit_bytes=_vmem_limit_bytes()),
    )(xp, w, b)


def conv_autoencoder(feat_padded, enc_w, enc_b, dec_w, dec_b):
    """convAuto_model: fused encoder (ReLU) + decoder (linear).

    feat_padded : (N, H+2, W+2, Cfp) bf16 from base_conv_ln.
    Returns (encoded (N, H*W, Cenc) bf16, decoded (N, H*W, Cdec) f32).
    """
    N, Hp, Wp, Cfp = feat_padded.shape
    H, W = Hp - 2, Wp - 2
    Cenc, Cf_w = enc_w.shape[0], enc_w.shape[1]
    Cdec = dec_w.shape[0]

    # Encoder weights -> im2col layout (9*Cfp, Cenc); zero-pad the K rows that
    # correspond to the feature map's zero-padded channels.
    we = jnp.transpose(enc_w, (2, 3, 1, 0)).reshape(9, Cf_w, Cenc)
    we = jnp.pad(we, ((0, 0), (0, Cfp - Cf_w), (0, 0)))
    we = we.reshape(9 * Cfp, Cenc).astype(jnp.bfloat16)
    be = enc_b.astype(jnp.float32).reshape(1, Cenc)

    wd = jnp.transpose(dec_w, (2, 3, 1, 0)).reshape(9, Cenc, Cdec).astype(jnp.bfloat16)
    bd = dec_b.astype(jnp.float32).reshape(1, Cdec)

    return pl.pallas_call(
        functools.partial(_autoenc_kernel, H=H, W=W),
        out_shape=(jax.ShapeDtypeStruct((N, H * W, Cenc), jnp.bfloat16),
                   jax.ShapeDtypeStruct((N, H * W, Cdec), jnp.float32)),
        grid=(N,),
        in_specs=[
            pl.BlockSpec((1, Hp, Wp, Cfp), lambda n: (n, 0, 0, 0)),
            pl.BlockSpec((9 * Cfp, Cenc), lambda n: (0, 0)),
            pl.BlockSpec((1, Cenc), lambda n: (0, 0)),
            pl.BlockSpec((9, Cenc, Cdec), lambda n: (0, 0, 0)),
            pl.BlockSpec((1, Cdec), lambda n: (0, 0)),
        ],
        out_specs=(pl.BlockSpec((1, H * W, Cenc), lambda n: (n, 0, 0)),
                   pl.BlockSpec((1, H * W, Cdec), lambda n: (n, 0, 0))),
        scratch_shapes=[pltpu.VMEM((H + 2, W + 2, Cenc), jnp.bfloat16)],
        compiler_params=pltpu.CompilerParams(
            dimension_semantics=("parallel",),
            vmem_limit_bytes=_vmem_limit_bytes()),
    )(feat_padded, we, be, wd, bd)


def init_params(key, c_in, c_feat, c_enc):
    ks = jax.random.split(key, 6)
    s = 0.1
    return {
        "base_w": s * jax.random.normal(ks[0], (c_feat, c_in, 3, 3), jnp.float32),
        "base_b": s * jax.random.normal(ks[1], (c_feat,), jnp.float32),
        "enc_w": s * jax.random.normal(ks[2], (c_enc, c_feat, 3, 3), jnp.float32),
        "enc_b": s * jax.random.normal(ks[3], (c_enc,), jnp.float32),
        "dec_w": s * jax.random.normal(ks[4], (c_feat, c_enc, 3, 3), jnp.float32),
        "dec_b": s * jax.random.normal(ks[5], (c_feat,), jnp.float32),
    }


@functools.partial(jax.jit, static_argnames=("islayer_norm",))
def vgg_conv_auto_forward(x_nchw, params, islayer_norm=True):
    """Returns (features, encoded, decoded), all NCHW like the torch module."""
    c_feat = params["base_b"].shape[0]
    c_enc = params["enc_b"].shape[0]
    N, _, H, W = x_nchw.shape

    x = jnp.transpose(x_nchw, (0, 2, 3, 1))            # NCHW -> NHWC

    # base_model (+ fused LayerNorm): bf16, spatially padded, 128-padded chans
    feat_p = base_conv_ln(x, params["base_w"], params["base_b"],
                          apply_ln=islayer_norm)

    # convAuto_model: fused encoder + decoder (encoded map stays in VMEM)
    enc_flat, dec_flat = conv_autoencoder(feat_p, params["enc_w"], params["enc_b"],
                                          params["dec_w"], params["dec_b"])

    # Strip halo / channel padding, back to f32 NCHW for the torch-style returns.
    features = jnp.transpose(
        feat_p[:, 1:H + 1, 1:W + 1, :c_feat].astype(jnp.float32), (0, 3, 1, 2))
    encoded = jnp.transpose(
        enc_flat.reshape(N, H, W, c_enc).astype(jnp.float32), (0, 3, 1, 2))
    decoded = jnp.transpose(
        dec_flat.reshape(N, H, W, c_feat), (0, 3, 1, 2))
    return features, encoded, decoded


if __name__ == "__main__":
    key = jax.random.PRNGKey(0)
    k_x, k_p = jax.random.split(key)

    N, C_IN, H, W = 2, 4, 16, 16       # small stand-in for VGG input
    C_FEAT, C_ENC = 32, 8              # small stand-in for 512-dim VGG features

    x = jax.random.normal(k_x, (N, C_IN, H, W), jnp.float32)
    params = init_params(k_p, C_IN, C_FEAT, C_ENC)

    features, encoded, decoded = vgg_conv_auto_forward(x, params, islayer_norm=True)
    jax.block_until_ready((features, encoded, decoded))

    assert features.shape == (N, C_FEAT, H, W)
    assert encoded.shape == (N, C_ENC, H, W)
    assert decoded.shape == (N, C_FEAT, H, W)
    assert bool(jnp.all(jnp.isfinite(features)))
    assert bool(jnp.all(jnp.isfinite(encoded)))
    assert bool(jnp.all(jnp.isfinite(decoded)))
    print("KERNEL_OK")
</pallas_src>

<mosaic_0001>
module attributes {stable_mosaic.version = 11 : i64} {
  func.func @_base_conv_ln_kernel(%arg0: i32, %arg1: memref<1x18x18x4xbf16, #tpu.memory_space<vmem>>, %arg2: memref<9x4x128xbf16, #tpu.memory_space<vmem>>, %arg3: memref<1x128xf32, #tpu.memory_space<vmem>>, %arg4: memref<1x18x18x128xbf16, #tpu.memory_space<vmem>>, %arg5: memref<256x128xf32, #tpu.memory_space<vmem>>) attributes {dimension_semantics = [#tpu.dimension_semantics<parallel>], iteration_bounds = array<i64: 2>, scalar_prefetch = 0 : i64, scratch_operands = 1 : i64, tpu.core_type = #tpu.core_type<tc>, window_params = [{transform_indices = @transform_0, window_bounds = array<i64: 1, 18, 18, 4>}, {pipeline_mode = #tpu.pipeline_mode<synchronous>, transform_indices = @transform_1, window_bounds = array<i64: 9, 4, 128>}, {pipeline_mode = #tpu.pipeline_mode<synchronous>, transform_indices = @transform_2, window_bounds = array<i64: 1, 128>}, {transform_indices = @transform_3, window_bounds = array<i64: 1, 18, 18, 128>}]} {
    %c0 = arith.constant 0 : index
    %c0_0 = arith.constant 0 : index
    %c0_1 = arith.constant 0 : index
    %c0_2 = arith.constant 0 : index
    %0 = vector.load %arg1[%c0, %c0_0, %c0_1, %c0_2] : memref<1x18x18x4xbf16, #tpu.memory_space<vmem>>, vector<1x18x18x4xbf16>
    %1 = vector.shape_cast %0 : vector<1x18x18x4xbf16> to vector<18x18x4xbf16>
    %cst = arith.constant 0.000000e+00 : f32
    %2 = vector.broadcast %cst : f32 to vector<256x128xf32>
    %c0_3 = arith.constant 0 : index
    %c0_4 = arith.constant 0 : index
    %3 = vector.load %arg5[%c0_3, %c0_4] : memref<256x128xf32, #tpu.memory_space<vmem>>, vector<256x128xf32>
    tpu.vector_store %arg5[%c0_3, %c0_4], %2 {strides = array<i32>} : memref<256x128xf32, #tpu.memory_space<vmem>>, vector<256x128xf32>,
    %4 = vector.extract_strided_slice %1 {offsets = [0, 0, 0], sizes = [16, 16, 4], strides = [1, 1, 1]} : vector<18x18x4xbf16> to vector<16x16x4xbf16>
    %5 = vector.shape_cast %4 : vector<16x16x4xbf16> to vector<256x4xbf16>
    %c0_5 = arith.constant 0 : index
    %c0_6 = arith.constant 0 : index
    %6 = vector.load %arg5[%c0_5, %c0_6] : memref<256x128xf32, #tpu.memory_space<vmem>>, vector<256x128xf32>
    %c0_7 = arith.constant 0 : index
    %c0_8 = arith.constant 0 : index
    %c0_9 = arith.constant 0 : index
    %7 = vector.load %arg2[%c0_7, %c0_8, %c0_9] : memref<9x4x128xbf16, #tpu.memory_space<vmem>>, vector<1x4x128xbf16>
    %8 = vector.shape_cast %7 : vector<1x4x128xbf16> to vector<4x128xbf16>
    %cst_10 = arith.constant dense<0.000000e+00> : vector<256x128xf32>
    %9 = tpu.matmul %5, %8, %cst_10 {dimension_numbers = #tpu.dot_dimension_numbers<[1], [0], [0], [1], [0, 0, 1, 1], [], []>} : vector<256x4xbf16>, vector<4x128xbf16>, vector<256x128xf32> -> vector<256x128xf32>
    %10 = arith.addf %6, %9 : vector<256x128xf32>
    %c0_11 = arith.constant 0 : index
    %c0_12 = arith.constant 0 : index
    %11 = vector.load %arg5[%c0_11, %c0_12] : memref<256x128xf32, #tpu.memory_space<vmem>>, vector<256x128xf32>
    tpu.vector_store %arg5[%c0_11, %c0_12], %10 {strides = array<i32>} : memref<256x128xf32, #tpu.memory_space<vmem>>, vector<256x128xf32>,
    %12 = vector.extract_strided_slice %1 {offsets = [0, 1, 0], sizes = [16, 16, 4], strides = [1, 1, 1]} : vector<18x18x4xbf16> to vector<16x16x4xbf16>
    %13 = vector.shape_cast %12 : vector<16x16x4xbf16> to vector<256x4xbf16>
    %c0_13 = arith.constant 0 : index
    %c0_14 = arith.constant 0 : index
    %14 = vector.load %arg5[%c0_13, %c0_14] : memref<256x128xf32, #tpu.memory_space<vmem>>, vector<256x128xf32>
    %c1 = arith.constant 1 : index
    %c0_15 = arith.constant 0 : index
    %c0_16 = arith.constant 0 : index
    %15 = vector.load %arg2[%c1, %c0_15, %c0_16] : memref<9x4x128xbf16, #tpu.memory_space<vmem>>, vector<1x4x128xbf16>
    %16 = vector.shape_cast %15 : vector<1x4x128xbf16> to vector<4x128xbf16>
    %cst_17 = arith.constant dense<0.000000e+00> : vector<256x128xf32>
    %17 = tpu.matmul %13, %16, %cst_17 {dimension_numbers = #tpu.dot_dimension_numbers<[1], [0], [0], [1], [0, 0, 1, 1], [], []>} : vector<256x4xbf16>, vector<4x128xbf16>, vector<256x128xf32> -> vector<256x128xf32>
    %18 = arith.addf %14, %17 : vector<256x128xf32>
    %c0_18 = arith.constant 0 : index
    %c0_19 = arith.constant 0 : index
    %19 = vector.load %arg5[%c0_18, %c0_19] : memref<256x128xf32, #tpu.memory_space<vmem>>, vector<256x128xf32>
    tpu.vector_store %arg5[%c0_18, %c0_19], %18 {strides = array<i32>} : memref<256x128xf32, #tpu.memory_space<vmem>>, vector<256x128xf32>,
    %20 = vector.extract_strided_slice %1 {offsets = [0, 2, 0], sizes = [16, 16, 4], strides = [1, 1, 1]} : vector<18x18x4xbf16> to vector<16x16x4xbf16>
    %21 = vector.shape_cast %20 : vector<16x16x4xbf16> to vector<256x4xbf16>
    %c0_20 = arith.constant 0 : index
    %c0_21 = arith.constant 0 : index
    %22 = vector.load %arg5[%c0_20, %c0_21] : memref<256x128xf32, #tpu.memory_space<vmem>>, vector<256x128xf32>
    %c2 = arith.constant 2 : index
    %c0_22 = arith.constant 0 : index
    %c0_23 = arith.constant 0 : index
    %23 = vector.load %arg2[%c2, %c0_22, %c0_23] : memref<9x4x128xbf16, #tpu.memory_space<vmem>>, vector<1x4x128xbf16>
    %24 = vector.shape_cast %23 : vector<1x4x128xbf16> to vector<4x128xbf16>
    %cst_24 = arith.constant dense<0.000000e+00> : vector<256x128xf32>
    %25 = tpu.matmul %21, %24, %cst_24 {dimension_numbers = #tpu.dot_dimension_numbers<[1], [0], [0], [1], [0, 0, 1, 1], [], []>} : vector<256x4xbf16>, vector<4x128xbf16>, vector<256x128xf32> -> vector<256x128xf32>
    %26 = arith.addf %22, %25 : vector<256x128xf32>
    %c0_25 = arith.constant 0 : index
    %c0_26 = arith.constant 0 : index
    %27 = vector.load %arg5[%c0_25, %c0_26] : memref<256x128xf32, #tpu.memory_space<vmem>>, vector<256x128xf32>
    tpu.vector_store %arg5[%c0_25, %c0_26], %26 {strides = array<i32>} : memref<256x128xf32, #tpu.memory_space<vmem>>, vector<256x128xf32>,
    %28 = vector.extract_strided_slice %1 {offsets = [1, 0, 0], sizes = [16, 16, 4], strides = [1, 1, 1]} : vector<18x18x4xbf16> to vector<16x16x4xbf16>
    %29 = vector.shape_cast %28 : vector<16x16x4xbf16> to vector<256x4xbf16>
    %c0_27 = arith.constant 0 : index
    %c0_28 = arith.constant 0 : index
    %30 = vector.load %arg5[%c0_27, %c0_28] : memref<256x128xf32, #tpu.memory_space<vmem>>, vector<256x128xf32>
    %c3 = arith.constant 3 : index
    %c0_29 = arith.constant 0 : index
    %c0_30 = arith.constant 0 : index
    %31 = vector.load %arg2[%c3, %c0_29, %c0_30] : memref<9x4x128xbf16, #tpu.memory_space<vmem>>, vector<1x4x128xbf16>
    %32 = vector.shape_cast %31 : vector<1x4x128xbf16> to vector<4x128xbf16>
    %cst_31 = arith.constant dense<0.000000e+00> : vector<256x128xf32>
    %33 = tpu.matmul %29, %32, %cst_31 {dimension_numbers = #tpu.dot_dimension_numbers<[1], [0], [0], [1], [0, 0, 1, 1], [], []>} : vector<256x4xbf16>, vector<4x128xbf16>, vector<256x128xf32> -> vector<256x128xf32>
    %34 = arith.addf %30, %33 : vector<256x128xf32>
    %c0_32 = arith.constant 0 : index
    %c0_33 = arith.constant 0 : index
    %35 = vector.load %arg5[%c0_32, %c0_33] : memref<256x128xf32, #tpu.memory_space<vmem>>, vector<256x128xf32>
    tpu.vector_store %arg5[%c0_32, %c0_33], %34 {strides = array<i32>} : memref<256x128xf32, #tpu.memory_space<vmem>>, vector<256x128xf32>,
    %36 = vector.extract_strided_slice %1 {offsets = [1, 1, 0], sizes = [16, 16, 4], strides = [1, 1, 1]} : vector<18x18x4xbf16> to vector<16x16x4xbf16>
    %37 = vector.shape_cast %36 : vector<16x16x4xbf16> to vector<256x4xbf16>
    %c0_34 = arith.constant 0 : index
    %c0_35 = arith.constant 0 : index
    %38 = vector.load %arg5[%c0_34, %c0_35] : memref<256x128xf32, #tpu.memory_space<vmem>>, vector<256x128xf32>
    %c4 = arith.constant 4 : index
    %c0_36 = arith.constant 0 : index
    %c0_37 = arith.constant 0 : index
    %39 = vector.load %arg2[%c4, %c0_36, %c0_37] : memref<9x4x128xbf16, #tpu.memory_space<vmem>>, vector<1x4x128xbf16>
    %40 = vector.shape_cast %39 : vector<1x4x128xbf16> to vector<4x128xbf16>
    %cst_38 = arith.constant dense<0.000000e+00> : vector<256x128xf32>
    %41 = tpu.matmul %37, %40, %cst_38 {dimension_numbers = #tpu.dot_dimension_numbers<[1], [0], [0], [1], [0, 0, 1, 1], [], []>} : vector<256x4xbf16>, vector<4x128xbf16>, vector<256x128xf32> -> vector<256x128xf32>
    %42 = arith.addf %38, %41 : vector<256x128xf32>
    %c0_39 = arith.constant 0 : index
    %c0_40 = arith.constant 0 : index
    %43 = vector.load %arg5[%c0_39, %c0_40] : memref<256x128xf32, #tpu.memory_space<vmem>>, vector<256x128xf32>
    tpu.vector_store %arg5[%c0_39, %c0_40], %42 {strides = array<i32>} : memref<256x128xf32, #tpu.memory_space<vmem>>, vector<256x128xf32>,
    %44 = vector.extract_strided_slice %1 {offsets = [1, 2, 0], sizes = [16, 16, 4], strides = [1, 1, 1]} : vector<18x18x4xbf16> to vector<16x16x4xbf16>
    %45 = vector.shape_cast %44 : vector<16x16x4xbf16> to vector<256x4xbf16>
    %c0_41 = arith.constant 0 : index
    %c0_42 = arith.constant 0 : index
    %46 = vector.load %arg5[%c0_41, %c0_42] : memref<256x128xf32, #tpu.memory_space<vmem>>, vector<256x128xf32>
    %c5 = arith.constant 5 : index
    %c0_43 = arith.constant 0 : index
    %c0_44 = arith.constant 0 : index
    %47 = vector.load %arg2[%c5, %c0_43, %c0_44] : memref<9x4x128xbf16, #tpu.memory_space<vmem>>, vector<1x4x128xbf16>
    %48 = vector.shape_cast %47 : vector<1x4x128xbf16> to vector<4x128xbf16>
    %cst_45 = arith.constant dense<0.000000e+00> : vector<256x128xf32>
    %49 = tpu.matmul %45, %48, %cst_45 {dimension_numbers = #tpu.dot_dimension_numbers<[1], [0], [0], [1], [0, 0, 1, 1], [], []>} : vector<256x4xbf16>, vector<4x128xbf16>, vector<256x128xf32> -> vector<256x128xf32>
    %50 = arith.addf %46, %49 : vector<256x128xf32>
    %c0_46 = arith.constant 0 : index
    %c0_47 = arith.constant 0 : index
    %51 = vector.load %arg5[%c0_46, %c0_47] : memref<256x128xf32, #tpu.memory_space<vmem>>, vector<256x128xf32>
    tpu.vector_store %arg5[%c0_46, %c0_47], %50 {strides = array<i32>} : memref<256x128xf32, #tpu.memory_space<vmem>>, vector<256x128xf32>,
    %52 = vector.extract_strided_slice %1 {offsets = [2, 0, 0], sizes = [16, 16, 4], strides = [1, 1, 1]} : vector<18x18x4xbf16> to vector<16x16x4xbf16>
    %53 = vector.shape_cast %52 : vector<16x16x4xbf16> to vector<256x4xbf16>
    %c0_48 = arith.constant 0 : index
    %c0_49 = arith.constant 0 : index
    %54 = vector.load %arg5[%c0_48, %c0_49] : memref<256x128xf32, #tpu.memory_space<vmem>>, vector<256x128xf32>
    %c6 = arith.constant 6 : index
    %c0_50 = arith.constant 0 : index
    %c0_51 = arith.constant 0 : index
    %55 = vector.load %arg2[%c6, %c0_50, %c0_51] : memref<9x4x128xbf16, #tpu.memory_space<vmem>>, vector<1x4x128xbf16>
    %56 = vector.shape_cast %55 : vector<1x4x128xbf16> to vector<4x128xbf16>
    %cst_52 = arith.constant dense<0.000000e+00> : vector<256x128xf32>
    %57 = tpu.matmul %53, %56, %cst_52 {dimension_numbers = #tpu.dot_dimension_numbers<[1], [0], [0], [1], [0, 0, 1, 1], [], []>} : vector<256x4xbf16>, vector<4x128xbf16>, vector<256x128xf32> -> vector<256x128xf32>
    %58 = arith.addf %54, %57 : vector<256x128xf32>
    %c0_53 = arith.constant 0 : index
    %c0_54 = arith.constant 0 : index
    %59 = vector.load %arg5[%c0_53, %c0_54] : memref<256x128xf32, #tpu.memory_space<vmem>>, vector<256x128xf32>
    tpu.vector_store %arg5[%c0_53, %c0_54], %58 {strides = array<i32>} : memref<256x128xf32, #tpu.memory_space<vmem>>, vector<256x128xf32>,
    %60 = vector.extract_strided_slice %1 {offsets = [2, 1, 0], sizes = [16, 16, 4], strides = [1, 1, 1]} : vector<18x18x4xbf16> to vector<16x16x4xbf16>
    %61 = vector.shape_cast %60 : vector<16x16x4xbf16> to vector<256x4xbf16>
    %c0_55 = arith.constant 0 : index
    %c0_56 = arith.constant 0 : index
    %62 = vector.load %arg5[%c0_55, %c0_56] : memref<256x128xf32, #tpu.memory_space<vmem>>, vector<256x128xf32>
    %c7 = arith.constant 7 : index
    %c0_57 = arith.constant 0 : index
    %c0_58 = arith.constant 0 : index
    %63 = vector.load %arg2[%c7, %c0_57, %c0_58] : memref<9x4x128xbf16, #tpu.memory_space<vmem>>, vector<1x4x128xbf16>
    %64 = vector.shape_cast %63 : vector<1x4x128xbf16> to vector<4x128xbf16>
    %cst_59 = arith.constant dense<0.000000e+00> : vector<256x128xf32>
    %65 = tpu.matmul %61, %64, %cst_59 {dimension_numbers = #tpu.dot_dimension_numbers<[1], [0], [0], [1], [0, 0, 1, 1], [], []>} : vector<256x4xbf16>, vector<4x128xbf16>, vector<256x128xf32> -> vector<256x128xf32>
    %66 = arith.addf %62, %65 : vector<256x128xf32>
    %c0_60 = arith.constant 0 : index
    %c0_61 = arith.constant 0 : index
    %67 = vector.load %arg5[%c0_60, %c0_61] : memref<256x128xf32, #tpu.memory_space<vmem>>, vector<256x128xf32>
    tpu.vector_store %arg5[%c0_60, %c0_61], %66 {strides = array<i32>} : memref<256x128xf32, #tpu.memory_space<vmem>>, vector<256x128xf32>,
    %68 = vector.extract_strided_slice %1 {offsets = [2, 2, 0], sizes = [16, 16, 4], strides = [1, 1, 1]} : vector<18x18x4xbf16> to vector<16x16x4xbf16>
    %69 = vector.shape_cast %68 : vector<16x16x4xbf16> to vector<256x4xbf16>
    %c0_62 = arith.constant 0 : index
    %c0_63 = arith.constant 0 : index
    %70 = vector.load %arg5[%c0_62, %c0_63] : memref<256x128xf32, #tpu.memory_space<vmem>>, vector<256x128xf32>
    %c8 = arith.constant 8 : index
    %c0_64 = arith.constant 0 : index
    %c0_65 = arith.constant 0 : index
    %71 = vector.load %arg2[%c8, %c0_64, %c0_65] : memref<9x4x128xbf16, #tpu.memory_space<vmem>>, vector<1x4x128xbf16>
    %72 = vector.shape_cast %71 : vector<1x4x128xbf16> to vector<4x128xbf16>
    %cst_66 = arith.constant dense<0.000000e+00> : vector<256x128xf32>
    %73 = tpu.matmul %69, %72, %cst_66 {dimension_numbers = #tpu.dot_dimension_numbers<[1], [0], [0], [1], [0, 0, 1, 1], [], []>} : vector<256x4xbf16>, vector<4x128xbf16>, vector<256x128xf32> -> vector<256x128xf32>
    %74 = arith.addf %70, %73 : vector<256x128xf32>
    %c0_67 = arith.constant 0 : index
    %c0_68 = arith.constant 0 : index
    %75 = vector.load %arg5[%c0_67, %c0_68] : memref<256x128xf32, #tpu.memory_space<vmem>>, vector<256x128xf32>
    tpu.vector_store %arg5[%c0_67, %c0_68], %74 {strides = array<i32>} : memref<256x128xf32, #tpu.memory_space<vmem>>, vector<256x128xf32>,
    %c0_69 = arith.constant 0 : index
    %c0_70 = arith.constant 0 : index
    %76 = vector.load %arg5[%c0_69, %c0_70] : memref<256x128xf32, #tpu.memory_space<vmem>>, vector<256x128xf32>
    %c0_71 = arith.constant 0 : index
    %c0_72 = arith.constant 0 : index
    %77 = vector.load %arg3[%c0_71, %c0_72] : memref<1x128xf32, #tpu.memory_space<vmem>>, vector<1x128xf32>
    %78 = vector.broadcast %77 : vector<1x128xf32> to vector<256x128xf32>
    %79 = arith.addf %76, %78 : vector<256x128xf32>
    %cst_73 = arith.constant 0.000000e+00 : f32
    %80 = vector.broadcast %cst_73 : f32 to vector<256x128xf32>
    %81 = arith.maximumf %79, %80 : vector<256x128xf32>
    %82 = vector.shape_cast %81 : vector<256x128xf32> to vector<1x256x128xf32>
    %cst_74 = arith.constant dense<0.000000e+00> : vector<1xf32>
    %83 = vector.multi_reduction <add>, %82, %cst_74 [1, 2] : vector<1x256x128xf32> to vector<1xf32>
    %84 = vector.shape_cast %83 : vector<1xf32> to vector<1x1x1xf32>
    %85 = vector.extract %84[0, 0, 0] : f32 from vector<1x1x1xf32>
    %86 = vector.broadcast %85 : f32 to vector<1x1xf32>
    %cst_75 = arith.constant 8.192000e+03 : f32
    %87 = vector.broadcast %cst_75 : f32 to vector<1x1xf32>
    %88 = arith.divf %86, %87 : vector<1x1xf32>
    %89 = tpu.iota {dimensions = array<i32: 1>} : vector<256x128xi32>
    %c32_i32 = arith.constant 32 : i32
    %90 = vector.broadcast %c32_i32 : i32 to vector<256x128xi32>
    %91 = arith.cmpi slt, %89, %90 : vector<256x128xi32>
    %92 = vector.broadcast %88 : vector<1x1xf32> to vector<256x128xf32>
    %93 = arith.subf %81, %92 : vector<256x128xf32>
    %cst_76 = arith.constant 0.000000e+00 : f32
    %94 = vector.broadcast %cst_76 : f32 to vector<256x128xf32>
    %95 = arith.select %91, %93, %94 : vector<256x128xi1>, vector<256x128xf32>
    %96 = arith.mulf %95, %95 : vector<256x128xf32>
    %97 = vector.shape_cast %96 : vector<256x128xf32> to vector<1x256x128xf32>
    %cst_77 = arith.constant dense<0.000000e+00> : vector<1xf32>
    %98 = vector.multi_reduction <add>, %97, %cst_77 [1, 2] : vector<1x256x128xf32> to vector<1xf32>
    %99 = vector.shape_cast %98 : vector<1xf32> to vector<1x1x1xf32>
    %100 = vector.extract %99[0, 0, 0] : f32 from vector<1x1x1xf32>
    %101 = vector.broadcast %100 : f32 to vector<1x1xf32>
    %cst_78 = arith.constant 8.192000e+03 : f32
    %102 = vector.broadcast %cst_78 : f32 to vector<1x1xf32>
    %103 = arith.divf %101, %102 : vector<1x1xf32>
    %cst_79 = arith.constant 9.99999974E-6 : f32
    %104 = vector.broadcast %cst_79 : f32 to vector<1x1xf32>
    %105 = arith.addf %103, %104 : vector<1x1xf32>
    %106 = math.rsqrt %105 : vector<1x1xf32>
    %107 = vector.broadcast %106 : vector<1x1xf32> to vector<256x128xf32>
    %108 = arith.mulf %95, %107 : vector<256x128xf32>
    %cst_80 = arith.constant 0.000000e+00 : bf16
    %109 = vector.broadcast %cst_80 : bf16 to vector<18x18x128xbf16>
    %c0_81 = arith.constant 0 : index
    %c0_82 = arith.constant 0 : index
    %c0_83 = arith.constant 0 : index
    %c0_84 = arith.constant 0 : index
    %110 = vector.load %arg4[%c0_81, %c0_82, %c0_83, %c0_84] : memref<1x18x18x128xbf16, #tpu.memory_space<vmem>>, vector<1x18x18x128xbf16>
    %111 = vector.shape_cast %110 : vector<1x18x18x128xbf16> to vector<18x18x128xbf16>
    %112 = vector.shape_cast %109 : vector<18x18x128xbf16> to vector<1x18x18x128xbf16>
    tpu.vector_store %arg4[%c0_81, %c0_82, %c0_83, %c0_84], %112 {strides = array<i32>} : memref<1x18x18x128xbf16, #tpu.memory_space<vmem>>, vector<1x18x18x128xbf16>,
    %113 = vector.shape_cast %108 : vector<256x128xf32> to vector<16x16x128xf32>
    %114 = arith.truncf %113 : vector<16x16x128xf32> to vector<16x16x128xbf16>
    %c0_85 = arith.constant 0 : index
    %c1_86 = arith.constant 1 : index
    %c1_87 = arith.constant 1 : index
    %c0_88 = arith.constant 0 : index
    %115 = vector.load %arg4[%c0_85, %c1_86, %c1_87, %c0_88] : memref<1x18x18x128xbf16, #tpu.memory_space<vmem>>, vector<1x16x16x128xbf16>
    %116 = vector.shape_cast %115 : vector<1x16x16x128xbf16> to vector<16x16x128xbf16>
    %117 = vector.shape_cast %114 : vector<16x16x128xbf16> to vector<1x16x16x128xbf16>
    tpu.vector_store %arg4[%c0_85, %c1_86, %c1_87, %c0_88], %117 {strides = array<i32>} : memref<1x18x18x128xbf16, #tpu.memory_space<vmem>>, vector<1x16x16x128xbf16>,
    return
  }
  func.func @transform_0(%arg0: i32) -> (i32, i32, i32, i32) {
    %c0_i32 = arith.constant 0 : i32
    %c0_i32_0 = arith.constant 0 : i32
    %c0_i32_1 = arith.constant 0 : i32
    %c0_i32_2 = arith.constant 0 : i32
    return %arg0, %c0_i32, %c0_i32_0, %c0_i32_1 : i32, i32, i32, i32
  }
  func.func @transform_1(%arg0: i32) -> (i32, i32, i32) {
    %c0_i32 = arith.constant 0 : i32
    %c0_i32_0 = arith.constant 0 : i32
    %c0_i32_1 = arith.constant 0 : i32
    %c0_i32_2 = arith.constant 0 : i32
    return %c0_i32, %c0_i32_0, %c0_i32_1 : i32, i32, i32
  }
  func.func @transform_2(%arg0: i32) -> (i32, i32) {
    %c0_i32 = arith.constant 0 : i32
    %c0_i32_0 = arith.constant 0 : i32
    %c0_i32_1 = arith.constant 0 : i32
    return %c0_i32, %c0_i32_0 : i32, i32
  }
  func.func @transform_3(%arg0: i32) -> (i32, i32, i32, i32) {
    %c0_i32 = arith.constant 0 : i32
    %c0_i32_0 = arith.constant 0 : i32
    %c0_i32_1 = arith.constant 0 : i32
    %c0_i32_2 = arith.constant 0 : i32
    return %arg0, %c0_i32, %c0_i32_0, %c0_i32_1 : i32, i32, i32, i32
  }
}

module attributes {stable_mosaic.version = 11 : i64} {
  func.func @_autoenc_kernel(%arg0: i32, %arg1: memref<1x18x18x128xbf16, #tpu.memory_space<vmem>>, %arg2: memref<1152x8xbf16, #tpu.memory_space<vmem>>, %arg3: memref<1x8xf32, #tpu.memory_space<vmem>>, %arg4: memref<9x8x32xbf16, #tpu.memory_space<vmem>>, %arg5: memref<1x32xf32, #tpu.memory_space<vmem>>, %arg6: memref<1x256x8xbf16, #tpu.memory_space<vmem>>, %arg7: memref<1x256x32xf32, #tpu.memory_space<vmem>>, %arg8: memref<18x18x8xbf16, #tpu.memory_space<vmem>>) attributes {dimension_semantics = [#tpu.dimension_semantics<parallel>], iteration_bounds = array<i64: 2>, scalar_prefetch = 0 : i64, scratch_operands = 1 : i64, tpu.core_type = #tpu.core_type<tc>, window_params = [{transform_indices = @transform_0, window_bounds = array<i64: 1, 18, 18, 128>}, {pipeline_mode = #tpu.pipeline_mode<synchronous>, transform_indices = @transform_1, window_bounds = array<i64: 1152, 8>}, {pipeline_mode = #tpu.pipeline_mode<synchronous>, transform_indices = @transform_2, window_bounds = array<i64: 1, 8>}, {pipeline_mode = #tpu.pipeline_mode<synchronous>, transform_indices = @transform_3, window_bounds = array<i64: 9, 8, 32>}, {pipeline_mode = #tpu.pipeline_mode<synchronous>, transform_indices = @transform_4, window_bounds = array<i64: 1, 32>}, {transform_indices = @transform_5, window_bounds = array<i64: 1, 256, 8>}, {transform_indices = @transform_6, window_bounds = array<i64: 1, 256, 32>}]} {
    %c0 = arith.constant 0 : index
    %c0_0 = arith.constant 0 : index
    %c0_1 = arith.constant 0 : index
    %c0_2 = arith.constant 0 : index
    %0 = vector.load %arg1[%c0, %c0_0, %c0_1, %c0_2] : memref<1x18x18x128xbf16, #tpu.memory_space<vmem>>, vector<1x18x18x128xbf16>
    %1 = vector.shape_cast %0 : vector<1x18x18x128xbf16> to vector<18x18x128xbf16>
    %2 = vector.extract_strided_slice %1 {offsets = [0, 0, 0], sizes = [16, 16, 128], strides = [1, 1, 1]} : vector<18x18x128xbf16> to vector<16x16x128xbf16>
    %3 = vector.shape_cast %2 : vector<16x16x128xbf16> to vector<256x128xbf16>
    %4 = vector.extract_strided_slice %1 {offsets = [0, 1, 0], sizes = [16, 16, 128], strides = [1, 1, 1]} : vector<18x18x128xbf16> to vector<16x16x128xbf16>
    %5 = vector.shape_cast %4 : vector<16x16x128xbf16> to vector<256x128xbf16>
    %6 = vector.extract_strided_slice %1 {offsets = [0, 2, 0], sizes = [16, 16, 128], strides = [1, 1, 1]} : vector<18x18x128xbf16> to vector<16x16x128xbf16>
    %7 = vector.shape_cast %6 : vector<16x16x128xbf16> to vector<256x128xbf16>
    %8 = vector.extract_strided_slice %1 {offsets = [1, 0, 0], sizes = [16, 16, 128], strides = [1, 1, 1]} : vector<18x18x128xbf16> to vector<16x16x128xbf16>
    %9 = vector.shape_cast %8 : vector<16x16x128xbf16> to vector<256x128xbf16>
    %10 = vector.extract_strided_slice %1 {offsets = [1, 1, 0], sizes = [16, 16, 128], strides = [1, 1, 1]} : vector<18x18x128xbf16> to vector<16x16x128xbf16>
    %11 = vector.shape_cast %10 : vector<16x16x128xbf16> to vector<256x128xbf16>
    %12 = vector.extract_strided_slice %1 {offsets = [1, 2, 0], sizes = [16, 16, 128], strides = [1, 1, 1]} : vector<18x18x128xbf16> to vector<16x16x128xbf16>
    %13 = vector.shape_cast %12 : vector<16x16x128xbf16> to vector<256x128xbf16>
    %14 = vector.extract_strided_slice %1 {offsets = [2, 0, 0], sizes = [16, 16, 128], strides = [1, 1, 1]} : vector<18x18x128xbf16> to vector<16x16x128xbf16>
    %15 = vector.shape_cast %14 : vector<16x16x128xbf16> to vector<256x128xbf16>
    %16 = vector.extract_strided_slice %1 {offsets = [2, 1, 0], sizes = [16, 16, 128], strides = [1, 1, 1]} : vector<18x18x128xbf16> to vector<16x16x128xbf16>
    %17 = vector.shape_cast %16 : vector<16x16x128xbf16> to vector<256x128xbf16>
    %18 = vector.extract_strided_slice %1 {offsets = [2, 2, 0], sizes = [16, 16, 128], strides = [1, 1, 1]} : vector<18x18x128xbf16> to vector<16x16x128xbf16>
    %19 = vector.shape_cast %18 : vector<16x16x128xbf16> to vector<256x128xbf16>
    %20 = tpu.concatenate %3, %5, %7, %9, %11, %13, %15, %17, %19 in 1 : vector<256x128xbf16>, vector<256x128xbf16>, vector<256x128xbf16>, vector<256x128xbf16>, vector<256x128xbf16>, vector<256x128xbf16>, vector<256x128xbf16>, vector<256x128xbf16>, vector<256x128xbf16> -> vector<256x1152xbf16>
    %c0_3 = arith.constant 0 : index
    %c0_4 = arith.constant 0 : index
    %21 = vector.load %arg2[%c0_3, %c0_4] : memref<1152x8xbf16, #tpu.memory_space<vmem>>, vector<1152x8xbf16>
    %cst = arith.constant dense<0.000000e+00> : vector<256x8xf32>
    %22 = tpu.matmul %20, %21, %cst {dimension_numbers = #tpu.dot_dimension_numbers<[1], [0], [0], [1], [0, 0, 1, 1], [], []>} : vector<256x1152xbf16>, vector<1152x8xbf16>, vector<256x8xf32> -> vector<256x8xf32>
    %c0_5 = arith.constant 0 : index
    %c0_6 = arith.constant 0 : index
    %23 = vector.load %arg3[%c0_5, %c0_6] : memref<1x8xf32, #tpu.memory_space<vmem>>, vector<1x8xf32>
    %24 = vector.broadcast %23 : vector<1x8xf32> to vector<256x8xf32>
    %25 = arith.addf %22, %24 : vector<256x8xf32>
    %cst_7 = arith.constant 0.000000e+00 : f32
    %26 = vector.broadcast %cst_7 : f32 to vector<256x8xf32>
    %27 = arith.maximumf %25, %26 : vector<256x8xf32>
    %28 = arith.truncf %27 : vector<256x8xf32> to vector<256x8xbf16>
    %c0_8 = arith.constant 0 : index
    %c0_9 = arith.constant 0 : index
    %c0_10 = arith.constant 0 : index
    %29 = vector.load %arg6[%c0_8, %c0_9, %c0_10] : memref<1x256x8xbf16, #tpu.memory_space<vmem>>, vector<1x256x8xbf16>
    %30 = vector.shape_cast %29 : vector<1x256x8xbf16> to vector<256x8xbf16>
    %31 = vector.shape_cast %28 : vector<256x8xbf16> to vector<1x256x8xbf16>
    tpu.vector_store %arg6[%c0_8, %c0_9, %c0_10], %31 {strides = array<i32>} : memref<1x256x8xbf16, #tpu.memory_space<vmem>>, vector<1x256x8xbf16>,
    %cst_11 = arith.constant 0.000000e+00 : bf16
    %32 = vector.broadcast %cst_11 : bf16 to vector<18x18x8xbf16>
    %c0_12 = arith.constant 0 : index
    %c0_13 = arith.constant 0 : index
    %c0_14 = arith.constant 0 : index
    %33 = vector.load %arg8[%c0_12, %c0_13, %c0_14] : memref<18x18x8xbf16, #tpu.memory_space<vmem>>, vector<18x18x8xbf16>
    tpu.vector_store %arg8[%c0_12, %c0_13, %c0_14], %32 {strides = array<i32>} : memref<18x18x8xbf16, #tpu.memory_space<vmem>>, vector<18x18x8xbf16>,
    %34 = vector.shape_cast %28 : vector<256x8xbf16> to vector<16x16x8xbf16>
    %c1 = arith.constant 1 : index
    %c1_15 = arith.constant 1 : index
    %c0_16 = arith.constant 0 : index
    %35 = vector.load %arg8[%c1, %c1_15, %c0_16] : memref<18x18x8xbf16, #tpu.memory_space<vmem>>, vector<16x16x8xbf16>
    tpu.vector_store %arg8[%c1, %c1_15, %c0_16], %34 {strides = array<i32>} : memref<18x18x8xbf16, #tpu.memory_space<vmem>>, vector<16x16x8xbf16>,
    %c0_17 = arith.constant 0 : index
    %c0_18 = arith.constant 0 : index
    %c0_19 = arith.constant 0 : index
    %36 = vector.load %arg8[%c0_17, %c0_18, %c0_19] : memref<18x18x8xbf16, #tpu.memory_space<vmem>>, vector<18x18x8xbf16>
    %cst_20 = arith.constant 0.000000e+00 : f32
    %37 = vector.broadcast %cst_20 : f32 to vector<256x32xf32>
    %38 = vector.extract_strided_slice %36 {offsets = [0, 0, 0], sizes = [16, 16, 8], strides = [1, 1, 1]} : vector<18x18x8xbf16> to vector<16x16x8xbf16>
    %39 = vector.shape_cast %38 : vector<16x16x8xbf16> to vector<256x8xbf16>
    %c0_21 = arith.constant 0 : index
    %c0_22 = arith.constant 0 : index
    %c0_23 = arith.constant 0 : index
    %40 = vector.load %arg4[%c0_21, %c0_22, %c0_23] : memref<9x8x32xbf16, #tpu.memory_space<vmem>>, vector<1x8x32xbf16>
    %41 = vector.shape_cast %40 : vector<1x8x32xbf16> to vector<8x32xbf16>
    %cst_24 = arith.constant dense<0.000000e+00> : vector<256x32xf32>
    %42 = tpu.matmul %39, %41, %cst_24 {dimension_numbers = #tpu.dot_dimension_numbers<[1], [0], [0], [1], [0, 0, 1, 1], [], []>} : vector<256x8xbf16>, vector<8x32xbf16>, vector<256x32xf32> -> vector<256x32xf32>
    %43 = arith.addf %37, %42 : vector<256x32xf32>
    %44 = vector.extract_strided_slice %36 {offsets = [0, 1, 0], sizes = [16, 16, 8], strides = [1, 1, 1]} : vector<18x18x8xbf16> to vector<16x16x8xbf16>
    %45 = vector.shape_cast %44 : vector<16x16x8xbf16> to vector<256x8xbf16>
    %c1_25 = arith.constant 1 : index
    %c0_26 = arith.constant 0 : index
    %c0_27 = arith.constant 0 : index
    %46 = vector.load %arg4[%c1_25, %c0_26, %c0_27] : memref<9x8x32xbf16, #tpu.memory_space<vmem>>, vector<1x8x32xbf16>
    %47 = vector.shape_cast %46 : vector<1x8x32xbf16> to vector<8x32xbf16>
    %cst_28 = arith.constant dense<0.000000e+00> : vector<256x32xf32>
    %48 = tpu.matmul %45, %47, %cst_28 {dimension_numbers = #tpu.dot_dimension_numbers<[1], [0], [0], [1], [0, 0, 1, 1], [], []>} : vector<256x8xbf16>, vector<8x32xbf16>, vector<256x32xf32> -> vector<256x32xf32>
    %49 = arith.addf %43, %48 : vector<256x32xf32>
    %50 = vector.extract_strided_slice %36 {offsets = [0, 2, 0], sizes = [16, 16, 8], strides = [1, 1, 1]} : vector<18x18x8xbf16> to vector<16x16x8xbf16>
    %51 = vector.shape_cast %50 : vector<16x16x8xbf16> to vector<256x8xbf16>
    %c2 = arith.constant 2 : index
    %c0_29 = arith.constant 0 : index
    %c0_30 = arith.constant 0 : index
    %52 = vector.load %arg4[%c2, %c0_29, %c0_30] : memref<9x8x32xbf16, #tpu.memory_space<vmem>>, vector<1x8x32xbf16>
    %53 = vector.shape_cast %52 : vector<1x8x32xbf16> to vector<8x32xbf16>
    %cst_31 = arith.constant dense<0.000000e+00> : vector<256x32xf32>
    %54 = tpu.matmul %51, %53, %cst_31 {dimension_numbers = #tpu.dot_dimension_numbers<[1], [0], [0], [1], [0, 0, 1, 1], [], []>} : vector<256x8xbf16>, vector<8x32xbf16>, vector<256x32xf32> -> vector<256x32xf32>
    %55 = arith.addf %49, %54 : vector<256x32xf32>
    %56 = vector.extract_strided_slice %36 {offsets = [1, 0, 0], sizes = [16, 16, 8], strides = [1, 1, 1]} : vector<18x18x8xbf16> to vector<16x16x8xbf16>
    %57 = vector.shape_cast %56 : vector<16x16x8xbf16> to vector<256x8xbf16>
    %c3 = arith.constant 3 : index
    %c0_32 = arith.constant 0 : index
    %c0_33 = arith.constant 0 : index
    %58 = vector.load %arg4[%c3, %c0_32, %c0_33] : memref<9x8x32xbf16, #tpu.memory_space<vmem>>, vector<1x8x32xbf16>
    %59 = vector.shape_cast %58 : vector<1x8x32xbf16> to vector<8x32xbf16>
    %cst_34 = arith.constant dense<0.000000e+00> : vector<256x32xf32>
    %60 = tpu.matmul %57, %59, %cst_34 {dimension_numbers = #tpu.dot_dimension_numbers<[1], [0], [0], [1], [0, 0, 1, 1], [], []>} : vector<256x8xbf16>, vector<8x32xbf16>, vector<256x32xf32> -> vector<256x32xf32>
    %61 = arith.addf %55, %60 : vector<256x32xf32>
    %62 = vector.extract_strided_slice %36 {offsets = [1, 1, 0], sizes = [16, 16, 8], strides = [1, 1, 1]} : vector<18x18x8xbf16> to vector<16x16x8xbf16>
    %63 = vector.shape_cast %62 : vector<16x16x8xbf16> to vector<256x8xbf16>
    %c4 = arith.constant 4 : index
    %c0_35 = arith.constant 0 : index
    %c0_36 = arith.constant 0 : index
    %64 = vector.load %arg4[%c4, %c0_35, %c0_36] : memref<9x8x32xbf16, #tpu.memory_space<vmem>>, vector<1x8x32xbf16>
    %65 = vector.shape_cast %64 : vector<1x8x32xbf16> to vector<8x32xbf16>
    %cst_37 = arith.constant dense<0.000000e+00> : vector<256x32xf32>
    %66 = tpu.matmul %63, %65, %cst_37 {dimension_numbers = #tpu.dot_dimension_numbers<[1], [0], [0], [1], [0, 0, 1, 1], [], []>} : vector<256x8xbf16>, vector<8x32xbf16>, vector<256x32xf32> -> vector<256x32xf32>
    %67 = arith.addf %61, %66 : vector<256x32xf32>
    %68 = vector.extract_strided_slice %36 {offsets = [1, 2, 0], sizes = [16, 16, 8], strides = [1, 1, 1]} : vector<18x18x8xbf16> to vector<16x16x8xbf16>
    %69 = vector.shape_cast %68 : vector<16x16x8xbf16> to vector<256x8xbf16>
    %c5 = arith.constant 5 : index
    %c0_38 = arith.constant 0 : index
    %c0_39 = arith.constant 0 : index
    %70 = vector.load %arg4[%c5, %c0_38, %c0_39] : memref<9x8x32xbf16, #tpu.memory_space<vmem>>, vector<1x8x32xbf16>
    %71 = vector.shape_cast %70 : vector<1x8x32xbf16> to vector<8x32xbf16>
    %cst_40 = arith.constant dense<0.000000e+00> : vector<256x32xf32>
    %72 = tpu.matmul %69, %71, %cst_40 {dimension_numbers = #tpu.dot_dimension_numbers<[1], [0], [0], [1], [0, 0, 1, 1], [], []>} : vector<256x8xbf16>, vector<8x32xbf16>, vector<256x32xf32> -> vector<256x32xf32>
    %73 = arith.addf %67, %72 : vector<256x32xf32>
    %74 = vector.extract_strided_slice %36 {offsets = [2, 0, 0], sizes = [16, 16, 8], strides = [1, 1, 1]} : vector<18x18x8xbf16> to vector<16x16x8xbf16>
    %75 = vector.shape_cast %74 : vector<16x16x8xbf16> to vector<256x8xbf16>
    %c6 = arith.constant 6 : index
    %c0_41 = arith.constant 0 : index
    %c0_42 = arith.constant 0 : index
    %76 = vector.load %arg4[%c6, %c0_41, %c0_42] : memref<9x8x32xbf16, #tpu.memory_space<vmem>>, vector<1x8x32xbf16>
    %77 = vector.shape_cast %76 : vector<1x8x32xbf16> to vector<8x32xbf16>
    %cst_43 = arith.constant dense<0.000000e+00> : vector<256x32xf32>
    %78 = tpu.matmul %75, %77, %cst_43 {dimension_numbers = #tpu.dot_dimension_numbers<[1], [0], [0], [1], [0, 0, 1, 1], [], []>} : vector<256x8xbf16>, vector<8x32xbf16>, vector<256x32xf32> -> vector<256x32xf32>
    %79 = arith.addf %73, %78 : vector<256x32xf32>
    %80 = vector.extract_strided_slice %36 {offsets = [2, 1, 0], sizes = [16, 16, 8], strides = [1, 1, 1]} : vector<18x18x8xbf16> to vector<16x16x8xbf16>
    %81 = vector.shape_cast %80 : vector<16x16x8xbf16> to vector<256x8xbf16>
    %c7 = arith.constant 7 : index
    %c0_44 = arith.constant 0 : index
    %c0_45 = arith.constant 0 : index
    %82 = vector.load %arg4[%c7, %c0_44, %c0_45] : memref<9x8x32xbf16, #tpu.memory_space<vmem>>, vector<1x8x32xbf16>
    %83 = vector.shape_cast %82 : vector<1x8x32xbf16> to vector<8x32xbf16>
    %cst_46 = arith.constant dense<0.000000e+00> : vector<256x32xf32>
    %84 = tpu.matmul %81, %83, %cst_46 {dimension_numbers = #tpu.dot_dimension_numbers<[1], [0], [0], [1], [0, 0, 1, 1], [], []>} : vector<256x8xbf16>, vector<8x32xbf16>, vector<256x32xf32> -> vector<256x32xf32>
    %85 = arith.addf %79, %84 : vector<256x32xf32>
    %86 = vector.extract_strided_slice %36 {offsets = [2, 2, 0], sizes = [16, 16, 8], strides = [1, 1, 1]} : vector<18x18x8xbf16> to vector<16x16x8xbf16>
    %87 = vector.shape_cast %86 : vector<16x16x8xbf16> to vector<256x8xbf16>
    %c8 = arith.constant 8 : index
    %c0_47 = arith.constant 0 : index
    %c0_48 = arith.constant 0 : index
    %88 = vector.load %arg4[%c8, %c0_47, %c0_48] : memref<9x8x32xbf16, #tpu.memory_space<vmem>>, vector<1x8x32xbf16>
    %89 = vector.shape_cast %88 : vector<1x8x32xbf16> to vector<8x32xbf16>
    %cst_49 = arith.constant dense<0.000000e+00> : vector<256x32xf32>
    %90 = tpu.matmul %87, %89, %cst_49 {dimension_numbers = #tpu.dot_dimension_numbers<[1], [0], [0], [1], [0, 0, 1, 1], [], []>} : vector<256x8xbf16>, vector<8x32xbf16>, vector<256x32xf32> -> vector<256x32xf32>
    %91 = arith.addf %85, %90 : vector<256x32xf32>
    %c0_50 = arith.constant 0 : index
    %c0_51 = arith.constant 0 : index
    %92 = vector.load %arg5[%c0_50, %c0_51] : memref<1x32xf32, #tpu.memory_space<vmem>>, vector<1x32xf32>
    %93 = vector.broadcast %92 : vector<1x32xf32> to vector<256x32xf32>
    %94 = arith.addf %91, %93 : vector<256x32xf32>
    %c0_52 = arith.constant 0 : index
    %c0_53 = arith.constant 0 : index
    %c0_54 = arith.constant 0 : index
    %95 = vector.load %arg7[%c0_52, %c0_53, %c0_54] : memref<1x256x32xf32, #tpu.memory_space<vmem>>, vector<1x256x32xf32>
    %96 = vector.shape_cast %95 : vector<1x256x32xf32> to vector<256x32xf32>
    %97 = vector.shape_cast %94 : vector<256x32xf32> to vector<1x256x32xf32>
    tpu.vector_store %arg7[%c0_52, %c0_53, %c0_54], %97 {strides = array<i32>} : memref<1x256x32xf32, #tpu.memory_space<vmem>>, vector<1x256x32xf32>,
    return
  }
  func.func @transform_0(%arg0: i32) -> (i32, i32, i32, i32) {
    %c0_i32 = arith.constant 0 : i32
    %c0_i32_0 = arith.constant 0 : i32
    %c0_i32_1 = arith.constant 0 : i32
    %c0_i32_2 = arith.constant 0 : i32
    return %arg0, %c0_i32, %c0_i32_0, %c0_i32_1 : i32, i32, i32, i32
  }
  func.func @transform_1(%arg0: i32) -> (i32, i32) {
    %c0_i32 = arith.constant 0 : i32
    %c0_i32_0 = arith.constant 0 : i32
    %c0_i32_1 = arith.constant 0 : i32
    return %c0_i32, %c0_i32_0 : i32, i32
  }
  func.func @transform_2(%arg0: i32) -> (i32, i32) {
    %c0_i32 = arith.constant 0 : i32
    %c0_i32_0 = arith.constant 0 : i32
    %c0_i32_1 = arith.constant 0 : i32
    return %c0_i32, %c0_i32_0 : i32, i32
  }
  func.func @transform_3(%arg0: i32) -> (i32, i32, i32) {
    %c0_i32 = arith.constant 0 : i32
    %c0_i32_0 = arith.constant 0 : i32
    %c0_i32_1 = arith.constant 0 : i32
    %c0_i32_2 = arith.constant 0 : i32
    return %c0_i32, %c0_i32_0, %c0_i32_1 : i32, i32, i32
  }
  func.func @transform_4(%arg0: i32) -> (i32, i32) {
    %c0_i32 = arith.constant 0 : i32
    %c0_i32_0 = arith.constant 0 : i32
    %c0_i32_1 = arith.constant 0 : i32
    return %c0_i32, %c0_i32_0 : i32, i32
  }
  func.func @transform_5(%arg0: i32) -> (i32, i32, i32) {
    %c0_i32 = arith.constant 0 : i32
    %c0_i32_0 = arith.constant 0 : i32
    %c0_i32_1 = arith.constant 0 : i32
    return %arg0, %c0_i32, %c0_i32_0 : i32, i32, i32
  }
  func.func @transform_6(%arg0: i32) -> (i32, i32, i32) {
    %c0_i32 = arith.constant 0 : i32
    %c0_i32_0 = arith.constant 0 : i32
    %c0_i32_1 = arith.constant 0 : i32
    return %arg0, %c0_i32, %c0_i32_0 : i32, i32, i32
  }
}

</mosaic_0001>

<bundles_post_ra>
// kernel: vgg_conv_auto_forward.2
= control target key start
LH: loop header
LB: loop body
LE: loop exit
PB: predicated region body
PF: predicated region fallthrough
CT: control target
= control target key end

     0   :  { %s5695_s12 = smov 0   ;;  %s7793_s0 = inlined_call_operand.vmem [shape: bf16[2,18,18,4], index: 0, kind: input, shape index: {}]   ;;  %s7794_s1 = inlined_call_operand.vmem [shape: bf16[9,4,128], index: 1, kind: input, shape index: {}]   ;;  %s7795_s2 = inlined_call_operand.vmem [shape: f32[1,128], index: 2, kind: input, shape index: {}]   ;;  %s7796_s3 = inlined_call_operand.vmem [shape: bf16[2,18,18,128], index: 3, kind: output, shape index: {}]  }
   0x1 LB: > { %s4526_s13 = sadd.s32 4294967295, %s5672_s12   ;;  %p4530_p0 = scmp.ge.s32.totalorder %s5672_s12, 1  ;;  %s5672_s12 = sphi %s5695_s12, %s13_s12  }
   0x2   : > { %p137_p1 = scmp.lt.s32.totalorder %s5672_s12, 3 }
   0x4   : > { %p138_p2 = pnand %p4530_p0, %p137_p1 }
   0x6   : > { %141 = sbr.rel (%p138_p2) target bundleno = 1135 (0x46f), region = 32 }
   0xd   : > { %v290_v0 = vld [vmem:[%s7794_s1] sm:$0x3]  ;;  %vm420_vm0 = vcmask 1041408   ;;  %p161_p3 = scmp.lt.s32.totalorder %s4526_s13, 1  ;;  %v4665_v2 = vld [vmem:[%s7794_s1 + $0x8] sm:$0x3] }
   0xe   : > { %5621 = vmatprep.subr.msk.bf16.mxu1 %vm420_vm0, %v290_v0  ;;  %v422_v1 = vsel %vm420_vm0, %v290_v0, 0  ;;  %v5714_v3 = vld [vmem:[%s7794_s1 + $0x2] sm:$0x3]  ;;  %5625 = vmatprep.subr.msk.bf16.mxu0 %vm420_vm0, %v4665_v2  ;;  %v5718_v4 = vsel %vm420_vm0, %v4665_v2, 0  ;;  %v5726_v5 = vld [vmem:[%s7794_s1 + $0xa] sm:$0x3] }
   0xf   : > { %5058 = vmatpush3.bf16.msra.mxu1 %v422_v1  ;;  %s7969_s13 = smov (!%p161_p3, %s4526_s13), 1  ;;  %7857 = vst [vmem:[#allocation3_spill] sm:$0xff] %v5718_v4  ;;  %5194 = vmatpush3.bf16.msra.mxu0 %v5718_v4  ;;  %vm371_vm1 = vcmask 31744   ;;  %v5674_v8 = vmov 0   ;;  %v1167_v14 = vsel %vm420_vm0, %v5714_v3, 0  ;;  %v5847_v23 = vsel %vm420_vm0, %v5726_v5, 0 }
  0x10   : > { %5622 = vmatprep.subr.msk.bf16.mxu1 %vm420_vm0, %v5714_v3  ;;  %s5631_s22 = smul.u32 216, %s7969_s13  ;;  %5627 = vmatprep.subr.msk.bf16.mxu0 %vm420_vm0, %v5726_v5  ;;  %v5824_v16 = vld [vmem:[%s7794_s1 + $0x4] sm:$0x3]  ;;  %vm649_vm2 = vsmask.f32 3328  ;;  %vm1410_vm5 = vcmask 1042432  }
  0x11   : > { %vm650_vm3 = vsmask.f32 7440  ;;  %vm1411_vm6 = vcmask 1046532   ;;  %vm4030_vm9 = vsmask.f32 256  ;;  %vm4354_vm12 = vcmask 1043456  }
  0x12   : > { %s5733_s25 = scalar_lea.vmem %s7793_s0, %s5631_s22  ;;  %s5738_s28 = scalar_lea.vmem %s7796_s3, %s5631_s22  ;;  %vm5887_vm4 = vmor %vm649_vm2, %vm650_vm3  ;;  %vm4031_vm10 = vsmask.f32 4368  ;;  %vm4355_vm13 = vsmask.f32 7938  ;;  %vm4361_vm14 = vcmask 1040384  }
  0x13   : > { %v5741_v6 = vld [vmem:[%s5733_s25] sm:$0xf]  ;;  %v5744_v7 = vld [vmem:[%s5733_s25 + $0x4] sm:$0xf]  ;;  %3880 = vst [vmem:[%s5738_s28] sm:$0xf] %v5674_v8  ;;  %vm6098_vm7 = vmor %vm1410_vm5, %vm1411_vm6 }
  0x14   : > { %3881 = vst [vmem:[%s5738_s28 + $0x4] sm:$0xf] %v5674_v8  ;;  %3882 = vst [vmem:[%s5738_s28 + $0x8] sm:$0x1] %v5674_v8  ;;  %v5801_v9 = vld [vmem:[%s5733_s25 + $0xc] sm:$0xf]  ;;  %v4533_v10 = vcombine.low %v5741_v6, %v5744_v7 }
  0x15   : > { %3931 = vst [vmem:[%s5738_s28 + $0xcc] sm:$0xf] %v5674_v8  ;;  %3932 = vst [vmem:[%s5738_s28 + $0xd0] sm:$0xf] %v5674_v8  ;;  %v5806_v11 = vld [vmem:[%s5733_s25 + $0x10] sm:$0xf] }
  0x16   : > { %3933 = vst [vmem:[%s5738_s28 + $0xd4] sm:$0x1] %v5674_v8  ;;  %3883 = vst [vmem:[%s5738_s28 + $0xc] sm:$0xf] %v5674_v8  ;;  %v5810_v12 = vcombine.low %v5801_v9, %v5806_v11  ;;  %v5813_v13 = vld [vmem:[%s5733_s25 + $0x18] sm:$0xf]  ;;  %5059 = vmatprep.mubr.msk.bf16.mxu1 %vm371_vm1, %v4533_v10 }
  0x17   : > { %3884 = vst [vmem:[%s5738_s28 + $0x10] sm:$0xf] %v5674_v8  ;;  %3885 = vst [vmem:[%s5738_s28 + $0x14] sm:$0x1] %v5674_v8  ;;  %v5819_v15 = vld [vmem:[%s5733_s25 + $0x1c] sm:$0xf] }
  0x18   : > { %3886 = vst [vmem:[%s5738_s28 + $0x18] sm:$0xf] %v5674_v8  ;;  %3887 = vst [vmem:[%s5738_s28 + $0x1c] sm:$0xf] %v5674_v8  ;;  %5060 = vmatmul.mubr.msk.bf16.vlgmr.msra.gmra.mrb[0].mxu1 %vm371_vm1, %v5810_v12  ;;  %v5830_v17 = vcombine.low %v5813_v13, %v5819_v15  ;;  %v701_v18 = vshrl.u32 %v5813_v13, 16  ;;  %v704_v21 = vshll.u32 %v5813_v13, 16 }
  0x19   : > { %3888 = vst [vmem:[%s5738_s28 + $0x20] sm:$0x1] %v5674_v8  ;;  %3889 = vst [vmem:[%s5738_s28 + $0x24] sm:$0xf] %v5674_v8  ;;  %v5834_v19 = vld [vmem:[%s5733_s25 + $0x24] sm:$0xf]  ;;  %5092 = vmatpush3.bf16.msra.mxu1 %v1167_v14 }
  0x1a   : > { %3890 = vst [vmem:[%s5738_s28 + $0x28] sm:$0xf] %v5674_v8  ;;  %3891 = vst [vmem:[%s5738_s28 + $0x2c] sm:$0x1] %v5674_v8  ;;  %v5837_v20 = vld [vmem:[%s5733_s25 + $0x28] sm:$0xf]  ;;  %5063 = vmatprep.mubr.msk.bf16.mxu1 %vm371_vm1, %v5830_v17  ;;  %5623 = vmatprep.subr.msk.bf16.mxu1 %vm420_vm0, %v5824_v16 }
  0x1b   : > { %3892 = vst [vmem:[%s5738_s28 + $0x30] sm:$0xf] %v5674_v8  ;;  %3893 = vst [vmem:[%s5738_s28 + $0x34] sm:$0xf] %v5674_v8  ;;  %v5843_v22 = vld [vmem:[%s5733_s25 + $0x14] sm:$0x1]  ;;  %v5857_v28 = vcombine.low %v5834_v19, %v5837_v20 }
  0x1c   : > { %3894 = vst [vmem:[%s5738_s28 + $0x38] sm:$0x1] %v5674_v8  ;;  %3895 = vst [vmem:[%s5738_s28 + $0x3c] sm:$0xf] %v5674_v8  ;;  %v714_v26 = vshrl.u32 %v5819_v15, 16  ;;  %v677_v27 = vshrl.u32 %v5801_v9, 16 }
  0x1d   : > { %3896 = vst [vmem:[%s5738_s28 + $0x40] sm:$0xf] %v5674_v8  ;;  %3897 = vst [vmem:[%s5738_s28 + $0x44] sm:$0x1] %v5674_v8  ;;  %v680_v29 = vshll.u32 %v5801_v9, 16  ;;  %v686_v30 = vshll.u32 %v5806_v11, 16 }
  0x1e   : > { %3898 = vst [vmem:[%s5738_s28 + $0x48] sm:$0xf] %v5674_v8  ;;  %3899 = vst [vmem:[%s5738_s28 + $0x4c] sm:$0xf] %v5674_v8  ;;  %v690_v31 = vshrl.u32 %v5806_v11, 16  ;;  %v725_v33 = vshrl.u32 %v5834_v19, 16 }
  0x1f   : > { %3900 = vst [vmem:[%s5738_s28 + $0x50] sm:$0x1] %v5674_v8  ;;  %3901 = vst [vmem:[%s5738_s28 + $0x54] sm:$0xf] %v5674_v8  ;;  %v5863_v32 = vld [vmem:[%s5733_s25 + $0x20] sm:$0x1] }
  0x20   : > { %3902 = vst [vmem:[%s5738_s28 + $0x58] sm:$0xf] %v5674_v8  ;;  %3903 = vst [vmem:[%s5738_s28 + $0x5c] sm:$0x1] %v5674_v8  ;;  %v679_v34 = vrot.slane %v677_v27, 4  ;;  %v696_v35 = vshll.u32 %v5843_v22, 16  ;;  %5064 = vmatmul.mubr.msk.bf16.gmra.mrb[4].mxu1 %vm371_vm1, %v5857_v28 }
  0x21   : > { %3904 = vst [vmem:[%s5738_s28 + $0x60] sm:$0xf] %v5674_v8  ;;  %3905 = vst [vmem:[%s5738_s28 + $0x64] sm:$0xf] %v5674_v8  ;;  %v703_v36 = vrot.slane %v701_v18, 4  ;;  %v682_v37 = vrot.slane %v680_v29, 5 }
  0x22   : > { %3906 = vst [vmem:[%s5738_s28 + $0x68] sm:$0x1] %v5674_v8  ;;  %3907 = vst [vmem:[%s5738_s28 + $0x6c] sm:$0xf] %v5674_v8  ;;  %v688_v38 = vrot.slane %v686_v30, 5  ;;  %v692_v39 = vrot.slane %v690_v31, 4 }
  0x23   : > { %3908 = vst [vmem:[%s5738_s28 + $0x70] sm:$0xf] %v5674_v8  ;;  %3909 = vst [vmem:[%s5738_s28 + $0x74] sm:$0x1] %v5674_v8  ;;  %v706_v40 = vrot.slane %v704_v21, 5  ;;  %v728_v42 = vshll.u32 %v5834_v19, 16  ;;  %v683_v47 = vor.u32 %v682_v37, %v679_v34 }
  0x24   : > { %3910 = vst [vmem:[%s5738_s28 + $0x78] sm:$0xf] %v5674_v8  ;;  %3911 = vst [vmem:[%s5738_s28 + $0x7c] sm:$0xf] %v5674_v8  ;;  %v5868_v41 = vld [vmem:[%s5733_s25 + $0x30] sm:$0xf]  ;;  %v693_v48 = vor.u32 %v692_v39, %v688_v38 }
  0x25   : > { %3912 = vst [vmem:[%s5738_s28 + $0x80] sm:$0x1] %v5674_v8  ;;  %3913 = vst [vmem:[%s5738_s28 + $0x84] sm:$0xf] %v5674_v8  ;;  %v710_v43 = vshll.u32 %v5819_v15, 16  ;;  %v716_v44 = vrot.slane %v714_v26, 4  ;;  %v707_v50 = vor.u32 %v706_v40, %v703_v36 }
  0x26   : > { %3914 = vst [vmem:[%s5738_s28 + $0x88] sm:$0xf] %v5674_v8  ;;  %3915 = vst [vmem:[%s5738_s28 + $0x8c] sm:$0x1] %v5674_v8  ;;  %v720_v45 = vshll.u32 %v5863_v32, 16  ;;  %v698_v49 = vrot.slane %v696_v35, 5 }
  0x27   : > { %3916 = vst [vmem:[%s5738_s28 + $0x90] sm:$0xf] %v5674_v8  ;;  %3917 = vst [vmem:[%s5738_s28 + $0x94] sm:$0xf] %v5674_v8  ;;  %v5874_v46 = vld [vmem:[%s5733_s25 + $0x34] sm:$0xf] }
  0x28   : > { %3918 = vst [vmem:[%s5738_s28 + $0x98] sm:$0x1] %v5674_v8  ;;  %3919 = vst [vmem:[%s5738_s28 + $0x9c] sm:$0xf] %v5674_v8  ;;  %v5879_v51 = vld [vmem:[%s5733_s25 + $0x3c] sm:$0xf]  ;;  %v5893_v57 = vcombine.low %v5868_v41, %v5874_v46 }
  0x29   : > { %3920 = vst [vmem:[%s5738_s28 + $0xa0] sm:$0xf] %v5674_v8  ;;  %3921 = vst [vmem:[%s5738_s28 + $0xa4] sm:$0x1] %v5674_v8  ;;  %v5882_v52 = vld [vmem:[%s5733_s25 + $0x40] sm:$0xf] }
  0x2a   : > { %3922 = vst [vmem:[%s5738_s28 + $0xa8] sm:$0xf] %v5674_v8  ;;  %3923 = vst [vmem:[%s5738_s28 + $0xac] sm:$0xf] %v5674_v8  ;;  %v738_v53 = vshrl.u32 %v5837_v20, 16  ;;  %v712_v55 = vrot.slane %v710_v43, 5  ;;  %5067 = vmatprep.mubr.msk.bf16.mxu1 %vm371_vm1, %v5893_v57  ;;  %v5902_v1 = vcombine.low %v5879_v51, %v5882_v52 }
  0x2b   : > { %3924 = vst [vmem:[%s5738_s28 + $0xb0] sm:$0x1] %v5674_v8  ;;  %3925 = vst [vmem:[%s5738_s28 + $0xb4] sm:$0xf] %v5674_v8  ;;  %v722_v56 = vrot.slane %v720_v45, 5  ;;  %v684_v58 = vrot.slane %v683_v47, 4 }
  0x2c   : > { %3926 = vst [vmem:[%s5738_s28 + $0xb8] sm:$0xf] %v5674_v8  ;;  %3927 = vst [vmem:[%s5738_s28 + $0xbc] sm:$0x1] %v5674_v8  ;;  %v694_v59 = vrot.slane %v693_v48, 4  ;;  %v708_v60 = vrot.slane %v707_v50, 4  ;;  %v717_v62 = vor.u32 %v716_v44, %v712_v55  ;;  %5068 = vmatmul.mubr.msk.bf16.gmra.mrb[8].mxu1 %vm371_vm1, %v5902_v1 }
  0x2d   : > { %3928 = vst [vmem:[%s5738_s28 + $0xc0] sm:$0xf] %v5674_v8  ;;  %3929 = vst [vmem:[%s5738_s28 + $0xc4] sm:$0xf] %v5674_v8  ;;  %v749_v61 = vshrl.u32 %v5868_v41, 16  ;;  %v752_v63 = vshll.u32 %v5868_v41, 16  ;;  %v689_v3 = vsel %vm5887_vm4, %v684_v58, %v688_v38 }
  0x2e   : > { %3930 = vst [vmem:[%s5738_s28 + $0xc8] sm:$0x1] %v5674_v8  ;;  %7858 = vst [vmem:[#allocation4_spill] sm:$0xff] %v5810_v12  ;;  %v762_v0 = vshrl.u32 %v5874_v46, 16  ;;  %v5905_v2 = vld [vmem:[%s5733_s25 + $0x2c] sm:$0x1]  ;;  %v699_v5 = vsel %vm5887_vm4, %v694_v59, %v698_v49  ;;  %v713_v8 = vsel %vm5887_vm4, %v708_v60, %v712_v55 }
  0x2f   : > { %7859 = vst [vmem:[#allocation5_spill] sm:$0xff] %v5830_v17  ;;  %7860 = vst [vmem:[#allocation6_spill] sm:$0xff] %v5857_v28  ;;  %v773_v10 = vshrl.u32 %v5879_v51, 16  ;;  %v5914_v14 = vcombine.low %v689_v3, %v699_v5  ;;  %v718_v18 = vrot.slane %v717_v62, 4  ;;  %v776_v21 = vshll.u32 %v5879_v51, 16 }
  0x30   : > { %7863 = vst [vmem:[#allocation7_spill] sm:$0xff] %v5893_v57  ;;  %7864 = vst [vmem:[#allocation8_spill] sm:$0xff] %v5902_v1  ;;  %v727_v26 = vrot.slane %v725_v33, 4  ;;  %v730_v27 = vrot.slane %v728_v42, 5  ;;  %v734_v29 = vshll.u32 %v5837_v20, 16  ;;  %v740_v30 = vrot.slane %v738_v53, 4 }
  0x31   : > { %v744_v31 = vshll.u32 %v5905_v2, 16  ;;  %v5920_v34 = vld [vmem:[%s5733_s25 + $0x38] sm:$0x1]  ;;  %5195 = vmatprep.mubr.msk.bf16.mxu0 %vm371_vm1, %v5914_v14  ;;  %v723_v35 = vsel %vm5887_vm4, %v718_v18, %v722_v56  ;;  %v751_v36 = vrot.slane %v749_v61, 4  ;;  %v754_v37 = vrot.slane %v752_v63, 5  ;;  %vm7402_vm11 = vmor %vm4030_vm9, %vm4031_vm10 }
  0x32   : > { %v758_v33 = vshll.u32 %v5874_v46, 16  ;;  %v5928_v38 = vld [vmem:[%s5733_s25 + $0x48] sm:$0xf]  ;;  %v5933_v39 = vld [vmem:[%s7794_s1 + $0xc] sm:$0x3]  ;;  %v5935_v40 = vcombine.low %v713_v8, %v723_v35  ;;  %v786_v42 = vshrl.u32 %v5882_v52, 16  ;;  %v731_v43 = vor.u32 %v730_v27, %v727_v26  ;;  %vm7579_vm15 = vmand %vm4354_vm12, %vm4355_vm13 }
  0x33   : > { %v736_v44 = vrot.slane %v734_v29, 5  ;;  %v5941_v45 = vld [vmem:[%s5733_s25 + $0x4c] sm:$0xf]  ;;  %v5944_v47 = vld [vmem:[%s5733_s25 + $0x54] sm:$0xf]  ;;  %v755_v48 = vor.u32 %v754_v37, %v751_v36  ;;  %v764_v50 = vrot.slane %v762_v0, 4 }
  0x34   : > { %7865 = vst [vmem:[#allocation9_spill] sm:$0xff] %v5935_v40  ;;  %v760_v49 = vrot.slane %v758_v33, 5  ;;  %v768_v53 = vshll.u32 %v5920_v34, 16  ;;  %v5948_v55 = vld [vmem:[%s5733_s25 + $0x58] sm:$0xf]  ;;  %5196 = vmatmul.mubr.msk.bf16.vlgmr.msra.gmra.mrb[0].mxu0 %vm371_vm1, %v5935_v40  ;;  %v732_v56 = vrot.slane %v731_v43, 4  ;;  %v5954_v60 = vcombine.low %v5928_v38, %v5941_v45 }
  0x35   : > { %v741_v58 = vor.u32 %v740_v30, %v736_v44  ;;  %v746_v59 = vrot.slane %v744_v31, 5  ;;  %5228 = vmatpush3.bf16.msra.mxu0 %v5847_v23  ;;  %v756_v61 = vrot.slane %v755_v48, 4  ;;  %v797_v0 = vshrl.u32 %v5928_v38, 16  ;;  %v5974_v30 = vld [vmem:[%s5733_s25 + $0x44] sm:$0x1] }
  0x36   : > { %7866 = vst [vmem:[#allocation10_spill] sm:$0xff] %v5954_v60  ;;  %v765_v62 = vor.u32 %v764_v50, %v760_v49  ;;  %v770_v63 = vrot.slane %v768_v53, 5  ;;  %v737_v3 = vsel %vm5887_vm4, %v732_v56, %v736_v44  ;;  %5071 = vmatprep.mubr.msk.bf16.mxu1 %vm371_vm1, %v5954_v60  ;;  %v800_v8 = vshll.u32 %v5928_v38, 16  ;;  %5628 = vmatprep.subr.msk.bf16.mxu0 %vm420_vm0, %v5933_v39  ;;  %v5993_v56 = vld [vmem:[%s5733_s25 + $0x60] sm:$0xf] }
  0x37   : > { %v742_v5 = vrot.slane %v741_v58, 4  ;;  %v5965_v18 = vcombine.low %v5944_v47, %v5948_v55  ;;  %v761_v23 = vsel %vm5887_vm4, %v756_v61, %v760_v49  ;;  %v810_v27 = vshrl.u32 %v5941_v45, 16  ;;  %v5985_v49 = vld [vmem:[%s5733_s25 + $0x50] sm:$0x1]  ;;  %v5996_v58 = vld [vmem:[%s5733_s25 + $0x64] sm:$0xf] }
  0x38   : > { %v766_v26 = vrot.slane %v765_v62, 4  ;;  %v821_v29 = vshrl.u32 %v5944_v47, 16  ;;  %v824_v35 = vshll.u32 %v5944_v47, 16  ;;  %v775_v36 = vrot.slane %v773_v10, 4  ;;  %v6066_v60 = vld [vmem:[%s5733_s25 + $0x88] sm:$0xf] }
  0x39   : > { %7867 = vst [vmem:[#allocation11_spill] sm:$0xff] %v5965_v18  ;;  %v747_v31 = vsel %vm5887_vm4, %v742_v5, %v746_v59  ;;  %v778_v37 = vrot.slane %v776_v21, 5  ;;  %v782_v44 = vshll.u32 %v5882_v52, 16  ;;  %v788_v48 = vrot.slane %v786_v42, 4  ;;  %5072 = vmatmul.mubr.msk.bf16.gmra.mrb[12].mxu1 %vm371_vm1, %v5965_v18  ;;  %v6042_v18 = vld [vmem:[%s5733_s25 + $0x68] sm:$0x1] }
  0x3a   : > { %v5979_v33 = vcombine.low %v737_v3, %v747_v31  ;;  %v771_v43 = vsel %vm5887_vm4, %v766_v26, %v770_v63  ;;  %v792_v10 = vshll.u32 %v5974_v30, 16  ;;  %v799_v21 = vrot.slane %v797_v0, 4  ;;  %v6002_v63 = vld [vmem:[%s5733_s25 + $0x6c] sm:$0xf]  ;;  %v6013_v26 = vld [vmem:[%s5733_s25 + $0x70] sm:$0xf] }
  0x3b   : > { %v5987_v50 = vcombine.low %v761_v23, %v771_v43  ;;  %v779_v53 = vor.u32 %v778_v37, %v775_v36  ;;  %v784_v42 = vrot.slane %v782_v44, 5  ;;  %v802_v59 = vrot.slane %v800_v8, 5 }
  0x3c   : > { %5199 = vmatprep.mubr.msk.bf16.mxu0 %vm371_vm1, %v5979_v33  ;;  %v806_v61 = vshll.u32 %v5941_v45, 16  ;;  %v812_v62 = vrot.slane %v810_v27, 4  ;;  %v834_v3 = vshrl.u32 %v5948_v55, 16  ;;  %v816_v5 = vshll.u32 %v5985_v49, 16 }
  0x3d   : > { %5200 = vmatmul.mubr.msk.bf16.gmra.mrb[4].mxu0 %vm371_vm1, %v5987_v50  ;;  %v780_v0 = vrot.slane %v779_v53, 4  ;;  %v6010_v23 = vcombine.low %v5993_v56, %v5996_v58  ;;  %v789_v8 = vor.u32 %v788_v48, %v784_v42  ;;  %v794_v31 = vrot.slane %v792_v10, 5  ;;  %v6026_v10 = vld [vmem:[%s5733_s25 + $0x5c] sm:$0x1] }
  0x3e   : > { %v803_v27 = vor.u32 %v802_v59, %v799_v21  ;;  %v808_v36 = vrot.slane %v806_v61, 5  ;;  %v818_v43 = vrot.slane %v816_v5, 5  ;;  %v845_v44 = vshrl.u32 %v5993_v56, 16 }
  0x3f   : > { %7868 = vst [vmem:[#allocation12_spill] sm:$0xff] %v6010_v23  ;;  %v785_v37 = vsel %vm5887_vm4, %v780_v0, %v784_v42  ;;  %5075 = vmatprep.mubr.msk.bf16.mxu1 %vm371_vm1, %v6010_v23  ;;  %v848_v53 = vshll.u32 %v5993_v56, 16  ;;  %v790_v25 = vrot.slane %v789_v8, 4  ;;  %v6023_v48 = vcombine.low %v6002_v63, %v6013_v26 }
  0x40   : > { %v804_v24 = vrot.slane %v803_v27, 4  ;;  %v813_v4 = vor.u32 %v812_v62, %v808_v36  ;;  %v662_v21 = vshll.u32 %v5744_v7, 16  ;;  %v666_v42 = vshrl.u32 %v5744_v7, 16 }
  0x41   : > { %7869 = vst [vmem:[#allocation13_spill] sm:$0xff] %v6023_v48  ;;  %v858_v59 = vshrl.u32 %v5996_v58, 16  ;;  %v823_v61 = vrot.slane %v821_v29, 4  ;;  %v795_v0 = vsel %vm5887_vm4, %v790_v25, %v794_v31  ;;  %v826_v8 = vrot.slane %v824_v35, 5  ;;  %5076 = vmatmul.mubr.msk.bf16.gmra.mrb[16].mxu1 %vm371_vm1, %v6023_v48  ;;  %v6047_v31 = vld [vmem:[%s5733_s25 + $0x78] sm:$0xf] }
  0x42   : > { %v809_v62 = vsel %vm5887_vm4, %v804_v24, %v808_v36  ;;  %v814_v5 = vrot.slane %v813_v4, 4  ;;  %v6035_v27 = vcombine.low %v785_v37, %v795_v0  ;;  %v830_v12 = vshll.u32 %v5948_v55, 16  ;;  %v6050_v36 = vld [vmem:[%s5733_s25 + $0x7c] sm:$0xf] }
  0x43   : > { %v836_v23 = vrot.slane %v834_v3, 4  ;;  %v840_v29 = vshll.u32 %v6026_v10, 16  ;;  %v827_v24 = vor.u32 %v826_v8, %v823_v61  ;;  %v847_v4 = vrot.slane %v845_v44, 4 }
  0x44   : > { %7870 = vst [vmem:[#allocation14_spill] sm:$0xff] %v6035_v27  ;;  %v819_v25 = vsel %vm5887_vm4, %v814_v5, %v818_v43  ;;  %v850_v35 = vrot.slane %v848_v53, 5  ;;  %v7871_v37 = vshrl.u32 %v5741_v6, 16  ;;  %5203 = vmatprep.mubr.msk.bf16.mxu0 %vm371_vm1, %v6035_v27  ;;  %v832_v48 = vrot.slane %v830_v12, 5  ;;  %v6062_v5 = vld [vmem:[%s5733_s25 + $0x84] sm:$0xf] }
  0x45   : > { %v6058_v3 = vcombine.low %v809_v62, %v819_v25  ;;  %v854_v43 = vshll.u32 %v5996_v58, 16  ;;  %v828_v44 = vrot.slane %v827_v24, 4  ;;  %v860_v61 = vrot.slane %v858_v59, 4 }
  0x46   : > { %v6054_v0 = vrot.slane %v7871_v37, 4  ;;  %v851_v53 = vor.u32 %v850_v35, %v847_v4  ;;  %v864_v8 = vshll.u32 %v6042_v18, 16  ;;  %v837_v37 = vor.u32 %v836_v23, %v832_v48 }
  0x47   : > { %7872 = vst [vmem:[#allocation15_spill] sm:$0xff] %v6058_v3  ;;  %5204 = vmatmul.mubr.msk.bf16.gmra.mrb[8].mxu0 %vm371_vm1, %v6058_v3  ;;  %v842_v62 = vrot.slane %v840_v29, 5  ;;  %v856_v25 = vrot.slane %v854_v43, 5  ;;  %v6072_v12 = vcombine.low %v6047_v31, %v6050_v36  ;;  %v7874_v24 = vshll.u32 %v5741_v6, 16  ;;  %v6086_v29 = vld [vmem:[%s5733_s25 + $0x90] sm:$0xf] }
  0x48   : > { %v1429_v59 = vrot.slane %v5819_v15, 5  ;;  %v833_v35 = vsel %vm5887_vm4, %v828_v44, %v832_v48  ;;  %v852_v1 = vrot.slane %v851_v53, 4  ;;  %v838_v57 = vrot.slane %v837_v37, 4  ;;  %v6089_v43 = vld [vmem:[%s5733_s25 + $0x94] sm:$0xf] }
  0x49   : > { %7873 = vst [vmem:[#allocation16_spill] sm:$0xff] %v6072_v12  ;;  %v658_v4 = vrot.slane %v7874_v24, 5  ;;  %v861_v28 = vor.u32 %v860_v61, %v856_v25  ;;  %v866_v17 = vrot.slane %v864_v8, 5  ;;  %5079 = vmatprep.mubr.msk.bf16.mxu1 %vm371_vm1, %v6072_v12  ;;  %v6083_v23 = vcombine.low %v6062_v5, %v6066_v60 }
  0x4a   : > { %v6091_v15 = vrot.slane %v662_v21, 5  ;;  %v668_v48 = vrot.slane %v666_v42, 4  ;;  %v1425_v44 = vrot.slane %v5843_v22, 5  ;;  %v857_v53 = vsel %vm5887_vm4, %v852_v1, %v856_v25 }
  0x4b   : > { %7875 = vst [vmem:[#allocation17_spill] sm:$0xff] %v6083_v23  ;;  %v843_v8 = vsel %vm5887_vm4, %v838_v57, %v842_v62  ;;  %v862_v37 = vrot.slane %v861_v28, 4  ;;  %5080 = vmatmul.mubr.msk.bf16.gmra.mrb[20].mxu1 %vm371_vm1, %v6083_v23  ;;  %v4599_v21 = vrot.slane %v5801_v9, 9  ;;  %v1422_v22 = vrot.slane %v5806_v11, 5  ;;  %v6116_v57 = vld [vmem:[%s5733_s25 + $0x9c] sm:$0xf] }
  0x4c   : > { %v4600_v42 = vrot.slane %v5813_v13, 9  ;;  %v1431_v1 = vrot.slane %v1429_v59, 4  ;;  %v6109_v25 = vcombine.low %v833_v35, %v843_v8  ;;  %v6113_v24 = vcombine.low %v6086_v29, %v6089_v43  ;;  %v6119_v28 = vld [vmem:[%s5733_s25 + $0xa0] sm:$0xf] }
  0x4d   : > { %v1432_v62 = vrot.slane %v5863_v32, 5  ;;  %v867_v9 = vsel %vm5887_vm4, %v862_v37, %v866_v17  ;;  %v1423_v11 = vsel %vm6098_vm7, %v4599_v21, %v1422_v22  ;;  %v1424_v13 = vrot.slane %v1422_v22, 4  ;;  %v6141_v37 = vld [vmem:[%s5733_s25 + $0xa8] sm:$0xf]  ;;  %v6144_v21 = vld [vmem:[%s5733_s25 + $0xac] sm:$0xf] }
  0x4e   : > { %7878 = vst [vmem:[#allocation18_spill] sm:$0xff] %v6109_v25  ;;  %7879 = vst [vmem:[#allocation19_spill] sm:$0xff] %v6113_v24  ;;  %5207 = vmatprep.mubr.msk.bf16.mxu0 %vm371_vm1, %v6109_v25  ;;  %v6128_v35 = vcombine.low %v857_v53, %v867_v9  ;;  %5083 = vmatprep.mubr.msk.bf16.mxu1 %vm371_vm1, %v6113_v24  ;;  %v659_v8 = vor.u32 %v658_v4, %v6054_v0  ;;  %v7817_v23 = vrot.slane %v5744_v7, 5 }
  0x4f   : > { %v1426_v32 = vsel %vm6098_vm7, %v1424_v13, %v1425_v44  ;;  %v6138_v17 = vcombine.low %v6116_v57, %v6119_v28  ;;  %v669_v53 = vor.u32 %v668_v48, %v6091_v15  ;;  %v4601_v4 = vrot.slane %v5834_v19, 9 }
  0x50   : > { %7880 = vst [vmem:[#allocation20_spill] sm:$0xff] %v6128_v35  ;;  %5208 = vmatmul.mubr.msk.bf16.gmra.mrb[12].mxu0 %vm371_vm1, %v6128_v35  ;;  %v6149_v0 = vcombine.low %v1423_v11, %v1426_v32  ;;  %v1436_v44 = vrot.slane %v5837_v20, 5  ;;  %v1430_v22 = vsel %vm6098_vm7, %v4600_v42, %v1429_v59  ;;  %v1433_v9 = vsel %vm6098_vm7, %v1431_v1, %v1432_v62  ;;  %v6177_v42 = vld [vmem:[%s5733_s25 + $0xb4] sm:$0xf]  ;;  %v6194_v59 = vld [vmem:[%s5733_s25 + $0x8] sm:$0x1] }
  0x51   : > { %7881 = vst [vmem:[#allocation21_spill] sm:$0xff] %v6138_v17  ;;  %v1439_v13 = vrot.slane %v5905_v2, 5  ;;  %v1443_v48 = vrot.slane %v5874_v46, 5  ;;  %v6165_v20 = vcombine.low %v6141_v37, %v6144_v21  ;;  %v6170_v2 = vrot.slane %v7817_v23, 4 }
  0x52   : > { %5229 = vmatprep.mubr.msk.bf16.mxu0 %vm371_vm1, %v6149_v0  ;;  %v1437_v19 = vsel %vm6098_vm7, %v4601_v4, %v1436_v44  ;;  %v1438_v11 = vrot.slane %v1436_v44, 4  ;;  %v2764_v46 = vsel %vm420_vm0, %v5933_v39, 0  ;;  %v6181_v1 = vsel %vm420_vm0, %v5824_v16, 0  ;;  %v6191_v39 = vld [vmem:[%s5733_s25 + $0xb8] sm:$0xf] }
  0x53   : > { %7882 = vst [vmem:[#allocation22_spill] sm:$0xff] %v6165_v20  ;;  %5084 = vmatmul.mubr.msk.bf16.gmra.mrb[24].mxu1 %vm371_vm1, %v6138_v17  ;;  %v660_v62 = vrot.slane %v659_v8, 4  ;;  %v6183_v32 = vcombine.low %v1430_v22, %v1433_v9  ;;  %v4602_v44 = vrot.slane %v5868_v41, 9  ;;  %v670_v23 = vrot.slane %v669_v53, 4 }
  0x54   : > { %v1440_v4 = vsel %vm6098_vm7, %v1438_v11, %v1439_v13  ;;  %5087 = vmatprep.mubr.msk.bf16.mxu1 %vm371_vm1, %v6165_v20  ;;  %v1445_v16 = vrot.slane %v1443_v48, 4  ;;  %v1446_v8 = vrot.slane %v5920_v34, 5  ;;  %v4603_v9 = vrot.slane %v5879_v51, 9  ;;  %v6213_v34 = vld [vmem:[%s7794_s1 + $0xe] sm:$0x3] }
  0x55   : > { %v6196_v17 = vcombine.low %v1437_v19, %v1440_v4  ;;  %v1450_v13 = vrot.slane %v5882_v52, 5  ;;  %v1453_v41 = vrot.slane %v5974_v30, 5  ;;  %v6207_v53 = vcombine.low %v6177_v42, %v6191_v39 }
  0x56   : > { %v672_v19 = vshll.u32 %v6194_v59, 16  ;;  %v1444_v30 = vsel %vm6098_vm7, %v4602_v44, %v1443_v48  ;;  %v1447_v20 = vsel %vm6098_vm7, %v1445_v16, %v1446_v8  ;;  %v1457_v11 = vrot.slane %v5941_v45, 5  ;;  %v6310_v16 = vld [vmem:[%s5733_s25 + $0x98] sm:$0x1] }
  0x57   : > { %7883 = vst [vmem:[#allocation23_spill] sm:$0xff] %v6196_v17  ;;  %7884 = vst [vmem:[#allocation24_spill] sm:$0xff] %v6207_v53  ;;  %v1452_v4 = vrot.slane %v1450_v13, 4  ;;  %v665_v52 = vsel %vm5887_vm4, %v660_v62, %v6091_v15  ;;  %v1451_v48 = vsel %vm6098_vm7, %v4603_v9, %v1450_v13  ;;  %v1464_v44 = vrot.slane %v5948_v55, 5 }
  0x58   : > { %5230 = vmatmul.mubr.msk.bf16.vlgmr.msra.gmra.mrb[0].mxu0 %vm371_vm1, %v6183_v32  ;;  %v674_v51 = vrot.slane %v672_v19, 5  ;;  %v6245_v9 = vcombine.low %v1444_v30, %v1447_v20  ;;  %v4604_v55 = vrot.slane %v5928_v38, 9  ;;  %v1459_v19 = vrot.slane %v1457_v11, 4 }
  0x59   : > { %5262 = vmatpush3.bf16.msra.mxu0 %v2764_v46  ;;  %5233 = vmatprep.mubr.msk.bf16.mxu0 %vm371_vm1, %v6196_v17  ;;  %v1454_v46 = vsel %vm6098_vm7, %v1452_v4, %v1453_v41  ;;  %v1460_v4 = vrot.slane %v5985_v49, 5  ;;  %v4605_v15 = vrot.slane %v5944_v47, 9  ;;  %v1466_v45 = vrot.slane %v1464_v44, 4  ;;  %v6278_v47 = vld [vmem:[%s5733_s25 + $0x80] sm:$0x1] }
  0x5a   : > { %5629 = vmatprep.subr.msk.bf16.mxu0 %vm420_vm0, %v6213_v34  ;;  %v675_v62 = vsel %vm5887_vm4, %v670_v23, %v674_v51  ;;  %7885 = vst [vmem:[#allocation25_spill] sm:$0xff] %v6245_v9  ;;  %v6248_v41 = vcombine.low %v1451_v48, %v1454_v46  ;;  %v1467_v23 = vrot.slane %v6026_v10, 5  ;;  %v1471_v20 = vrot.slane %v5996_v58, 5 }
  0x5b   : > { %5088 = vmatmul.mubr.msk.bf16.gmra.mrb[28].mxu1 %vm371_vm1, %v6207_v53  ;;  %v4566_v13 = vcombine.low %v665_v52, %v675_v62  ;;  %v1478_v48 = vrot.slane %v6013_v26, 5  ;;  %v1458_v58 = vsel %vm6098_vm7, %v4604_v55, %v1457_v11  ;;  %v1461_v46 = vsel %vm6098_vm7, %v1459_v19, %v1460_v4  ;;  %v6288_v55 = vld [vmem:[%s7794_s1 + $0x6] sm:$0x3]  ;;  %v6327_v53 = vld [vmem:[%s5733_s25 + $0xa4] sm:$0x1] }
  0x5c   : > { %7886 = vst [vmem:[#allocation26_spill] sm:$0xff] %v6248_v41  ;;  %v1465_v62 = vsel %vm6098_vm7, %v4605_v15, %v1464_v44  ;;  %v1485_v10 = vrot.slane %v6050_v36, 5  ;;  %v1468_v30 = vsel %vm6098_vm7, %v1466_v45, %v1467_v23  ;;  %v4606_v49 = vrot.slane %v5993_v56, 9 }
  0x5d   : > { %5093 = vmatprep.mubr.msk.bf16.mxu1 %vm371_vm1, %v4566_v13  ;;  %v6275_v13 = vld [vmem:[%s5733_s25 + $0x74] sm:$0x1]  ;;  %v1473_v52 = vrot.slane %v1471_v20, 4  ;;  %v1474_v11 = vrot.slane %v6042_v18, 5  ;;  %v4607_v15 = vrot.slane %v6002_v63, 9  ;;  %v4608_v45 = vrot.slane %v6047_v31, 9 }
  0x5e   : > { %v1492_v56 = vrot.slane %v6066_v60, 5  ;;  %v6297_v18 = vcombine.low %v1458_v58, %v1461_v46  ;;  %v1480_v4 = vrot.slane %v1478_v48, 4  ;;  %v1481_v23 = vrot.slane %v6275_v13, 5 }
  0x5f   : > { %v6306_v44 = vcombine.low %v1465_v62, %v1468_v30  ;;  %v1487_v51 = vrot.slane %v1485_v10, 4  ;;  %v1488_v38 = vrot.slane %v6278_v47, 5  ;;  %v1499_v58 = vrot.slane %v6089_v43, 5 }
  0x60   : > { %5234 = vmatmul.mubr.msk.bf16.gmra.mrb[4].mxu0 %vm371_vm1, %v6245_v9  ;;  %7887 = vst [vmem:[#allocation27_spill] sm:$0xff] %v6297_v18  ;;  %v1475_v19 = vsel %vm6098_vm7, %v1473_v52, %v1474_v11  ;;  %v1506_v30 = vrot.slane %v6119_v28, 5  ;;  %v1479_v62 = vsel %vm6098_vm7, %v4607_v15, %v1478_v48  ;;  %v1486_v8 = vsel %vm6098_vm7, %v4608_v45, %v1485_v10 }
  0x61   : > { %5237 = vmatprep.mubr.msk.bf16.mxu0 %vm371_vm1, %v6248_v41  ;;  %7888 = vst [vmem:[#allocation28_spill] sm:$0xff] %v6306_v44  ;;  %v4609_v22 = vrot.slane %v6062_v5, 9  ;;  %v1502_v48 = vrot.slane %v6310_v16, 5  ;;  %v1489_v10 = vsel %vm6098_vm7, %v1487_v51, %v1488_v38  ;;  %v1501_v11 = vrot.slane %v1499_v58, 4 }
  0x62   : > { %v4611_v15 = vrot.slane %v6116_v57, 9  ;;  %v1513_v45 = vrot.slane %v6144_v21, 5  ;;  %v1508_v46 = vrot.slane %v1506_v30, 4  ;;  %v7889_v24 = vshrl.u32 %v6002_v63, 16 }
  0x63   : > { %5094 = vmatmul.mubr.msk.bf16.vlgmr.msra.gmra.mrb[0].mxu1 %vm371_vm1, %v5914_v14  ;;  %v6304_v14 = vld [vmem:[%s5733_s25 + $0x8c] sm:$0x1]  ;;  %v7890_v41 = vshll.u32 %v6002_v63, 16  ;;  %v1493_v51 = vsel %vm6098_vm7, %v4609_v22, %v1492_v56  ;;  %v878_v9 = vshll.u32 %v6013_v26, 16  ;;  %v6359_v17 = vcombine.low %v1486_v8, %v1489_v10 }
  0x64   : > { %5097 = vmatprep.mubr.msk.bf16.mxu1 %vm371_vm1, %v5935_v40  ;;  %5126 = vmatpush3.bf16.msra.mxu1 %v6181_v1  ;;  %v1472_v1 = vsel %vm6098_vm7, %v4606_v49, %v1471_v20  ;;  %v1494_v40 = vrot.slane %v1492_v56, 4  ;;  %v1482_v20 = vsel %vm6098_vm7, %v1480_v4, %v1481_v23  ;;  %v1495_v52 = vrot.slane %v6304_v14, 5  ;;  %v6344_v23 = vld [vmem:[%s5733_s25 + $0xb0] sm:$0x1] }
  0x65   : > { %5624 = vmatprep.subr.msk.bf16.mxu1 %vm420_vm0, %v6288_v55  ;;  %v4610_v49 = vrot.slane %v6086_v29, 9  ;;  %v1509_v4 = vrot.slane %v6327_v53, 5  ;;  %v874_v12 = vrot.slane %v7890_v41, 5  ;;  %v6354_v38 = vcombine.low %v1479_v62, %v1482_v20 }
  0x66   : > { %v1496_v63 = vsel %vm6098_vm7, %v1494_v40, %v1495_v52  ;;  %v4612_v41 = vrot.slane %v6141_v37, 9  ;;  %v1507_v22 = vsel %vm6098_vm7, %v4611_v15, %v1506_v30  ;;  %v1515_v8 = vrot.slane %v1513_v45, 4 }
  0x67   : > { %v1516_v56 = vrot.slane %v6344_v23, 5  ;;  %v1520_v40 = vrot.slane %v6191_v39, 5  ;;  %v6377_v20 = vrot.slane %v878_v9, 5  ;;  %v7891_v52 = vshrl.u32 %v6013_v26, 16 }
  0x68   : > { %5238 = vmatmul.mubr.msk.bf16.gmra.mrb[8].mxu0 %vm371_vm1, %v6297_v18  ;;  %v871_v18 = vrot.slane %v7889_v24, 4  ;;  %v1500_v24 = vsel %vm6098_vm7, %v4610_v49, %v1499_v58  ;;  %v902_v58 = vshll.u32 %v6050_v36, 16  ;;  %v7893_v30 = vshll.u32 %v6047_v31, 16 }
  0x69   : > { %5241 = vmatprep.mubr.msk.bf16.mxu0 %vm371_vm1, %v6306_v44  ;;  %v6350_v44 = vcombine.low %v1472_v1, %v1475_v19  ;;  %v1503_v19 = vsel %vm6098_vm7, %v1501_v11, %v1502_v48  ;;  %v1510_v1 = vsel %vm6098_vm7, %v1508_v46, %v1509_v4  ;;  %v884_v49 = vrot.slane %v7891_v52, 4 }
  0x6a   : > { %v875_v62 = vor.u32 %v874_v12, %v871_v18  ;;  %v7892_v48 = vshrl.u32 %v6047_v31, 16  ;;  %v898_v11 = vrot.slane %v7893_v30, 5  ;;  %v6387_v46 = vcombine.low %v1493_v51, %v1496_v63  ;;  %v6392_v18 = vld [vmem:[%s5733_s25 + $0xbc] sm:$0x1]  ;;  %v6424_v30 = vld [vmem:[%s5733_s25 + $0xc0] sm:$0xf] }
  0x6b   : > { %5098 = vmatmul.mubr.msk.bf16.gmra.mrb[4].mxu1 %vm371_vm1, %v5979_v33  ;;  %v6389_v12 = vcombine.low %v1500_v24, %v1503_v19  ;;  %v6394_v9 = vrot.slane %v902_v58, 5  ;;  %v7894_v26 = vshrl.u32 %v6050_v36, 16  ;;  %v6400_v4 = vcombine.low %v1507_v22, %v1510_v1 }
  0x6c   : > { %5101 = vmatprep.mubr.msk.bf16.mxu1 %vm371_vm1, %v5987_v50  ;;  %v895_v10 = vrot.slane %v7892_v48, 4  ;;  %v1514_v31 = vsel %vm6098_vm7, %v4612_v41, %v1513_v45  ;;  %v888_v51 = vshll.u32 %v6275_v13, 16  ;;  %v4613_v63 = vrot.slane %v6177_v42, 9 }
  0x6d   : > { %v908_v15 = vrot.slane %v7894_v26, 4  ;;  %v1517_v24 = vsel %vm6098_vm7, %v1515_v8, %v1516_v56  ;;  %v876_v19 = vrot.slane %v875_v62, 4  ;;  %v1522_v58 = vrot.slane %v1520_v40, 4 }
  0x6e   : > { %v926_v36 = vshll.u32 %v6066_v60, 16  ;;  %v885_v22 = vor.u32 %v884_v49, %v6377_v20  ;;  %v1523_v1 = vrot.slane %v6392_v18, 5  ;;  %v899_v45 = vor.u32 %v898_v11, %v895_v10 }
  0x6f   : > { %v912_v13 = vshll.u32 %v6278_v47, 16  ;;  %v909_v41 = vor.u32 %v908_v15, %v6394_v9  ;;  %v7895_v8 = vshrl.u32 %v6062_v5, 16  ;;  %v7896_v62 = vshll.u32 %v6062_v5, 16 }
  0x70   : > { %5242 = vmatmul.mubr.msk.bf16.gmra.mrb[12].mxu0 %vm371_vm1, %v6350_v44  ;;  %v7897_v48 = vshrl.u32 %v6066_v60, 16  ;;  %v6426_v10 = vrot.slane %v926_v36, 5  ;;  %v7898_v47 = vshrl.u32 %v6086_v29, 16  ;;  %v7899_v26 = vshll.u32 %v6086_v29, 16 }
  0x71   : > { %5245 = vmatprep.mubr.msk.bf16.mxu0 %vm371_vm1, %v6354_v38  ;;  %v919_v56 = vrot.slane %v7895_v8, 4  ;;  %v922_v52 = vrot.slane %v7896_v62, 5  ;;  %v6433_v8 = vcombine.low %v1514_v31, %v1517_v24  ;;  %v890_v5 = vrot.slane %v888_v51, 5 }
  0x72   : > { %v932_v49 = vrot.slane %v7897_v48, 4  ;;  %v943_v11 = vrot.slane %v7898_v47, 4  ;;  %v946_v15 = vrot.slane %v7899_v26, 5  ;;  %v1521_v60 = vsel %vm6098_vm7, %v4613_v63, %v1520_v40  ;;  %v6443_v47 = vld [vmem:[%s5733_s25 + $0xc4] sm:$0xf] }
  0x73   : > { %5102 = vmatmul.mubr.msk.bf16.gmra.mrb[8].mxu1 %vm371_vm1, %v6035_v27  ;;  %v7900_v62 = vshrl.u32 %v6089_v43, 16  ;;  %v881_v36 = vsel %vm5887_vm4, %v876_v19, %v6377_v20  ;;  %v886_v27 = vrot.slane %v885_v22, 4  ;;  %v900_v29 = vrot.slane %v899_v45, 4  ;;  %v6452_v40 = vld [vmem:[%s5733_s25 + $0xc8] sm:$0x1] }
  0x74   : > { %5105 = vmatprep.mubr.msk.bf16.mxu1 %vm371_vm1, %v6058_v3  ;;  %v950_v3 = vshll.u32 %v6089_v43, 16  ;;  %v1524_v31 = vsel %vm6098_vm7, %v1522_v58, %v1523_v1  ;;  %v4683_v43 = vrot.slane %v6424_v30, 9  ;;  %v923_v51 = vor.u32 %v922_v52, %v919_v56 }
  0x75   : > { %v956_v48 = vrot.slane %v7900_v62, 4  ;;  %v936_v63 = vshll.u32 %v6304_v14, 16  ;;  %v910_v20 = vrot.slane %v909_v41, 4  ;;  %v914_v24 = vrot.slane %v912_v13, 5 }
  0x76   : > { %v6445_v26 = vrot.slane %v950_v3, 5  ;;  %v933_v3 = vor.u32 %v932_v49, %v6426_v10  ;;  %v947_v19 = vor.u32 %v946_v15, %v943_v11  ;;  %v2448_v22 = vrot.slane %v6443_v47, 5 }
  0x77   : > { %v960_v58 = vshll.u32 %v6310_v16, 16  ;;  %v974_v1 = vshll.u32 %v6119_v28, 16  ;;  %v891_v14 = vsel %vm5887_vm4, %v886_v27, %v890_v5  ;;  %v6467_v56 = vcombine.low %v1521_v60, %v1524_v31 }
  0x78   : > { %5246 = vmatmul.mubr.msk.bf16.gmra.mrb[16].mxu0 %vm371_vm1, %v6359_v17  ;;  %v957_v45 = vor.u32 %v956_v48, %v6445_v26  ;;  %v2451_v13 = vrot.slane %v6452_v40, 5  ;;  %v905_v41 = vsel %vm5887_vm4, %v900_v29, %v6394_v9  ;;  %v924_v16 = vrot.slane %v923_v51, 4 }
  0x79   : > { %5249 = vmatprep.mubr.msk.bf16.mxu0 %vm371_vm1, %v6387_v46  ;;  %v938_v52 = vrot.slane %v936_v63, 5  ;;  %v7901_v49 = vshrl.u32 %v6116_v57, 16  ;;  %v7902_v15 = vshll.u32 %v6116_v57, 16  ;;  %v915_v27 = vsel %vm5887_vm4, %v910_v20, %v914_v24 }
  0x7a   : > { %v934_v5 = vrot.slane %v933_v3, 4  ;;  %v948_v60 = vrot.slane %v947_v19, 4  ;;  %v998_v48 = vshll.u32 %v6144_v21, 16  ;;  %v958_v31 = vrot.slane %v957_v45, 4 }
  0x7b   : > { %5106 = vmatmul.mubr.msk.bf16.gmra.mrb[12].mxu1 %vm371_vm1, %v6109_v25  ;;  %v967_v11 = vrot.slane %v7901_v49, 4  ;;  %v970_v62 = vrot.slane %v7902_v15, 5  ;;  %v962_v9 = vrot.slane %v960_v58, 5  ;;  %v6482_v29 = vrot.slane %v974_v1, 5 }
  0x7c   : > { %5109 = vmatprep.mubr.msk.bf16.mxu1 %vm371_vm1, %v6128_v35  ;;  %v7903_v51 = vshrl.u32 %v6119_v28, 16  ;;  %v6486_v35 = vcombine.low %v881_v36, %v891_v14  ;;  %v2450_v49 = vrot.slane %v2448_v22, 4  ;;  %v7904_v57 = vshrl.u32 %v6141_v37, 16 }
  0x7d   : > { %v7905_v25 = vshll.u32 %v6141_v37, 16  ;;  %v6494_v24 = vcombine.low %v905_v41, %v915_v27  ;;  %v929_v3 = vsel %vm5887_vm4, %v924_v16, %v6426_v10  ;;  %v971_v28 = vor.u32 %v970_v62, %v967_v11 }
  0x7e   : > { %v980_v63 = vrot.slane %v7903_v51, 4  ;;  %v991_v15 = vrot.slane %v7904_v57, 4  ;;  %v984_v36 = vshll.u32 %v6327_v53, 16  ;;  %v939_v19 = vsel %vm5887_vm4, %v934_v5, %v938_v52 }
  0x7f   : > { %v994_v20 = vrot.slane %v7905_v25, 5  ;;  %v1000_v37 = vrot.slane %v998_v48, 5  ;;  %v7906_v25 = vshrl.u32 %v6144_v21, 16  ;;  %v7907_v58 = vrot.slane %v5744_v7, 5 }
  0x80   : > { %5250 = vmatmul.mubr.msk.bf16.gmra.mrb[20].mxu0 %vm371_vm1, %v6389_v12  ;;  %v7908_v1 = vrot.slane %v5741_v6, 9  ;;  %v953_v53 = vsel %vm5887_vm4, %v948_v60, %v6445_v26  ;;  %v963_v14 = vsel %vm5887_vm4, %v958_v31, %v962_v9  ;;  %v981_v41 = vor.u32 %v980_v63, %v6482_v29 }
  0x81   : > { %5253 = vmatprep.mubr.msk.bf16.mxu0 %vm371_vm1, %v6400_v4  ;;  %v1004_v45 = vrot.slane %v7906_v25, 4  ;;  %v1008_v21 = vshll.u32 %v6344_v23, 16  ;;  %v2449_v6 = vsel %vm6098_vm7, %v4683_v43, %v2448_v22  ;;  %v2452_v7 = vsel %vm6098_vm7, %v2450_v49, %v2451_v13 }
  0x82   : > { %v6512_v10 = vsel %vm6098_vm7, %v7908_v1, %v7907_v58  ;;  %v995_v16 = vor.u32 %v994_v20, %v991_v15  ;;  %v1418_v52 = vrot.slane %v6194_v59, 5  ;;  %v6530_v26 = vcombine.low %v929_v3, %v939_v19 }
  0x83   : > { %5110 = vmatmul.mubr.msk.bf16.gmra.mrb[16].mxu1 %vm371_vm1, %v6486_v35  ;;  %v972_v11 = vrot.slane %v971_v28, 4  ;;  %v986_v62 = vrot.slane %v984_v36, 5  ;;  %v1022_v23 = vshll.u32 %v6191_v39, 16  ;;  %v6533_v27 = vcombine.low %v953_v53, %v963_v14 }
  0x84   : > { %5113 = vmatprep.mubr.msk.bf16.mxu1 %vm371_vm1, %v6494_v24  ;;  %v1005_v5 = vor.u32 %v1004_v45, %v1000_v37  ;;  %v7909_v43 = vshrl.u32 %v6177_v42, 16  ;;  %v1419_v13 = vsel %vm6098_vm7, %v6170_v2, %v1418_v52  ;;  %v982_v59 = vrot.slane %v981_v41, 4 }
  0x85   : > { %v1010_v60 = vrot.slane %v1008_v21, 5  ;;  %v7910_v48 = vshll.u32 %v6177_v42, 16  ;;  %v4615_v9 = vcombine.low %v6512_v10, %v1419_v13  ;;  %v996_v51 = vrot.slane %v995_v16, 4 }
  0x86   : > { %v1015_v22 = vrot.slane %v7909_v43, 4  ;;  %v2154_v63 = vshrl.u32 %v6424_v30, 16  ;;  %v2157_v49 = vshll.u32 %v6424_v30, 16  ;;  %v2163_v57 = vshll.u32 %v6443_v47, 16  ;;  %v7912_v43 = vld [vmem:[#allocation5_spill] sm:$0xff] }
  0x87   : > { %v1018_v31 = vrot.slane %v7910_v48, 5  ;;  %v1024_v15 = vrot.slane %v1022_v23, 5  ;;  %v7911_v2 = vshrl.u32 %v6191_v39, 16  ;;  %v2167_v3 = vshrl.u32 %v6443_v47, 16 }
  0x88   : > { %5254 = vmatmul.mubr.msk.bf16.gmra.mrb[24].mxu0 %vm371_vm1, %v6433_v8  ;;  %v2173_v42 = vshll.u32 %v6452_v40, 16  ;;  %v1006_v28 = vrot.slane %v1005_v5, 4  ;;  %v2156_v36 = vrot.slane %v2154_v63, 4  ;;  %v2159_v19 = vrot.slane %v2157_v49, 5  ;;  %v7914_v63 = vld [vmem:[#allocation7_spill] sm:$0xff]  ;;  %v7916_v49 = vld [vmem:[#allocation10_spill] sm:$0xff] }
  0x89   : > { %v1028_v20 = vrot.slane %v7911_v2, 4  ;;  %5257 = vmatprep.mubr.msk.bf16.mxu0 %vm371_vm1, %v6467_v56  ;;  %v2165_v25 = vrot.slane %v2163_v57, 5  ;;  %v6554_v45 = vcombine.low %v2449_v6, %v2452_v7  ;;  %v2169_v58 = vrot.slane %v2167_v3, 4  ;;  %v7918_v2 = vld [vmem:[#allocation12_spill] sm:$0xff] }
  0x8a   : > { %v977_v39 = vsel %vm5887_vm4, %v972_v11, %v6482_v29  ;;  %v987_v40 = vsel %vm5887_vm4, %v982_v59, %v986_v62  ;;  %v1032_v1 = vshll.u32 %v6392_v18, 16  ;;  %v2160_v10 = vor.u32 %v2159_v19, %v2156_v36  ;;  %v7922_v3 = vld [vmem:[#allocation16_spill] sm:$0xff]  ;;  %v7925_v36 = vld [vmem:[#allocation17_spill] sm:$0xff]  ;;  %v7926_v19 = vld [vmem:[#allocation19_spill] sm:$0xff] }
  0x8b   : > { %5114 = vmatmul.mubr.msk.bf16.gmra.mrb[20].mxu1 %vm371_vm1, %v6530_v26  ;;  %v1019_v53 = vor.u32 %v1018_v31, %v1015_v22  ;;  %v1029_v14 = vor.u32 %v1028_v20, %v1024_v15  ;;  %v2170_v41 = vor.u32 %v2169_v58, %v2165_v25  ;;  %v2175_v21 = vrot.slane %v2173_v42, 5  ;;  %v4739_v31 = vld [vmem:[%s7794_s1 + $0x10] sm:$0x3]  ;;  %v7923_v42 = vld [vmem:[#allocation26_spill] sm:$0xff] }
  0x8c   : > { %5117 = vmatprep.mubr.msk.bf16.mxu1 %vm371_vm1, %v6533_v27  ;;  %v1001_v6 = vsel %vm5887_vm4, %v996_v51, %v1000_v37  ;;  %v1011_v7 = vsel %vm5887_vm4, %v1006_v28, %v1010_v60  ;;  %v2161_v29 = vrot.slane %v2160_v10, 4  ;;  %v6570_v52 = vcombine.low %v977_v39, %v987_v40  ;;  %v7913_v51 = vld [vmem:[#allocation6_spill] sm:$0xff]  ;;  %v7921_v20 = vld [vmem:[#allocation13_spill] sm:$0xff]  ;;  %v7924_v28 = vld [vmem:[#allocation27_spill] sm:$0xff] }
  0x8d   : > { %v2171_v16 = vrot.slane %v2170_v41, 4  ;;  %v1034_v11 = vrot.slane %v1032_v1, 5  ;;  %v6576_v62 = vcombine.low %v1001_v6, %v1011_v7  ;;  %v1020_v23 = vrot.slane %v1019_v53, 4  ;;  %v7928_v58 = vld [vmem:[#allocation21_spill] sm:$0xff]  ;;  %v7929_v39 = vld [vmem:[#allocation22_spill] sm:$0xff]  ;;  %v7930_v1 = vld [vmem:[#allocation24_spill] sm:$0xff] }
  0x8e   : > { %v2166_v18 = vsel %vm5887_vm4, %v2161_v29, %v2165_v25  ;;  %v1030_v5 = vrot.slane %v1029_v14, 4  ;;  %v3056_v60 = vsel %vm420_vm0, %v6213_v34, 0  ;;  %v7915_v34 = vld [vmem:[#allocation8_spill] sm:$0xff]  ;;  %v1926_v57 = vsel %vm420_vm0, %v6288_v55, 0  ;;  %v7919_v55 = vld [vmem:[#allocation23_spill] sm:$0xff] }
  0x8f   : > { %v2176_v37 = vsel %vm5887_vm4, %v2171_v16, %v2175_v21  ;;  %v1025_v13 = vsel %vm5887_vm4, %v1020_v23, %v1024_v15  ;;  %v7917_v15 = vld [vmem:[#allocation11_spill] sm:$0xff]  ;;  %v7927_v25 = vld [vmem:[#allocation28_spill] sm:$0xff]  ;;  %v6655_v40 = vcombine.low %v6424_v30, %v6443_v47  ;;  %v6665_v53 = vld [vmem:[%s5733_s25 + $0xd0] sm:$0xf]  ;;  %v3332_v47 = vsel %vm420_vm0, %v4739_v31, 0 }
  0x90   : > { %5258 = vmatmul.mubr.msk.bf16.gmra.mrb[28].mxu0 %vm371_vm1, %v6554_v45  ;;  %v6582_v22 = vcombine.low %v2166_v18, %v2176_v37  ;;  %v1035_v59 = vsel %vm5887_vm4, %v1030_v5, %v1034_v11  ;;  %v6662_v10 = vld [vmem:[%s5733_s25 + $0xcc] sm:$0xf]  ;;  %v7931_v30 = vld [vmem:[#allocation9_spill] sm:$0xff]  ;;  %v7933_v21 = vld [vmem:[#allocation14_spill] sm:$0xff]  ;;  %v3005_v11 = vshrl.u32 %v6665_v53, 16  ;;  %v3001_v18 = vshll.u32 %v6665_v53, 16 }
  0x91   : > { %5263 = vmatprep.mubr.msk.bf16.mxu0 %vm371_vm1, %v7912_v43  ;;  %v6594_v48 = vcombine.low %v1025_v13, %v1035_v59  ;;  %v4703_v14 = vcombine.low %v6662_v10, %v6665_v53  ;;  %v7932_v41 = vld [vmem:[#allocation4_spill] sm:$0xff]  ;;  %v7934_v6 = vld [vmem:[#allocation15_spill] sm:$0xff]  ;;  %v2992_v29 = vshrl.u32 %v6662_v10, 16  ;;  %v2995_v16 = vshll.u32 %v6662_v10, 16  ;;  %v225_v13 = vld [vmem:[%s5733_s25 + $0xd4] sm:$0x1] }
  0x92   : > { %v7937_v7 = vld [vmem:[#allocation20_spill] sm:$0xff]  ;;  %v3003_v37 = vrot.slane %v3001_v18, 5  ;;  %v3286_v54 = vrot.slane %v6665_v53, 5 }
  0x93   : > { %5118 = vmatmul.mubr.msk.bf16.gmra.mrb[24].mxu1 %vm371_vm1, %v6570_v52  ;;  %v2994_v23 = vrot.slane %v2992_v29, 4  ;;  %v2997_v5 = vrot.slane %v2995_v16, 5 }
  0x94   : > { %5121 = vmatprep.mubr.msk.bf16.mxu1 %vm371_vm1, %v6576_v62 }
  0x95   : > { %v2998_v59 = vor.u32 %v2997_v5, %v2994_v23 }
  0x98   : > { %5264 = vmatmul.mubr.msk.bf16.vlgmr.msra.gmra.mrb[0].mxu0 %vm371_vm1, %v7913_v51 }
  0x99   : > { %5296 = vmatpush3.bf16.msra.mxu0 %v3056_v60  ;;  %5267 = vmatprep.mubr.msk.bf16.mxu0 %vm371_vm1, %v7914_v63 }
  0x9a   : > { %5630 = vmatprep.subr.msk.bf16.mxu0 %vm420_vm0, %v4739_v31  ;;  %v3011_v31 = vshll.u32 %v225_v13, 16 }
  0x9b   : > { %5122 = vmatmul.mubr.msk.bf16.gmra.mrb[28].mxu1 %vm371_vm1, %v6594_v48 }
  0x9c   : > { %5127 = vmatprep.mubr.msk.bf16.mxu1 %vm371_vm1, %v4615_v9  ;;  %v5665_v9 = vld [vmem:[%s7794_s1 + $0x8] sm:$0x3] }
  0xa0   : > { %5268 = vmatmul.mubr.msk.bf16.gmra.mrb[4].mxu0 %vm371_vm1, %v7915_v34 }
  0xa1   : > { %5271 = vmatprep.mubr.msk.bf16.mxu0 %vm371_vm1, %v7916_v49 }
  0xa3   : > { %5128 = vmatmul.mubr.msk.bf16.vlgmr.msra.gmra.mrb[0].mxu1 %vm371_vm1, %v6149_v0  ;;  %v7920_v0 = vld [vmem:[#allocation25_spill] sm:$0xff] }
  0xa4   : > { %5131 = vmatprep.mubr.msk.bf16.mxu1 %vm371_vm1, %v6183_v32  ;;  %5160 = vmatpush3.bf16.msra.mxu1 %v1926_v57 }
  0xa5   : > { %5626 = vmatprep.subr.msk.bf16.mxu1 %vm420_vm0, %v5665_v9  ;;  %vm7591_vm0 = vmand %vm4361_vm14, %vm4030_vm9 }
  0xa8   : > { %5272 = vmatmul.mubr.msk.bf16.gmra.mrb[8].mxu0 %vm371_vm1, %v7917_v15 }
  0xa9   : > { %5275 = vmatprep.mubr.msk.bf16.mxu0 %vm371_vm1, %v7918_v2 }
  0xab   : > { %5132 = vmatmul.mubr.msk.bf16.gmra.mrb[4].mxu1 %vm371_vm1, %v7919_v55 }
  0xac   : > { %5135 = vmatprep.mubr.msk.bf16.mxu1 %vm371_vm1, %v7920_v0 }
  0xb0   : > { %5276 = vmatmul.mubr.msk.bf16.gmra.mrb[12].mxu0 %vm371_vm1, %v7921_v20 }
  0xb1   : > { %5279 = vmatprep.mubr.msk.bf16.mxu0 %vm371_vm1, %v7922_v3 }
  0xb3   : > { %5136 = vmatmul.mubr.msk.bf16.gmra.mrb[8].mxu1 %vm371_vm1, %v7923_v42 }
  0xb4   : > { %5139 = vmatprep.mubr.msk.bf16.mxu1 %vm371_vm1, %v7924_v28 }
  0xb8   : > { %5280 = vmatmul.mubr.msk.bf16.gmra.mrb[16].mxu0 %vm371_vm1, %v7925_v36 }
  0xb9   : > { %5283 = vmatprep.mubr.msk.bf16.mxu0 %vm371_vm1, %v7926_v19 }
  0xbb   : > { %5140 = vmatmul.mubr.msk.bf16.gmra.mrb[12].mxu1 %vm371_vm1, %v7927_v25 }
  0xbc   : > { %5143 = vmatprep.mubr.msk.bf16.mxu1 %vm371_vm1, %v6350_v44 }
  0xc0   : > { %5284 = vmatmul.mubr.msk.bf16.gmra.mrb[20].mxu0 %vm371_vm1, %v7928_v58 }
  0xc1   : > { %5287 = vmatprep.mubr.msk.bf16.mxu0 %vm371_vm1, %v7929_v39 }
  0xc3   : > { %5144 = vmatmul.mubr.msk.bf16.gmra.mrb[16].mxu1 %vm371_vm1, %v6354_v38 }
  0xc4   : > { %5147 = vmatprep.mubr.msk.bf16.mxu1 %vm371_vm1, %v6359_v17 }
  0xc8   : > { %5288 = vmatmul.mubr.msk.bf16.gmra.mrb[24].mxu0 %vm371_vm1, %v7930_v1 }
  0xc9   : > { %5291 = vmatprep.mubr.msk.bf16.mxu0 %vm371_vm1, %v6655_v40 }
  0xcb   : > { %5148 = vmatmul.mubr.msk.bf16.gmra.mrb[20].mxu1 %vm371_vm1, %v6387_v46 }
  0xcc   : > { %5151 = vmatprep.mubr.msk.bf16.mxu1 %vm371_vm1, %v6389_v12 }
  0xd0   : > { %5292 = vmatmul.mubr.msk.bf16.gmra.mrb[28].mxu0 %vm371_vm1, %v4703_v14 }
  0xd1   : > { %5297 = vmatprep.mubr.msk.bf16.mxu0 %vm371_vm1, %v7931_v30 }
  0xd3   : > { %5152 = vmatmul.mubr.msk.bf16.gmra.mrb[24].mxu1 %vm371_vm1, %v6400_v4 }
  0xd4   : > { %5155 = vmatprep.mubr.msk.bf16.mxu1 %vm371_vm1, %v6433_v8 }
  0xd8   : > { %5298 = vmatmul.mubr.msk.bf16.vlgmr.msra.gmra.mrb[0].mxu0 %vm371_vm1, %v5979_v33  ;;  %v7935_v33 = vld [vmem:[#allocation3_spill] sm:$0xff] }
  0xd9   : > { %5330 = vmatpush3.bf16.msra.mxu0 %v3332_v47  ;;  %5301 = vmatprep.mubr.msk.bf16.mxu0 %vm371_vm1, %v5987_v50  ;;  %v7936_v50 = vld [vmem:[#allocation18_spill] sm:$0xff] }
  0xdb   : > { %5156 = vmatmul.mubr.msk.bf16.gmra.mrb[28].mxu1 %vm371_vm1, %v6467_v56 }
  0xdc   : > { %5161 = vmatprep.mubr.msk.bf16.mxu1 %vm371_vm1, %v7932_v41 }
  0xe0   : > { %5302 = vmatmul.mubr.msk.bf16.gmra.mrb[4].mxu0 %vm371_vm1, %v7933_v21 }
  0xe1   : > { %5305 = vmatprep.mubr.msk.bf16.mxu0 %vm371_vm1, %v7934_v6 }
  0xe3   : > { %5162 = vmatmul.mubr.msk.bf16.vlgmr.msra.gmra.mrb[0].mxu1 %vm371_vm1, %v7912_v43  ;;  %v3007_v43 = vrot.slane %v3005_v11, 4 }
  0xe4   : > { %5165 = vmatprep.mubr.msk.bf16.mxu1 %vm371_vm1, %v7913_v51  ;;  %5364 = vmatpush3.bf16.msra.mxu1 %v7935_v33  ;;  %v2999_v51 = vrot.slane %v2998_v59, 4 }
  0xe5   : > { %v3008_v60 = vor.u32 %v3007_v43, %v3003_v37 }
  0xe8   : > { %5306 = vmatmul.mubr.msk.bf16.gmra.mrb[8].mxu0 %vm371_vm1, %v7936_v50 }
  0xe9   : > { %5309 = vmatprep.mubr.msk.bf16.mxu0 %vm371_vm1, %v7937_v7 }
  0xeb   : > { %5166 = vmatmul.mubr.msk.bf16.gmra.mrb[4].mxu1 %vm371_vm1, %v7914_v63  ;;  %v3009_v63 = vrot.slane %v3008_v60, 4 }
  0xec   : > { %5169 = vmatprep.mubr.msk.bf16.mxu1 %vm371_vm1, %v7915_v34  ;;  %v3013_v34 = vrot.slane %v3011_v31, 5 }
  0xee   : > { %v3014_v57 = vsel %vm5887_vm4, %v3009_v63, %v3013_v34 }
  0xf0   : > { %5310 = vmatmul.mubr.msk.bf16.gmra.mrb[12].mxu0 %vm371_vm1, %v6486_v35 }
  0xf1   : > { %5313 = vmatprep.mubr.msk.bf16.mxu0 %vm371_vm1, %v6494_v24 }
  0xf3   : > { %5170 = vmatmul.mubr.msk.bf16.gmra.mrb[8].mxu1 %vm371_vm1, %v7916_v49  ;;  %v3004_v49 = vsel %vm5887_vm4, %v2999_v51, %v3003_v37 }
  0xf4   : > { %5173 = vmatprep.mubr.msk.bf16.mxu1 %vm371_vm1, %v7917_v15  ;;  %v4721_v9 = vcombine.low %v3004_v49, %v3014_v57 }
  0xf8   : > { %5314 = vmatmul.mubr.msk.bf16.gmra.mrb[16].mxu0 %vm371_vm1, %v6530_v26 }
  0xf9   : > { %5317 = vmatprep.mubr.msk.bf16.mxu0 %vm371_vm1, %v6533_v27 }
  0xfb   : > { %5174 = vmatmul.mubr.msk.bf16.gmra.mrb[12].mxu1 %vm371_vm1, %v7918_v2 }
  0xfc   : > { %5177 = vmatprep.mubr.msk.bf16.mxu1 %vm371_vm1, %v7921_v20 }
 0x100   : > { %5318 = vmatmul.mubr.msk.bf16.gmra.mrb[20].mxu0 %vm371_vm1, %v6570_v52 }
 0x101   : > { %5321 = vmatprep.mubr.msk.bf16.mxu0 %vm371_vm1, %v6576_v62 }
 0x103   : > { %5178 = vmatmul.mubr.msk.bf16.gmra.mrb[16].mxu1 %vm371_vm1, %v7922_v3  ;;  %v6818_v3 = vld [vmem:[%s7795_s2] ss:$0 sm:$0xff] }
 0x104   : > { %5181 = vmatprep.mubr.msk.bf16.mxu1 %vm371_vm1, %v7925_v36 }
 0x108   : > { %5322 = vmatmul.mubr.msk.bf16.gmra.mrb[24].mxu0 %vm371_vm1, %v6594_v48 }
 0x109   : > { %5325 = vmatprep.mubr.msk.bf16.mxu0 %vm371_vm1, %v6582_v22 }
 0x10b   : > { %5182 = vmatmul.mubr.msk.bf16.gmra.mrb[20].mxu1 %vm371_vm1, %v7926_v19 }
 0x10c   : > { %5185 = vmatprep.mubr.msk.bf16.mxu1 %vm371_vm1, %v7928_v58 }
 0x110   : > { %5326 = vmatmul.mubr.msk.bf16.gmra.mrb[28].mxu0 %vm371_vm1, %v4721_v9 }
 0x111   : > { %5331 = vmatprep.mubr.msk.bf16.mxu0 %vm371_vm1, %v6183_v32  ;;  %v3289_v32 = vrot.slane %v225_v13, 5 }
 0x113   : > { %5186 = vmatmul.mubr.msk.bf16.gmra.mrb[24].mxu1 %vm371_vm1, %v7929_v39 }
 0x114   : > { %5189 = vmatprep.mubr.msk.bf16.mxu1 %vm371_vm1, %v7930_v1 }
 0x118   : > { %5332 = vmatmul.mubr.msk.bf16.vlgmr.msra.gmra.mrb[0].mxu0 %vm371_vm1, %v7919_v55 }
 0x119   : > { %5335 = vmatprep.mubr.msk.bf16.mxu0 %vm371_vm1, %v7920_v0 }
 0x11b   : > { %5190 = vmatmul.mubr.msk.bf16.gmra.mrb[28].mxu1 %vm371_vm1, %v6655_v40 }
 0x11c   : > { %5211 = vmatprep.mubr.msk.bf16.mxu1 %vm371_vm1, %v6486_v35  ;;  %v4738_v35 = vrot.slane %v6662_v10, 9 }
 0x120   : > { %5336 = vmatmul.mubr.msk.bf16.gmra.mrb[4].mxu0 %vm371_vm1, %v7923_v42 }
 0x121   : > { %5339 = vmatprep.mubr.msk.bf16.mxu0 %vm371_vm1, %v7924_v28 }
 0x123   : > { %5212 = vmatmul.mubr.msk.bf16.vlgmr.msra.gmra.mrb[16].mxu1 %vm371_vm1, %v6494_v24 }
 0x124   : > { %5215 = vmatprep.mubr.msk.bf16.mxu1 %vm371_vm1, %v6530_v26 }
 0x128   : > { %5340 = vmatmul.mubr.msk.bf16.gmra.mrb[8].mxu0 %vm371_vm1, %v7927_v25 }
 0x129   : > { %5343 = vmatprep.mubr.msk.bf16.mxu0 %vm371_vm1, %v6350_v44  ;;  %v3287_v44 = vsel %vm6098_vm7, %v4738_v35, %v3286_v54 }
 0x12b   : > { %5216 = vmatmul.mubr.msk.bf16.gmra.mrb[20].mxu1 %vm371_vm1, %v6533_v27 }
 0x12c   : > { %5219 = vmatprep.mubr.msk.bf16.mxu1 %vm371_vm1, %v6570_v52 }
 0x130   : > { %5344 = vmatmul.mubr.msk.bf16.gmra.mrb[12].mxu0 %vm371_vm1, %v6354_v38 }
 0x131   : > { %5347 = vmatprep.mubr.msk.bf16.mxu0 %vm371_vm1, %v6359_v17  ;;  %v3288_v17 = vrot.slane %v3286_v54, 4 }
 0x133   : > { %5220 = vmatmul.mubr.msk.bf16.gmra.mrb[24].mxu1 %vm371_vm1, %v6576_v62  ;;  %v3290_v38 = vsel %vm6098_vm7, %v3288_v17, %v3289_v32 }
 0x134   : > { %5223 = vmatprep.mubr.msk.bf16.mxu1 %vm371_vm1, %v6594_v48 }
 0x138   : > { %5348 = vmatmul.mubr.msk.bf16.gmra.mrb[16].mxu0 %vm371_vm1, %v6387_v46  ;;  %v4740_v46 = vcombine.low %v3287_v44, %v3290_v38 }
 0x139   : > { %5351 = vmatprep.mubr.msk.bf16.mxu0 %vm371_vm1, %v6389_v12 }
 0x13b   : > { %5224 = vmatmul.mubr.msk.bf16.gmra.mrb[28].mxu1 %vm371_vm1, %v6582_v22 }
 0x140   : > { %5352 = vmatmul.mubr.msk.bf16.gmra.mrb[20].mxu0 %vm371_vm1, %v6400_v4 }
 0x141   : > { %5355 = vmatprep.mubr.msk.bf16.mxu0 %vm371_vm1, %v6433_v8 }
 0x148   : > { %5356 = vmatmul.mubr.msk.bf16.gmra.mrb[24].mxu0 %vm371_vm1, %v6467_v56 }
 0x149   : > { %5359 = vmatprep.mubr.msk.bf16.mxu0 %vm371_vm1, %v6554_v45 }
 0x150   : > { %5360 = vmatmul.mubr.msk.bf16.gmra.mrb[28].mxu0 %vm371_vm1, %v4740_v46 }
 0x1b6   : > { %v5163_v12 = vpop.f32.mrb[0].mxu1 }
 0x1b7   : > { %v1962_v4 = vpop.f32.mrb[1].mxu1 }
 0x1b8   : > { %v5164_v8 = vpop.f32.mrb[2].mxu1 }
 0x1b9   : > { %v1965_v24 = vpop.f32.mrb[3].mxu1 }
 0x1be   : > { %v5167_v26 = vpop.f32.mrb[4].mxu1 }
 0x1bf   : > { %v1978_v27 = vpop.f32.mrb[5].mxu1 }
 0x1c0   : > { %v5168_v52 = vpop.f32.mrb[6].mxu1 }
 0x1c1   : > { %v1981_v56 = vpop.f32.mrb[7].mxu1 }
 0x1c6   : > { %v5171_v62 = vpop.f32.mrb[8].mxu1 }
 0x1c7   : > { %v1994_v22 = vpop.f32.mrb[9].mxu1 }
 0x1c8   : > { %v5172_v45 = vpop.f32.mrb[10].mxu1 }
 0x1c9   : > { %v1997_v48 = vpop.f32.mrb[11].mxu1 }
 0x1ce   : > { %v6807_v15 = vpop.f32.mrb[12].mxu1 }
 0x1cf   : > { %v6809_v2 = vpop.f32.mrb[13].mxu1 }
 0x1d0   : > { %v6811_v61 = vpop.f32.mrb[14].mxu1 }
 0x1d1   : > { %v6813_v55 = vpop.f32.mrb[15].mxu1 }
 0x1eb   : > { %v5333_v0 = vpop.f32.mrb[0].mxu0 }
 0x1ec   : > { %v5365_v20 = vadd.f32 %v5333_v0, %v5163_v12  ;;  %v3368_v42 = vpop.f32.mrb[1].mxu0 }
 0x1ed   : > { %v5366_v28 = vadd.f32 %v3368_v42, %v1962_v4  ;;  %v5334_v36 = vpop.f32.mrb[2].mxu0 }
 0x1ee   : > { %v5367_v19 = vadd.f32 %v5334_v36, %v5164_v8  ;;  %v3371_v25 = vpop.f32.mrb[3].mxu0  ;;  %v6824_v40 = vadd.f32 %v5365_v20, %v6818_v3 }
 0x1ef   : > { %v6821_v58 = vadd.f32 %v5366_v28, %v6818_v3  ;;  %v5368_v39 = vadd.f32 %v3371_v25, %v1965_v24 }
 0x1f0   : > { %v6831_v53 = vadd.f32 %v5367_v19, %v6818_v3  ;;  %v3632_v21 = vmax.f32 %v6824_v40, 0.0 }
 0x1f1   : > { %v6827_v1 = vadd.f32 %v5368_v39, %v6818_v3  ;;  %v3630_v10 = vmax.f32 %v6821_v58, 0.0 }
 0x1f2   : > { %v3633_v11 = vmax.f32 %v6831_v53, 0.0 }
 0x1f3   : > { %v3631_v14 = vmax.f32 %v6827_v1, 0.0  ;;  %v5337_v30 = vpop.f32.mrb[4].mxu0 }
 0x1f4   : > { %v5369_v47 = vadd.f32 %v5337_v30, %v5167_v26  ;;  %v3384_v41 = vpop.f32.mrb[5].mxu0 }
 0x1f5   : > { %v3662_v6 = vadd.f32 %v3631_v14, %v3630_v10  ;;  %v5370_v33 = vadd.f32 %v3384_v41, %v1978_v27  ;;  %v5338_v50 = vpop.f32.mrb[6].mxu0 }
 0x1f6   : > { %v5371_v7 = vadd.f32 %v5338_v50, %v5168_v52  ;;  %v3387_v29 = vpop.f32.mrb[7].mxu0  ;;  %v6839_v16 = vpop.f32.mrb[16].mxu1  ;;  %v6852_v13 = vadd.f32 %v5369_v47, %v6818_v3 }
 0x1f7   : > { %v3663_v18 = vadd.f32 %v3662_v6, %v3632_v21  ;;  %v6845_v23 = vadd.f32 %v5370_v33, %v6818_v3  ;;  %v5372_v5 = vadd.f32 %v3387_v29, %v1981_v56  ;;  %v6847_v37 = vpop.f32.mrb[17].mxu1 }
 0x1f8   : > { %v6849_v43 = vpop.f32.mrb[18].mxu1  ;;  %v6865_v34 = vadd.f32 %v5371_v7, %v6818_v3  ;;  %v3636_v35 = vmax.f32 %v6852_v13, 0.0 }
 0x1f9   : > { %v3634_v59 = vmax.f32 %v6845_v23, 0.0  ;;  %v3664_v60 = vadd.f32 %v3663_v18, %v3633_v11  ;;  %v6858_v31 = vadd.f32 %v5372_v5, %v6818_v3  ;;  %v6860_v51 = vpop.f32.mrb[19].mxu1 }
 0x1fa   : > { %v3637_v4 = vmax.f32 %v6865_v34, 0.0 }
 0x1fb   : > { %v3665_v63 = vadd.f32 %v3664_v60, %v3634_v59  ;;  %v3635_v49 = vmax.f32 %v6858_v31, 0.0  ;;  %v5341_v57 = vpop.f32.mrb[8].mxu0 }
 0x1fc   : > { %v5373_v9 = vadd.f32 %v5341_v57, %v5171_v62  ;;  %v3400_v54 = vpop.f32.mrb[9].mxu0 }
 0x1fd   : > { %v3666_v17 = vadd.f32 %v3665_v63, %v3635_v49  ;;  %v5374_v32 = vadd.f32 %v3400_v54, %v1994_v22  ;;  %v5342_v44 = vpop.f32.mrb[10].mxu0 }
 0x1fe   : > { %v5375_v38 = vadd.f32 %v5342_v44, %v5172_v45  ;;  %v3403_v46 = vpop.f32.mrb[11].mxu0  ;;  %v6871_v12 = vpop.f32.mrb[20].mxu1  ;;  %v6884_v56 = vadd.f32 %v5373_v9, %v6818_v3 }
 0x1ff   : > { %v3667_v8 = vadd.f32 %v3666_v17, %v3636_v35  ;;  %v6877_v24 = vadd.f32 %v5374_v32, %v6818_v3  ;;  %v5376_v26 = vadd.f32 %v3403_v46, %v1997_v48  ;;  %v6879_v27 = vpop.f32.mrb[21].mxu1 }
 0x200   : > { %v6881_v52 = vpop.f32.mrb[22].mxu1  ;;  %v6897_v20 = vadd.f32 %v5375_v38, %v6818_v3  ;;  %v3640_v25 = vmax.f32 %v6884_v56, 0.0 }
 0x201   : > { %v3638_v62 = vmax.f32 %v6877_v24, 0.0  ;;  %v3668_v22 = vadd.f32 %v3667_v8, %v3637_v4  ;;  %v6890_v45 = vadd.f32 %v5376_v26, %v6818_v3  ;;  %v6892_v0 = vpop.f32.mrb[23].mxu1 }
 0x202   : > { %v3641_v50 = vmax.f32 %v6897_v20, 0.0 }
 0x203   : > { %v3669_v48 = vadd.f32 %v3668_v22, %v3638_v62  ;;  %v3639_v42 = vmax.f32 %v6890_v45, 0.0  ;;  %v5345_v28 = vpop.f32.mrb[12].mxu0 }
 0x204   : > { %v5377_v36 = vadd.f32 %v5345_v28, %v6807_v15  ;;  %v3416_v19 = vpop.f32.mrb[13].mxu0 }
 0x205   : > { %v3670_v39 = vadd.f32 %v3669_v48, %v3639_v42  ;;  %v5378_v30 = vadd.f32 %v3416_v19, %v6809_v2  ;;  %v5346_v47 = vpop.f32.mrb[14].mxu0 }
 0x206   : > { %v5379_v41 = vadd.f32 %v5346_v47, %v6811_v61  ;;  %v3419_v6 = vpop.f32.mrb[15].mxu0  ;;  %v5221_v33 = vpop.f32.mrb[24].mxu1  ;;  %v6914_v60 = vadd.f32 %v5377_v36, %v6818_v3 }
 0x207   : > { %v3671_v7 = vadd.f32 %v3670_v39, %v3640_v25  ;;  %v6910_v15 = vadd.f32 %v5378_v30, %v6818_v3  ;;  %v5380_v29 = vadd.f32 %v3419_v6, %v6813_v55  ;;  %v2350_v18 = vpop.f32.mrb[25].mxu1 }
 0x208   : > { %v5222_v5 = vpop.f32.mrb[26].mxu1  ;;  %v6925_v54 = vadd.f32 %v5379_v41, %v6818_v3  ;;  %v3644_v38 = vmax.f32 %v6914_v60, 0.0 }
 0x209   : > { %v3642_v2 = vmax.f32 %v6910_v15, 0.0  ;;  %v3672_v61 = vadd.f32 %v3671_v7, %v3641_v50  ;;  %v6920_v63 = vadd.f32 %v5380_v29, %v6818_v3  ;;  %v2353_v57 = vpop.f32.mrb[27].mxu1 }
 0x20a   : > { %v3645_v36 = vmax.f32 %v6925_v54, 0.0 }
 0x20b   : > { %v3673_v9 = vadd.f32 %v3672_v61, %v3642_v2  ;;  %v3643_v55 = vmax.f32 %v6920_v63, 0.0  ;;  %v5349_v17 = vpop.f32.mrb[16].mxu0 }
 0x20c   : > { %v5381_v32 = vadd.f32 %v5349_v17, %v6839_v16  ;;  %v3432_v44 = vpop.f32.mrb[17].mxu0 }
 0x20d   : > { %v3674_v46 = vadd.f32 %v3673_v9, %v3643_v55  ;;  %v5382_v8 = vadd.f32 %v3432_v44, %v6847_v37  ;;  %v5350_v26 = vpop.f32.mrb[18].mxu0 }
 0x20e   : > { %v5383_v22 = vadd.f32 %v5350_v26, %v6849_v43  ;;  %v3435_v48 = vpop.f32.mrb[19].mxu0  ;;  %v5225_v28 = vpop.f32.mrb[28].mxu1  ;;  %v6942_v41 = vadd.f32 %v5381_v32, %v6818_v3 }
 0x20f   : > { %v3675_v19 = vadd.f32 %v3674_v46, %v3644_v38  ;;  %v6938_v16 = vadd.f32 %v5382_v8, %v6818_v3  ;;  %v5384_v39 = vadd.f32 %v3435_v48, %v6860_v51  ;;  %v2366_v30 = vpop.f32.mrb[29].mxu1 }
 0x210   : > { %v5226_v47 = vpop.f32.mrb[30].mxu1  ;;  %v6953_v61 = vadd.f32 %v5383_v22, %v6818_v3  ;;  %v7843_v44 = vmax.f32 %v6942_v41, 0.0 }
 0x211   : > { %v7846_v37 = vmax.f32 %v6938_v16, 0.0  ;;  %v3676_v43 = vadd.f32 %v3675_v19, %v3645_v36  ;;  %v6948_v6 = vadd.f32 %v5384_v39, %v6818_v3  ;;  %v2369_v7 = vpop.f32.mrb[31].mxu1 }
 0x212   : > { %v7844_v22 = vmax.f32 %v6953_v61, 0.0 }
 0x213   : > { %v3677_v29 = vadd.f32 %v3676_v43, %v7846_v37  ;;  %v7845_v51 = vmax.f32 %v6948_v6, 0.0  ;;  %v5353_v9 = vpop.f32.mrb[20].mxu0 }
 0x214   : > { %v5385_v17 = vadd.f32 %v5353_v9, %v6871_v12  ;;  %v3448_v32 = vpop.f32.mrb[21].mxu0 }
 0x215   : > { %v3678_v46 = vadd.f32 %v3677_v29, %v7845_v51  ;;  %v5386_v8 = vadd.f32 %v3448_v32, %v6879_v27  ;;  %v5354_v26 = vpop.f32.mrb[22].mxu0 }
 0x216   : > { %v5387_v48 = vadd.f32 %v5354_v26, %v6881_v52  ;;  %v3451_v19 = vpop.f32.mrb[23].mxu0  ;;  %v6970_v9 = vadd.f32 %v5385_v17, %v6818_v3 }
 0x217   : > { %v3679_v39 = vadd.f32 %v3678_v46, %v7843_v44  ;;  %v6966_v43 = vadd.f32 %v5386_v8, %v6818_v3  ;;  %v5388_v12 = vadd.f32 %v3451_v19, %v6892_v0 }
 0x218   : > { %v6981_v46 = vadd.f32 %v5387_v48, %v6818_v3  ;;  %v7849_v19 = vmax.f32 %v6970_v9, 0.0 }
 0x219   : > { %v7847_v29 = vmax.f32 %v6966_v43, 0.0  ;;  %v3680_v27 = vadd.f32 %v3679_v39, %v7844_v22  ;;  %v6976_v52 = vadd.f32 %v5388_v12, %v6818_v3 }
 0x21a   : > { %v7848_v37 = vmax.f32 %v6981_v46, 0.0 }
 0x21b   : > { %v3681_v32 = vadd.f32 %v3680_v27, %v7847_v29  ;;  %v7850_v8 = vmax.f32 %v6976_v52, 0.0  ;;  %v5357_v0 = vpop.f32.mrb[24].mxu0 }
 0x21c   : > { %v5389_v26 = vadd.f32 %v5357_v0, %v5221_v33  ;;  %v3464_v17 = vpop.f32.mrb[25].mxu0 }
 0x21d   : > { %v3682_v44 = vadd.f32 %v3681_v32, %v7850_v8  ;;  %v5390_v39 = vadd.f32 %v3464_v17, %v2350_v18  ;;  %v5358_v22 = vpop.f32.mrb[26].mxu0 }
 0x21e   : > { %v5391_v12 = vadd.f32 %v5358_v22, %v5222_v5  ;;  %v3467_v51 = vpop.f32.mrb[27].mxu0  ;;  %v6994_v33 = vadd.f32 %v5389_v26, %v6818_v3 }
 0x21f   : > { %v3683_v48 = vadd.f32 %v3682_v44, %v7849_v19  ;;  %v6991_v27 = vadd.f32 %v5390_v39, %v6818_v3  ;;  %v5392_v29 = vadd.f32 %v3467_v51, %v2353_v57 }
 0x220   : > { %v7005_v44 = vadd.f32 %v5391_v12, %v6818_v3  ;;  %v7854_v17 = vmax.f32 %v6994_v33, 0.0 }
 0x221   : > { %v7851_v0 = vmax.f32 %v6991_v27, 0.0  ;;  %v3684_v18 = vadd.f32 %v3683_v48, %v7848_v37  ;;  %v7000_v5 = vadd.f32 %v5392_v29, %v6818_v3 }
 0x222   : > { %v7853_v8 = vmax.f32 %v7005_v44, 0.0 }
 0x223   : > { %v3685_v22 = vadd.f32 %v3684_v18, %v7851_v0  ;;  %v7856_v32 = vmax.f32 %v7000_v5, 0.0  ;;  %v5361_v57 = vpop.f32.mrb[28].mxu0 }
 0x224   : > { %v5393_v51 = vadd.f32 %v5361_v57, %v5225_v28  ;;  %v3480_v26 = vpop.f32.mrb[29].mxu0 }
 0x225   : > { %v3686_v39 = vadd.f32 %v3685_v22, %v7856_v32  ;;  %v5394_v48 = vadd.f32 %v3480_v26, %v2366_v30  ;;  %v5362_v37 = vpop.f32.mrb[30].mxu0 }
 0x226   : > { %v5395_v29 = vadd.f32 %v5362_v37, %v5226_v47  ;;  %v3483_v19 = vpop.f32.mrb[31].mxu0  ;;  %v7018_v28 = vadd.f32 %v5393_v51, %v6818_v3 }
 0x227   : > { %v3687_v12 = vadd.f32 %v3686_v39, %v7854_v17  ;;  %v7015_v18 = vadd.f32 %v5394_v48, %v6818_v3  ;;  %v5396_v0 = vadd.f32 %v3483_v19, %v2369_v7  ;;  %v3705_v17 = vlaneseq }
 0x228   : > { %v7030_v26 = vadd.f32 %v5395_v29, %v6818_v3  ;;  %v3660_v7 = vmax.f32 %v7018_v28, 0.0 }
 0x229   : > { %v7852_v57 = vmax.f32 %v7015_v18, 0.0  ;;  %v3688_v30 = vadd.f32 %v3687_v12, %v7853_v8  ;;  %v7024_v47 = vadd.f32 %v5396_v0, %v6818_v3  ;;  %v7042_v32 = vand.u32 127, %v3705_v17 }
 0x22a   : > { %v3661_v51 = vmax.f32 %v7030_v26, 0.0 }
 0x22b   : > { %v3689_v37 = vadd.f32 %v3688_v30, %v7852_v57  ;;  %v7855_v22 = vmax.f32 %v7024_v47, 0.0  ;;  %vm3707_vm8 = vcmp.lt.s32.totalorder %v7042_v32, 32 }
 0x22d   : > { %v3690_v19 = vadd.f32 %v3689_v37, %v7855_v22 }
 0x22f   : > { %v3691_v39 = vadd.f32 %v3690_v19, %v3660_v7 }
 0x231   : > { %v3692_v0 = vadd.f32 %v3691_v39, %v3661_v51 }
 0x233   : > { %3693 = vadd.xlane.f32.xlu0 %v3692_v0 }
 0x2c0   : > { %v3694_v48 = vpop.xlane.xlu0 %3693 }
 0x2c1   : > { %v3695_v12 = vrot.slane %v3694_v48, 4 }
 0x2c3   : > { %v3696_v30 = vadd.f32 %v3695_v12, %v3694_v48 }
 0x2c5   : > { %v3697_v57 = vrot.slane %v3696_v30, 2 }
 0x2c7   : > { %v3698_v3 = vadd.f32 %v3697_v57, %v3696_v30 }
 0x2c9   : > { %v3699_v29 = vrot.slane %v3698_v3, 1 }
 0x2cb   : > { %v3700_v8 = vadd.f32 %v3699_v29, %v3698_v3 }
 0x2cd   : > { %5632 = vpush %v3700_v8 }
 0x2fe   : > { %s5633_s17 = spop %5632 }
 0x2ff   : > { %v3702_v37 = vstv %s5633_s17 }
 0x300   : > { %v7040_v22 = vmul.f32 0.00012207031, %v3702_v37 }
 0x302   : > { %v3708_v19 = vsub.f32 %v3630_v10, %v7040_v22  ;;  %v3709_v39 = vsub.f32 %v3631_v14, %v7040_v22  ;;  %v3710_v8 = vsub.f32 %v3632_v21, %v7040_v22  ;;  %v3711_v58 = vsub.f32 %v3633_v11, %v7040_v22 }
 0x303   : > { %v3712_v40 = vsub.f32 %v3634_v59, %v7040_v22  ;;  %v3713_v21 = vsub.f32 %v3635_v49, %v7040_v22  ;;  %v3714_v23 = vsub.f32 %v3636_v35, %v7040_v22  ;;  %v3715_v48 = vsub.f32 %v3637_v4, %v7040_v22 }
 0x304   : > { %v7056_v57 = vsel %vm3707_vm8, %v3708_v19, 0.0  ;;  %v7060_v17 = vsel %vm3707_vm8, %v3709_v39, 0.0  ;;  %v7074_v14 = vsel %vm3707_vm8, %v3710_v8, 0.0  ;;  %v7081_v53 = vsel %vm3707_vm8, %v3711_v58, 0.0 }
 0x305   : > { %v3772_v1 = vmul.f32 %v7056_v57, %v7056_v57  ;;  %v3773_v10 = vmul.f32 %v7060_v17, %v7060_v17  ;;  %v3774_v11 = vmul.f32 %v7074_v14, %v7074_v14  ;;  %v7090_v59 = vsel %vm3707_vm8, %v3712_v40, 0.0 }
 0x306   : > { %v3775_v31 = vmul.f32 %v7081_v53, %v7081_v53  ;;  %v7099_v12 = vsel %vm3707_vm8, %v3713_v21, 0.0  ;;  %v3776_v13 = vmul.f32 %v7090_v59, %v7090_v59  ;;  %v3716_v30 = vsub.f32 %v3638_v62, %v7040_v22 }
 0x307   : > { %v3804_v0 = vadd.f32 %v3773_v10, %v3772_v1  ;;  %v7108_v3 = vsel %vm3707_vm8, %v3714_v23, 0.0  ;;  %v3777_v34 = vmul.f32 %v7099_v12, %v7099_v12  ;;  %v3717_v29 = vsub.f32 %v3639_v42, %v7040_v22 }
 0x308   : > { %v7117_v37 = vsel %vm3707_vm8, %v3715_v48, 0.0  ;;  %v3778_v24 = vmul.f32 %v7108_v3, %v7108_v3  ;;  %v3718_v19 = vsub.f32 %v3640_v25, %v7040_v22  ;;  %v7126_v39 = vsel %vm3707_vm8, %v3716_v30, 0.0 }
 0x309   : > { %v3805_v49 = vadd.f32 %v3804_v0, %v3774_v11  ;;  %v3779_v45 = vmul.f32 %v7117_v37, %v7117_v37  ;;  %v3719_v8 = vsub.f32 %v3641_v50, %v7040_v22  ;;  %v7135_v58 = vsel %vm3707_vm8, %v3717_v29, 0.0 }
 0x30a   : > { %v3780_v56 = vmul.f32 %v7126_v39, %v7126_v39  ;;  %v3720_v1 = vsub.f32 %v3642_v2, %v7040_v22  ;;  %v7144_v10 = vsel %vm3707_vm8, %v3718_v19, 0.0  ;;  %v3781_v20 = vmul.f32 %v7135_v58, %v7135_v58 }
 0x30b   : > { %v3806_v35 = vadd.f32 %v3805_v49, %v3775_v31  ;;  %v3721_v40 = vsub.f32 %v3643_v55, %v7040_v22  ;;  %v7153_v21 = vsel %vm3707_vm8, %v3719_v8, 0.0  ;;  %v3782_v15 = vmul.f32 %v7144_v10, %v7144_v10 }
 0x30c   : > { %v3722_v11 = vsub.f32 %v3644_v38, %v7040_v22  ;;  %v7162_v0 = vsel %vm3707_vm8, %v3720_v1, 0.0  ;;  %v3783_v63 = vmul.f32 %v7153_v21, %v7153_v21  ;;  %v3723_v23 = vsub.f32 %v3645_v36, %v7040_v22 }
 0x30d   : > { %v3807_v4 = vadd.f32 %v3806_v35, %v3776_v13  ;;  %v7171_v31 = vsel %vm3707_vm8, %v3721_v40, 0.0  ;;  %v3784_v60 = vmul.f32 %v7162_v0, %v7162_v0  ;;  %v7938_v49 = vmax.f32 %v6938_v16, 0.0 }
 0x30e   : > { %v7180_v13 = vsel %vm3707_vm8, %v3722_v11, 0.0  ;;  %v3785_v54 = vmul.f32 %v7171_v31, %v7171_v31  ;;  %v7939_v35 = vmax.f32 %v6948_v6, 0.0  ;;  %v7940_v29 = vmax.f32 %v6942_v41, 0.0 }
 0x30f   : > { %v3808_v62 = vadd.f32 %v3807_v4, %v3777_v34  ;;  %v3724_v48 = vsub.f32 %v7938_v49, %v7040_v22  ;;  %v7189_v34 = vsel %vm3707_vm8, %v3723_v23, 0.0  ;;  %v3786_v16 = vmul.f32 %v7180_v13, %v7180_v13 }
 0x310   : > { %v3725_v30 = vsub.f32 %v7939_v35, %v7040_v22  ;;  %v3787_v6 = vmul.f32 %v7189_v34, %v7189_v34  ;;  %v7943_v40 = vmax.f32 %v6976_v52, 0.0 }
 0x311   : > { %v3809_v42 = vadd.f32 %v3808_v62, %v3778_v24  ;;  %v3726_v24 = vsub.f32 %v7940_v29, %v7040_v22  ;;  %v7198_v62 = vsel %vm3707_vm8, %v3724_v48, 0.0 }
 0x312   : > { %v7207_v8 = vsel %vm3707_vm8, %v3725_v30, 0.0  ;;  %v3788_v41 = vmul.f32 %v7198_v62, %v7198_v62 }
 0x313   : > { %v3810_v25 = vadd.f32 %v3809_v42, %v3779_v45  ;;  %v7941_v45 = vmax.f32 %v6953_v61, 0.0  ;;  %v3789_v61 = vmul.f32 %v7207_v8, %v7207_v8 }
 0x315   : > { %v3811_v50 = vadd.f32 %v3810_v25, %v3780_v56  ;;  %v3727_v42 = vsub.f32 %v7941_v45, %v7040_v22  ;;  %v7942_v25 = vmax.f32 %v6966_v43, 0.0 }
 0x317   : > { %v3812_v2 = vadd.f32 %v3811_v50, %v3781_v20  ;;  %v3728_v1 = vsub.f32 %v7942_v25, %v7040_v22  ;;  %v7216_v20 = vsel %vm3707_vm8, %v3726_v24, 0.0 }
 0x318   : > { %v3790_v43 = vmul.f32 %v7216_v20, %v7216_v20 }
 0x319   : > { %v3813_v55 = vadd.f32 %v3812_v2, %v3782_v15  ;;  %v3729_v15 = vsub.f32 %v7943_v40, %v7040_v22  ;;  %v7225_v2 = vsel %vm3707_vm8, %v3727_v42, 0.0  ;;  %v7234_v23 = vsel %vm3707_vm8, %v3728_v1, 0.0 }
 0x31a   : > { %v3791_v52 = vmul.f32 %v7225_v2, %v7225_v2 }
 0x31b   : > { %v3814_v38 = vadd.f32 %v3813_v55, %v3783_v63  ;;  %v7944_v63 = vmax.f32 %v6970_v9, 0.0  ;;  %v7243_v48 = vsel %vm3707_vm8, %v3729_v15, 0.0  ;;  %v3792_v9 = vmul.f32 %v7234_v23, %v7234_v23 }
 0x31d   : > { %v3815_v36 = vadd.f32 %v3814_v38, %v3784_v60  ;;  %v3730_v55 = vsub.f32 %v7944_v63, %v7040_v22  ;;  %v7945_v38 = vmax.f32 %v6981_v46, 0.0  ;;  %v3793_v46 = vmul.f32 %v7243_v48, %v7243_v48 }
 0x31f   : > { %v3816_v4 = vadd.f32 %v3815_v36, %v3785_v54  ;;  %v3731_v49 = vsub.f32 %v7945_v38, %v7040_v22  ;;  %v7946_v36 = vmax.f32 %v6991_v27, 0.0  ;;  %v7252_v30 = vsel %vm3707_vm8, %v3730_v55, 0.0 }
 0x320   : > { %v3794_v27 = vmul.f32 %v7252_v30, %v7252_v30 }
 0x321   : > { %v3817_v19 = vadd.f32 %v3816_v4, %v3786_v16  ;;  %v3732_v35 = vsub.f32 %v7946_v36, %v7040_v22  ;;  %v7947_v4 = vmax.f32 %v7000_v5, 0.0  ;;  %v7261_v24 = vsel %vm3707_vm8, %v3731_v49, 0.0 }
 0x322   : > { %v3795_v5 = vmul.f32 %v7261_v24, %v7261_v24 }
 0x323   : > { %v3818_v56 = vadd.f32 %v3817_v19, %v3787_v6  ;;  %v3733_v29 = vsub.f32 %v7947_v4, %v7040_v22  ;;  %v7948_v19 = vmax.f32 %v6994_v33, 0.0  ;;  %v7270_v42 = vsel %vm3707_vm8, %v3732_v35, 0.0 }
 0x324   : > { %v3796_v33 = vmul.f32 %v7270_v42, %v7270_v42 }
 0x325   : > { %v3819_v50 = vadd.f32 %v3818_v56, %v3788_v41  ;;  %v3734_v45 = vsub.f32 %v7948_v19, %v7040_v22  ;;  %v7949_v56 = vmax.f32 %v7005_v44, 0.0  ;;  %v7279_v1 = vsel %vm3707_vm8, %v3733_v29, 0.0 }
 0x326   : > { %v3797_v44 = vmul.f32 %v7279_v1, %v7279_v1 }
 0x327   : > { %v3820_v11 = vadd.f32 %v3819_v50, %v3789_v61  ;;  %v3735_v25 = vsub.f32 %v7949_v56, %v7040_v22  ;;  %v7950_v50 = vmax.f32 %v7015_v18, 0.0  ;;  %v7288_v15 = vsel %vm3707_vm8, %v3734_v45, 0.0 }
 0x329   : > { %v3821_v60 = vadd.f32 %v3820_v11, %v3790_v43  ;;  %v3736_v40 = vsub.f32 %v7950_v50, %v7040_v22  ;;  %v7951_v11 = vmax.f32 %v7024_v47, 0.0  ;;  %v3767_v55 = vsel %vm3707_vm8, %v3735_v25, 0.0 }
 0x32a   : > { %v3799_v49 = vmul.f32 %v3767_v55, %v3767_v55  ;;  %v3739_v47 = vsub.f32 %v3661_v51, %v7040_v22 }
 0x32b   : > { %v3822_v54 = vadd.f32 %v3821_v60, %v3791_v52  ;;  %v3737_v63 = vsub.f32 %v7951_v11, %v7040_v22  ;;  %v3798_v52 = vmul.f32 %v7288_v15, %v7288_v15  ;;  %v3738_v60 = vsub.f32 %v3660_v7, %v7040_v22 }
 0x32c   : > { %v3768_v38 = vsel %vm3707_vm8, %v3736_v40, 0.0  ;;  %v3771_v7 = vsel %vm3707_vm8, %v3739_v47, 0.0 }
 0x32d   : > { %v3823_v16 = vadd.f32 %v3822_v54, %v3792_v9  ;;  %v3769_v54 = vsel %vm3707_vm8, %v3737_v63, 0.0  ;;  %v3800_v36 = vmul.f32 %v3768_v38, %v3768_v38 }
 0x32f   : > { %v3824_v6 = vadd.f32 %v3823_v16, %v3793_v46  ;;  %v3770_v46 = vsel %vm3707_vm8, %v3738_v60, 0.0  ;;  %v3801_v16 = vmul.f32 %v3769_v54, %v3769_v54 }
 0x330   : > { %v3802_v4 = vmul.f32 %v3770_v46, %v3770_v46 }
 0x331   : > { %v3825_v41 = vadd.f32 %v3824_v6, %v3794_v27  ;;  %v3803_v27 = vmul.f32 %v3771_v7, %v3771_v7 }
 0x333   : > { %v3826_v61 = vadd.f32 %v3825_v41, %v3795_v5 }
 0x335   : > { %v3827_v43 = vadd.f32 %v3826_v61, %v3796_v33 }
 0x337   : > { %v3828_v18 = vadd.f32 %v3827_v43, %v3797_v44 }
 0x339   : > { %v3829_v9 = vadd.f32 %v3828_v18, %v3798_v52 }
 0x33b   : > { %v3830_v35 = vadd.f32 %v3829_v9, %v3799_v49 }
 0x33d   : > { %v3831_v28 = vadd.f32 %v3830_v35, %v3800_v36 }
 0x33f   : > { %v3832_v29 = vadd.f32 %v3831_v28, %v3801_v16 }
 0x341   : > { %v3833_v6 = vadd.f32 %v3832_v29, %v3802_v4 }
 0x343   : > { %v3834_v19 = vadd.f32 %v3833_v6, %v3803_v27 }
 0x345   : > { %3835 = vadd.xlane.f32.xlu0 %v3834_v19 }
 0x3d2   : > { %v3836_v22 = vpop.xlane.xlu0 %3835 }
 0x3d3   : > { %v3837_v26 = vrot.slane %v3836_v22, 4 }
 0x3d5   : > { %v3838_v51 = vadd.f32 %v3837_v26, %v3836_v22 }
 0x3d7   : > { %v3839_v45 = vrot.slane %v3838_v51, 2 }
 0x3d9   : > { %v3840_v5 = vadd.f32 %v3839_v45, %v3838_v51 }
 0x3db   : > { %v3841_v41 = vrot.slane %v3840_v5, 1 }
 0x3dd   : > { %v3842_v56 = vadd.f32 %v3841_v41, %v3840_v5 }
 0x3df   : > { %5634 = vpush %v3842_v56 }
 0x410   : > { %s5635_s18 = spop %5634 }
 0x411   : > { %v3844_v25 = vstv %s5635_s18 }
 0x412   : > { %v3845_v33 = vmul.f32 0.00012207031, %v3844_v25 }
 0x414   : > { %v3846_v61 = vadd.f32 1e-05, %v3845_v33 }
 0x416   : > { %5663 = vrsqrt.f32 %v3846_v61 }
 0x420   : > { %v5664_v32 = vpop.eup %5663 }
 0x421   : > { %v3848_v50 = vmul.f32 %v5664_v32, %v7056_v57  ;;  %v3849_v40 = vmul.f32 %v5664_v32, %v7060_v17  ;;  %v3850_v44 = vmul.f32 %v5664_v32, %v7074_v14  ;;  %v3851_v43 = vmul.f32 %v5664_v32, %v7081_v53 }
 0x422   : > { %v3852_v11 = vmul.f32 %v5664_v32, %v7090_v59  ;;  %v3853_v63 = vmul.f32 %v5664_v32, %v7099_v12  ;;  %v3854_v52 = vmul.f32 %v5664_v32, %v7108_v3  ;;  %v3855_v18 = vmul.f32 %v5664_v32, %v7117_v37 }
 0x423   : > { %v3856_v60 = vmul.f32 %v5664_v32, %v7126_v39  ;;  %v3857_v49 = vmul.f32 %v5664_v32, %v7135_v58  ;;  %v3858_v57 = vmul.f32 %v5664_v32, %v7144_v10  ;;  %v3859_v17 = vmul.f32 %v5664_v32, %v7153_v21 }
 0x424   : > { %v3860_v14 = vmul.f32 %v5664_v32, %v7162_v0  ;;  %v3861_v53 = vmul.f32 %v5664_v32, %v7171_v31  ;;  %v3862_v59 = vmul.f32 %v5664_v32, %v7180_v13  ;;  %v3863_v12 = vmul.f32 %v5664_v32, %v7189_v34 }
 0x425   : > { %v3864_v3 = vmul.f32 %v5664_v32, %v7198_v62  ;;  %v3865_v37 = vmul.f32 %v5664_v32, %v7207_v8  ;;  %v3866_v39 = vmul.f32 %v5664_v32, %v7216_v20  ;;  %v3867_v58 = vmul.f32 %v5664_v32, %v7225_v2 }
 0x426   : > { %v3868_v10 = vmul.f32 %v5664_v32, %v7234_v23  ;;  %v3869_v21 = vmul.f32 %v5664_v32, %v7243_v48  ;;  %v3870_v0 = vmul.f32 %v5664_v32, %v7252_v30  ;;  %v3871_v31 = vmul.f32 %v5664_v32, %v7261_v24 }
 0x427   : > { %v3872_v13 = vmul.f32 %v5664_v32, %v7270_v42  ;;  %v3873_v34 = vmul.f32 %v5664_v32, %v7279_v1  ;;  %v3874_v62 = vmul.f32 %v5664_v32, %v7288_v15  ;;  %v3875_v9 = vmul.f32 %v5664_v32, %v3767_v55 }
 0x428   : > { %v3876_v8 = vmul.f32 %v5664_v32, %v3768_v38  ;;  %v3877_v47 = vmul.f32 %v5664_v32, %v3769_v54  ;;  %v3878_v20 = vmul.f32 %v5664_v32, %v3770_v46  ;;  %v3879_v36 = vmul.f32 %v5664_v32, %v3771_v7 }
 0x429   : > { %v4872_v2 = vpack.c.bf16 %v3848_v50, %v3848_v50  ;;  %v4873_v35 = vpack.c.bf16 %v3849_v40, %v3849_v40  ;;  %v4874_v23 = vpack.c.bf16 %v3850_v44, %v3850_v44  ;;  %v4875_v16 = vpack.c.bf16 %v3851_v43, %v3851_v43 }
 0x42a   : > { %v7340_v48 = vpack.c.bf16 %v3852_v11, %v3852_v11  ;;  %v7342_v30 = vpack.c.bf16 %v3853_v63, %v3853_v63  ;;  %v7344_v24 = vpack.c.bf16 %v3854_v52, %v3854_v52  ;;  %v7346_v42 = vpack.c.bf16 %v3855_v18, %v3855_v18 }
 0x42b   : > { %v7348_v1 = vpack.c.bf16 %v3856_v60, %v3856_v60  ;;  %v7350_v15 = vpack.c.bf16 %v3857_v49, %v3857_v49  ;;  %v7352_v55 = vpack.c.bf16 %v3858_v57, %v3858_v57  ;;  %v7354_v38 = vpack.c.bf16 %v3859_v17, %v3859_v17 }
 0x42c   : > { %v7356_v54 = vpack.c.bf16 %v3860_v14, %v3860_v14  ;;  %v7358_v46 = vpack.c.bf16 %v3861_v53, %v3861_v53  ;;  %v7360_v28 = vpack.c.bf16 %v3862_v59, %v3862_v59  ;;  %v7362_v7 = vpack.c.bf16 %v3863_v12, %v3863_v12 }
 0x42d   : > { %v7364_v4 = vpack.c.bf16 %v3864_v3, %v3864_v3  ;;  %v7366_v29 = vpack.c.bf16 %v3865_v37, %v3865_v37  ;;  %v7368_v27 = vpack.c.bf16 %v3866_v39, %v3866_v39  ;;  %v7370_v6 = vpack.c.bf16 %v3867_v58, %v3867_v58 }
 0x42e   : > { %v7372_v19 = vpack.c.bf16 %v3868_v10, %v3868_v10  ;;  %v7374_v22 = vpack.c.bf16 %v3869_v21, %v3869_v21  ;;  %v7376_v26 = vpack.c.bf16 %v3870_v0, %v3870_v0  ;;  %v7378_v51 = vpack.c.bf16 %v3871_v31, %v3871_v31 }
 0x42f   : > { %v7380_v45 = vpack.c.bf16 %v3872_v13, %v3872_v13  ;;  %v7382_v5 = vpack.c.bf16 %v3873_v34, %v3873_v34  ;;  %v7384_v41 = vpack.c.bf16 %v3874_v62, %v3874_v62  ;;  %v7386_v56 = vpack.c.bf16 %v3875_v9, %v3875_v9 }
 0x430   : > { %v7388_v25 = vpack.c.bf16 %v3876_v8, %v3876_v8  ;;  %v7390_v33 = vpack.c.bf16 %v3877_v47, %v3877_v47  ;;  %v7392_v61 = vpack.c.bf16 %v3878_v20, %v3878_v20  ;;  %v7394_v32 = vpack.c.bf16 %v3879_v36, %v3879_v36 }
 0x431   : > { %v4034_v50 = vshrl.u32 %v4872_v2, 16  ;;  %v4037_v40 = vshll.u32 %v4872_v2, 16  ;;  %v4042_v44 = vshrl.u32 %v4873_v35, 16  ;;  %v4045_v43 = vshll.u32 %v4873_v35, 16 }
 0x432   : > { %v4051_v11 = vshrl.u32 %v4874_v23, 16  ;;  %v4054_v63 = vshll.u32 %v4874_v23, 16  ;;  %v4059_v52 = vshrl.u32 %v4875_v16, 16  ;;  %v4062_v18 = vshll.u32 %v4875_v16, 16 }
 0x433   : > { %v4036_v60 = vrot.slane %v4034_v50, 7  ;;  %v7396_v49 = vrot.slane %v4042_v44, 7  ;;  %v4068_v57 = vshrl.u32 %v7340_v48, 16  ;;  %v4071_v17 = vshll.u32 %v7340_v48, 16 }
 0x434   : > { %v4053_v53 = vrot.slane %v4051_v11, 7  ;;  %v7406_v59 = vrot.slane %v4059_v52, 7  ;;  %v4076_v12 = vshrl.u32 %v7342_v30, 16  ;;  %v4079_v3 = vshll.u32 %v7342_v30, 16 }
 0x435   : > { %v7410_v37 = vor.u32 %v4037_v40, %v4036_v60  ;;  %v4040_v39 = vrot.slane %v4036_v60, 4  ;;  %v4047_v58 = vor.u32 %v4045_v43, %v7396_v49  ;;  %v4049_v10 = vrot.slane %v7396_v49, 4 }
 0x436   : > { %v7414_v21 = vor.u32 %v4054_v63, %v4053_v53  ;;  %v4057_v0 = vrot.slane %v4053_v53, 4  ;;  %v4064_v31 = vor.u32 %v4062_v18, %v7406_v59  ;;  %v4066_v13 = vrot.slane %v7406_v59, 4 }
 0x437   : > { %v4048_v34 = vsel %vm7402_vm11, %v4040_v39, %v4047_v58  ;;  %v4070_v62 = vrot.slane %v4068_v57, 7  ;;  %v7420_v9 = vrot.slane %v4076_v12, 7  ;;  %v4085_v8 = vshrl.u32 %v7344_v24, 16 }
 0x438   : > { %v4065_v47 = vsel %vm7402_vm11, %v4057_v0, %v4064_v31  ;;  %v4088_v20 = vshll.u32 %v7344_v24, 16  ;;  %v4093_v36 = vshrl.u32 %v7346_v42, 16  ;;  %v4096_v2 = vshll.u32 %v7346_v42, 16  ;;  %4792 = vst [vmem:[%s5738_s28 + $0x10] sm:$0xf] %v4048_v34 }
 0x439   : > { %v7429_v35 = vor.u32 %v4071_v17, %v4070_v62  ;;  %v4074_v23 = vrot.slane %v4070_v62, 4  ;;  %v4081_v16 = vor.u32 %v4079_v3, %v7420_v9  ;;  %v4083_v48 = vrot.slane %v7420_v9, 4  ;;  %4797 = vst [vmem:[%s5738_s28 + $0x1c] sm:$0xf] %v4065_v47 }
 0x43a   : > { %v4087_v30 = vrot.slane %v4085_v8, 7  ;;  %v7434_v50 = vrot.slane %v4093_v36, 7  ;;  %v4102_v40 = vshrl.u32 %v7348_v1, 16  ;;  %v4105_v24 = vshll.u32 %v7348_v1, 16 }
 0x43b   : > { %v4082_v42 = vsel %vm7402_vm11, %v4074_v23, %v4081_v16  ;;  %v4110_v44 = vshrl.u32 %v7350_v15, 16  ;;  %v4113_v43 = vshll.u32 %v7350_v15, 16  ;;  %v4119_v11 = vshrl.u32 %v7352_v55, 16  ;;  %v4825_v16 = vld [vmem:[%s5738_s28 + $0x60] sm:$0xf] }
 0x43c   : > { %v7443_v63 = vor.u32 %v4088_v20, %v4087_v30  ;;  %v4091_v52 = vrot.slane %v4087_v30, 4  ;;  %v4098_v18 = vor.u32 %v4096_v2, %v7434_v50  ;;  %v4100_v60 = vrot.slane %v7434_v50, 4  ;;  %4802 = vst [vmem:[%s5738_s28 + $0x28] sm:$0xf] %v4082_v42 }
 0x43d   : > { %v4104_v57 = vrot.slane %v4102_v40, 7  ;;  %v7448_v1 = vrot.slane %v4110_v44, 7  ;;  %v4121_v17 = vrot.slane %v4119_v11, 7  ;;  %v4122_v53 = vshll.u32 %v7352_v55, 16 }
 0x43e   : > { %v4099_v15 = vsel %vm7402_vm11, %v4091_v52, %v4098_v18  ;;  %v4127_v12 = vshrl.u32 %v7354_v38, 16  ;;  %v4130_v3 = vshll.u32 %v7354_v38, 16  ;;  %v4136_v39 = vshrl.u32 %v7356_v54, 16 }
 0x43f   : > { %v7456_v58 = vor.u32 %v4105_v24, %v4104_v57  ;;  %v4108_v0 = vrot.slane %v4104_v57, 4  ;;  %v4115_v31 = vor.u32 %v4113_v43, %v7448_v1  ;;  %v4117_v34 = vrot.slane %v7448_v1, 4  ;;  %4807 = vst [vmem:[%s5738_s28 + $0x34] sm:$0xf] %v4099_v15  ;;  %v4853_v1 = vld [vmem:[%s5738_s28 + $0xa4] sm:$0x1] }
 0x440   : > { %v7461_v62 = vor.u32 %v4122_v53, %v4121_v17  ;;  %v4125_v55 = vrot.slane %v4121_v17, 4  ;;  %v7463_v8 = vrot.slane %v4127_v12, 7  ;;  %v4138_v47 = vrot.slane %v4136_v39, 7 }
 0x441   : > { %v4116_v38 = vsel %vm7402_vm11, %v4108_v0, %v4115_v31  ;;  %v4139_v20 = vshll.u32 %v7356_v54, 16  ;;  %v4144_v36 = vshrl.u32 %v7358_v46, 16  ;;  %v4147_v2 = vshll.u32 %v7358_v46, 16 }
 0x442   : > { %v4132_v23 = vor.u32 %v4130_v3, %v7463_v8  ;;  %v4142_v30 = vrot.slane %v4138_v47, 4  ;;  %v4153_v40 = vshrl.u32 %v7360_v28, 16  ;;  %4812 = vst [vmem:[%s5738_s28 + $0x40] sm:$0xf] %v4116_v38  ;;  %v4156_v44 = vshll.u32 %v7360_v28, 16 }
 0x443   : > { %v7474_v24 = vor.u32 %v4139_v20, %v4138_v47  ;;  %v7476_v42 = vrot.slane %v4144_v36, 7  ;;  %v4161_v54 = vshrl.u32 %v7362_v7, 16  ;;  %v4164_v11 = vshll.u32 %v7362_v7, 16 }
 0x444   : > { %v4133_v46 = vsel %vm7402_vm11, %v4125_v55, %v4132_v23  ;;  %v4155_v43 = vrot.slane %v4153_v40, 7  ;;  %v4170_v52 = vshrl.u32 %v7364_v4, 16  ;;  %v4173_v53 = vshll.u32 %v7364_v4, 16 }
 0x445   : > { %v4149_v18 = vor.u32 %v4147_v2, %v7476_v42  ;;  %v7486_v17 = vrot.slane %v4161_v54, 7  ;;  %4817 = vst [vmem:[%s5738_s28 + $0x4c] sm:$0xf] %v4133_v46  ;;  %v4178_v3 = vshrl.u32 %v7366_v29, 16  ;;  %v4181_v31 = vshll.u32 %v7366_v29, 16 }
 0x446   : > { %v7490_v28 = vor.u32 %v4156_v44, %v4155_v43  ;;  %v4159_v15 = vrot.slane %v4155_v43, 4  ;;  %v4172_v12 = vrot.slane %v4170_v52, 7  ;;  %v4187_v38 = vshrl.u32 %v7368_v27, 16  ;;  %v4815_v29 = vld [vmem:[%s5738_s28 + $0x48] sm:$0xf] }
 0x447   : > { %v4150_v7 = vsel %vm7402_vm11, %v4142_v30, %v4149_v18  ;;  %v4166_v39 = vor.u32 %v4164_v11, %v7486_v17  ;;  %v7500_v47 = vrot.slane %v4178_v3, 7  ;;  %v4190_v36 = vshll.u32 %v7368_v27, 16 }
 0x448   : > { %v7498_v55 = vor.u32 %v4173_v53, %v4172_v12  ;;  %v4176_v4 = vrot.slane %v4172_v12, 4  ;;  %4822 = vst [vmem:[%s5738_s28 + $0x58] sm:$0xf] %v4150_v7  ;;  %v4195_v2 = vshrl.u32 %v7370_v6, 16  ;;  %v4198_v23 = vshll.u32 %v7370_v6, 16 }
 0x449   : > { %v4167_v20 = vsel %vm7402_vm11, %v4159_v15, %v4166_v39  ;;  %v4183_v30 = vor.u32 %v4181_v31, %v7500_v47  ;;  %v4189_v40 = vrot.slane %v4187_v38, 7  ;;  %v4204_v44 = vshrl.u32 %v7372_v19, 16  ;;  %v4810_v38 = vld [vmem:[%s5738_s28 + $0x3c] sm:$0xf] }
 0x44a   : > { %4827 = vst [vmem:[%s5738_s28 + $0x64] sm:$0xf] %v4167_v20  ;;  %v7513_v54 = vrot.slane %v4195_v2, 7  ;;  %v4207_v46 = vshll.u32 %v7372_v19, 16  ;;  %v4212_v43 = vshrl.u32 %v7374_v22, 16  ;;  %v4215_v27 = vshll.u32 %v7374_v22, 16 }
 0x44b   : > { %v4184_v6 = vsel %vm7402_vm11, %v4176_v4, %v4183_v30  ;;  %v7520_v11 = vor.u32 %v4190_v36, %v4189_v40  ;;  %v4193_v52 = vrot.slane %v4189_v40, 4  ;;  %v4206_v18 = vrot.slane %v4204_v44, 7 }
 0x44c   : > { %v4200_v53 = vor.u32 %v4198_v23, %v7513_v54  ;;  %v7524_v12 = vrot.slane %v4212_v43, 7  ;;  %v4221_v19 = vshrl.u32 %v7376_v26, 16  ;;  %4832 = vst [vmem:[%s5738_s28 + $0x70] sm:$0xf] %v4184_v6  ;;  %v4224_v7 = vshll.u32 %v7376_v26, 16 }
 0x44d   : > { %v7528_v22 = vor.u32 %v4207_v46, %v4206_v18  ;;  %v4210_v3 = vrot.slane %v4206_v18, 4  ;;  %v4229_v39 = vshrl.u32 %v7378_v51, 16  ;;  %v4232_v2 = vshll.u32 %v7378_v51, 16 }
 0x44e   : > { %v4201_v31 = vsel %vm7402_vm11, %v4193_v52, %v4200_v53  ;;  %v4217_v4 = vor.u32 %v4215_v27, %v7524_v12  ;;  %v4223_v20 = vrot.slane %v4221_v19, 7  ;;  %v4238_v23 = vshrl.u32 %v7380_v45, 16  ;;  %v4808_v27 = vld [vmem:[%s5738_s28 + $0x38] sm:$0x1] }
 0x44f   : > { %v7536_v36 = vrot.slane %v4229_v39, 7  ;;  %v4241_v30 = vshll.u32 %v7380_v45, 16  ;;  %4837 = vst [vmem:[%s5738_s28 + $0x7c] sm:$0xf] %v4201_v31  ;;  %v4246_v46 = vshrl.u32 %v7382_v5, 16  ;;  %v4249_v51 = vshll.u32 %v7382_v5, 16 }
 0x450   : > { %v4218_v26 = vsel %vm7402_vm11, %v4210_v3, %v4217_v4  ;;  %v7544_v40 = vor.u32 %v4224_v7, %v4223_v20  ;;  %v4227_v44 = vrot.slane %v4223_v20, 4  ;;  %v4240_v6 = vrot.slane %v4238_v23, 7  ;;  %v4805_v31 = vld [vmem:[%s5738_s28 + $0x30] sm:$0xf] }
 0x451   : > { %v4234_v43 = vor.u32 %v4232_v2, %v7536_v36  ;;  %4842 = vst [vmem:[%s5738_s28 + $0x88] sm:$0xf] %v4218_v26  ;;  %v7551_v52 = vrot.slane %v4246_v46, 7  ;;  %v4255_v45 = vshrl.u32 %v7384_v41, 16  ;;  %v4258_v18 = vshll.u32 %v7384_v41, 16 }
 0x452   : > { %v4263_v53 = vshrl.u32 %v7386_v56, 16  ;;  %v7558_v3 = vor.u32 %v4241_v30, %v4240_v6  ;;  %v4244_v7 = vrot.slane %v4240_v6, 4  ;;  %v4266_v39 = vshll.u32 %v7386_v56, 16  ;;  %v4790_v56 = vld [vmem:[%s5738_s28 + $0xc] sm:$0xf] }
 0x453   : > { %v4235_v19 = vsel %vm7402_vm11, %v4227_v44, %v4234_v43  ;;  %v4251_v5 = vor.u32 %v4249_v51, %v7551_v52  ;;  %v4257_v4 = vrot.slane %v4255_v45, 7  ;;  %v4272_v41 = vshrl.u32 %v7388_v25, 16  ;;  %v4793_v26 = vld [vmem:[%s5738_s28 + $0x14] sm:$0x1]  ;;  %v4798_v51 = vld [vmem:[%s5738_s28 + $0x20] sm:$0x1] }
 0x454   : > { %v7563_v20 = vrot.slane %v4263_v53, 7  ;;  %4847 = vst [vmem:[%s5738_s28 + $0x94] sm:$0xf] %v4235_v19  ;;  %v4275_v2 = vshll.u32 %v7388_v25, 16  ;;  %v4280_v23 = vshrl.u32 %v7390_v33, 16  ;;  %v4283_v30 = vshll.u32 %v7390_v33, 16 }
 0x455   : > { %v4252_v44 = vsel %vm7402_vm11, %v4244_v7, %v4251_v5  ;;  %v7574_v46 = vor.u32 %v4258_v18, %v4257_v4  ;;  %v4261_v43 = vrot.slane %v4257_v4, 4  ;;  %v4795_v33 = vld [vmem:[%s5738_s28 + $0x18] sm:$0xf]  ;;  %v4274_v53 = vrot.slane %v4272_v41, 7  ;;  %v4803_v45 = vld [vmem:[%s5738_s28 + $0x2c] sm:$0x1] }
 0x456   : > { %v4268_v6 = vor.u32 %v4266_v39, %v7563_v20  ;;  %v7586_v18 = vrot.slane %v4280_v23, 7  ;;  %v4289_v19 = vshrl.u32 %v7392_v61, 16  ;;  %v4800_v39 = vld [vmem:[%s5738_s28 + $0x24] sm:$0xf]  ;;  %4852 = vst [vmem:[%s5738_s28 + $0xa0] sm:$0xf] %v4252_v44  ;;  %v4367_v49 = vsel %vm7579_vm15, %v7414_v21, %v4795_v33 }
 0x457   : > { %v4292_v4 = vshll.u32 %v7392_v61, 16  ;;  %v4297_v41 = vshrl.u32 %v7394_v32, 16  ;;  %v4300_v23 = vshll.u32 %v7394_v32, 16  ;;  %v7606_v15 = vor.u32 %v4275_v2, %v4274_v53  ;;  %v4818_v32 = vld [vmem:[%s5738_s28 + $0x50] sm:$0x1] }
 0x458   : > { %v4269_v5 = vsel %vm7402_vm11, %v4261_v43, %v4268_v6  ;;  %v4278_v44 = vrot.slane %v4274_v53, 4  ;;  %v4285_v43 = vor.u32 %v4283_v30, %v7586_v18  ;;  %v4813_v6 = vld [vmem:[%s5738_s28 + $0x44] sm:$0x1]  ;;  %v4291_v0 = vrot.slane %v4289_v19, 7  ;;  %v4820_v53 = vld [vmem:[%s5738_s28 + $0x54] sm:$0xf] }
 0x459   : > { %4857 = vst [vmem:[%s5738_s28 + $0xac] sm:$0xf] %v4269_v5  ;;  %v7614_v57 = vrot.slane %v4297_v41, 7  ;;  %v4358_v2 = vsel %vm7579_vm15, %v7410_v37, %v4790_v56  ;;  %v4364_v30 = vsel %vm7591_vm0, %v4049_v10, %v4793_v26  ;;  %v4823_v61 = vld [vmem:[%s5738_s28 + $0x5c] sm:$0x1]  ;;  %v4371_v37 = vsel %vm7591_vm0, %v4066_v13, %v4798_v51 }
 0x45a   : > { %v4286_v19 = vsel %vm7402_vm11, %v4278_v44, %v4285_v43  ;;  %4791 = vst [vmem:[%s5738_s28 + $0xc] sm:$0xf] %v4358_v2  ;;  %4794 = vst [vmem:[%s5738_s28 + $0x14] sm:$0x1] %v4364_v30  ;;  %v4374_v10 = vsel %vm7579_vm15, %v7429_v35, %v4800_v39  ;;  %v4828_v56 = vld [vmem:[%s5738_s28 + $0x68] sm:$0x1]  ;;  %v7643_v41 = vor.u32 %v4292_v4, %v4291_v0 }
 0x45b   : > { %v4830_v26 = vld [vmem:[%s5738_s28 + $0x6c] sm:$0xf]  ;;  %v4833_v5 = vld [vmem:[%s5738_s28 + $0x74] sm:$0x1]  ;;  %v4295_v44 = vrot.slane %v4291_v0, 4  ;;  %v4302_v21 = vor.u32 %v4300_v23, %v7614_v57  ;;  %v4304_v59 = vrot.slane %v7614_v57, 4  ;;  %v4378_v0 = vsel %vm7591_vm0, %v4083_v48, %v4803_v45 }
 0x45c   : > { %4796 = vst [vmem:[%s5738_s28 + $0x18] sm:$0xf] %v4367_v49  ;;  %4799 = vst [vmem:[%s5738_s28 + $0x20] sm:$0x1] %v4371_v37  ;;  %v4835_v13 = vld [vmem:[%s5738_s28 + $0x78] sm:$0xf]  ;;  %v4381_v33 = vsel %vm7579_vm15, %v7443_v63, %v4805_v31  ;;  %v4385_v51 = vsel %vm7591_vm0, %v4100_v60, %v4808_v27  ;;  %v4388_v9 = vsel %vm7579_vm15, %v7456_v58, %v4810_v38 }
 0x45d   : > { %4801 = vst [vmem:[%s5738_s28 + $0x24] sm:$0xf] %v4374_v10  ;;  %v4838_v35 = vld [vmem:[%s5738_s28 + $0x80] sm:$0x1]  ;;  %4862 = vst [vmem:[%s5738_s28 + $0xb8] sm:$0xf] %v4286_v19  ;;  %v4303_v4 = vsel %vm7402_vm11, %v4295_v44, %v4302_v21  ;;  %v4392_v50 = vsel %vm7591_vm0, %v4117_v34, %v4813_v6  ;;  %v4395_v63 = vsel %vm7579_vm15, %v7461_v62, %v4815_v29 }
 0x45e   : > { %v4840_v39 = vld [vmem:[%s5738_s28 + $0x84] sm:$0xf]  ;;  %v4843_v48 = vld [vmem:[%s5738_s28 + $0x8c] sm:$0x1]  ;;  %v4845_v45 = vld [vmem:[%s5738_s28 + $0x90] sm:$0xf]  ;;  %v4402_v34 = vsel %vm7579_vm15, %v7474_v24, %v4820_v53  ;;  %v4409_v29 = vsel %vm7579_vm15, %v7490_v28, %v4825_v16  ;;  %v4416_v16 = vsel %vm7579_vm15, %v7498_v55, %v4830_v26  ;;  %v4423_v43 = vsel %vm7579_vm15, %v7520_v11, %v4835_v13 }
 0x45f   : > { %4804 = vst [vmem:[%s5738_s28 + $0x2c] sm:$0x1] %v4378_v0  ;;  %4806 = vst [vmem:[%s5738_s28 + $0x30] sm:$0xf] %v4381_v33  ;;  %v7958_v14 = vrot.slane %v7463_v8, 4  ;;  %v7959_v62 = vrot.slane %v7476_v42, 4  ;;  %v4437_v30 = vsel %vm7579_vm15, %v7544_v40, %v4845_v45 }
 0x460   : > { %4809 = vst [vmem:[%s5738_s28 + $0x38] sm:$0x1] %v4385_v51  ;;  %4811 = vst [vmem:[%s5738_s28 + $0x3c] sm:$0xf] %v4388_v9  ;;  %v4848_v58 = vld [vmem:[%s5738_s28 + $0x98] sm:$0x1] }
 0x461   : > { %v4399_v60 = vsel %vm7591_vm0, %v7958_v14, %v4818_v32  ;;  %v4850_v38 = vld [vmem:[%s5738_s28 + $0x9c] sm:$0xf]  ;;  %4814 = vst [vmem:[%s5738_s28 + $0x44] sm:$0x1] %v4392_v50  ;;  %4816 = vst [vmem:[%s5738_s28 + $0x48] sm:$0xf] %v4395_v63  ;;  %v4406_v8 = vsel %vm7591_vm0, %v7959_v62, %v4823_v61 }
 0x462   : > { %4819 = vst [vmem:[%s5738_s28 + $0x50] sm:$0x1] %v4399_v60  ;;  %v7960_v27 = vrot.slane %v7486_v17, 4  ;;  %v4855_v23 = vld [vmem:[%s5738_s28 + $0xa8] sm:$0xf]  ;;  %v7961_v17 = vrot.slane %v7500_v47, 4  ;;  %v4430_v47 = vsel %vm7579_vm15, %v7528_v22, %v4840_v39 }
 0x463   : > { %v4858_v24 = vld [vmem:[%s5738_s28 + $0xb0] sm:$0x1]  ;;  %v4860_v42 = vld [vmem:[%s5738_s28 + $0xb4] sm:$0xf]  ;;  %4867 = vst [vmem:[%s5738_s28 + $0xc4] sm:$0xf] %v4303_v4  ;;  %v4451_v40 = vsel %vm7579_vm15, %v7574_v46, %v4855_v23 }
 0x464   : > { %v4413_v31 = vsel %vm7591_vm0, %v7960_v27, %v4828_v56  ;;  %4821 = vst [vmem:[%s5738_s28 + $0x54] sm:$0xf] %v4402_v34  ;;  %4824 = vst [vmem:[%s5738_s28 + $0x5c] sm:$0x1] %v4406_v8  ;;  %v4420_v28 = vsel %vm7591_vm0, %v7961_v17, %v4833_v5  ;;  %v7962_v61 = vrot.slane %v7513_v54, 4  ;;  %v7963_v54 = vrot.slane %v7524_v12, 4 }
 0x465   : > { %4826 = vst [vmem:[%s5738_s28 + $0x60] sm:$0xf] %v4409_v29  ;;  %4829 = vst [vmem:[%s5738_s28 + $0x68] sm:$0x1] %v4413_v31  ;;  %v4863_v32 = vld [vmem:[%s5738_s28 + $0xbc] sm:$0x1]  ;;  %v4444_v12 = vsel %vm7579_vm15, %v7558_v3, %v4850_v38 }
 0x466   : > { %v4427_v6 = vsel %vm7591_vm0, %v7962_v61, %v4838_v35  ;;  %v4865_v2 = vld [vmem:[%s5738_s28 + $0xc0] sm:$0xf]  ;;  %v4868_v55 = vld [vmem:[%s5738_s28 + $0xc8] sm:$0x1]  ;;  %4831 = vst [vmem:[%s5738_s28 + $0x6c] sm:$0xf] %v4416_v16  ;;  %v4434_v11 = vsel %vm7591_vm0, %v7963_v54, %v4843_v48 }
 0x467   : > { %4834 = vst [vmem:[%s5738_s28 + $0x74] sm:$0x1] %v4420_v28  ;;  %4836 = vst [vmem:[%s5738_s28 + $0x78] sm:$0xf] %v4423_v43  ;;  %v7964_v53 = vrot.slane %v7536_v36, 4  ;;  %v7965_v22 = vrot.slane %v7551_v52, 4  ;;  %v4458_v52 = vsel %vm7579_vm15, %v7606_v15, %v4860_v42  ;;  %v4469_v46 = vsel %vm7591_vm0, %v4304_v59, %v4868_v55 }
 0x468   : > { %4839 = vst [vmem:[%s5738_s28 + $0x80] sm:$0x1] %v4427_v6  ;;  %4841 = vst [vmem:[%s5738_s28 + $0x84] sm:$0xf] %v4430_v47  ;;  %v7966_v49 = vrot.slane %v7563_v20, 4  ;;  %v7967_v3 = vrot.slane %v7586_v18, 4  ;;  %v4465_v20 = vsel %vm7579_vm15, %v7643_v41, %v4865_v2 }
 0x469   : > { %v4441_v19 = vsel %vm7591_vm0, %v7964_v53, %v4848_v58  ;;  %4844 = vst [vmem:[%s5738_s28 + $0x8c] sm:$0x1] %v4434_v11  ;;  %4846 = vst [vmem:[%s5738_s28 + $0x90] sm:$0xf] %v4437_v30  ;;  %v4448_v36 = vsel %vm7591_vm0, %v7965_v22, %v4853_v1 }
 0x46a   : > { %4849 = vst [vmem:[%s5738_s28 + $0x98] sm:$0x1] %v4441_v19  ;;  %v4455_v37 = vsel %vm7591_vm0, %v7966_v49, %v4858_v24  ;;  %4851 = vst [vmem:[%s5738_s28 + $0x9c] sm:$0xf] %v4444_v12  ;;  %v4462_v10 = vsel %vm7591_vm0, %v7967_v3, %v4863_v32 }
 0x46b   : > { %4854 = vst [vmem:[%s5738_s28 + $0xa4] sm:$0x1] %v4448_v36  ;;  %4856 = vst [vmem:[%s5738_s28 + $0xa8] sm:$0xf] %v4451_v40 }
 0x46c   : > { %4859 = vst [vmem:[%s5738_s28 + $0xb0] sm:$0x1] %v4455_v37  ;;  %4861 = vst [vmem:[%s5738_s28 + $0xb4] sm:$0xf] %v4458_v52 }
 0x46d   : > { %4864 = vst [vmem:[%s5738_s28 + $0xbc] sm:$0x1] %v4462_v10  ;;  %4866 = vst [vmem:[%s5738_s28 + $0xc0] sm:$0xf] %v4465_v20 }
 0x46e   : > { %4869 = vst [vmem:[%s5738_s28 + $0xc8] sm:$0x1] %v4469_v46 }
 0x46f PF: > { %s13_s12 = sadd.s32 1, %s5672_s12  }
 0x470   : > { %p10_p4 = scmp.ge.s32.totalorder %s13_s12, 4  }
 0x472   :  { %12 = sbr.rel (!%p10_p4) target bundleno = 1 (0x1), region = 71 }

// kernel: vgg_conv_auto_forward.3
= control target key start
LH: loop header
LB: loop body
LE: loop exit
PB: predicated region body
PF: predicated region fallthrough
CT: control target
= control target key end

     0   :  { %12 = vsyncpa [#allocation4], 0  ;;  %s10859_s0 = inlined_call_operand.vmem [shape: bf16[2,18,18,128], index: 0, kind: input, shape index: {}]   ;;  %s10860_s1 = inlined_call_operand.vmem [shape: bf16[1152,8], index: 1, kind: input, shape index: {}]   ;;  %s10861_s2 = inlined_call_operand.vmem [shape: f32[1,8], index: 2, kind: input, shape index: {}]   ;;  %s10862_s3 = inlined_call_operand.vmem [shape: bf16[9,8,32], index: 3, kind: input, shape index: {}]   ;;  %s10863_s4 = inlined_call_operand.vmem [shape: f32[1,32], index: 4, kind: input, shape index: {}]   ;;  %s10864_s5 = inlined_call_operand.vmem [shape: bf16[2,256,8], index: 5, kind: output, shape index: {0}]   ;;  %s10865_s6 = inlined_call_operand.hbm [shape: f32[2,256,32], index: 6, kind: output, shape index: {1}]  }
   0x1   :  { %14 = vsyncpa [#allocation4 + $0x1], 0  ;;  %s8079_s21 = smov 0   ;;  %s8081_s22 = smov 0  }
   0x2   :  { %s8083_s23 = smov 0   ;;  %s8085_s24 = smov 0  }
   0x3 LB: > { %s8100_s25 = sadd.s32 4294967295, %s8038_s24   ;;  %s6119_s26 = sadd.s32 4294967294, %s8038_s24   ;;  %s8038_s24 = sphi %s8085_s24, %s11114_s24   ;;  %s8034_s23 = sphi %s8083_s23, %s11113_s23   ;;  %s8030_s22 = sphi %s8081_s22, %s11112_s22   ;;  %s8026_s21 = sphi %s8079_s21, %s11111_s21  }
   0x4   : > { %s8104_s27 = sadd.s32 1, %s8038_s24   ;;  %s163_s28 = sadd.s32 1, %s8034_s23 }
   0x5   : > { %s160_s29 = ssub.s32 %s8038_s24, %s8104_s27  ;;  %p173_p0 = scmp.ne.s32.totalorder %s8034_s23, %s8030_s22 }
   0x6   : > { %p161_p1 = scmp.eq.s32.totalorder %s160_s29, 0  ;;  %p174_p2 = scmp.eq.s32.totalorder %s8100_s25, 1 }
   0x7   : > { %p179_p3 = scmp.ne.s32.totalorder %s8030_s22, %s8026_s21  ;;  %p180_p4 = scmp.eq.s32.totalorder %s6119_s26, 1 }
   0x8   : > { %s8115_s30 = scalar_select %p161_p1, %s8034_s23, %s163_s28  }
   0x9   : > { %p8117_p5 = por %p174_p2, %p173_p0  ;;  %p8121_p6 = por %p180_p4, %p179_p3 }
   0xa   : > { %p6122_p7 = scmp.ge.s32.totalorder %s8038_s24, 1  ;;  %p218_p8 = scmp.lt.s32.totalorder %s8038_s24, 3 }
   0xc   : > { %p219_p9 = pnand %p6122_p7, %p218_p8 }
   0xe   : > { %222 = sbr.rel (%p219_p9) target bundleno = 1676 (0x68c), region = 40 }
  0x15   : > { %v7855_v0 = vld [vmem:[%s10860_s1 + $0x40] sm:$0xff]   ;;  %p253_p10 = scmp.lt.s32.totalorder %s8100_s25, 1  ;;  %v7857_v2 = vld [vmem:[%s10860_s1 + $0x48] sm:$0xff]   ;;  %v7859_v4 = vld [vmem:[%s10860_s1 + $0x50] sm:$0xff]   ;;  %vm753_vm0 = vcmask 1042432   ;;  %vm754_vm1 = vcmask 1046532  }
  0x16   : > { %v7856_v1 = vld [vmem:[%s10860_s1] sm:$0xff]   ;;  %6568 = vmatprep.subr.bf16.mxu0 %v7855_v0  ;;  %v7858_v3 = vld [vmem:[%s10860_s1 + $0x8] sm:$0xff]   ;;  %v7860_v5 = vld [vmem:[%s10860_s1 + $0x10] sm:$0xff]   ;;  %vm318_vm2 = vsmask.f32 3328  ;;  %v10959_v33 = vmov 0 }
  0x17   : > { %6569 = vmatpush3.bf16.msra.mxu0 %v7856_v1  ;;  %s8144_s19 = scalar_select %p253_p10, %s8100_s25, 1  ;;  %v7861_v6 = vld [vmem:[%s10860_s1 + $0x58] sm:$0xff]   ;;  %v7863_v8 = vld [vmem:[%s10860_s1 + $0x60] sm:$0xff]   ;;  %v7865_v10 = vld [vmem:[%s10860_s1 + $0x68] sm:$0xff]   ;;  %vm319_vm3 = vsmask.f32 7440 }
  0x18   : > { %6570 = vmatprep.subr.bf16.mxu0 %v7857_v2  ;;  %v7862_v7 = vld [vmem:[%s10860_s1 + $0x18] sm:$0xff]   ;;  %v7864_v9 = vld [vmem:[%s10860_s1 + $0x20] sm:$0xff]   ;;  %v7866_v16 = vld [vmem:[%s10860_s1 + $0x28] sm:$0xff]   ;;  %vm2700_vm6 = vcmask 60416   ;;  %vm2735_vm7 = vcmask 57344   ;;  %vm3767_vm8 = vcmask 1043456  }
  0x19   : > { %s7812_s9 = smul.u32 216, %s8144_s19  ;;  %v7867_v24 = vld [vmem:[%s10860_s1 + $0x70] sm:$0xff]   ;;  %vm8190_vm4 = vmor %vm753_vm0, %vm754_vm1  ;;  %v7869_v39 = vld [vmem:[%s10860_s1 + $0x78] sm:$0xff]   ;;  %vm3718_vm9 = vcmask 64512   ;;  %s6534_s17 = sshll.u32 %s8144_s19, 7  ;;  %vm5977_vm0 = vcmask 261120  }
  0x1a   : > { %v7868_v28 = vld [vmem:[%s10860_s1 + $0x30] sm:$0xff]   ;;  %vm8204_vm5 = vmor %vm318_vm2, %vm319_vm3  ;;  %v7870_v58 = vld [vmem:[%s10860_s1 + $0x38] sm:$0xff]   ;;  %s9620_s26 = scalar_lea.vmem %s10864_s5, %s6534_s17  ;;  %vm3113_vm10 = vsmask.f32 7938  ;;  %vm2788_vm11 = vsmask.f32 256 }
  0x1b   : > { %6571 = vmatpush3.bf16.msra.mxu0 %v7858_v3  ;;  %s8162_s16 = scalar_lea.vmem %s10859_s0, %s7812_s9  ;;  %v10960_v33 = vsel %vm8204_vm5, 4294967295, %v10959_v33  ;;  %v7872_v60 = vld [vmem:[%s10860_s1 + $0xc0] sm:$0xff]   ;;  %vm2789_vm12 = vsmask.f32 4368  ;;  %vm9632_vm13 = vmand %vm2700_vm6, %vm3113_vm10  ;;  %s6567_s10 = sshll.u32 %s8100_s25, 12 }
  0x1c   : > { %6572 = vmatprep.subr.bf16.mxu0 %v7859_v4  ;;  %v8171_v11 = vld [vmem:[%s8162_s16] sm:$0xf]  ;;  %v8174_v12 = vld [vmem:[%s8162_s16 + $0x4] sm:$0xf]  ;;  %v266_v13 = vld [vmem:[%s8162_s16 + $0x8] sm:$0x1]  ;;  %s10805_s13 = scalar_lea.hbm %s10865_s6, %s6567_s10 }
  0x1d   : > { %v322_v14 = vshrl.u32 %v8171_v11, 16  ;;  %v325_v15 = vshll.u32 %v8171_v11, 16  ;;  %v331_v17 = vshll.u32 %v8174_v12, 16  ;;  %v335_v18 = vshrl.u32 %v8174_v12, 16  ;;  %v8200_v32 = vld [vmem:[%s8162_s16 + $0xc] sm:$0xf]  ;;  %vm9641_vm14 = vmor %vm2788_vm11, %vm2789_vm12 }
  0x1e   : > { %v341_v19 = vshll.u32 %v266_v13, 16  ;;  %v10866_v22 = vrot.slane %v8174_v12, 5  ;;  %v761_v23 = vrot.slane %v266_v13, 5  ;;  %10961 = vst [vmem:[#allocation6_spill] sm:$0xff] %v10960_v33  ;;  %v8209_v35 = vld [vmem:[%s8162_s16 + $0x10] sm:$0xf]  ;;  %vm9647_vm15 = vmand %vm2735_vm7, %vm2788_vm11 }
  0x1f   : > { %6573 = vmatpush3.bf16.msra.mxu0 %v7860_v5  ;;  %v324_v20 = vrot.slane %v322_v14, 4  ;;  %v327_v21 = vrot.slane %v325_v15, 5  ;;  %v333_v25 = vrot.slane %v331_v17, 5  ;;  %v337_v26 = vrot.slane %v335_v18, 4  ;;  %v269_v36 = vld [vmem:[%s8162_s16 + $0x14] sm:$0x1] }
  0x20   : > { %6574 = vmatprep.subr.bf16.mxu0 %v7861_v6  ;;  %v343_v30 = vrot.slane %v341_v19, 5  ;;  %v760_v31 = vrot.slane %v10866_v22, 4  ;;  %v346_v37 = vshrl.u32 %v8200_v32, 16  ;;  %v349_v38 = vshll.u32 %v8200_v32, 16  ;;  %v8224_v44 = vld [vmem:[%s8162_s16 + $0x18] sm:$0xf] }
  0x21   : > { %v328_v29 = vor.u32 %v327_v21, %v324_v20  ;;  %v338_v34 = vor.u32 %v337_v26, %v333_v25  ;;  %v355_v42 = vshll.u32 %v8209_v35, 16  ;;  %v359_v43 = vshrl.u32 %v8209_v35, 16  ;;  %v8227_v49 = vld [vmem:[%s8162_s16 + $0x1c] sm:$0xf]  ;;  %v272_v53 = vld [vmem:[%s8162_s16 + $0x20] sm:$0x1] }
  0x22   : > { %v8219_v41 = vsel %vm8190_vm4, %v760_v31, %v761_v23  ;;  %v348_v46 = vrot.slane %v346_v37, 4  ;;  %v351_v47 = vrot.slane %v349_v38, 5  ;;  %v365_v48 = vshll.u32 %v269_v36, 16  ;;  %v8245_v4 = vld [vmem:[%s8162_s16 + $0x24] sm:$0xf]  ;;  %s8041_s15 = smov [#allocation3]  }
  0x23   : > { %6575 = vmatpush3.bf16.msra.mxu0 %v7862_v7  ;;  %v329_v40 = vrot.slane %v328_v29, 4  ;;  %v339_v45 = vrot.slane %v338_v34, 4  ;;  %v357_v51 = vrot.slane %v355_v42, 5  ;;  %v361_v52 = vrot.slane %v359_v43, 4  ;;  %v8264_v20 = vld [vmem:[%s8162_s16 + $0x2c] sm:$0x1] }
  0x24   : > { %6576 = vmatprep.subr.bf16.mxu0 %v7863_v8  ;;  %v352_v55 = vor.u32 %v351_v47, %v348_v46  ;;  %v367_v56 = vrot.slane %v365_v48, 5  ;;  %v370_v57 = vshrl.u32 %v8224_v44, 16  ;;  %v373_v62 = vshll.u32 %v8224_v44, 16  ;;  %s7980_s17 = sshll.u32 %s8041_s15, 4  ;;  %s7981_s17 = int_to_ptr.vmem [resolvable:$false] %s7980_s17 }
  0x25   : > { %v334_v50 = vsel %vm8204_vm5, %v329_v40, %v333_v25  ;;  %v344_v54 = vsel %vm8204_vm5, %v339_v45, %v343_v30  ;;  %v362_v61 = vor.u32 %v361_v52, %v357_v51  ;;  %v379_v63 = vshll.u32 %v8227_v49, 16  ;;  %v8275_v30 = vld [vmem:[%s8162_s16 + $0x34] sm:$0xf]  ;;  %v7877_v40 = vld [vmem:[%s10860_s1 + $0x88] sm:$0xff]   ;;  %s7982_s18 = scalar_lea.vmem %s7981_s17, 8192 }
  0x26   : > { %v6161_v59 = vcombine.low %v334_v50, %v344_v54  ;;  %v353_v0 = vrot.slane %v352_v55, 4  ;;  %v372_v1 = vrot.slane %v370_v57, 4  ;;  %v383_v2 = vshrl.u32 %v8227_v49, 16 }
  0x27   : > { %6577 = vmatpush3.bf16.msra.mxu0 %v7864_v9  ;;  %v389_v3 = vshll.u32 %v272_v53, 16  ;;  %v6145_v5 = vcombine.low %v8171_v11, %v8174_v12  ;;  %v363_v6 = vrot.slane %v362_v61, 4  ;;  %v375_v7 = vrot.slane %v373_v62, 5  ;;  %v8250_v9 = vld [vmem:[%s8162_s16 + $0x28] sm:$0xf]  ;;  %v7881_v53 = vld [vmem:[%s10860_s1 + $0x90] sm:$0xff]  }
  0x28   : > { %6578 = vmatprep.subr.bf16.mxu0 %v7865_v10  ;;  %1767 = vmatprep.mubr.bf16.mxu0 %v6161_v59  ;;  %v381_v8 = vrot.slane %v379_v63, 5  ;;  %v7873_v10 = vld [vmem:[%s10860_s1 + $0x80] sm:$0xff]   ;;  %v358_v13 = vsel %vm8204_vm5, %v353_v0, %v357_v51  ;;  %v385_v14 = vrot.slane %v383_v2, 4  ;;  %v394_v17 = vshrl.u32 %v8245_v4, 16  ;;  %v7880_v51 = vld [vmem:[%s10860_s1 + $0xd0] sm:$0xff]   ;;  %v7884_v59 = vld [vmem:[%s10860_s1 + $0xd8] sm:$0xff]  }
  0x29   : > { %v391_v15 = vrot.slane %v389_v3, 5  ;;  %v368_v18 = vsel %vm8204_vm5, %v363_v6, %v367_v56  ;;  %v376_v19 = vor.u32 %v375_v7, %v372_v1  ;;  %v397_v21 = vshll.u32 %v8245_v4, 16  ;;  %v8301_v56 = vld [vmem:[%s8162_s16 + $0x38] sm:$0x1]  ;;  %v8309_v63 = vld [vmem:[%s8162_s16 + $0x3c] sm:$0xf] }
  0x2a   : > { %v403_v23 = vshll.u32 %v8250_v9, 16  ;;  %v8271_v25 = vcombine.low %v358_v13, %v368_v18  ;;  %v386_v26 = vor.u32 %v385_v14, %v381_v8  ;;  %v407_v29 = vshrl.u32 %v8250_v9, 16 }
  0x2b   : > { %6579 = vmatpush3.bf16.msra.mxu0 %v7866_v16  ;;  %v7876_v16 = vld [vmem:[%s10860_s1 + $0xc8] sm:$0xff]   ;;  %v377_v31 = vrot.slane %v376_v19, 4  ;;  %v399_v34 = vrot.slane %v397_v21, 5  ;;  %v413_v43 = vshll.u32 %v8264_v20, 16  ;;  %v427_v50 = vshll.u32 %v8275_v30, 16 }
  0x2c   : > { %6580 = vmatprep.subr.bf16.mxu0 %v7867_v24  ;;  %v8269_v24 = vld [vmem:[%s8162_s16 + $0x30] sm:$0xf]  ;;  %10962 = vst [vmem:[#allocation7_spill] sm:$0xff] %v8271_v25  ;;  %v405_v36 = vrot.slane %v403_v23, 5  ;;  %v387_v37 = vrot.slane %v386_v26, 4  ;;  %v409_v38 = vrot.slane %v407_v29, 4  ;;  %v8298_v54 = vcombine.low %v8200_v32, %v8209_v35 }
  0x2d   : > { %v421_v45 = vshll.u32 %v8269_v24, 16  ;;  %v382_v46 = vsel %vm8204_vm5, %v377_v31, %v381_v8  ;;  %v431_v52 = vshrl.u32 %v8275_v30, 16  ;;  %v415_v62 = vrot.slane %v413_v43, 5  ;;  %v8312_v32 = vld [vmem:[%s8162_s16 + $0x40] sm:$0xf]  ;;  %v7893_v43 = vld [vmem:[%s10860_s1 + $0xa8] sm:$0xff]  }
  0x2e   : > { %v392_v47 = vsel %vm8204_vm5, %v387_v37, %v391_v15  ;;  %v410_v48 = vor.u32 %v409_v38, %v405_v36  ;;  %10963 = vst [vmem:[#allocation8_spill] sm:$0xff] %v8298_v54  ;;  %v429_v0 = vrot.slane %v427_v50, 5  ;;  %v437_v3 = vshll.u32 %v8301_v56, 16  ;;  %v7888_v15 = vld [vmem:[%s10860_s1 + $0xe0] sm:$0xff]   ;;  %v8344_v23 = vld [vmem:[%s8162_s16 + $0x4c] sm:$0xf] }
  0x2f   : > { %6581 = vmatpush3.bf16.msra.mxu0 %v7868_v28  ;;  %v396_v28 = vrot.slane %v394_v17, 4  ;;  %v433_v1 = vrot.slane %v431_v52, 4  ;;  %v442_v6 = vshrl.u32 %v8309_v63, 16  ;;  %v445_v7 = vshll.u32 %v8309_v63, 16  ;;  %v8335_v17 = vld [vmem:[%s8162_s16 + $0x48] sm:$0xf] }
  0x30   : > { %6582 = vmatprep.subr.bf16.mxu0 %v7869_v39  ;;  %v418_v39 = vshrl.u32 %v8269_v24, 16  ;;  %v411_v61 = vrot.slane %v410_v48, 4  ;;  %v451_v8 = vshll.u32 %v8312_v32, 16  ;;  %v455_v14 = vshrl.u32 %v8312_v32, 16  ;;  %v7889_v26 = vld [vmem:[%s10860_s1 + $0xa0] sm:$0xff]   ;;  %v7896_v50 = vld [vmem:[%s10860_s1 + $0xf0] sm:$0xff]  }
  0x31   : > { %v400_v42 = vor.u32 %v399_v34, %v396_v28  ;;  %v434_v13 = vor.u32 %v433_v1, %v429_v0  ;;  %v8339_v18 = vcombine.low %v8224_v44, %v8227_v49  ;;  %v439_v21 = vrot.slane %v437_v3, 5  ;;  %v7892_v28 = vld [vmem:[%s10860_s1 + $0xe8] sm:$0xff]   ;;  %v8373_v52 = vld [vmem:[%s8162_s16 + $0x58] sm:$0xf]  ;;  %v7897_v1 = vld [vmem:[%s10860_s1 + $0xb0] sm:$0xff]  }
  0x32   : > { %v420_v57 = vrot.slane %v418_v39, 4  ;;  %v444_v31 = vrot.slane %v442_v6, 4  ;;  %v447_v34 = vrot.slane %v445_v7, 5  ;;  %v457_v49 = vrot.slane %v455_v14, 4  ;;  %v7900_v6 = vld [vmem:[%s10860_s1 + $0xf8] sm:$0xff]  }
  0x33   : > { %6583 = vmatpush3.bf16.msra.mxu0 %v7870_v58  ;;  %v401_v55 = vrot.slane %v400_v42, 4  ;;  %v423_v58 = vrot.slane %v421_v45, 5  ;;  %10965 = vst [vmem:[#allocation10_spill] sm:$0xff] %v8339_v18  ;;  %v435_v44 = vrot.slane %v434_v13, 4  ;;  %v466_v38 = vshrl.u32 %v8335_v17, 16 }
  0x34   : > { %6680 = vmatprep.subr.bf16.mxu0 %v7872_v60  ;;  %v8306_v60 = vcombine.low %v382_v46, %v392_v47  ;;  %v448_v39 = vor.u32 %v447_v34, %v444_v31  ;;  %v475_v42 = vshll.u32 %v8344_v23, 16  ;;  %v479_v48 = vshrl.u32 %v8344_v23, 16 }
  0x35   : > { %v406_v35 = vsel %vm8204_vm5, %v401_v55, %v405_v36  ;;  %v424_v2 = vor.u32 %v423_v58, %v420_v57  ;;  %v453_v36 = vrot.slane %v451_v8, 5  ;;  %v440_v46 = vsel %vm8204_vm5, %v435_v44, %v439_v21  ;;  %v8380_v57 = vld [vmem:[%s8162_s16 + $0x50] sm:$0x1]  ;;  %v8405_v21 = vld [vmem:[%s8162_s16 + $0x64] sm:$0xf] }
  0x36   : > { %1768 = vmatmul.mubr.bf16.vlgmr.msra.gmra.mrb[0].mxu0 %v6145_v5  ;;  %10964 = vst [vmem:[#allocation9_spill] sm:$0xff] %v8306_v60  ;;  %v416_v5 = vsel %vm8204_vm5, %v411_v61, %v415_v62  ;;  %v468_v58 = vrot.slane %v466_v38, 4  ;;  %v449_v61 = vrot.slane %v448_v39, 4  ;;  %v499_v7 = vshll.u32 %v8373_v52, 16  ;;  %v8423_v38 = vld [vmem:[%s8162_s16 + $0x5c] sm:$0x1] }
  0x37   : > { %6681 = vmatpush3.bf16.msra.mxu0 %v7873_v10  ;;  %1775 = vmatprep.mubr.bf16.mxu0 %v8271_v25  ;;  %v7885_v10 = vld [vmem:[%s10860_s1 + $0x98] sm:$0xff]   ;;  %v8341_v19 = vcombine.low %v406_v35, %v416_v5  ;;  %v425_v29 = vrot.slane %v424_v2, 4  ;;  %v458_v47 = vor.u32 %v457_v49, %v453_v36  ;;  %v481_v2 = vrot.slane %v479_v48, 4 }
  0x38   : > { %6682 = vmatprep.subr.bf16.mxu0 %v7876_v16  ;;  %v8332_v16 = vld [vmem:[%s8162_s16 + $0x44] sm:$0x1]  ;;  %v503_v8 = vshrl.u32 %v8373_v52, 16  ;;  %v485_v14 = vshll.u32 %v8380_v57, 16  ;;  %v8416_v44 = vrot.slane %v499_v7, 5 }
  0x39   : > { %10966 = vst [vmem:[#allocation11_spill] sm:$0xff] %v8341_v19  ;;  %v461_v37 = vshll.u32 %v8332_v16, 16  ;;  %v430_v45 = vsel %vm8204_vm5, %v425_v29, %v429_v0  ;;  %v8384_v0 = vrot.slane %v475_v42, 5  ;;  %v459_v35 = vrot.slane %v458_v47, 4  ;;  %v8449_v7 = vld [vmem:[%s8162_s16 + $0x70] sm:$0xf] }
  0x3a   : > { %v505_v49 = vrot.slane %v503_v8, 4  ;;  %v487_v48 = vrot.slane %v485_v14, 5  ;;  %v8453_v8 = vcombine.low %v8309_v63, %v8312_v32 }
  0x3b   : > { %6683 = vmatpush3.bf16.msra.mxu0 %v7877_v40  ;;  %v469_v40 = vshll.u32 %v8335_v17, 16  ;;  %v463_v55 = vrot.slane %v461_v37, 5  ;;  %v482_v29 = vor.u32 %v481_v2, %v8384_v0  ;;  %v8420_v37 = vcombine.low %v8269_v24, %v8275_v30 }
  0x3c   : > { %6684 = vmatprep.subr.bf16.mxu0 %v7880_v51  ;;  %v8370_v51 = vld [vmem:[%s8162_s16 + $0x54] sm:$0xf]  ;;  %10971 = vst [vmem:[#allocation16_spill] sm:$0xff] %v8453_v8 }
  0x3d   : > { %v471_v62 = vrot.slane %v469_v40, 5  ;;  %v490_v3 = vshrl.u32 %v8370_v51, 16  ;;  %v493_v5 = vshll.u32 %v8370_v51, 16  ;;  %10969 = vst [vmem:[#allocation14_spill] sm:$0xff] %v8420_v37  ;;  %v483_v47 = vrot.slane %v482_v29, 4 }
  0x3e   : > { %1776 = vmatmul.mubr.bf16.gmra.mrb[4].mxu0 %v8298_v54 }
  0x3f   : > { %1783 = vmatprep.mubr.bf16.mxu0 %v8306_v60  ;;  %6685 = vmatpush3.bf16.msra.mxu0 %v7881_v53  ;;  %v8377_v53 = vcombine.low %v8245_v4, %v8250_v9  ;;  %v472_v13 = vor.u32 %v471_v62, %v468_v58  ;;  %v492_v31 = vrot.slane %v490_v3, 4  ;;  %v495_v34 = vrot.slane %v493_v5, 5  ;;  %v8441_v3 = vld [vmem:[%s8162_s16 + $0x6c] sm:$0xf] }
  0x40   : > { %6686 = vmatprep.subr.bf16.mxu0 %v7884_v59  ;;  %v8382_v59 = vcombine.low %v430_v45, %v440_v46  ;;  %v527_v45 = vshrl.u32 %v8405_v21, 16  ;;  %v509_v58 = vshll.u32 %v8423_v38, 16  ;;  %v541_v29 = vshll.u32 %v8441_v3, 16 }
  0x41   : > { %10967 = vst [vmem:[#allocation12_spill] sm:$0xff] %v8377_v53  ;;  %v473_v46 = vrot.slane %v472_v13, 4 }
  0x42   : > { %10968 = vst [vmem:[#allocation13_spill] sm:$0xff] %v8382_v59  ;;  %v529_v2 = vrot.slane %v527_v45, 4  ;;  %v511_v14 = vrot.slane %v509_v58, 5 }
  0x43   : > { %6687 = vmatpush3.bf16.msra.mxu0 %v7885_v10  ;;  %v454_v10 = vsel %vm8204_vm5, %v449_v61, %v453_v36  ;;  %v7903_v36 = vld [vmem:[%s10860_s1 + $0x140] sm:$0xff]   ;;  %v8435_v61 = vld [vmem:[%s8162_s16 + $0x68] sm:$0x1]  ;;  %v478_v5 = vsel %vm8204_vm5, %v473_v46, %v8384_v0  ;;  %v538_v0 = vshrl.u32 %v8441_v3, 16  ;;  %v8475_v46 = vld [vmem:[%s8162_s16 + $0x74] sm:$0x1] }
  0x44   : > { %6688 = vmatprep.subr.bf16.mxu0 %v7888_v15  ;;  %v8402_v15 = vld [vmem:[%s8162_s16 + $0x60] sm:$0xf] }
  0x45   : > { %v514_v39 = vshrl.u32 %v8402_v15, 16  ;;  %v517_v40 = vshll.u32 %v8402_v15, 16  ;;  %v540_v58 = vrot.slane %v538_v0, 4 }
  0x46   : > { %1784 = vmatmul.mubr.bf16.gmra.mrb[8].mxu0 %v8339_v18 }
  0x47   : > { %1791 = vmatprep.mubr.bf16.mxu0 %v8341_v19  ;;  %6689 = vmatpush3.bf16.msra.mxu0 %v7889_v26  ;;  %v7901_v26 = vld [vmem:[%s10860_s1 + $0xb8] sm:$0xff]   ;;  %v516_v62 = vrot.slane %v514_v39, 4 }
  0x48   : > { %6690 = vmatprep.subr.bf16.mxu0 %v7892_v28  ;;  %v464_v28 = vsel %vm8204_vm5, %v459_v35, %v463_v55  ;;  %v506_v55 = vor.u32 %v505_v49, %v8416_v44  ;;  %v8463_v49 = vld [vmem:[%s8162_s16 + $0x78] sm:$0xf]  ;;  %v8466_v39 = vld [vmem:[%s8162_s16 + $0x7c] sm:$0xf] }
  0x49   : > { %v8427_v42 = vcombine.low %v454_v10, %v464_v28  ;;  %v533_v28 = vshll.u32 %v8435_v61, 16  ;;  %v575_v0 = vshrl.u32 %v8466_v39, 16 }
  0x4a   : > { %v507_v13 = vrot.slane %v506_v55, 4 }
  0x4b   : > { %6691 = vmatpush3.bf16.msra.mxu0 %v7893_v43  ;;  %10970 = vst [vmem:[#allocation15_spill] sm:$0xff] %v8427_v42  ;;  %v523_v43 = vshll.u32 %v8405_v21, 16  ;;  %v535_v55 = vrot.slane %v533_v28, 5 }
  0x4c   : > { %6692 = vmatprep.subr.bf16.mxu0 %v7896_v50  ;;  %v496_v50 = vor.u32 %v495_v34, %v492_v31  ;;  %v512_v45 = vsel %vm8204_vm5, %v507_v13, %v511_v14  ;;  %v565_v13 = vshll.u32 %v8463_v49, 16  ;;  %v571_v14 = vshll.u32 %v8466_v39, 16 }
  0x4d   : > { %v8438_v35 = vrot.slane %v523_v43, 5 }
  0x4e   : > { %1792 = vmatmul.mubr.bf16.gmra.mrb[12].mxu0 %v8377_v53  ;;  %v497_v10 = vrot.slane %v496_v50, 4  ;;  %v577_v53 = vrot.slane %v575_v0, 4 }
  0x4f   : > { %1799 = vmatprep.mubr.bf16.mxu0 %v8382_v59  ;;  %6693 = vmatpush3.bf16.msra.mxu0 %v7897_v1  ;;  %v519_v1 = vrot.slane %v517_v40, 5  ;;  %v530_v34 = vor.u32 %v529_v2, %v8438_v35  ;;  %v551_v40 = vshrl.u32 %v8449_v7, 16 }
  0x50   : > { %6694 = vmatprep.subr.bf16.mxu0 %v7900_v6  ;;  %v488_v6 = vsel %vm8204_vm5, %v483_v47, %v487_v48  ;;  %v502_v43 = vsel %vm8204_vm5, %v497_v10, %v8416_v44  ;;  %v8478_v47 = vld [vmem:[%s8162_s16 + $0x84] sm:$0xf]  ;;  %v8481_v48 = vld [vmem:[%s8162_s16 + $0x88] sm:$0xf]  ;;  %v562_v10 = vshrl.u32 %v8463_v49, 16 }
  0x51   : > { %v8458_v31 = vcombine.low %v478_v5, %v488_v6  ;;  %10973 = vst [vmem:[#allocation18_spill] sm:$0xff] %v8478_v47  ;;  %10974 = vst [vmem:[#allocation19_spill] sm:$0xff] %v8481_v48  ;;  %v531_v44 = vrot.slane %v530_v34, 4  ;;  %v553_v5 = vrot.slane %v551_v40, 4  ;;  %v8491_v6 = vld [vmem:[%s8162_s16 + $0x80] sm:$0x1]  ;;  %v8500_v28 = vcombine.low %v502_v43, %v512_v45 }
  0x52   : > { %10976 = vst [vmem:[#allocation21_spill] sm:$0xff] %v8491_v6  ;;  %v8505_v34 = vld [vmem:[%s8162_s16 + $0x94] sm:$0xf]  ;;  %v589_v40 = vshll.u32 %v8478_v47, 16  ;;  %v595_v22 = vshll.u32 %v8481_v48, 16  ;;  %v564_v25 = vrot.slane %v562_v10, 4 }
  0x53   : > { %6695 = vmatpush3.bf16.msra.mxu0 %v7901_v26  ;;  %v520_v26 = vor.u32 %v519_v1, %v516_v62  ;;  %10972 = vst [vmem:[#allocation17_spill] sm:$0xff] %v8458_v31  ;;  %v543_v62 = vrot.slane %v541_v29, 5  ;;  %v8485_v1 = vld [vmem:[%s8162_s16 + $0x90] sm:$0xf]  ;;  %10978 = vst [vmem:[#allocation23_spill] sm:$0xff] %v8500_v28  ;;  %v586_v29 = vshrl.u32 %v8478_v47, 16  ;;  %v536_v19 = vsel %vm8204_vm5, %v531_v44, %v535_v55 }
  0x54   : > { %6792 = vmatprep.subr.bf16.mxu0 %v7903_v36  ;;  %v547_v36 = vshll.u32 %v8449_v7, 16  ;;  %10975 = vst [vmem:[#allocation20_spill] sm:$0xff] %v8485_v1  ;;  %10979 = vst [vmem:[#allocation24_spill] sm:$0xff] %v8505_v34  ;;  %v613_v59 = vshll.u32 %v8485_v1, 16  ;;  %v581_v18 = vshll.u32 %v8491_v6, 16  ;;  %v619_v55 = vshll.u32 %v8505_v34, 16 }
  0x55   : > { %v521_v50 = vrot.slane %v520_v26, 4  ;;  %v8498_v26 = vcombine.low %v8335_v17, %v8344_v23  ;;  %v544_v45 = vor.u32 %v543_v62, %v540_v58  ;;  %v591_v58 = vrot.slane %v589_v40, 5  ;;  %v8533_v44 = vld [vmem:[%s8162_s16 + $0x9c] sm:$0xf] }
  0x56   : > { %1800 = vmatmul.mubr.bf16.gmra.mrb[16].mxu0 %v8420_v37  ;;  %v8488_v2 = vrot.slane %v547_v36, 5  ;;  %v557_v36 = vshll.u32 %v8475_v46, 16  ;;  %v8519_v37 = vrot.slane %v571_v14, 5  ;;  %v8526_v62 = vrot.slane %v595_v22, 5 }
  0x57   : > { %1807 = vmatprep.mubr.bf16.mxu0 %v8427_v42  ;;  %10977 = vst [vmem:[#allocation22_spill] sm:$0xff] %v8498_v26  ;;  %v526_v43 = vsel %vm8204_vm5, %v521_v50, %v8438_v35  ;;  %v610_v42 = vshrl.u32 %v8485_v1, 16  ;;  %v8523_v35 = vld [vmem:[%s8162_s16 + $0x8c] sm:$0x1]  ;;  %v588_v50 = vrot.slane %v586_v29, 4  ;;  %v623_v14 = vshrl.u32 %v8505_v34, 16 }
  0x58   : > { %v554_v60 = vor.u32 %v553_v5, %v8488_v2  ;;  %v8529_v1 = vld [vmem:[%s8162_s16 + $0x98] sm:$0x1]  ;;  %v6127_v5 = vrot.slane %v8171_v11, 9  ;;  %v8540_v22 = vcombine.low %v8370_v51, %v8373_v52  ;;  %v545_v0 = vrot.slane %v544_v45, 4 }
  0x59   : > { %v612_v10 = vrot.slane %v610_v42, 4  ;;  %v559_v29 = vrot.slane %v557_v36, 5  ;;  %v578_v47 = vor.u32 %v577_v53, %v8519_v37  ;;  %v583_v11 = vrot.slane %v581_v18, 5  ;;  %v8560_v36 = vld [vmem:[%s8162_s16 + $0xa4] sm:$0x1] }
  0x5a   : > { %10980 = vst [vmem:[#allocation25_spill] sm:$0xff] %v8540_v22  ;;  %v555_v40 = vrot.slane %v554_v60, 4  ;;  %v592_v42 = vor.u32 %v591_v58, %v588_v50  ;;  %v8550_v34 = vrot.slane %v619_v55, 5  ;;  %v634_v60 = vshrl.u32 %v8533_v44, 16 }
  0x5b   : > { %v550_v18 = vsel %vm8204_vm5, %v545_v0, %v8488_v2  ;;  %v10981_v45 = vrot.slane %v8174_v12, 5 }
  0x5c   : > { %v560_v58 = vsel %vm8204_vm5, %v555_v40, %v559_v29  ;;  %v8571_v55 = vrot.slane %v592_v42, 4  ;;  %v8594_v29 = vcombine.low %v8402_v15, %v8405_v21 }
  0x5d   : > { %v8566_v50 = vsel %vm8190_vm4, %v6127_v5, %v10981_v45 }
  0x5e   : > { %1808 = vmatmul.mubr.bf16.gmra.mrb[20].mxu0 %v8453_v8  ;;  %v567_v8 = vrot.slane %v565_v13, 5  ;;  %v615_v13 = vrot.slane %v613_v59, 5  ;;  %10982 = vst [vmem:[#allocation26_spill] sm:$0xff] %v8594_v29 }
  0x5f   : > { %1815 = vmatprep.mubr.bf16.mxu0 %v8458_v31  ;;  %v599_v31 = vshrl.u32 %v8481_v48, 16  ;;  %v8546_v48 = vld [vmem:[%s8162_s16 + $0xa0] sm:$0xf] }
  0x60   : > { %v616_v6 = vor.u32 %v615_v13, %v612_v10  ;;  %v643_v53 = vshll.u32 %v8546_v48, 16  ;;  %v8585_v13 = vrot.slane %v634_v60, 4  ;;  %v647_v40 = vshrl.u32 %v8546_v48, 16 }
  0x61   : > { %v601_v54 = vrot.slane %v599_v31, 4  ;;  %v8542_v31 = vcombine.low %v526_v43, %v536_v19  ;;  %v625_v19 = vrot.slane %v623_v14, 4  ;;  %v629_v43 = vshll.u32 %v8529_v1, 16 }
  0x62   : > { %v8580_v12 = vrot.slane %v616_v6, 4  ;;  %v8589_v0 = vrot.slane %v643_v53, 5  ;;  %v779_v6 = vrot.slane %v8250_v9, 5  ;;  %v8613_v9 = vcombine.low %v8441_v3, %v8449_v7 }
  0x63   : > { %v602_v59 = vor.u32 %v601_v54, %v8526_v62  ;;  %v579_v54 = vrot.slane %v578_v47, 4  ;;  %v6177_v47 = vcombine.low %v8566_v50, %v8219_v41  ;;  %v8583_v5 = vrot.slane %v629_v43, 5  ;;  %v7907_v41 = vld [vmem:[%s10860_s1 + $0x150] sm:$0xff]  }
  0x64   : > { %v782_v43 = vrot.slane %v8264_v20, 5  ;;  %v781_v53 = vrot.slane %v779_v6, 4  ;;  %10983 = vst [vmem:[#allocation27_spill] sm:$0xff] %v8613_v9 }
  0x65   : > { %v8578_v2 = vrot.slane %v602_v59, 4  ;;  %v584_v59 = vsel %vm8204_vm5, %v579_v54, %v583_v11  ;;  %v786_v11 = vrot.slane %v8275_v30, 5  ;;  %v6132_v54 = vrot.slane %v8309_v63, 9 }
  0x66   : > { %1816 = vmatmul.mubr.bf16.gmra.mrb[24].mxu0 %v8498_v26  ;;  %v568_v26 = vor.u32 %v567_v8, %v564_v25  ;;  %v637_v25 = vshll.u32 %v8533_v44, 16  ;;  %v783_v20 = vsel %vm8190_vm4, %v781_v53, %v782_v43  ;;  %v796_v30 = vrot.slane %v8332_v16, 5 }
  0x67   : > { %1823 = vmatprep.mubr.bf16.mxu0 %v8500_v28  ;;  %v605_v28 = vshll.u32 %v8523_v35, 16  ;;  %v803_v63 = vrot.slane %v8380_v57, 5  ;;  %v6134_v43 = vrot.slane %v8370_v51, 9  ;;  %v810_v57 = vrot.slane %v8423_v38, 5 }
  0x68   : > { %v569_v8 = vrot.slane %v568_v26, 4  ;;  %v626_v26 = vor.u32 %v625_v19, %v8550_v34  ;;  %v8587_v14 = vrot.slane %v637_v25, 5  ;;  %v653_v19 = vshll.u32 %v8560_v36, 16 }
  0x69   : > { %v8573_v10 = vrot.slane %v605_v28, 5  ;;  %v6130_v28 = vrot.slane %v8245_v4, 9  ;;  %v8605_v4 = vcombine.low %v550_v18, %v560_v58  ;;  %v789_v18 = vrot.slane %v8301_v56, 5 }
  0x6a   : > { %v574_v42 = vsel %vm8204_vm5, %v569_v8, %v8519_v37  ;;  %v8607_v60 = vrot.slane %v626_v26, 4  ;;  %v6131_v37 = vrot.slane %v8269_v24, 9  ;;  %v788_v26 = vrot.slane %v786_v11, 4 }
  0x6b   : > { %v780_v25 = vsel %vm8190_vm4, %v6130_v28, %v779_v6  ;;  %v8617_v8 = vcombine.low %v574_v42, %v584_v59  ;;  %v793_v24 = vrot.slane %v8312_v32, 5  ;;  %v6133_v28 = vrot.slane %v8335_v17, 9 }
  0x6c   : > { %v8624_v45 = vcombine.low %v780_v25, %v783_v20  ;;  %v787_v58 = vsel %vm8190_vm4, %v6131_v37, %v786_v11  ;;  %v800_v56 = vrot.slane %v8344_v23, 5  ;;  %v790_v6 = vsel %vm8190_vm4, %v788_v26, %v789_v18 }
  0x6d   : > { %v794_v42 = vsel %vm8190_vm4, %v6132_v54, %v793_v24  ;;  %v795_v59 = vrot.slane %v793_v24, 4  ;;  %v8639_v32 = vcombine.low %v787_v58, %v790_v6  ;;  %v807_v17 = vrot.slane %v8373_v52, 5 }
  0x6e   : > { %1824 = vmatmul.mubr.bf16.gmra.mrb[28].mxu0 %v8540_v22  ;;  %10984 = vst [vmem:[#allocation28_spill] sm:$0xff] %v8624_v45  ;;  %v801_v16 = vsel %vm8190_vm4, %v6133_v28, %v800_v56  ;;  %v802_v25 = vrot.slane %v800_v56, 4  ;;  %v6135_v53 = vrot.slane %v8402_v15, 9  ;;  %v814_v37 = vrot.slane %v8405_v21, 5 }
  0x6f   : > { %1831 = vmatprep.mubr.bf16.mxu0 %v8542_v31  ;;  %10985 = vst [vmem:[#allocation29_spill] sm:$0xff] %v8639_v32  ;;  %v797_v23 = vsel %vm8190_vm4, %v795_v59, %v796_v30  ;;  %v808_v20 = vsel %vm8190_vm4, %v6134_v43, %v807_v17  ;;  %v809_v18 = vrot.slane %v807_v17, 4  ;;  %v817_v38 = vrot.slane %v8435_v61, 5 }
  0x70   : > { %v8649_v11 = vcombine.low %v794_v42, %v797_v23  ;;  %v804_v51 = vsel %vm8190_vm4, %v802_v25, %v803_v63  ;;  %v815_v52 = vsel %vm8190_vm4, %v6135_v53, %v814_v37  ;;  %v816_v58 = vrot.slane %v814_v37, 4  ;;  %v10990_v42 = vld [vmem:[#allocation21_spill] sm:$0xff]  ;;  %v8694_v25 = vld [vmem:[%s8162_s16 + $0xac] sm:$0xf] }
  0x71   : > { %v8655_v54 = vcombine.low %v801_v16, %v804_v51  ;;  %v811_v15 = vsel %vm8190_vm4, %v809_v18, %v810_v57  ;;  %v6136_v21 = vrot.slane %v8441_v3, 9  ;;  %v821_v26 = vrot.slane %v8449_v7, 5  ;;  %v8691_v16 = vld [vmem:[%s8162_s16 + $0xa8] sm:$0xf] }
  0x72   : > { %10986 = vst [vmem:[#allocation30_spill] sm:$0xff] %v8649_v11  ;;  %v824_v24 = vrot.slane %v8475_v46, 5  ;;  %v8666_v30 = vcombine.low %v808_v20, %v811_v15  ;;  %v818_v28 = vsel %vm8190_vm4, %v816_v58, %v817_v38  ;;  %v6137_v7 = vrot.slane %v8463_v49, 9  ;;  %v10994_v20 = vld [vmem:[#allocation19_spill] sm:$0xff]  ;;  %v10995_v58 = vld [vmem:[#allocation18_spill] sm:$0xff] }
  0x73   : > { %10987 = vst [vmem:[#allocation31_spill] sm:$0xff] %v8655_v54  ;;  %v8671_v61 = vcombine.low %v815_v52, %v818_v28  ;;  %v822_v3 = vsel %vm8190_vm4, %v6136_v21, %v821_v26  ;;  %v823_v56 = vrot.slane %v821_v26, 4  ;;  %v598_v46 = vsel %vm8204_vm5, %v8571_v55, %v8526_v62 }
  0x74   : > { %10988 = vst [vmem:[#allocation32_spill] sm:$0xff] %v8666_v30  ;;  %v608_v63 = vsel %vm8204_vm5, %v8578_v2, %v8573_v10  ;;  %v828_v6 = vrot.slane %v8466_v39, 5  ;;  %v831_v59 = vrot.slane %v10990_v42, 5  ;;  %v8688_v43 = vcombine.low %v8463_v49, %v8466_v39  ;;  %v8751_v42 = vld [vmem:[%s8162_s16 + $0xb8] sm:$0xf] }
  0x75   : > { %10989 = vst [vmem:[#allocation33_spill] sm:$0xff] %v8671_v61  ;;  %v825_v62 = vsel %vm8190_vm4, %v823_v56, %v824_v24  ;;  %v649_v55 = vrot.slane %v647_v40, 4  ;;  %v8704_v23 = vcombine.low %v598_v46, %v608_v63  ;;  %v640_v57 = vor.u32 %v8587_v14, %v8585_v13  ;;  %v8737_v24 = vld [vmem:[%s8162_s16 + $0xb0] sm:$0x1]  ;;  %v8740_v56 = vld [vmem:[%s8162_s16 + $0xb4] sm:$0xf] }
  0x76   : > { %1832 = vmatmul.mubr.bf16.gmra.mrb[32].mxu0 %v8594_v29  ;;  %10991 = vst [vmem:[#allocation21_spill] sm:$0xff] %v8688_v43  ;;  %v8700_v17 = vcombine.low %v822_v3, %v825_v62  ;;  %v829_v10 = vsel %vm8190_vm4, %v6137_v7, %v828_v6  ;;  %v830_v2 = vrot.slane %v828_v6, 4  ;;  %v658_v40 = vshrl.u32 %v8691_v16, 16 }
  0x77   : > { %1839 = vmatprep.mubr.bf16.mxu0 %v8605_v4  ;;  %v661_v53 = vshll.u32 %v8691_v16, 16  ;;  %v667_v37 = vshll.u32 %v8694_v25, 16  ;;  %v622_v51 = vsel %vm8204_vm5, %v8580_v12, %v8550_v34  ;;  %v632_v13 = vsel %vm8204_vm5, %v8607_v60, %v8583_v5 }
  0x78   : > { %10992 = vst [vmem:[#allocation34_spill] sm:$0xff] %v8700_v17  ;;  %v832_v49 = vsel %vm8190_vm4, %v830_v2, %v831_v59  ;;  %v671_v14 = vshrl.u32 %v8694_v25, 16  ;;  %v835_v18 = vrot.slane %v10994_v20, 5  ;;  %v650_v52 = vor.u32 %v649_v55, %v8589_v0 }
  0x79   : > { %v8708_v39 = vcombine.low %v829_v10, %v832_v49  ;;  %v8730_v38 = vcombine.low %v10995_v58, %v10994_v20  ;;  %v6138_v15 = vrot.slane %v10995_v58, 9  ;;  %v838_v12 = vrot.slane %v8523_v35, 5  ;;  %v10999_v49 = vld [vmem:[#allocation24_spill] sm:$0xff] }
  0x7a   : > { %v837_v34 = vrot.slane %v835_v18, 4  ;;  %v8734_v21 = vcombine.low %v622_v51, %v632_v13  ;;  %v641_v26 = vrot.slane %v640_v57, 4  ;;  %v660_v5 = vrot.slane %v658_v40, 4  ;;  %v11000_v51 = vld [vmem:[#allocation20_spill] sm:$0xff] }
  0x7b   : > { %10993 = vst [vmem:[#allocation35_spill] sm:$0xff] %v8708_v39  ;;  %10996 = vst [vmem:[#allocation19_spill] sm:$0xff] %v8730_v38  ;;  %v663_v60 = vrot.slane %v661_v53, 5  ;;  %v669_v28 = vrot.slane %v667_v37, 5  ;;  %v673_v3 = vrot.slane %v671_v14, 4  ;;  %v836_v7 = vsel %vm8190_vm4, %v6138_v15, %v835_v18 }
  0x7c   : > { %10997 = vst [vmem:[#allocation18_spill] sm:$0xff] %v8734_v21  ;;  %v839_v46 = vsel %vm8190_vm4, %v837_v34, %v838_v12  ;;  %v651_v63 = vrot.slane %v650_v52, 4  ;;  %v655_v35 = vrot.slane %v653_v19, 5  ;;  %v677_v62 = vshll.u32 %v8737_v24, 16 }
  0x7d   : > { %v8748_v6 = vcombine.low %v836_v7, %v839_v46  ;;  %v664_v59 = vor.u32 %v663_v60, %v660_v5  ;;  %v682_v55 = vshrl.u32 %v8740_v56, 16  ;;  %v646_v10 = vsel %vm8204_vm5, %v641_v26, %v8589_v0  ;;  %v311_v7 = vld [vmem:[%s8162_s16 + $0xbc] sm:$0x1] }
  0x7e   : > { %1840 = vmatmul.mubr.bf16.gmra.mrb[36].mxu0 %v8613_v9  ;;  %v674_v2 = vor.u32 %v673_v3, %v669_v28  ;;  %v842_v19 = vrot.slane %v10999_v49, 5  ;;  %v656_v57 = vsel %vm8204_vm5, %v651_v63, %v655_v35  ;;  %v685_v40 = vshll.u32 %v8740_v56, 16 }
  0x7f   : > { %1847 = vmatprep.mubr.bf16.mxu0 %v8617_v8  ;;  %10998 = vst [vmem:[#allocation36_spill] sm:$0xff] %v8748_v6  ;;  %v691_v53 = vshll.u32 %v8751_v42, 16  ;;  %v695_v37 = vshrl.u32 %v8751_v42, 16  ;;  %v6139_v13 = vrot.slane %v11000_v51, 9  ;;  %v845_v20 = vrot.slane %v8529_v1, 5 }
  0x80   : > { %v844_v14 = vrot.slane %v842_v19, 4  ;;  %v8770_v0 = vcombine.low %v11000_v51, %v10999_v49  ;;  %v665_v18 = vrot.slane %v664_v59, 4  ;;  %v679_v52 = vrot.slane %v677_v62, 5 }
  0x81   : > { %v684_v58 = vrot.slane %v682_v55, 4  ;;  %v8772_v15 = vcombine.low %v646_v10, %v656_v57  ;;  %v675_v34 = vrot.slane %v674_v2, 4  ;;  %v843_v12 = vsel %vm8190_vm4, %v6139_v13, %v842_v19 }
  0x82   : > { %11001 = vst [vmem:[#allocation24_spill] sm:$0xff] %v8770_v0  ;;  %v846_v26 = vsel %vm8190_vm4, %v844_v14, %v845_v20  ;;  %v687_v5 = vrot.slane %v685_v40, 5  ;;  %v693_v60 = vrot.slane %v691_v53, 5  ;;  %v697_v3 = vrot.slane %v695_v37, 4 }
  0x83   : > { %11002 = vst [vmem:[#allocation20_spill] sm:$0xff] %v8772_v15  ;;  %v8778_v1 = vcombine.low %v843_v12, %v846_v26  ;;  %v670_v46 = vsel %vm8204_vm5, %v665_v18, %v669_v28  ;;  %v849_v63 = vrot.slane %v8546_v48, 5  ;;  %v680_v35 = vsel %vm8204_vm5, %v675_v34, %v679_v52 }
  0x84   : > { %v688_v59 = vor.u32 %v687_v5, %v684_v58  ;;  %v698_v62 = vor.u32 %v697_v3, %v693_v60  ;;  %v701_v55 = vshll.u32 %v311_v7, 16  ;;  %v6140_v10 = vrot.slane %v8533_v44, 9 }
  0x85   : > { %11003 = vst [vmem:[#allocation37_spill] sm:$0xff] %v8778_v1  ;;  %v851_v2 = vrot.slane %v849_v63, 4  ;;  %v852_v49 = vrot.slane %v8560_v36, 5  ;;  %v8792_v19 = vcombine.low %v8533_v44, %v8546_v48  ;;  %v8794_v57 = vcombine.low %v670_v46, %v680_v35  ;;  %v11009_v35 = vld [vmem:[#allocation8_spill] sm:$0xff] }
  0x86   : > { %1848 = vmatmul.mubr.bf16.gmra.mrb[40].mxu0 %v8688_v43  ;;  %v850_v28 = vsel %vm8190_vm4, %v6140_v10, %v849_v63  ;;  %v689_v53 = vrot.slane %v688_v59, 4  ;;  %v699_v37 = vrot.slane %v698_v62, 4  ;;  %v703_v51 = vrot.slane %v701_v55, 5  ;;  %v7956_v59 = vld [vmem:[%s8162_s16 + $0x10] sm:$0xf] }
  0x87   : > { %1855 = vmatprep.mubr.bf16.mxu0 %v8704_v23  ;;  %11004 = vst [vmem:[#allocation38_spill] sm:$0xff] %v8792_v19  ;;  %v853_v40 = vsel %vm8190_vm4, %v851_v2, %v852_v49  ;;  %v856_v48 = vrot.slane %v8694_v25, 5  ;;  %v6141_v14 = vrot.slane %v8691_v16, 9  ;;  %v859_v18 = vrot.slane %v8737_v24, 5  ;;  %v7958_v10 = vld [vmem:[%s8162_s16 + $0x14] sm:$0x1] }
  0x88   : > { %v8800_v13 = vcombine.low %v850_v28, %v853_v40  ;;  %v694_v44 = vsel %vm8204_vm5, %v689_v53, %v693_v60  ;;  %v704_v36 = vsel %vm8204_vm5, %v699_v37, %v703_v51  ;;  %v8813_v52 = vcombine.low %v8691_v16, %v8694_v25  ;;  %v7905_v49 = vld [vmem:[%s10860_s1 + $0x148] sm:$0xff]   ;;  %v11010_v28 = vld [vmem:[#allocation10_spill] sm:$0xff] }
  0x89   : > { %v858_v20 = vrot.slane %v856_v48, 4  ;;  %v8815_v58 = vcombine.low %v694_v44, %v704_v36  ;;  %v857_v34 = vsel %vm8190_vm4, %v6141_v14, %v856_v48  ;;  %v863_v24 = vrot.slane %v8751_v42, 5  ;;  %v7959_v37 = vld [vmem:[%s8162_s16 + $0x1c] sm:$0xf]  ;;  %v7906_v48 = vld [vmem:[%s10860_s1 + $0x108] sm:$0xff]  }
  0x8a   : > { %11005 = vst [vmem:[#allocation39_spill] sm:$0xff] %v8800_v13  ;;  %11006 = vst [vmem:[#allocation40_spill] sm:$0xff] %v8813_v52  ;;  %v6142_v16 = vrot.slane %v8740_v56, 9  ;;  %v866_v5 = vrot.slane %v311_v7, 5  ;;  %v8829_v60 = vcombine.low %v8740_v56, %v8751_v42  ;;  %v765_v62 = vrot.slane %v7956_v59, 5  ;;  %v7904_v56 = vld [vmem:[%s10860_s1 + $0x100] sm:$0xff]  }
  0x8b   : > { %v860_v12 = vsel %vm8190_vm4, %v858_v20, %v859_v18  ;;  %v865_v25 = vrot.slane %v863_v24, 4  ;;  %v7957_v42 = vld [vmem:[%s8162_s16 + $0xc] sm:$0xf]  ;;  %v768_v2 = vrot.slane %v7958_v10, 5  ;;  %v772_v51 = vrot.slane %v7959_v37, 5  ;;  %v7908_v18 = vld [vmem:[%s10860_s1 + $0x110] sm:$0xff]  }
  0x8c   : > { %v8821_v26 = vcombine.low %v857_v34, %v860_v12  ;;  %11008 = vst [vmem:[#allocation42_spill] sm:$0xff] %v8829_v60  ;;  %v864_v3 = vsel %vm8190_vm4, %v6142_v16, %v863_v24  ;;  %v6128_v7 = vrot.slane %v7957_v42, 9  ;;  %v767_v55 = vrot.slane %v765_v62, 4  ;;  %v7961_v14 = vld [vmem:[%s8162_s16 + $0x20] sm:$0x1]  ;;  %v7909_v34 = vld [vmem:[%s10860_s1 + $0x158] sm:$0xff]  }
  0x8d   : > { %v867_v46 = vsel %vm8190_vm4, %v865_v25, %v866_v5  ;;  %v774_v36 = vrot.slane %v772_v51, 4  ;;  %v775_v20 = vrot.slane %v7961_v14, 5  ;;  %v11011_v12 = vld [vmem:[#allocation12_spill] sm:$0xff]  ;;  %v7910_v25 = vld [vmem:[%s10860_s1 + $0x118] sm:$0xff]   ;;  %v7911_v5 = vld [vmem:[%s10860_s1 + $0x160] sm:$0xff]  }
  0x8e   : > { %1856 = vmatmul.mubr.bf16.gmra.mrb[44].mxu0 %v8730_v38  ;;  %11007 = vst [vmem:[#allocation41_spill] sm:$0xff] %v8821_v26  ;;  %v8835_v63 = vcombine.low %v864_v3, %v867_v46  ;;  %v766_v40 = vsel %vm8190_vm4, %v6128_v7, %v765_v62  ;;  %v769_v53 = vsel %vm8190_vm4, %v767_v55, %v768_v2  ;;  %v7912_v46 = vld [vmem:[%s10860_s1 + $0x120] sm:$0xff]   ;;  %v11013_v59 = vld [vmem:[#allocation14_spill] sm:$0xff]  ;;  %v7914_v62 = vld [vmem:[%s10860_s1 + $0x128] sm:$0xff]  }
  0x8f   : > { %1863 = vmatprep.mubr.bf16.mxu0 %v8734_v21  ;;  %v8863_v50 = vcombine.low %v766_v40, %v769_v53  ;;  %v776_v16 = vsel %vm8190_vm4, %v774_v36, %v775_v20  ;;  %v7916_v42 = vld [vmem:[%s10860_s1 + $0x130] sm:$0xff]   ;;  %v7917_v7 = vld [vmem:[%s10860_s1 + $0x178] sm:$0xff]   ;;  %v11014_v55 = vld [vmem:[#allocation16_spill] sm:$0xff] }
  0x90   : > { %v7918_v10 = vld [vmem:[%s10860_s1 + $0x138] sm:$0xff]   ;;  %v7920_v2 = vld [vmem:[%s10860_s1 + $0x1c0] sm:$0xff]  }
  0x96   : > { %1864 = vmatmul.mubr.bf16.gmra.mrb[48].mxu0 %v8770_v0 }
  0x97   : > { %1871 = vmatprep.mubr.bf16.mxu0 %v8772_v15 }
  0x9e   : > { %1872 = vmatmul.mubr.bf16.gmra.mrb[52].mxu0 %v8792_v19 }
  0x9f   : > { %1879 = vmatprep.mubr.bf16.mxu0 %v8794_v57 }
  0xa6   : > { %1880 = vmatmul.mubr.bf16.gmra.mrb[56].mxu0 %v8813_v52 }
  0xa7   : > { %1887 = vmatprep.mubr.bf16.mxu0 %v8815_v58 }
  0xae   : > { %1888 = vmatmul.mubr.bf16.gmra.mrb[60].mxu0 %v8829_v60 }
  0xaf   : > { %1928 = vmatprep.mubr.bf16.mxu0 %v11009_v35  ;;  %v7913_v35 = vld [vmem:[%s10860_s1 + $0x168] sm:$0xff]  }
  0xb6   : > { %1929 = vmatmul.mubr.bf16.vlgmr.msra.gmra.mrb[64].mxu0 %v6177_v47  ;;  %v7960_v47 = vld [vmem:[%s8162_s16 + $0x18] sm:$0xf] }
  0xb7   : > { %6793 = vmatpush3.bf16.msra.mxu0 %v7904_v56  ;;  %1936 = vmatprep.mubr.bf16.mxu0 %v11010_v28  ;;  %v6129_v44 = vrot.slane %v7960_v47, 9  ;;  %v7915_v56 = vld [vmem:[%s10860_s1 + $0x170] sm:$0xff]  }
  0xb8   : > { %6794 = vmatprep.subr.bf16.mxu0 %v7905_v49  ;;  %v11015_v49 = vld [vmem:[#allocation22_spill] sm:$0xff] }
  0xb9   : > { %v773_v24 = vsel %vm8190_vm4, %v6129_v44, %v772_v51 }
  0xba   : > { %v8885_v3 = vcombine.low %v773_v24, %v776_v16 }
  0xbb   : > { %6795 = vmatpush3.bf16.msra.mxu0 %v7906_v48 }
  0xbc   : > { %6796 = vmatprep.subr.bf16.mxu0 %v7907_v41  ;;  %11012 = vst [vmem:[#allocation8_spill] sm:$0xff] %v8885_v3 }
  0xbe   : > { %1937 = vmatmul.mubr.bf16.gmra.mrb[68].mxu0 %v8863_v50 }
  0xbf   : > { %1944 = vmatprep.mubr.bf16.mxu0 %v11011_v12  ;;  %6797 = vmatpush3.bf16.msra.mxu0 %v7908_v18 }
  0xc0   : > { %6798 = vmatprep.subr.bf16.mxu0 %v7909_v34 }
  0xc3   : > { %6799 = vmatpush3.bf16.msra.mxu0 %v7910_v25 }
  0xc4   : > { %6800 = vmatprep.subr.bf16.mxu0 %v7911_v5 }
  0xc6   : > { %1945 = vmatmul.mubr.bf16.gmra.mrb[72].mxu0 %v8885_v3 }
  0xc7   : > { %1952 = vmatprep.mubr.bf16.mxu0 %v11013_v59  ;;  %6801 = vmatpush3.bf16.msra.mxu0 %v7912_v46 }
  0xc8   : > { %6802 = vmatprep.subr.bf16.mxu0 %v7913_v35  ;;  %v8948_v35 = vld [vmem:[%s8162_s16 + $0xc0] sm:$0xf] }
  0xcb   : > { %6803 = vmatpush3.bf16.msra.mxu0 %v7914_v62  ;;  %v8951_v62 = vld [vmem:[%s8162_s16 + $0xc4] sm:$0xf] }
  0xcc   : > { %6804 = vmatprep.subr.bf16.mxu0 %v7915_v56 }
  0xce   : > { %1953 = vmatmul.mubr.bf16.gmra.mrb[76].mxu0 %v8624_v45 }
  0xcf   : > { %1960 = vmatprep.mubr.bf16.mxu0 %v11014_v55  ;;  %6805 = vmatpush3.bf16.msra.mxu0 %v7916_v42 }
  0xd0   : > { %6806 = vmatprep.subr.bf16.mxu0 %v7917_v7 }
  0xd3   : > { %6807 = vmatpush3.bf16.msra.mxu0 %v7918_v10 }
  0xd4   : > { %6904 = vmatprep.subr.bf16.mxu0 %v7920_v2  ;;  %v8957_v2 = vcombine.low %v8948_v35, %v8951_v62 }
  0xd6   : > { %1961 = vmatmul.mubr.bf16.gmra.mrb[80].mxu0 %v8639_v32  ;;  %11016 = vst [vmem:[#allocation10_spill] sm:$0xff] %v8957_v2 }
  0xd7   : > { %1968 = vmatprep.mubr.bf16.mxu0 %v11015_v49 }
  0xde   : > { %1969 = vmatmul.mubr.bf16.gmra.mrb[84].mxu0 %v8649_v11 }
  0xdf   : > { %1976 = vmatprep.mubr.bf16.mxu0 %v8540_v22 }
  0xe6   : > { %1977 = vmatmul.mubr.bf16.gmra.mrb[88].mxu0 %v8655_v54 }
  0xe7   : > { %1984 = vmatprep.mubr.bf16.mxu0 %v8594_v29 }
  0xee   : > { %1985 = vmatmul.mubr.bf16.gmra.mrb[92].mxu0 %v8666_v30 }
  0xef   : > { %1992 = vmatprep.mubr.bf16.mxu0 %v8613_v9 }
  0xf6   : > { %1993 = vmatmul.mubr.bf16.gmra.mrb[96].mxu0 %v8671_v61 }
  0xf7   : > { %2000 = vmatprep.mubr.bf16.mxu0 %v8688_v43 }
  0xfe   : > { %2001 = vmatmul.mubr.bf16.gmra.mrb[100].mxu0 %v8700_v17 }
  0xff   : > { %2008 = vmatprep.mubr.bf16.mxu0 %v8730_v38 }
 0x106   : > { %2009 = vmatmul.mubr.bf16.gmra.mrb[104].mxu0 %v8708_v39 }
 0x107   : > { %2016 = vmatprep.mubr.bf16.mxu0 %v8770_v0 }
 0x109   : > { %v6584_v40 = vpop.f32.mrb[0].mxu0 }
 0x10a   : > { %v6585_v53 = vpop.f32.mrb[1].mxu0 }
 0x10b   : > { %v8929_v37 = vadd.f32 %v6585_v53, %v6584_v40  ;;  %v6587_v51 = vpop.f32.mrb[2].mxu0 }
 0x10c   : > { %v6588_v48 = vpop.f32.mrb[3].mxu0 }
 0x10d   : > { %v8931_v41 = vadd.f32 %v6588_v48, %v6587_v51 }
 0x10e   : > { %2017 = vmatmul.mubr.bf16.gmra.mrb[108].mxu0 %v8748_v6 }
 0x10f   : > { %2024 = vmatprep.mubr.bf16.mxu0 %v8792_v19 }
 0x111   : > { %v6590_v47 = vpop.f32.mrb[4].mxu0 }
 0x112   : > { %v6591_v44 = vpop.f32.mrb[5].mxu0 }
 0x113   : > { %v8935_v36 = vadd.f32 %v6591_v44, %v6590_v47  ;;  %v6593_v14 = vpop.f32.mrb[6].mxu0 }
 0x114   : > { %v6594_v20 = vpop.f32.mrb[7].mxu0 }
 0x115   : > { %v8937_v18 = vadd.f32 %v6594_v20, %v6593_v14 }
 0x116   : > { %2025 = vmatmul.mubr.bf16.gmra.mrb[112].mxu0 %v8778_v1 }
 0x117   : > { %2032 = vmatprep.mubr.bf16.mxu0 %v8813_v52  ;;  %v11020_v52 = vld [vmem:[#allocation13_spill] sm:$0xff] }
 0x119   : > { %v6596_v34 = vpop.f32.mrb[8].mxu0 }
 0x11a   : > { %v6597_v24 = vpop.f32.mrb[9].mxu0 }
 0x11b   : > { %v8941_v16 = vadd.f32 %v6597_v24, %v6596_v34  ;;  %v6599_v25 = vpop.f32.mrb[10].mxu0 }
 0x11c   : > { %v6600_v5 = vpop.f32.mrb[11].mxu0 }
 0x11d   : > { %v8943_v46 = vadd.f32 %v6600_v5, %v6599_v25 }
 0x11e   : > { %2033 = vmatmul.mubr.bf16.gmra.mrb[116].mxu0 %v8800_v13 }
 0x11f   : > { %2040 = vmatprep.mubr.bf16.mxu0 %v8829_v60 }
 0x121   : > { %v6602_v56 = vpop.f32.mrb[12].mxu0 }
 0x122   : > { %v6603_v42 = vpop.f32.mrb[13].mxu0 }
 0x123   : > { %v8953_v7 = vadd.f32 %v6603_v42, %v6602_v56  ;;  %v6605_v10 = vpop.f32.mrb[14].mxu0  ;;  %v7921_v56 = vld [vmem:[%s10860_s1 + $0x180] sm:$0xff]  }
 0x124   : > { %v6606_v40 = vpop.f32.mrb[15].mxu0 }
 0x125   : > { %v8959_v53 = vadd.f32 %v6606_v40, %v6605_v10  ;;  %v7922_v10 = vld [vmem:[%s10860_s1 + $0x1c8] sm:$0xff]  }
 0x126   : > { %2041 = vmatmul.mubr.bf16.gmra.mrb[120].mxu0 %v8821_v26 }
 0x127   : > { %2048 = vmatprep.mubr.bf16.mxu0 %v8957_v2  ;;  %v11019_v2 = vld [vmem:[#allocation11_spill] sm:$0xff] }
 0x129   : > { %v6608_v51 = vpop.f32.mrb[16].mxu0 }
 0x12a   : > { %v6609_v48 = vpop.f32.mrb[17].mxu0 }
 0x12b   : > { %v8963_v47 = vadd.f32 %v6609_v48, %v6608_v51  ;;  %v6611_v44 = vpop.f32.mrb[18].mxu0  ;;  %v11017_v51 = vld [vmem:[#allocation7_spill] sm:$0xff]  ;;  %v7924_v48 = vld [vmem:[%s10860_s1 + $0x1d0] sm:$0xff]  }
 0x12c   : > { %v6612_v14 = vpop.f32.mrb[19].mxu0 }
 0x12d   : > { %v8965_v20 = vadd.f32 %v6612_v14, %v6611_v44 }
 0x12e   : > { %2049 = vmatmul.mubr.bf16.gmra.mrb[124].mxu0 %v8835_v63 }
 0x12f   : > { %2089 = vmatprep.mubr.bf16.mxu0 %v8863_v50  ;;  %v7923_v50 = vld [vmem:[%s10860_s1 + $0x188] sm:$0xff]  }
 0x131   : > { %v6614_v34 = vpop.f32.mrb[20].mxu0 }
 0x132   : > { %v6615_v24 = vpop.f32.mrb[21].mxu0 }
 0x133   : > { %v8969_v25 = vadd.f32 %v6615_v24, %v6614_v34  ;;  %v6617_v5 = vpop.f32.mrb[22].mxu0 }
 0x134   : > { %v6618_v42 = vpop.f32.mrb[23].mxu0 }
 0x135   : > { %v8977_v40 = vadd.f32 %v6618_v42, %v6617_v5  ;;  %v7925_v5 = vld [vmem:[%s10860_s1 + $0x190] sm:$0xff]   ;;  %v7926_v42 = vld [vmem:[%s10860_s1 + $0x1d8] sm:$0xff]  }
 0x136   : > { %2090 = vmatmul.mubr.bf16.vlgmr.msra.gmra.mrb[128].mxu0 %v11017_v51  ;;  %v11018_v51 = vld [vmem:[#allocation9_spill] sm:$0xff] }
 0x137   : > { %6905 = vmatpush3.bf16.msra.mxu0 %v7921_v56  ;;  %2097 = vmatprep.mubr.bf16.mxu0 %v8885_v3 }
 0x138   : > { %6906 = vmatprep.subr.bf16.mxu0 %v7922_v10 }
 0x139   : > { %v6620_v44 = vpop.f32.mrb[24].mxu0 }
 0x13a   : > { %v6621_v14 = vpop.f32.mrb[25].mxu0 }
 0x13b   : > { %v8987_v34 = vadd.f32 %v6621_v14, %v6620_v44  ;;  %v6623_v24 = vpop.f32.mrb[26].mxu0  ;;  %6907 = vmatpush3.bf16.msra.mxu0 %v7923_v50  ;;  %v7927_v50 = vld [vmem:[%s10860_s1 + $0x198] sm:$0xff]  }
 0x13c   : > { %v6624_v56 = vpop.f32.mrb[27].mxu0  ;;  %6908 = vmatprep.subr.bf16.mxu0 %v7924_v48  ;;  %v7928_v48 = vld [vmem:[%s10860_s1 + $0x1e0] sm:$0xff]  }
 0x13d   : > { %v8995_v10 = vadd.f32 %v6624_v56, %v6623_v24  ;;  %v7929_v56 = vld [vmem:[%s10860_s1 + $0x1a0] sm:$0xff]  }
 0x13e   : > { %2098 = vmatmul.mubr.bf16.gmra.mrb[132].mxu0 %v11018_v51 }
 0x13f   : > { %2105 = vmatprep.mubr.bf16.mxu0 %v8624_v45  ;;  %6909 = vmatpush3.bf16.msra.mxu0 %v7925_v5 }
 0x140   : > { %6910 = vmatprep.subr.bf16.mxu0 %v7926_v42  ;;  %v7930_v42 = vld [vmem:[%s10860_s1 + $0x1e8] sm:$0xff]  }
 0x141   : > { %v6626_v44 = vpop.f32.mrb[28].mxu0 }
 0x142   : > { %v6627_v14 = vpop.f32.mrb[29].mxu0 }
 0x143   : > { %v9005_v3 = vadd.f32 %v6627_v14, %v6626_v44  ;;  %v6629_v24 = vpop.f32.mrb[30].mxu0  ;;  %6911 = vmatpush3.bf16.msra.mxu0 %v7927_v50  ;;  %v7931_v50 = vld [vmem:[%s10860_s1 + $0x1a8] sm:$0xff]  }
 0x144   : > { %v6630_v5 = vpop.f32.mrb[31].mxu0  ;;  %6912 = vmatprep.subr.bf16.mxu0 %v7928_v48  ;;  %v7932_v48 = vld [vmem:[%s10860_s1 + $0x1f0] sm:$0xff]  }
 0x145   : > { %v9013_v45 = vadd.f32 %v6630_v5, %v6629_v24  ;;  %v7933_v5 = vld [vmem:[%s10860_s1 + $0x1b0] sm:$0xff]  }
 0x146   : > { %2106 = vmatmul.mubr.bf16.gmra.mrb[136].mxu0 %v11019_v2 }
 0x147   : > { %2113 = vmatprep.mubr.bf16.mxu0 %v8639_v32  ;;  %6913 = vmatpush3.bf16.msra.mxu0 %v7929_v56 }
 0x148   : > { %6914 = vmatprep.subr.bf16.mxu0 %v7930_v42  ;;  %v7934_v42 = vld [vmem:[%s10860_s1 + $0x1f8] sm:$0xff]  }
 0x149   : > { %v6632_v44 = vpop.f32.mrb[32].mxu0 }
 0x14a   : > { %v6633_v14 = vpop.f32.mrb[33].mxu0 }
 0x14b   : > { %v9023_v60 = vadd.f32 %v6633_v14, %v6632_v44  ;;  %v6635_v24 = vpop.f32.mrb[34].mxu0  ;;  %6915 = vmatpush3.bf16.msra.mxu0 %v7931_v50  ;;  %v7935_v50 = vld [vmem:[%s10860_s1 + $0x1b8] sm:$0xff]  }
 0x14c   : > { %v6636_v56 = vpop.f32.mrb[35].mxu0  ;;  %6916 = vmatprep.subr.bf16.mxu0 %v7932_v48  ;;  %v9041_v48 = vld [vmem:[%s10860_s1 + $0x200] sm:$0xff]  }
 0x14d   : > { %v9031_v32 = vadd.f32 %v6636_v56, %v6635_v24 }
 0x14e   : > { %2114 = vmatmul.mubr.bf16.gmra.mrb[140].mxu0 %v11020_v52 }
 0x14f   : > { %2121 = vmatprep.mubr.bf16.mxu0 %v8649_v11  ;;  %6917 = vmatpush3.bf16.msra.mxu0 %v7933_v5  ;;  %v11021_v11 = vld [vmem:[#allocation15_spill] sm:$0xff] }
 0x150   : > { %6918 = vmatprep.subr.bf16.mxu0 %v7934_v42 }
 0x151   : > { %v6638_v44 = vpop.f32.mrb[36].mxu0 }
 0x152   : > { %v6639_v14 = vpop.f32.mrb[37].mxu0 }
 0x153   : > { %v9043_v19 = vadd.f32 %v6639_v14, %v6638_v44  ;;  %v6641_v24 = vpop.f32.mrb[38].mxu0  ;;  %6919 = vmatpush3.bf16.msra.mxu0 %v7935_v50  ;;  %v11024_v44 = vld [vmem:[#allocation17_spill] sm:$0xff] }
 0x154   : > { %v6642_v56 = vpop.f32.mrb[39].mxu0  ;;  %7193 = vmatprep.subr.bf16.mxu0 %v9041_v48 }
 0x155   : > { %v9046_v5 = vadd.f32 %v6642_v56, %v6641_v24 }
 0x156   : > { %2122 = vmatmul.mubr.bf16.gmra.mrb[144].mxu0 %v11021_v11 }
 0x157   : > { %2129 = vmatprep.mubr.bf16.mxu0 %v8655_v54  ;;  %v11026_v54 = vld [vmem:[#allocation23_spill] sm:$0xff] }
 0x159   : > { %v6644_v42 = vpop.f32.mrb[40].mxu0 }
 0x15a   : > { %v6645_v0 = vpop.f32.mrb[41].mxu0 }
 0x15b   : > { %v9050_v38 = vadd.f32 %v6645_v0, %v6644_v42  ;;  %v6647_v43 = vpop.f32.mrb[42].mxu0 }
 0x15c   : > { %v6648_v9 = vpop.f32.mrb[43].mxu0 }
 0x15d   : > { %11022 = vst [vmem:[#allocation12_spill] sm:$0xff] %v9050_v38  ;;  %v9052_v29 = vadd.f32 %v6648_v9, %v6647_v43 }
 0x15e   : > { %2130 = vmatmul.mubr.bf16.gmra.mrb[148].mxu0 %v11024_v44 }
 0x15f   : > { %11023 = vst [vmem:[#allocation14_spill] sm:$0xff] %v9052_v29  ;;  %2137 = vmatprep.mubr.bf16.mxu0 %v8666_v30 }
 0x161   : > { %v6650_v50 = vpop.f32.mrb[44].mxu0 }
 0x162   : > { %v6651_v14 = vpop.f32.mrb[45].mxu0 }
 0x163   : > { %v9056_v24 = vadd.f32 %v6651_v14, %v6650_v50  ;;  %v6653_v56 = vpop.f32.mrb[46].mxu0 }
 0x164   : > { %v6654_v22 = vpop.f32.mrb[47].mxu0 }
 0x165   : > { %v9058_v49 = vadd.f32 %v6654_v22, %v6653_v56 }
 0x166   : > { %2138 = vmatmul.mubr.bf16.gmra.mrb[152].mxu0 %v11026_v54 }
 0x167   : > { %11025 = vst [vmem:[#allocation16_spill] sm:$0xff] %v9058_v49  ;;  %2145 = vmatprep.mubr.bf16.mxu0 %v8671_v61 }
 0x169   : > { %v6656_v0 = vpop.f32.mrb[48].mxu0 }
 0x16a   : > { %v6657_v42 = vpop.f32.mrb[49].mxu0 }
 0x16b   : > { %v9062_v9 = vadd.f32 %v6657_v42, %v6656_v0  ;;  %v6659_v43 = vpop.f32.mrb[50].mxu0 }
 0x16c   : > { %v6660_v29 = vpop.f32.mrb[51].mxu0 }
 0x16d   : > { %v9064_v38 = vadd.f32 %v6660_v29, %v6659_v43 }
 0x16e   : > { %2146 = vmatmul.mubr.bf16.gmra.mrb[156].mxu0 %v8542_v31 }
 0x16f   : > { %11027 = vst [vmem:[#allocation7_spill] sm:$0xff] %v9064_v38  ;;  %2153 = vmatprep.mubr.bf16.mxu0 %v8700_v17 }
 0x171   : > { %v6662_v50 = vpop.f32.mrb[52].mxu0 }
 0x172   : > { %v6663_v14 = vpop.f32.mrb[53].mxu0 }
 0x173   : > { %v9068_v22 = vadd.f32 %v6663_v14, %v6662_v50  ;;  %v6665_v56 = vpop.f32.mrb[54].mxu0 }
 0x174   : > { %v6666_v30 = vpop.f32.mrb[55].mxu0 }
 0x175   : > { %v9070_v49 = vadd.f32 %v6666_v30, %v6665_v56 }
 0x176   : > { %2154 = vmatmul.mubr.bf16.gmra.mrb[160].mxu0 %v8605_v4 }
 0x177   : > { %11028 = vst [vmem:[#allocation9_spill] sm:$0xff] %v9070_v49  ;;  %2161 = vmatprep.mubr.bf16.mxu0 %v8708_v39 }
 0x179   : > { %v6668_v0 = vpop.f32.mrb[56].mxu0 }
 0x17a   : > { %v6669_v42 = vpop.f32.mrb[57].mxu0 }
 0x17b   : > { %v9074_v29 = vadd.f32 %v6669_v42, %v6668_v0  ;;  %v6671_v43 = vpop.f32.mrb[58].mxu0 }
 0x17c   : > { %v6672_v61 = vpop.f32.mrb[59].mxu0 }
 0x17d   : > { %v9076_v38 = vadd.f32 %v6672_v61, %v6671_v43  ;;  %v9089_v61 = vld [vmem:[%s10861_s2] ss:$0 sm:$0xff] }
 0x17e   : > { %2162 = vmatmul.mubr.bf16.gmra.mrb[164].mxu0 %v8617_v8  ;;  %v1770_v43 = vadd.f32 %v8929_v37, %v9089_v61  ;;  %v1778_v37 = vadd.f32 %v8935_v36, %v9089_v61  ;;  %v897_v36 = vrot.slane %v8951_v62, 5 }
 0x17f   : > { %11029 = vst [vmem:[#allocation11_spill] sm:$0xff] %v9076_v38  ;;  %2169 = vmatprep.mubr.bf16.mxu0 %v8748_v6 }
 0x181   : > { %v6674_v50 = vpop.f32.mrb[60].mxu0 }
 0x182   : > { %v6675_v14 = vpop.f32.mrb[61].mxu0 }
 0x183   : > { %v9080_v30 = vadd.f32 %v6675_v14, %v6674_v50  ;;  %v6677_v56 = vpop.f32.mrb[62].mxu0 }
 0x184   : > { %v6678_v17 = vpop.f32.mrb[63].mxu0 }
 0x185   : > { %11030 = vst [vmem:[#allocation13_spill] sm:$0xff] %v9080_v30  ;;  %v9082_v49 = vadd.f32 %v6678_v17, %v6677_v56  ;;  %v1773_v17 = vadd.f32 %v8931_v41, %v9089_v61 }
 0x186   : > { %2170 = vmatmul.mubr.bf16.gmra.mrb[168].mxu0 %v8704_v23 }
 0x187   : > { %11031 = vst [vmem:[#allocation15_spill] sm:$0xff] %v9082_v49  ;;  %2177 = vmatprep.mubr.bf16.mxu0 %v8778_v1 }
 0x189   : > { %v6696_v0 = vpop.f32.mrb[64].mxu0 }
 0x18a   : > { %v6697_v42 = vpop.f32.mrb[65].mxu0 }
 0x18b   : > { %v6698_v50 = vadd.f32 %v6697_v42, %v6696_v0  ;;  %v6699_v14 = vpop.f32.mrb[66].mxu0 }
 0x18c   : > { %v6700_v6 = vpop.f32.mrb[67].mxu0 }
 0x18d   : > { %v9093_v39 = vadd.f32 %v6698_v50, %v1770_v43  ;;  %v6701_v56 = vadd.f32 %v6700_v6, %v6699_v14  ;;  %v1781_v6 = vadd.f32 %v8937_v18, %v9089_v61  ;;  %v869_v14 = vshrl.u32 %v8948_v35, 16 }
 0x18e   : > { %2178 = vmatmul.mubr.bf16.gmra.mrb[172].mxu0 %v8734_v21 }
 0x18f   : > { %11032 = vst [vmem:[#allocation17_spill] sm:$0xff] %v9093_v39  ;;  %v9098_v1 = vadd.f32 %v6701_v56, %v1773_v17  ;;  %2185 = vmatprep.mubr.bf16.mxu0 %v8800_v13  ;;  %v872_v17 = vshll.u32 %v8948_v35, 16  ;;  %v882_v56 = vshrl.u32 %v8951_v62, 16 }
 0x191   : > { %11033 = vst [vmem:[#allocation23_spill] sm:$0xff] %v9098_v1  ;;  %v6702_v49 = vpop.f32.mrb[68].mxu0 }
 0x192   : > { %v6703_v30 = vpop.f32.mrb[69].mxu0 }
 0x193   : > { %v6704_v0 = vadd.f32 %v6703_v30, %v6702_v49  ;;  %v6705_v42 = vpop.f32.mrb[70].mxu0  ;;  %v878_v49 = vshll.u32 %v8951_v62, 16  ;;  %v1789_v62 = vadd.f32 %v8943_v46, %v9089_v61  ;;  %v1794_v46 = vadd.f32 %v8953_v7, %v9089_v61 }
 0x194   : > { %v6706_v43 = vpop.f32.mrb[71].mxu0 }
 0x195   : > { %v9103_v50 = vadd.f32 %v6704_v0, %v1778_v37  ;;  %v6707_v41 = vadd.f32 %v6706_v43, %v6705_v42  ;;  %v314_v37 = vld [vmem:[%s8162_s16 + $0xc8] sm:$0x1]  ;;  %v871_v0 = vrot.slane %v869_v14, 4  ;;  %v874_v42 = vrot.slane %v872_v17, 5 }
 0x196   : > { %2186 = vmatmul.mubr.bf16.gmra.mrb[176].mxu0 %v8772_v15  ;;  %v1786_v43 = vadd.f32 %v8941_v16, %v9089_v61  ;;  %v880_v39 = vrot.slane %v878_v49, 5  ;;  %v884_v15 = vrot.slane %v882_v56, 4  ;;  %v888_v56 = vshll.u32 %v314_v37, 16 }
 0x197   : > { %11034 = vst [vmem:[#allocation43_spill] sm:$0xff] %v9103_v50  ;;  %v9111_v13 = vadd.f32 %v6707_v41, %v1781_v6  ;;  %2193 = vmatprep.mubr.bf16.mxu0 %v8821_v26  ;;  %v6143_v41 = vrot.slane %v8948_v35, 9  ;;  %v899_v26 = vrot.slane %v897_v36, 4  ;;  %v875_v14 = vor.u32 %v874_v42, %v871_v0 }
 0x198   : > { %v885_v16 = vor.u32 %v884_v15, %v880_v39 }
 0x199   : > { %11035 = vst [vmem:[#allocation44_spill] sm:$0xff] %v9111_v13  ;;  %v6708_v30 = vpop.f32.mrb[72].mxu0  ;;  %v900_v13 = vrot.slane %v314_v37, 5  ;;  %v898_v35 = vsel %vm8190_vm4, %v6143_v41, %v897_v36  ;;  %v1797_v36 = vadd.f32 %v8959_v53, %v9089_v61  ;;  %v1802_v53 = vadd.f32 %v8963_v47, %v9089_v61 }
 0x19a   : > { %v6709_v18 = vpop.f32.mrb[73].mxu0  ;;  %v886_v42 = vrot.slane %v885_v16, 4 }
 0x19b   : > { %v6710_v50 = vadd.f32 %v6709_v18, %v6708_v30  ;;  %v6711_v1 = vpop.f32.mrb[74].mxu0  ;;  %v876_v30 = vrot.slane %v875_v14, 4 }
 0x19c   : > { %v6712_v6 = vpop.f32.mrb[75].mxu0 }
 0x19d   : > { %v9120_v21 = vadd.f32 %v6710_v50, %v1786_v43  ;;  %v6713_v38 = vadd.f32 %v6712_v6, %v6711_v1  ;;  %v901_v50 = vsel %vm8190_vm4, %v899_v26, %v900_v13  ;;  %v890_v43 = vrot.slane %v888_v56, 5 }
 0x19e   : > { %2194 = vmatmul.mubr.bf16.gmra.mrb[180].mxu0 %v8794_v57  ;;  %v881_v26 = vsel %vm8204_vm5, %v876_v30, %v880_v39  ;;  %v9158_v39 = vld [vmem:[%s8162_s16 + $0xcc] sm:$0xf]  ;;  %v9164_v30 = vld [vmem:[%s8162_s16 + $0xd4] sm:$0x1] }
 0x19f   : > { %v9125_v17 = vadd.f32 %v6713_v38, %v1789_v62  ;;  %2201 = vmatprep.mubr.bf16.mxu0 %v8835_v63  ;;  %v9134_v38 = vcombine.low %v898_v35, %v901_v50  ;;  %v891_v7 = vsel %vm8204_vm5, %v886_v42, %v890_v43  ;;  %v6144_v47 = vrot.slane %v9158_v39, 9 }
 0x1a0   : > { %v9148_v14 = vcombine.low %v881_v26, %v891_v7  ;;  %v934_v42 = vrot.slane %v9164_v30, 5 }
 0x1a1   : > { %v6714_v49 = vpop.f32.mrb[76].mxu0 }
 0x1a2   : > { %v6715_v1 = vpop.f32.mrb[77].mxu0 }
 0x1a3   : > { %v6716_v18 = vadd.f32 %v6715_v1, %v6714_v49  ;;  %v6717_v0 = vpop.f32.mrb[78].mxu0  ;;  %v1805_v49 = vadd.f32 %v8965_v20, %v9089_v61  ;;  %v9161_v1 = vld [vmem:[%s8162_s16 + $0xd0] sm:$0xf] }
 0x1a4   : > { %v6718_v15 = vpop.f32.mrb[79].mxu0 }
 0x1a5   : > { %v9136_v37 = vadd.f32 %v6716_v18, %v1794_v46  ;;  %v6719_v6 = vadd.f32 %v6718_v15, %v6717_v0  ;;  %v931_v0 = vrot.slane %v9161_v1, 5 }
 0x1a6   : > { %2202 = vmatmul.mubr.bf16.gmra.mrb[184].mxu0 %v8815_v58 }
 0x1a7   : > { %v9141_v13 = vadd.f32 %v6719_v6, %v1797_v36  ;;  %2209 = vmatprep.mubr.bf16.mxu0 %v9134_v38  ;;  %v9174_v43 = vsel %vm8190_vm4, %v6144_v47, %v931_v0  ;;  %v933_v15 = vrot.slane %v931_v0, 4  ;;  %v1810_v6 = vadd.f32 %v8969_v25, %v9089_v61 }
 0x1a8   : > { %v1818_v0 = vadd.f32 %v8987_v34, %v9089_v61  ;;  %v7940_v34 = vld [vmem:[%s10860_s1 + $0x220] sm:$0xff]  }
 0x1a9   : > { %v6720_v41 = vpop.f32.mrb[80].mxu0 }
 0x1aa   : > { %v6721_v62 = vpop.f32.mrb[81].mxu0 }
 0x1ab   : > { %v6722_v16 = vadd.f32 %v6721_v62, %v6720_v41  ;;  %v6723_v56 = vpop.f32.mrb[82].mxu0  ;;  %v7937_v62 = vld [vmem:[%s10860_s1 + $0x208] sm:$0xff]  }
 0x1ac   : > { %v6724_v35 = vpop.f32.mrb[83].mxu0 }
 0x1ad   : > { %v9152_v50 = vadd.f32 %v6722_v16, %v1802_v53  ;;  %v6725_v46 = vadd.f32 %v6724_v35, %v6723_v56  ;;  %v1813_v56 = vadd.f32 %v8977_v40, %v9089_v61 }
 0x1ae   : > { %2210 = vmatmul.mubr.bf16.gmra.mrb[188].mxu0 %v9148_v14 }
 0x1af   : > { %v9166_v18 = vadd.f32 %v6725_v46, %v1805_v49  ;;  %2250 = vmatprep.mubr.bf16.mxu0 %v11018_v51  ;;  %v9180_v51 = vsel %vm8190_vm4, %v933_v15, %v934_v42  ;;  %v7938_v49 = vld [vmem:[%s10860_s1 + $0x210] sm:$0xff]  }
 0x1b0   : > { %v6198_v53 = vcombine.low %v9174_v43, %v9180_v51 }
 0x1b1   : > { %v6726_v20 = vpop.f32.mrb[84].mxu0 }
 0x1b2   : > { %v6727_v36 = vpop.f32.mrb[85].mxu0 }
 0x1b3   : > { %v6728_v26 = vadd.f32 %v6727_v36, %v6726_v20  ;;  %v6729_v7 = vpop.f32.mrb[86].mxu0  ;;  %v1821_v20 = vadd.f32 %v8995_v10, %v9089_v61 }
 0x1b4   : > { %v6730_v41 = vpop.f32.mrb[87].mxu0 }
 0x1b5   : > { %v9187_v16 = vadd.f32 %v6728_v26, %v1810_v6  ;;  %v6731_v25 = vadd.f32 %v6730_v41, %v6729_v7  ;;  %v1826_v7 = vadd.f32 %v9005_v3, %v9089_v61  ;;  %v7942_v3 = vld [vmem:[%s10860_s1 + $0x230] sm:$0xff]  }
 0x1b6   : > { %2251 = vmatmul.mubr.bf16.vlgmr.msra.gmra.mrb[192].mxu0 %v11010_v28 }
 0x1b7   : > { %v9192_v35 = vadd.f32 %v6731_v25, %v1813_v56  ;;  %7194 = vmatpush3.bf16.msra.mxu0 %v9041_v48  ;;  %2258 = vmatprep.mubr.bf16.mxu0 %v11019_v2  ;;  %v7939_v48 = vld [vmem:[%s10860_s1 + $0x218] sm:$0xff]   ;;  %v1829_v56 = vadd.f32 %v9013_v45, %v9089_v61 }
 0x1b8   : > { %7195 = vmatprep.subr.bf16.mxu0 %v7937_v62 }
 0x1b9   : > { %v6732_v46 = vpop.f32.mrb[88].mxu0 }
 0x1ba   : > { %v6733_v47 = vpop.f32.mrb[89].mxu0 }
 0x1bb   : > { %v6734_v40 = vadd.f32 %v6733_v47, %v6732_v46  ;;  %v6735_v42 = vpop.f32.mrb[90].mxu0  ;;  %7196 = vmatpush3.bf16.msra.mxu0 %v7937_v62 }
 0x1bc   : > { %v6736_v28 = vpop.f32.mrb[91].mxu0  ;;  %7197 = vmatprep.subr.bf16.mxu0 %v7938_v49 }
 0x1bd   : > { %v9204_v2 = vadd.f32 %v6734_v40, %v1818_v0  ;;  %v6737_v15 = vadd.f32 %v6736_v28, %v6735_v42  ;;  %v1834_v0 = vadd.f32 %v9023_v60, %v9089_v61 }
 0x1be   : > { %2259 = vmatmul.mubr.bf16.gmra.mrb[196].mxu0 %v11011_v12 }
 0x1bf   : > { %v9209_v36 = vadd.f32 %v6737_v15, %v1821_v20  ;;  %2266 = vmatprep.mubr.bf16.mxu0 %v11020_v52  ;;  %7198 = vmatpush3.bf16.msra.mxu0 %v7938_v49  ;;  %v7941_v52 = vld [vmem:[%s10860_s1 + $0x228] sm:$0xff]  }
 0x1c0   : > { %7199 = vmatprep.subr.bf16.mxu0 %v7939_v48 }
 0x1c1   : > { %v6738_v6 = vpop.f32.mrb[92].mxu0 }
 0x1c2   : > { %v6739_v26 = vpop.f32.mrb[93].mxu0 }
 0x1c3   : > { %v6740_v41 = vadd.f32 %v6739_v26, %v6738_v6  ;;  %v6741_v10 = vpop.f32.mrb[94].mxu0  ;;  %7200 = vmatpush3.bf16.msra.mxu0 %v7939_v48 }
 0x1c4   : > { %v6742_v62 = vpop.f32.mrb[95].mxu0  ;;  %7201 = vmatprep.subr.bf16.mxu0 %v7940_v34 }
 0x1c5   : > { %v9220_v12 = vadd.f32 %v6740_v41, %v1826_v7  ;;  %v6743_v25 = vadd.f32 %v6742_v62, %v6741_v10  ;;  %v1845_v7 = vadd.f32 %v9046_v5, %v9089_v61  ;;  %v11036_v10 = vld [vmem:[#allocation22_spill] sm:$0xff] }
 0x1c6   : > { %2267 = vmatmul.mubr.bf16.gmra.mrb[200].mxu0 %v11013_v59  ;;  %v1837_v59 = vadd.f32 %v9031_v32, %v9089_v61 }
 0x1c7   : > { %v9225_v49 = vadd.f32 %v6743_v25, %v1829_v56  ;;  %2274 = vmatprep.mubr.bf16.mxu0 %v11021_v11  ;;  %7202 = vmatpush3.bf16.msra.mxu0 %v7940_v34  ;;  %v7943_v11 = vld [vmem:[%s10860_s1 + $0x238] sm:$0xff]   ;;  %v1842_v34 = vadd.f32 %v9043_v19, %v9089_v61  ;;  %v11037_v19 = vld [vmem:[#allocation12_spill] sm:$0xff] }
 0x1c8   : > { %7203 = vmatprep.subr.bf16.mxu0 %v7941_v52  ;;  %v1850_v56 = vadd.f32 %v11037_v19, %v9089_v61 }
 0x1c9   : > { %v6744_v46 = vpop.f32.mrb[96].mxu0 }
 0x1ca   : > { %v6745_v47 = vpop.f32.mrb[97].mxu0 }
 0x1cb   : > { %v6746_v40 = vadd.f32 %v6745_v47, %v6744_v46  ;;  %v6747_v45 = vpop.f32.mrb[98].mxu0  ;;  %7204 = vmatpush3.bf16.msra.mxu0 %v7941_v52  ;;  %v11038_v47 = vld [vmem:[#allocation14_spill] sm:$0xff] }
 0x1cc   : > { %v6748_v42 = vpop.f32.mrb[99].mxu0  ;;  %7205 = vmatprep.subr.bf16.mxu0 %v7942_v3  ;;  %v1853_v5 = vadd.f32 %v11038_v47, %v9089_v61  ;;  %v11043_v47 = vld [vmem:[#allocation27_spill] sm:$0xff] }
 0x1cd   : > { %v9238_v28 = vadd.f32 %v6746_v40, %v1834_v0  ;;  %v6749_v48 = vadd.f32 %v6748_v42, %v6747_v45  ;;  %v11039_v45 = vld [vmem:[#allocation25_spill] sm:$0xff] }
 0x1ce   : > { %2275 = vmatmul.mubr.bf16.gmra.mrb[204].mxu0 %v11014_v55 }
 0x1cf   : > { %v9241_v20 = vadd.f32 %v6749_v48, %v1837_v59  ;;  %2282 = vmatprep.mubr.bf16.mxu0 %v11024_v44  ;;  %7206 = vmatpush3.bf16.msra.mxu0 %v7942_v3  ;;  %v1858_v59 = vadd.f32 %v9056_v24, %v9089_v61  ;;  %v1866_v24 = vadd.f32 %v9062_v9, %v9089_v61 }
 0x1d0   : > { %7207 = vmatprep.subr.bf16.mxu0 %v7943_v11  ;;  %v1874_v9 = vadd.f32 %v9068_v22, %v9089_v61  ;;  %v1882_v22 = vadd.f32 %v9074_v29, %v9089_v61 }
 0x1d1   : > { %v6750_v60 = vpop.f32.mrb[100].mxu0 }
 0x1d2   : > { %v6751_v15 = vpop.f32.mrb[101].mxu0 }
 0x1d3   : > { %v6752_v6 = vadd.f32 %v6751_v15, %v6750_v60  ;;  %v6753_v26 = vpop.f32.mrb[102].mxu0  ;;  %7208 = vmatpush3.bf16.msra.mxu0 %v7943_v11 }
 0x1d4   : > { %v6754_v32 = vpop.f32.mrb[103].mxu0 }
 0x1d5   : > { %v9248_v41 = vadd.f32 %v6752_v6, %v1842_v34  ;;  %v6755_v55 = vadd.f32 %v6754_v32, %v6753_v26  ;;  %v11040_v34 = vld [vmem:[#allocation16_spill] sm:$0xff] }
 0x1d6   : > { %2283 = vmatmul.mubr.bf16.gmra.mrb[208].mxu0 %v11036_v10  ;;  %v1861_v6 = vadd.f32 %v11040_v34, %v9089_v61  ;;  %v11045_v34 = vld [vmem:[#allocation21_spill] sm:$0xff] }
 0x1d7   : > { %v9251_v44 = vadd.f32 %v6755_v55, %v1845_v7  ;;  %2290 = vmatprep.mubr.bf16.mxu0 %v11026_v54  ;;  %v11041_v7 = vld [vmem:[#allocation26_spill] sm:$0xff] }
 0x1d9   : > { %v6756_v62 = vpop.f32.mrb[104].mxu0 }
 0x1da   : > { %v6757_v52 = vpop.f32.mrb[105].mxu0 }
 0x1db   : > { %v6758_v25 = vadd.f32 %v6757_v52, %v6756_v62  ;;  %v6759_v3 = vpop.f32.mrb[106].mxu0 }
 0x1dc   : > { %v6760_v46 = vpop.f32.mrb[107].mxu0 }
 0x1dd   : > { %v9258_v0 = vadd.f32 %v6758_v25, %v1850_v56  ;;  %v6761_v40 = vadd.f32 %v6760_v46, %v6759_v3  ;;  %v11042_v56 = vld [vmem:[#allocation7_spill] sm:$0xff] }
 0x1de   : > { %2291 = vmatmul.mubr.bf16.gmra.mrb[212].mxu0 %v11039_v45  ;;  %v1869_v25 = vadd.f32 %v11042_v56, %v9089_v61  ;;  %v11047_v56 = vld [vmem:[#allocation19_spill] sm:$0xff] }
 0x1df   : > { %v9261_v42 = vadd.f32 %v6761_v40, %v1853_v5  ;;  %2298 = vmatprep.mubr.bf16.mxu0 %v8542_v31 }
 0x1e1   : > { %v6762_v54 = vpop.f32.mrb[108].mxu0 }
 0x1e2   : > { %v6763_v11 = vpop.f32.mrb[109].mxu0 }
 0x1e3   : > { %v6764_v48 = vadd.f32 %v6763_v11, %v6762_v54  ;;  %v6765_v60 = vpop.f32.mrb[110].mxu0 }
 0x1e4   : > { %v6766_v15 = vpop.f32.mrb[111].mxu0 }
 0x1e5   : > { %v9268_v26 = vadd.f32 %v6764_v48, %v1858_v59  ;;  %v6767_v32 = vadd.f32 %v6766_v15, %v6765_v60  ;;  %v11044_v59 = vld [vmem:[#allocation9_spill] sm:$0xff] }
 0x1e6   : > { %2299 = vmatmul.mubr.bf16.gmra.mrb[216].mxu0 %v11041_v7  ;;  %v1877_v48 = vadd.f32 %v11044_v59, %v9089_v61 }
 0x1e7   : > { %v9271_v55 = vadd.f32 %v6767_v32, %v1861_v6  ;;  %2306 = vmatprep.mubr.bf16.mxu0 %v8605_v4 }
 0x1e9   : > { %v6768_v31 = vpop.f32.mrb[112].mxu0 }
 0x1ea   : > { %v6769_v10 = vpop.f32.mrb[113].mxu0 }
 0x1eb   : > { %v6770_v62 = vadd.f32 %v6769_v10, %v6768_v31  ;;  %v6771_v52 = vpop.f32.mrb[114].mxu0 }
 0x1ec   : > { %v6772_v19 = vpop.f32.mrb[115].mxu0 }
 0x1ed   : > { %v9278_v3 = vadd.f32 %v6770_v62, %v1866_v24  ;;  %v6773_v46 = vadd.f32 %v6772_v19, %v6771_v52  ;;  %v11046_v24 = vld [vmem:[#allocation11_spill] sm:$0xff] }
 0x1ee   : > { %2307 = vmatmul.mubr.bf16.gmra.mrb[220].mxu0 %v11043_v47  ;;  %v1885_v62 = vadd.f32 %v11046_v24, %v9089_v61  ;;  %v11053_v24 = vld [vmem:[#allocation17_spill] sm:$0xff] }
 0x1ef   : > { %v9281_v5 = vadd.f32 %v6773_v46, %v1869_v25  ;;  %2314 = vmatprep.mubr.bf16.mxu0 %v8617_v8  ;;  %v11048_v46 = vld [vmem:[#allocation18_spill] sm:$0xff] }
 0x1f1   : > { %v6774_v4 = vpop.f32.mrb[116].mxu0 }
 0x1f2   : > { %v6775_v40 = vpop.f32.mrb[117].mxu0 }
 0x1f3   : > { %v6776_v45 = vadd.f32 %v6775_v40, %v6774_v4  ;;  %v6777_v54 = vpop.f32.mrb[118].mxu0  ;;  %v11049_v4 = vld [vmem:[#allocation13_spill] sm:$0xff] }
 0x1f4   : > { %v6778_v11 = vpop.f32.mrb[119].mxu0  ;;  %v1890_v29 = vadd.f32 %v11049_v4, %v9089_v61  ;;  %v912_v4 = vshll.u32 %v9161_v1, 16 }
 0x1f5   : > { %v9288_v60 = vadd.f32 %v6776_v45, %v1874_v9  ;;  %v6779_v15 = vadd.f32 %v6778_v11, %v6777_v54  ;;  %v11050_v54 = vld [vmem:[#allocation15_spill] sm:$0xff] }
 0x1f6   : > { %2315 = vmatmul.mubr.bf16.gmra.mrb[224].mxu0 %v11045_v34  ;;  %v1893_v11 = vadd.f32 %v11050_v54, %v9089_v61  ;;  %v11055_v61 = vld [vmem:[#allocation23_spill] sm:$0xff] }
 0x1f7   : > { %v9291_v6 = vadd.f32 %v6779_v15, %v1877_v48  ;;  %2322 = vmatprep.mubr.bf16.mxu0 %v8704_v23  ;;  %v11051_v15 = vld [vmem:[#allocation24_spill] sm:$0xff] }
 0x1f9   : > { %v6780_v8 = vpop.f32.mrb[120].mxu0 }
 0x1fa   : > { %v6781_v32 = vpop.f32.mrb[121].mxu0 }
 0x1fb   : > { %v6782_v7 = vadd.f32 %v6781_v32, %v6780_v8  ;;  %v6783_v31 = vpop.f32.mrb[122].mxu0  ;;  %v11052_v8 = vld [vmem:[#allocation20_spill] sm:$0xff] }
 0x1fc   : > { %v6784_v10 = vpop.f32.mrb[123].mxu0 }
 0x1fd   : > { %v9298_v52 = vadd.f32 %v6782_v7, %v1882_v22  ;;  %v6785_v19 = vadd.f32 %v6784_v10, %v6783_v31 }
 0x1fe   : > { %2323 = vmatmul.mubr.bf16.gmra.mrb[228].mxu0 %v11047_v56  ;;  %v11054_v56 = vld [vmem:[#allocation38_spill] sm:$0xff] }
 0x1ff   : > { %v9301_v25 = vadd.f32 %v6785_v19, %v1885_v62  ;;  %2330 = vmatprep.mubr.bf16.mxu0 %v11048_v46 }
 0x201   : > { %v6786_v23 = vpop.f32.mrb[124].mxu0 }
 0x202   : > { %v6787_v47 = vpop.f32.mrb[125].mxu0 }
 0x203   : > { %v6788_v40 = vadd.f32 %v6787_v47, %v6786_v23  ;;  %v6789_v9 = vpop.f32.mrb[126].mxu0  ;;  %v903_v23 = vshrl.u32 %v9158_v39, 16  ;;  %v906_v47 = vshll.u32 %v9158_v39, 16 }
 0x204   : > { %v6790_v45 = vpop.f32.mrb[127].mxu0 }
 0x205   : > { %v9308_v59 = vadd.f32 %v6788_v40, %v1890_v29  ;;  %v6791_v48 = vadd.f32 %v6790_v45, %v6789_v9  ;;  %v916_v29 = vshrl.u32 %v9161_v1, 16 }
 0x206   : > { %2331 = vmatmul.mubr.bf16.gmra.mrb[232].mxu0 %v11051_v15  ;;  %v908_v15 = vrot.slane %v906_v47, 5 }
 0x207   : > { %v9311_v34 = vadd.f32 %v6791_v48, %v1893_v11  ;;  %2338 = vmatprep.mubr.bf16.mxu0 %v11052_v8  ;;  %v905_v48 = vrot.slane %v903_v23, 4  ;;  %v914_v8 = vrot.slane %v912_v4, 5 }
 0x209   : > { %v6808_v32 = vpop.f32.mrb[128].mxu0 }
 0x20a   : > { %v6809_v22 = vpop.f32.mrb[129].mxu0 }
 0x20b   : > { %v6810_v7 = vadd.f32 %v6809_v22, %v6808_v32  ;;  %v6811_v31 = vpop.f32.mrb[130].mxu0  ;;  %v918_v32 = vrot.slane %v916_v29, 4  ;;  %v11056_v22 = vld [vmem:[#allocation43_spill] sm:$0xff] }
 0x20c   : > { %v6812_v10 = vpop.f32.mrb[131].mxu0 }
 0x20d   : > { %v9315_v62 = vadd.f32 %v6810_v7, %v11053_v24  ;;  %v6813_v19 = vadd.f32 %v6812_v10, %v6811_v31  ;;  %v11057_v31 = vld [vmem:[#allocation40_spill] sm:$0xff] }
 0x20e   : > { %2339 = vmatmul.mubr.bf16.gmra.mrb[236].mxu0 %v11054_v56  ;;  %v11058_v10 = vld [vmem:[#allocation44_spill] sm:$0xff]  ;;  %v919_v56 = vor.u32 %v918_v32, %v914_v8 }
 0x20f   : > { %v9319_v46 = vadd.f32 %v6813_v19, %v11055_v61  ;;  %2346 = vmatprep.mubr.bf16.mxu0 %v8794_v57  ;;  %v909_v19 = vor.u32 %v908_v15, %v905_v48  ;;  %v922_v61 = vshll.u32 %v9164_v30, 16 }
 0x211   : > { %v6814_v40 = vpop.f32.mrb[132].mxu0 }
 0x212   : > { %v6815_v9 = vpop.f32.mrb[133].mxu0 }
 0x213   : > { %v6816_v45 = vadd.f32 %v6815_v9, %v6814_v40  ;;  %v6817_v54 = vpop.f32.mrb[134].mxu0  ;;  %v910_v9 = vrot.slane %v909_v19, 4 }
 0x214   : > { %v6818_v11 = vpop.f32.mrb[135].mxu0 }
 0x215   : > { %v9327_v7 = vadd.f32 %v6816_v45, %v11056_v22  ;;  %v6819_v57 = vadd.f32 %v6818_v11, %v6817_v54  ;;  %v920_v45 = vrot.slane %v919_v56, 4  ;;  %v924_v22 = vrot.slane %v922_v61, 5 }
 0x216   : > { %2347 = vmatmul.mubr.bf16.gmra.mrb[240].mxu0 %v11057_v31  ;;  %v915_v30 = vsel %vm8204_vm5, %v910_v9, %v914_v8 }
 0x217   : > { %v9331_v24 = vadd.f32 %v6819_v57, %v11058_v10  ;;  %2354 = vmatprep.mubr.bf16.mxu0 %v8815_v58  ;;  %v11059_v57 = vld [vmem:[#allocation42_spill] sm:$0xff]  ;;  %v925_v48 = vsel %vm8204_vm5, %v920_v45, %v924_v22  ;;  %v11061_v22 = vld [vmem:[#allocation8_spill] sm:$0xff] }
 0x219   : > { %v6820_v40 = vpop.f32.mrb[136].mxu0 }
 0x21a   : > { %v6821_v23 = vpop.f32.mrb[137].mxu0 }
 0x21b   : > { %v6822_v47 = vadd.f32 %v6821_v23, %v6820_v40  ;;  %v6823_v4 = vpop.f32.mrb[138].mxu0  ;;  %v6196_v23 = vcombine.low %v9158_v39, %v9161_v1 }
 0x21c   : > { %v6824_v29 = vpop.f32.mrb[139].mxu0 }
 0x21d   : > { %v9336_v54 = vadd.f32 %v6822_v47, %v9120_v21  ;;  %v6825_v11 = vadd.f32 %v6824_v29, %v6823_v4  ;;  %v6197_v21 = vcombine.low %v915_v30, %v925_v48 }
 0x21e   : > { %2355 = vmatmul.mubr.bf16.gmra.mrb[244].mxu0 %v11059_v57 }
 0x21f   : > { %v9340_v58 = vadd.f32 %v6825_v11, %v9125_v17  ;;  %2362 = vmatprep.mubr.bf16.mxu0 %v9148_v14  ;;  %v11060_v17 = vld [vmem:[#allocation10_spill] sm:$0xff] }
 0x221   : > { %v6826_v15 = vpop.f32.mrb[140].mxu0 }
 0x222   : > { %v6827_v32 = vpop.f32.mrb[141].mxu0 }
 0x223   : > { %v6828_v31 = vadd.f32 %v6827_v32, %v6826_v15  ;;  %v6829_v10 = vpop.f32.mrb[142].mxu0  ;;  %v11062_v15 = vld [vmem:[#allocation28_spill] sm:$0xff]  ;;  %v11063_v32 = vld [vmem:[#allocation29_spill] sm:$0xff] }
 0x224   : > { %v6830_v19 = vpop.f32.mrb[143].mxu0 }
 0x225   : > { %v9348_v56 = vadd.f32 %v6828_v31, %v9136_v37  ;;  %v6831_v61 = vadd.f32 %v6830_v19, %v6829_v10 }
 0x226   : > { %2363 = vmatmul.mubr.bf16.gmra.mrb[248].mxu0 %v11060_v17 }
 0x227   : > { %v9352_v14 = vadd.f32 %v6831_v61, %v9141_v13  ;;  %2370 = vmatprep.mubr.bf16.mxu0 %v6197_v21 }
 0x229   : > { %v6832_v8 = vpop.f32.mrb[144].mxu0 }
 0x22a   : > { %v6833_v40 = vpop.f32.mrb[145].mxu0 }
 0x22b   : > { %v6834_v47 = vadd.f32 %v6833_v40, %v6832_v8  ;;  %v6835_v4 = vpop.f32.mrb[146].mxu0  ;;  %v11064_v8 = vld [vmem:[#allocation30_spill] sm:$0xff]  ;;  %v11065_v40 = vld [vmem:[#allocation31_spill] sm:$0xff] }
 0x22c   : > { %v6836_v29 = vpop.f32.mrb[147].mxu0 }
 0x22d   : > { %v9357_v9 = vadd.f32 %v6834_v47, %v9152_v50  ;;  %v6837_v37 = vadd.f32 %v6836_v29, %v6835_v4 }
 0x22e   : > { %2371 = vmatmul.mubr.bf16.gmra.mrb[252].mxu0 %v6196_v23 }
 0x22f   : > { %v9360_v45 = vadd.f32 %v6837_v37, %v9166_v18  ;;  %7209 = vmatprep.mubr.bf16.mxu0 %v11061_v22 }
 0x231   : > { %v6838_v13 = vpop.f32.mrb[148].mxu0 }
 0x232   : > { %v6839_v11 = vpop.f32.mrb[149].mxu0 }
 0x233   : > { %v6840_v57 = vadd.f32 %v6839_v11, %v6838_v13  ;;  %v6841_v30 = vpop.f32.mrb[150].mxu0  ;;  %v11066_v13 = vld [vmem:[#allocation32_spill] sm:$0xff]  ;;  %v11067_v11 = vld [vmem:[#allocation33_spill] sm:$0xff] }
 0x234   : > { %v6842_v48 = vpop.f32.mrb[151].mxu0 }
 0x235   : > { %v9364_v39 = vadd.f32 %v6840_v57, %v9187_v16  ;;  %v6843_v1 = vadd.f32 %v6842_v48, %v6841_v30 }
 0x236   : > { %7210 = vmatmul.mubr.bf16.vlgmr.msra.gmra.mrb[0].mxu0 %v11062_v15 }
 0x237   : > { %v9368_v50 = vadd.f32 %v6843_v1, %v9192_v35  ;;  %7213 = vmatprep.mubr.bf16.mxu0 %v11063_v32 }
 0x239   : > { %v6844_v18 = vpop.f32.mrb[152].mxu0 }
 0x23a   : > { %v6845_v31 = vpop.f32.mrb[153].mxu0 }
 0x23b   : > { %v6846_v10 = vadd.f32 %v6845_v31, %v6844_v18  ;;  %v6847_v21 = vpop.f32.mrb[154].mxu0  ;;  %v11068_v18 = vld [vmem:[#allocation34_spill] sm:$0xff]  ;;  %v11069_v31 = vld [vmem:[#allocation35_spill] sm:$0xff] }
 0x23c   : > { %v6848_v19 = vpop.f32.mrb[155].mxu0 }
 0x23d   : > { %v9372_v61 = vadd.f32 %v6846_v10, %v9204_v2  ;;  %v6849_v17 = vadd.f32 %v6848_v19, %v6847_v21 }
 0x23e   : > { %7214 = vmatmul.mubr.bf16.gmra.mrb[4].mxu0 %v11064_v8 }
 0x23f   : > { %v9376_v16 = vadd.f32 %v6849_v17, %v9209_v36  ;;  %7217 = vmatprep.mubr.bf16.mxu0 %v11065_v40 }
 0x241   : > { %v6850_v35 = vpop.f32.mrb[156].mxu0 }
 0x242   : > { %v6851_v23 = vpop.f32.mrb[157].mxu0 }
 0x243   : > { %v6852_v47 = vadd.f32 %v6851_v23, %v6850_v35  ;;  %v6853_v4 = vpop.f32.mrb[158].mxu0  ;;  %v11070_v35 = vld [vmem:[#allocation36_spill] sm:$0xff]  ;;  %v11071_v23 = vld [vmem:[#allocation37_spill] sm:$0xff] }
 0x244   : > { %v6854_v29 = vpop.f32.mrb[159].mxu0 }
 0x245   : > { %v9380_v37 = vadd.f32 %v6852_v47, %v9220_v12  ;;  %v6855_v22 = vadd.f32 %v6854_v29, %v6853_v4 }
 0x246   : > { %7218 = vmatmul.mubr.bf16.gmra.mrb[8].mxu0 %v11066_v13 }
 0x247   : > { %v9384_v2 = vadd.f32 %v6855_v22, %v9225_v49  ;;  %7221 = vmatprep.mubr.bf16.mxu0 %v11067_v11 }
 0x249   : > { %v6856_v36 = vpop.f32.mrb[160].mxu0 }
 0x24a   : > { %v6857_v57 = vpop.f32.mrb[161].mxu0 }
 0x24b   : > { %v6858_v30 = vadd.f32 %v6857_v57, %v6856_v36  ;;  %v6859_v48 = vpop.f32.mrb[162].mxu0  ;;  %v11072_v36 = vld [vmem:[#allocation39_spill] sm:$0xff]  ;;  %v11073_v57 = vld [vmem:[#allocation41_spill] sm:$0xff] }
 0x24c   : > { %v6860_v1 = vpop.f32.mrb[163].mxu0 }
 0x24d   : > { %v9388_v15 = vadd.f32 %v6858_v30, %v9238_v28  ;;  %v6861_v32 = vadd.f32 %v6860_v1, %v6859_v48 }
 0x24e   : > { %7222 = vmatmul.mubr.bf16.gmra.mrb[12].mxu0 %v11068_v18 }
 0x24f   : > { %v9392_v12 = vadd.f32 %v6861_v32, %v9241_v20  ;;  %7225 = vmatprep.mubr.bf16.mxu0 %v11069_v31 }
 0x251   : > { %v6862_v49 = vpop.f32.mrb[164].mxu0 }
 0x252   : > { %v6863_v10 = vpop.f32.mrb[165].mxu0 }
 0x253   : > { %v6864_v21 = vadd.f32 %v6863_v10, %v6862_v49  ;;  %v6865_v19 = vpop.f32.mrb[166].mxu0 }
 0x254   : > { %v6866_v17 = vpop.f32.mrb[167].mxu0 }
 0x255   : > { %v9396_v8 = vadd.f32 %v6864_v21, %v9248_v41  ;;  %v6867_v40 = vadd.f32 %v6866_v17, %v6865_v19 }
 0x256   : > { %7226 = vmatmul.mubr.bf16.gmra.mrb[16].mxu0 %v11070_v35 }
 0x257   : > { %v9400_v28 = vadd.f32 %v6867_v40, %v9251_v44  ;;  %7229 = vmatprep.mubr.bf16.mxu0 %v11071_v23 }
 0x259   : > { %v6868_v20 = vpop.f32.mrb[168].mxu0 }
 0x25a   : > { %v6869_v47 = vpop.f32.mrb[169].mxu0 }
 0x25b   : > { %v6870_v4 = vadd.f32 %v6869_v47, %v6868_v20  ;;  %v6871_v29 = vpop.f32.mrb[170].mxu0 }
 0x25c   : > { %v6872_v22 = vpop.f32.mrb[171].mxu0 }
 0x25d   : > { %v9404_v13 = vadd.f32 %v6870_v4, %v9258_v0  ;;  %v6873_v11 = vadd.f32 %v6872_v22, %v6871_v29 }
 0x25e   : > { %7230 = vmatmul.mubr.bf16.gmra.mrb[20].mxu0 %v11072_v36 }
 0x25f   : > { %v9408_v41 = vadd.f32 %v6873_v11, %v9261_v42  ;;  %7233 = vmatprep.mubr.bf16.mxu0 %v11073_v57 }
 0x261   : > { %v6874_v44 = vpop.f32.mrb[172].mxu0 }
 0x262   : > { %v6875_v30 = vpop.f32.mrb[173].mxu0 }
 0x263   : > { %v6876_v48 = vadd.f32 %v6875_v30, %v6874_v44  ;;  %v6877_v1 = vpop.f32.mrb[174].mxu0 }
 0x264   : > { %v6878_v32 = vpop.f32.mrb[175].mxu0 }
 0x265   : > { %v9412_v18 = vadd.f32 %v6876_v48, %v9268_v26  ;;  %v6879_v31 = vadd.f32 %v6878_v32, %v6877_v1 }
 0x266   : > { %7234 = vmatmul.mubr.bf16.gmra.mrb[24].mxu0 %v8835_v63 }
 0x267   : > { %v9416_v0 = vadd.f32 %v6879_v31, %v9271_v55  ;;  %7237 = vmatprep.mubr.bf16.mxu0 %v9134_v38 }
 0x269   : > { %v6880_v42 = vpop.f32.mrb[176].mxu0 }
 0x26a   : > { %v6881_v49 = vpop.f32.mrb[177].mxu0 }
 0x26b   : > { %v6882_v10 = vadd.f32 %v6881_v49, %v6880_v42  ;;  %v6883_v21 = vpop.f32.mrb[178].mxu0 }
 0x26c   : > { %v6884_v19 = vpop.f32.mrb[179].mxu0 }
 0x26d   : > { %v9420_v17 = vadd.f32 %v6882_v10, %v9278_v3  ;;  %v6885_v40 = vadd.f32 %v6884_v19, %v6883_v21  ;;  %v8040_v21 = vmov 0  }
 0x26e   : > { %7238 = vmatmul.mubr.bf16.gmra.mrb[28].mxu0 %v6198_v53  ;;  %2740 = vst.msk [vmem:[#allocation2 + $0x18] sm:$0xf] %vm2700_vm6, %v8040_v21  ;;  %2733 = vst.msk [vmem:[#allocation2] sm:$0xf] %vm2700_vm6, %v8040_v21 }
 0x26f   : > { %v9426_v63 = vadd.f32 %v6885_v40, %v9281_v5  ;;  %2734 = vst.msk [vmem:[#allocation2 + $0x4] sm:$0xf] %vm2700_vm6, %v8040_v21  ;;  %2737 = vst.msk [vmem:[#allocation2 + $0xc] sm:$0xf] %vm2700_vm6, %v8040_v21 }
 0x270   : > { %2738 = vst.msk [vmem:[#allocation2 + $0x10] sm:$0xf] %vm2700_vm6, %v8040_v21  ;;  %2741 = vst.msk [vmem:[#allocation2 + $0x1c] sm:$0xf] %vm2700_vm6, %v8040_v21 }
 0x271   : > { %v6886_v26 = vpop.f32.mrb[180].mxu0  ;;  %2743 = vst.msk [vmem:[#allocation2 + $0x24] sm:$0xf] %vm2700_vm6, %v8040_v21  ;;  %2744 = vst.msk [vmem:[#allocation2 + $0x28] sm:$0xf] %vm2700_vm6, %v8040_v21 }
 0x272   : > { %v6887_v55 = vpop.f32.mrb[181].mxu0  ;;  %2746 = vst.msk [vmem:[#allocation2 + $0x30] sm:$0xf] %vm2700_vm6, %v8040_v21  ;;  %2747 = vst.msk [vmem:[#allocation2 + $0x34] sm:$0xf] %vm2700_vm6, %v8040_v21 }
 0x273   : > { %v6888_v35 = vadd.f32 %v6887_v55, %v6886_v26  ;;  %v6889_v38 = vpop.f32.mrb[182].mxu0  ;;  %2749 = vst.msk [vmem:[#allocation2 + $0x3c] sm:$0xf] %vm2700_vm6, %v8040_v21  ;;  %2750 = vst.msk [vmem:[#allocation2 + $0x40] sm:$0xf] %vm2700_vm6, %v8040_v21 }
 0x274   : > { %v6890_v23 = vpop.f32.mrb[183].mxu0  ;;  %2752 = vst.msk [vmem:[#allocation2 + $0x48] sm:$0xf] %vm2700_vm6, %v8040_v21  ;;  %2753 = vst.msk [vmem:[#allocation2 + $0x4c] sm:$0xf] %vm2700_vm6, %v8040_v21 }
 0x275   : > { %v9429_v20 = vadd.f32 %v6888_v35, %v9288_v60  ;;  %v6891_v47 = vadd.f32 %v6890_v23, %v6889_v38  ;;  %2755 = vst.msk [vmem:[#allocation2 + $0x54] sm:$0xf] %vm2700_vm6, %v8040_v21  ;;  %2756 = vst.msk [vmem:[#allocation2 + $0x58] sm:$0xf] %vm2700_vm6, %v8040_v21 }
 0x276   : > { %2758 = vst.msk [vmem:[#allocation2 + $0x60] sm:$0xf] %vm2700_vm6, %v8040_v21  ;;  %2759 = vst.msk [vmem:[#allocation2 + $0x64] sm:$0xf] %vm2700_vm6, %v8040_v21 }
 0x277   : > { %v9432_v3 = vadd.f32 %v6891_v47, %v9291_v6  ;;  %2761 = vst.msk [vmem:[#allocation2 + $0x6c] sm:$0xf] %vm2700_vm6, %v8040_v21  ;;  %2762 = vst.msk [vmem:[#allocation2 + $0x70] sm:$0xf] %vm2700_vm6, %v8040_v21 }
 0x278   : > { %2764 = vst.msk [vmem:[#allocation2 + $0x78] sm:$0xf] %vm2700_vm6, %v8040_v21  ;;  %2765 = vst.msk [vmem:[#allocation2 + $0x7c] sm:$0xf] %vm2700_vm6, %v8040_v21 }
 0x279   : > { %v6892_v4 = vpop.f32.mrb[184].mxu0  ;;  %2767 = vst.msk [vmem:[#allocation2 + $0x84] sm:$0xf] %vm2700_vm6, %v8040_v21  ;;  %2768 = vst.msk [vmem:[#allocation2 + $0x88] sm:$0xf] %vm2700_vm6, %v8040_v21 }
 0x27a   : > { %v6893_v29 = vpop.f32.mrb[185].mxu0  ;;  %2770 = vst.msk [vmem:[#allocation2 + $0x90] sm:$0xf] %vm2700_vm6, %v8040_v21  ;;  %2771 = vst.msk [vmem:[#allocation2 + $0x94] sm:$0xf] %vm2700_vm6, %v8040_v21 }
 0x27b   : > { %v6894_v22 = vadd.f32 %v6893_v29, %v6892_v4  ;;  %v6895_v43 = vpop.f32.mrb[186].mxu0  ;;  %2773 = vst.msk [vmem:[#allocation2 + $0x9c] sm:$0xf] %vm2700_vm6, %v8040_v21  ;;  %2774 = vst.msk [vmem:[#allocation2 + $0xa0] sm:$0xf] %vm2700_vm6, %v8040_v21 }
 0x27c   : > { %v6896_v51 = vpop.f32.mrb[187].mxu0  ;;  %2776 = vst.msk [vmem:[#allocation2 + $0xa8] sm:$0xf] %vm2700_vm6, %v8040_v21  ;;  %2777 = vst.msk [vmem:[#allocation2 + $0xac] sm:$0xf] %vm2700_vm6, %v8040_v21 }
 0x27d   : > { %v9435_v53 = vadd.f32 %v6894_v22, %v9298_v52  ;;  %v6897_v5 = vadd.f32 %v6896_v51, %v6895_v43  ;;  %2779 = vst.msk [vmem:[#allocation2 + $0xb4] sm:$0xf] %vm2700_vm6, %v8040_v21  ;;  %2780 = vst.msk [vmem:[#allocation2 + $0xb8] sm:$0xf] %vm2700_vm6, %v8040_v21 }
 0x27e   : > { %2782 = vst.msk [vmem:[#allocation2 + $0xc0] sm:$0xf] %vm2700_vm6, %v8040_v21  ;;  %2783 = vst.msk [vmem:[#allocation2 + $0xc4] sm:$0xf] %vm2700_vm6, %v8040_v21 }
 0x27f   : > { %v9438_v11 = vadd.f32 %v6897_v5, %v9301_v25  ;;  %2785 = vst.msk [vmem:[#allocation2 + $0xcc] sm:$0xf] %vm2700_vm6, %v8040_v21  ;;  %2786 = vst.msk [vmem:[#allocation2 + $0xd0] sm:$0xf] %vm2700_vm6, %v8040_v21 }
 0x280   : > { %2742 = vst.msk [vmem:[#allocation2 + $0x20] sm:$0x1] %vm2735_vm7, %v8040_v21  ;;  %2736 = vst.msk [vmem:[#allocation2 + $0x8] sm:$0x1] %vm2735_vm7, %v8040_v21 }
 0x281   : > { %v6898_v36 = vpop.f32.mrb[188].mxu0  ;;  %2739 = vst.msk [vmem:[#allocation2 + $0x14] sm:$0x1] %vm2735_vm7, %v8040_v21  ;;  %2745 = vst.msk [vmem:[#allocation2 + $0x2c] sm:$0x1] %vm2735_vm7, %v8040_v21 }
 0x282   : > { %v6899_v57 = vpop.f32.mrb[189].mxu0  ;;  %2748 = vst.msk [vmem:[#allocation2 + $0x38] sm:$0x1] %vm2735_vm7, %v8040_v21  ;;  %2751 = vst.msk [vmem:[#allocation2 + $0x44] sm:$0x1] %vm2735_vm7, %v8040_v21 }
 0x283   : > { %v6900_v60 = vadd.f32 %v6899_v57, %v6898_v36  ;;  %v6901_v44 = vpop.f32.mrb[190].mxu0  ;;  %2754 = vst.msk [vmem:[#allocation2 + $0x50] sm:$0x1] %vm2735_vm7, %v8040_v21  ;;  %2757 = vst.msk [vmem:[#allocation2 + $0x5c] sm:$0x1] %vm2735_vm7, %v8040_v21 }
 0x284   : > { %v6902_v30 = vpop.f32.mrb[191].mxu0  ;;  %2760 = vst.msk [vmem:[#allocation2 + $0x68] sm:$0x1] %vm2735_vm7, %v8040_v21  ;;  %2763 = vst.msk [vmem:[#allocation2 + $0x74] sm:$0x1] %vm2735_vm7, %v8040_v21 }
 0x285   : > { %v9441_v6 = vadd.f32 %v6900_v60, %v9308_v59  ;;  %v6903_v48 = vadd.f32 %v6902_v30, %v6901_v44  ;;  %2766 = vst.msk [vmem:[#allocation2 + $0x80] sm:$0x1] %vm2735_vm7, %v8040_v21  ;;  %2769 = vst.msk [vmem:[#allocation2 + $0x8c] sm:$0x1] %vm2735_vm7, %v8040_v21 }
 0x286   : > { %2772 = vst.msk [vmem:[#allocation2 + $0x98] sm:$0x1] %vm2735_vm7, %v8040_v21  ;;  %2775 = vst.msk [vmem:[#allocation2 + $0xa4] sm:$0x1] %vm2735_vm7, %v8040_v21 }
 0x287   : > { %v9444_v1 = vadd.f32 %v6903_v48, %v9311_v34  ;;  %2778 = vst.msk [vmem:[#allocation2 + $0xb0] sm:$0x1] %vm2735_vm7, %v8040_v21  ;;  %2781 = vst.msk [vmem:[#allocation2 + $0xbc] sm:$0x1] %vm2735_vm7, %v8040_v21 }
 0x288   : > { %2784 = vst.msk [vmem:[#allocation2 + $0xc8] sm:$0x1] %vm2735_vm7, %v8040_v21  ;;  %2787 = vst.msk [vmem:[#allocation2 + $0xd4] sm:$0x1] %vm2735_vm7, %v8040_v21 }
 0x289   : > { %v6920_v32 = vpop.f32.mrb[192].mxu0 }
 0x28a   : > { %v6921_v31 = vpop.f32.mrb[193].mxu0 }
 0x28b   : > { %v6922_v52 = vadd.f32 %v6921_v31, %v6920_v32  ;;  %v6923_v42 = vpop.f32.mrb[194].mxu0 }
 0x28c   : > { %v6924_v49 = vpop.f32.mrb[195].mxu0 }
 0x28d   : > { %v6925_v10 = vadd.f32 %v6924_v49, %v6923_v42  ;;  %v9447_v25 = vadd.f32 %v6922_v52, %v9315_v62  ;;  %v3229_v52 = vld [vmem:[#allocation2] sm:$0xf]  ;;  %v3230_v42 = vld [vmem:[#allocation2 + $0x4] sm:$0xf] }
 0x28e   : > { %v3285_v49 = vshrl.u32 %v3229_v52, 16  ;;  %v3294_v21 = vshll.u32 %v3230_v42, 16 }
 0x28f   : > { %v9486_v59 = vadd.f32 %v6925_v10, %v9319_v46  ;;  %v3288_v10 = vshll.u32 %v3229_v52, 16 }
 0x291   : > { %v6926_v34 = vpop.f32.mrb[196].mxu0 }
 0x292   : > { %v6927_v62 = vpop.f32.mrb[197].mxu0 }
 0x293   : > { %v6928_v46 = vadd.f32 %v6927_v62, %v6926_v34  ;;  %v6929_v19 = vpop.f32.mrb[198].mxu0  ;;  %v3298_v34 = vshrl.u32 %v3230_v42, 16 }
 0x294   : > { %v6930_v40 = vpop.f32.mrb[199].mxu0 }
 0x295   : > { %v6931_v26 = vadd.f32 %v6930_v40, %v6929_v19  ;;  %v9507_v55 = vadd.f32 %v6928_v46, %v9327_v7  ;;  %v3290_v19 = vrot.slane %v3288_v10, 5  ;;  %v3296_v40 = vrot.slane %v3294_v21, 5 }
 0x297   : > { %v9510_v35 = vadd.f32 %v6931_v26, %v9331_v24 }
 0x299   : > { %v6932_v38 = vpop.f32.mrb[200].mxu0 }
 0x29a   : > { %v6933_v23 = vpop.f32.mrb[201].mxu0 }
 0x29b   : > { %v6934_v47 = vadd.f32 %v6933_v23, %v6932_v38  ;;  %v6935_v4 = vpop.f32.mrb[202].mxu0  ;;  %v6304_v38 = vld [vmem:[%s10862_s3 + $0x4] sm:$0xf] }
 0x29c   : > { %v6936_v29 = vpop.f32.mrb[203].mxu0  ;;  %7803 = vmatprep.subr.msk.bf16.mxu1 %vm3767_vm8, %v6304_v38  ;;  %v3769_v23 = vsel %vm3767_vm8, %v6304_v38, 0 }
 0x29d   : > { %v6937_v22 = vadd.f32 %v6936_v29, %v6935_v4  ;;  %v9513_v43 = vadd.f32 %v6934_v47, %v9336_v54  ;;  %v3231_v47 = vld [vmem:[#allocation2 + $0x8] sm:$0x1]  ;;  %7242 = vmatpush3.bf16.msra.mxu1 %v3769_v23 }
 0x29f   : > { %v9516_v51 = vadd.f32 %v6937_v22, %v9340_v58  ;;  %v3304_v22 = vshll.u32 %v3231_v47, 16 }
 0x2a1   : > { %v6938_v5 = vpop.f32.mrb[204].mxu0 }
 0x2a2   : > { %v6939_v36 = vpop.f32.mrb[205].mxu0 }
 0x2a3   : > { %v6940_v57 = vadd.f32 %v6939_v36, %v6938_v5  ;;  %v6941_v7 = vpop.f32.mrb[206].mxu0 }
 0x2a4   : > { %v6942_v60 = vpop.f32.mrb[207].mxu0 }
 0x2a5   : > { %v6943_v44 = vadd.f32 %v6942_v60, %v6941_v7  ;;  %v9519_v24 = vadd.f32 %v6940_v57, %v9348_v56  ;;  %v3287_v56 = vrot.slane %v3285_v49, 4  ;;  %v3306_v60 = vrot.slane %v3304_v22, 5 }
 0x2a7   : > { %v9522_v30 = vadd.f32 %v6943_v44, %v9352_v14  ;;  %v3300_v14 = vrot.slane %v3298_v34, 4  ;;  %v3291_v4 = vor.u32 %v3290_v19, %v3287_v56 }
 0x2a9   : > { %v6944_v48 = vpop.f32.mrb[208].mxu0  ;;  %v3292_v36 = vrot.slane %v3291_v4, 4  ;;  %v9558_v4 = vld [vmem:[%s10862_s3] sm:$0xf] }
 0x2aa   : > { %v6945_v32 = vpop.f32.mrb[209].mxu0  ;;  %7804 = vmatprep.subr.msk.bf16.mxu1 %vm3767_vm8, %v9558_v4 }
 0x2ab   : > { %v6946_v31 = vadd.f32 %v6945_v32, %v6944_v48  ;;  %v6947_v54 = vpop.f32.mrb[210].mxu0  ;;  %v3297_v48 = vsel %vm8204_vm5, %v3292_v36, %v3296_v40 }
 0x2ac   : > { %v6948_v58 = vpop.f32.mrb[211].mxu0 }
 0x2ad   : > { %v6949_v62 = vadd.f32 %v6948_v58, %v6947_v54  ;;  %v9525_v46 = vadd.f32 %v6946_v31, %v9357_v9  ;;  %v3301_v9 = vor.u32 %v3300_v14, %v3296_v40 }
 0x2af   : > { %v9528_v26 = vadd.f32 %v6949_v62, %v9360_v45  ;;  %v3302_v57 = vrot.slane %v3301_v9, 4 }
 0x2b1   : > { %v6950_v29 = vpop.f32.mrb[212].mxu0  ;;  %v3307_v54 = vsel %vm8204_vm5, %v3302_v57, %v3306_v60 }
 0x2b2   : > { %v6951_v5 = vpop.f32.mrb[213].mxu0  ;;  %v6305_v52 = vcombine.low %v3297_v48, %v3307_v54 }
 0x2b3   : > { %v6952_v45 = vadd.f32 %v6951_v5, %v6950_v29  ;;  %v6953_v7 = vpop.f32.mrb[214].mxu0 }
 0x2b4   : > { %v6954_v44 = vpop.f32.mrb[215].mxu0  ;;  %7243 = vmatprep.mubr.msk.bf16.mxu1 %vm3718_vm9, %v6305_v52 }
 0x2b5   : > { %v6955_v32 = vadd.f32 %v6954_v44, %v6953_v7  ;;  %v9538_v31 = vadd.f32 %v6952_v45, %v9364_v39 }
 0x2b7   : > { %v9543_v42 = vadd.f32 %v6955_v32, %v9368_v50 }
 0x2b9   : > { %v6956_v58 = vpop.f32.mrb[216].mxu0 }
 0x2ba   : > { %v6957_v49 = vpop.f32.mrb[217].mxu0 }
 0x2bb   : > { %v6958_v10 = vadd.f32 %v6957_v49, %v6956_v58  ;;  %v6959_v21 = vpop.f32.mrb[218].mxu0 }
 0x2bc   : > { %v6960_v34 = vpop.f32.mrb[219].mxu0 }
 0x2bd   : > { %v6961_v62 = vadd.f32 %v6960_v34, %v6959_v21  ;;  %v9547_v56 = vadd.f32 %v6958_v10, %v9372_v61 }
 0x2bf   : > { %v9550_v39 = vadd.f32 %v6961_v62, %v9376_v16 }
 0x2c1   : > { %v6962_v19 = vpop.f32.mrb[220].mxu0 }
 0x2c2   : > { %v6963_v40 = vpop.f32.mrb[221].mxu0 }
 0x2c3   : > { %v6964_v14 = vadd.f32 %v6963_v40, %v6962_v19  ;;  %v6965_v38 = vpop.f32.mrb[222].mxu0 }
 0x2c4   : > { %v6966_v50 = vpop.f32.mrb[223].mxu0 }
 0x2c5   : > { %v6967_v23 = vadd.f32 %v6966_v50, %v6965_v38  ;;  %v9553_v47 = vadd.f32 %v6964_v14, %v9380_v37 }
 0x2c7   : > { %v9561_v61 = vadd.f32 %v6967_v23, %v9384_v2 }
 0x2c9   : > { %v6968_v16 = vpop.f32.mrb[224].mxu0 }
 0x2ca   : > { %v6969_v9 = vpop.f32.mrb[225].mxu0 }
 0x2cb   : > { %v6970_v29 = vadd.f32 %v6969_v9, %v6968_v16  ;;  %v6971_v22 = vpop.f32.mrb[226].mxu0 }
 0x2cc   : > { %v6972_v5 = vpop.f32.mrb[227].mxu0 }
 0x2cd   : > { %v6973_v36 = vadd.f32 %v6972_v5, %v6971_v22  ;;  %v9566_v37 = vadd.f32 %v6970_v29, %v9388_v15 }
 0x2cf   : > { %v9569_v57 = vadd.f32 %v6973_v36, %v9392_v12 }
 0x2d1   : > { %v6974_v45 = vpop.f32.mrb[228].mxu0 }
 0x2d2   : > { %v6975_v7 = vpop.f32.mrb[229].mxu0 }
 0x2d3   : > { %v6976_v60 = vadd.f32 %v6975_v7, %v6974_v45  ;;  %v6977_v2 = vpop.f32.mrb[230].mxu0 }
 0x2d4   : > { %v6978_v44 = vpop.f32.mrb[231].mxu0 }
 0x2d5   : > { %v6979_v48 = vadd.f32 %v6978_v44, %v6977_v2  ;;  %v9572_v32 = vadd.f32 %v6976_v60, %v9396_v8 }
 0x2d7   : > { %v9575_v54 = vadd.f32 %v6979_v48, %v9400_v28 }
 0x2d9   : > { %v6980_v52 = vpop.f32.mrb[232].mxu0 }
 0x2da   : > { %v6981_v58 = vpop.f32.mrb[233].mxu0 }
 0x2db   : > { %v6982_v49 = vadd.f32 %v6981_v58, %v6980_v52  ;;  %v6983_v15 = vpop.f32.mrb[234].mxu0 }
 0x2dc   : > { %v6984_v10 = vpop.f32.mrb[235].mxu0 }
 0x2dd   : > { %v6985_v21 = vadd.f32 %v6984_v10, %v6983_v15  ;;  %v9578_v12 = vadd.f32 %v6982_v49, %v9404_v13 }
 0x2df   : > { %v9581_v34 = vadd.f32 %v6985_v21, %v9408_v41 }
 0x2e1   : > { %v6986_v62 = vpop.f32.mrb[236].mxu0 }
 0x2e2   : > { %v6987_v19 = vpop.f32.mrb[237].mxu0 }
 0x2e3   : > { %v6988_v40 = vadd.f32 %v6987_v19, %v6986_v62  ;;  %v6989_v8 = vpop.f32.mrb[238].mxu0 }
 0x2e4   : > { %v6990_v14 = vpop.f32.mrb[239].mxu0 }
 0x2e5   : > { %v6991_v38 = vadd.f32 %v6990_v14, %v6989_v8  ;;  %v9584_v28 = vadd.f32 %v6988_v40, %v9412_v18 }
 0x2e7   : > { %v9587_v50 = vadd.f32 %v6991_v38, %v9416_v0 }
 0x2e9   : > { %v6992_v23 = vpop.f32.mrb[240].mxu0 }
 0x2ea   : > { %v6993_v16 = vpop.f32.mrb[241].mxu0 }
 0x2eb   : > { %v6994_v9 = vadd.f32 %v6993_v16, %v6992_v23  ;;  %v6995_v13 = vpop.f32.mrb[242].mxu0 }
 0x2ec   : > { %v6996_v29 = vpop.f32.mrb[243].mxu0 }
 0x2ed   : > { %v6997_v22 = vadd.f32 %v6996_v29, %v6995_v13  ;;  %v9590_v41 = vadd.f32 %v6994_v9, %v9420_v17 }
 0x2ef   : > { %v9593_v5 = vadd.f32 %v6997_v22, %v9426_v63 }
 0x2f1   : > { %v6998_v36 = vpop.f32.mrb[244].mxu0 }
 0x2f2   : > { %v6999_v45 = vpop.f32.mrb[245].mxu0 }
 0x2f3   : > { %v7000_v7 = vadd.f32 %v6999_v45, %v6998_v36  ;;  %v7001_v18 = vpop.f32.mrb[246].mxu0 }
 0x2f4   : > { %v7002_v60 = vpop.f32.mrb[247].mxu0 }
 0x2f5   : > { %v7003_v2 = vadd.f32 %v7002_v60, %v7001_v18  ;;  %v9596_v0 = vadd.f32 %v7000_v7, %v9429_v20 }
 0x2f7   : > { %v9599_v44 = vadd.f32 %v7003_v2, %v9432_v3 }
 0x2f9   : > { %v7004_v48 = vpop.f32.mrb[248].mxu0 }
 0x2fa   : > { %v7005_v52 = vpop.f32.mrb[249].mxu0 }
 0x2fb   : > { %v7006_v17 = vadd.f32 %v7005_v52, %v7004_v48  ;;  %v7007_v58 = vpop.f32.mrb[250].mxu0 }
 0x2fc   : > { %v7008_v49 = vpop.f32.mrb[251].mxu0 }
 0x2fd   : > { %v7009_v63 = vadd.f32 %v7008_v49, %v7007_v58  ;;  %v9602_v15 = vadd.f32 %v7006_v17, %v9435_v53 }
 0x2ff   : > { %v9605_v10 = vadd.f32 %v7009_v63, %v9438_v11 }
 0x301   : > { %v7010_v21 = vpop.f32.mrb[252].mxu0 }
 0x302   : > { %v7011_v62 = vpop.f32.mrb[253].mxu0 }
 0x303   : > { %v7012_v20 = vadd.f32 %v7011_v62, %v7010_v21  ;;  %v7013_v19 = vpop.f32.mrb[254].mxu0  ;;  %v3124_v21 = vld [vmem:[#allocation2 + $0x18] sm:$0xf] }
 0x304   : > { %v7014_v40 = vpop.f32.mrb[255].mxu0 }
 0x305   : > { %v7015_v3 = vadd.f32 %v7014_v40, %v7013_v19  ;;  %v9608_v8 = vadd.f32 %v7012_v20, %v9441_v6 }
 0x307   : > { %v9611_v14 = vadd.f32 %v7015_v3, %v9444_v1 }
 0x309   : > { %v7211_v38 = vpop.f32.mrb[0].mxu0 }
 0x30a   : > { %v2422_v53 = vadd.f32 %v7211_v38, %v9507_v55  ;;  %v2413_v23 = vpop.f32.mrb[1].mxu0 }
 0x30b   : > { %v2414_v11 = vadd.f32 %v2413_v23, %v9447_v25  ;;  %v7212_v16 = vpop.f32.mrb[2].mxu0  ;;  %v3115_v23 = vld [vmem:[#allocation2 + $0xc] sm:$0xf] }
 0x30c   : > { %v2542_v9 = vmax.f32 %v2422_v53, 0.0  ;;  %v2425_v13 = vadd.f32 %v7212_v16, %v9510_v35  ;;  %v2416_v29 = vpop.f32.mrb[3].mxu0 }
 0x30d   : > { %v2540_v6 = vmax.f32 %v2414_v11, 0.0  ;;  %v2417_v1 = vadd.f32 %v2416_v29, %v9486_v59 }
 0x30e   : > { %v6537_v22 = vpack.c.bf16 %v2542_v9, %v2542_v9  ;;  %v2543_v55 = vmax.f32 %v2425_v13, 0.0 }
 0x30f   : > { %v6535_v25 = vpack.c.bf16 %v2540_v6, %v2540_v6  ;;  %v2541_v36 = vmax.f32 %v2417_v1, 0.0 }
 0x310   : > { %2703 = vst.msk [vmem:[%s9620_s26 + $0x8] sm:$0xf] %vm2700_vm6, %v6537_v22  ;;  %v2809_v35 = vshrl.u32 %v6537_v22, 16  ;;  %v6538_v45 = vpack.c.bf16 %v2543_v55, %v2543_v55  ;;  %v2812_v7 = vshll.u32 %v6537_v22, 16 }
 0x311   : > { %2701 = vst.msk [vmem:[%s9620_s26] sm:$0xf] %vm2700_vm6, %v6535_v25  ;;  %v2792_v18 = vshrl.u32 %v6535_v25, 16  ;;  %v2795_v60 = vshll.u32 %v6535_v25, 16  ;;  %v6536_v2 = vpack.c.bf16 %v2541_v36, %v2541_v36  ;;  %v7215_v59 = vpop.f32.mrb[4].mxu0 }
 0x312   : > { %v2811_v48 = vrot.slane %v2809_v35, 7  ;;  %2704 = vst.msk [vmem:[%s9620_s26 + $0xc] sm:$0xf] %vm2700_vm6, %v6538_v45  ;;  %v2817_v52 = vshrl.u32 %v6538_v45, 16  ;;  %v2820_v17 = vshll.u32 %v6538_v45, 16  ;;  %v2438_v58 = vadd.f32 %v7215_v59, %v9519_v24  ;;  %v2429_v49 = vpop.f32.mrb[5].mxu0 }
 0x313   : > { %v2794_v62 = vrot.slane %v2792_v18, 7  ;;  %2702 = vst.msk [vmem:[%s9620_s26 + $0x4] sm:$0xf] %vm2700_vm6, %v6536_v2  ;;  %v2800_v20 = vshrl.u32 %v6536_v2, 16  ;;  %v2803_v19 = vshll.u32 %v6536_v2, 16  ;;  %v2430_v40 = vadd.f32 %v2429_v49, %v9513_v43  ;;  %v7216_v3 = vpop.f32.mrb[6].mxu0 }
 0x314   : > { %v2814_v38 = vor.u32 %v2812_v7, %v2811_v48  ;;  %v2815_v53 = vrot.slane %v2811_v48, 4  ;;  %v2819_v11 = vrot.slane %v2817_v52, 7  ;;  %v2546_v16 = vmax.f32 %v2438_v58, 0.0  ;;  %v2432_v9 = vpop.f32.mrb[7].mxu0  ;;  %v3128_v43 = vld [vmem:[#allocation2 + $0x20] sm:$0x1] }
 0x315   : > { %v2797_v13 = vor.u32 %v2795_v60, %v2794_v62  ;;  %v2798_v29 = vrot.slane %v2794_v62, 4  ;;  %v2802_v1 = vrot.slane %v2800_v20, 7  ;;  %v2544_v22 = vmax.f32 %v2430_v40, 0.0  ;;  %v3121_v35 = vld [vmem:[#allocation2 + $0x14] sm:$0x1] }
 0x316   : > { %v3125_v55 = vsel %vm9632_vm13, %v2814_v38, %v3124_v21  ;;  %v2822_v25 = vor.u32 %v2820_v17, %v2819_v11  ;;  %v2824_v36 = vrot.slane %v2819_v11, 4  ;;  %v6541_v45 = vpack.c.bf16 %v2546_v16, %v2546_v16 }
 0x317   : > { %3126 = vst [vmem:[#allocation2 + $0x18] sm:$0xf] %v3125_v55  ;;  %v3116_v7 = vsel %vm9632_vm13, %v2797_v13, %v3115_v23  ;;  %v2805_v18 = vor.u32 %v2803_v19, %v2802_v1  ;;  %v2807_v60 = vrot.slane %v2802_v1, 4  ;;  %v6539_v2 = vpack.c.bf16 %v2544_v22, %v2544_v22  ;;  %v3138_v23 = vld [vmem:[#allocation2 + $0x30] sm:$0xf] }
 0x318   : > { %3117 = vst [vmem:[#allocation2 + $0xc] sm:$0xf] %v3116_v7  ;;  %v2823_v59 = vsel %vm9641_vm14, %v2815_v53, %v2822_v25  ;;  %v3129_v48 = vsel %vm9647_vm15, %v2824_v36, %v3128_v43  ;;  %2707 = vst.msk [vmem:[%s9620_s26 + $0x18] sm:$0xf] %vm2700_vm6, %v6541_v45  ;;  %v2843_v52 = vshrl.u32 %v6541_v45, 16  ;;  %v2846_v49 = vshll.u32 %v6541_v45, 16 }
 0x319   : > { %3127 = vst.msk [vmem:[#allocation2 + $0x1c] sm:$0xf] %vm2700_vm6, %v2823_v59  ;;  %3130 = vst [vmem:[#allocation2 + $0x20] sm:$0x1] %v3129_v48  ;;  %v2806_v17 = vsel %vm9641_vm14, %v2798_v29, %v2805_v18  ;;  %v3122_v58 = vsel %vm9647_vm15, %v2807_v60, %v3121_v35  ;;  %v2826_v21 = vshrl.u32 %v6539_v2, 16  ;;  %v7219_v62 = vpop.f32.mrb[8].mxu0  ;;  %v2441_v19 = vadd.f32 %v7216_v3, %v9522_v30 }
 0x31a   : > { %2705 = vst.msk [vmem:[%s9620_s26 + $0x10] sm:$0xf] %vm2700_vm6, %v6539_v2  ;;  %3118 = vst.msk [vmem:[#allocation2 + $0x10] sm:$0xf] %vm2700_vm6, %v2806_v17  ;;  %v9669_v20 = vrot.slane %v2843_v52, 7  ;;  %v2433_v40 = vadd.f32 %v2432_v9, %v9516_v51  ;;  %v2454_v38 = vadd.f32 %v7219_v62, %v9538_v31  ;;  %v2445_v53 = vpop.f32.mrb[9].mxu0 }
 0x31b   : > { %3123 = vst [vmem:[#allocation2 + $0x14] sm:$0x1] %v3122_v58  ;;  %v9674_v11 = vrot.slane %v2826_v21, 7  ;;  %v2829_v16 = vshll.u32 %v6539_v2, 16  ;;  %v2446_v13 = vadd.f32 %v2445_v53, %v9525_v46  ;;  %v7220_v29 = vpop.f32.mrb[10].mxu0  ;;  %v2547_v55 = vmax.f32 %v2441_v19, 0.0 }
 0x31c   : > { %v2848_v43 = vor.u32 %v2846_v49, %v9669_v20  ;;  %v2849_v1 = vrot.slane %v9669_v20, 4  ;;  %v3131_v22 = vld [vmem:[#allocation2 + $0x24] sm:$0xf]  ;;  %v2545_v25 = vmax.f32 %v2433_v40, 0.0  ;;  %v2448_v30 = vpop.f32.mrb[11].mxu0  ;;  %v2550_v3 = vmax.f32 %v2454_v38, 0.0 }
 0x31d   : > { %v2831_v51 = vor.u32 %v2829_v16, %v9674_v11  ;;  %v2832_v31 = vrot.slane %v9674_v11, 4  ;;  %v2548_v9 = vmax.f32 %v2446_v13, 0.0  ;;  %v6542_v36 = vpack.c.bf16 %v2547_v55, %v2547_v55  ;;  %v3142_v58 = vld [vmem:[#allocation2 + $0x38] sm:$0x1]  ;;  %v3152_v16 = vld [vmem:[#allocation2 + $0x48] sm:$0xf] }
 0x31e   : > { %v3139_v46 = vsel %vm9632_vm13, %v2848_v43, %v3138_v23  ;;  %v6540_v35 = vpack.c.bf16 %v2545_v25, %v2545_v25  ;;  %v2457_v45 = vadd.f32 %v7220_v29, %v9543_v42  ;;  %v6545_v18 = vpack.c.bf16 %v2550_v3, %v2550_v3  ;;  %v3135_v42 = vld [vmem:[#allocation2 + $0x2c] sm:$0x1]  ;;  %v3145_v3 = vld [vmem:[#allocation2 + $0x3c] sm:$0xf] }
 0x31f   : > { %3140 = vst [vmem:[#allocation2 + $0x30] sm:$0xf] %v3139_v46  ;;  %v3132_v7 = vsel %vm9632_vm13, %v2831_v51, %v3131_v22  ;;  %v6543_v60 = vpack.c.bf16 %v2548_v9, %v2548_v9  ;;  %v2449_v2 = vadd.f32 %v2448_v30, %v9528_v26  ;;  %2708 = vst.msk [vmem:[%s9620_s26 + $0x1c] sm:$0xf] %vm2700_vm6, %v6542_v36  ;;  %v2851_v59 = vshrl.u32 %v6542_v36, 16 }
 0x320   : > { %3133 = vst [vmem:[#allocation2 + $0x24] sm:$0xf] %v3132_v7  ;;  %v2854_v48 = vshll.u32 %v6542_v36, 16  ;;  %2706 = vst.msk [vmem:[%s9620_s26 + $0x14] sm:$0xf] %vm2700_vm6, %v6540_v35  ;;  %v2834_v52 = vshrl.u32 %v6540_v35, 16 }
 0x321   : > { %v2837_v17 = vshll.u32 %v6540_v35, 16  ;;  %2711 = vst.msk [vmem:[%s9620_s26 + $0x28] sm:$0xf] %vm2700_vm6, %v6545_v18  ;;  %v2877_v49 = vshrl.u32 %v6545_v18, 16  ;;  %v2880_v21 = vshll.u32 %v6545_v18, 16  ;;  %v2860_v62 = vshrl.u32 %v6543_v60, 16 }
 0x322   : > { %2709 = vst.msk [vmem:[%s9620_s26 + $0x20] sm:$0xf] %vm2700_vm6, %v6543_v60  ;;  %v2863_v20 = vshll.u32 %v6543_v60, 16  ;;  %v7223_v26 = vpop.f32.mrb[12].mxu0  ;;  %v2853_v19 = vrot.slane %v2851_v59, 7  ;;  %v2836_v40 = vrot.slane %v2834_v52, 7 }
 0x323   : > { %v2551_v38 = vmax.f32 %v2457_v45, 0.0  ;;  %v2549_v53 = vmax.f32 %v2449_v2, 0.0  ;;  %v2461_v23 = vpop.f32.mrb[13].mxu0  ;;  %v9695_v11 = vrot.slane %v2877_v49, 7  ;;  %v9697_v13 = vrot.slane %v2860_v62, 7 }
 0x324   : > { %v2470_v29 = vadd.f32 %v7223_v26, %v9553_v47  ;;  %v2462_v43 = vadd.f32 %v2461_v23, %v9547_v56  ;;  %v7224_v22 = vpop.f32.mrb[14].mxu0  ;;  %v2856_v55 = vor.u32 %v2854_v48, %v2853_v19  ;;  %v2858_v25 = vrot.slane %v2853_v19, 4 }
 0x325   : > { %v2839_v30 = vor.u32 %v2837_v17, %v2836_v40  ;;  %v2841_v51 = vrot.slane %v2836_v40, 4  ;;  %v2464_v9 = vpop.f32.mrb[15].mxu0  ;;  %v2882_v46 = vor.u32 %v2880_v21, %v9695_v11  ;;  %v2883_v36 = vrot.slane %v9695_v11, 4 }
 0x326   : > { %v2865_v35 = vor.u32 %v2863_v20, %v9697_v13  ;;  %v2866_v45 = vrot.slane %v9697_v13, 4  ;;  %v2857_v47 = vsel %vm9641_vm14, %v2849_v1, %v2856_v55  ;;  %v3143_v56 = vsel %vm9647_vm15, %v2858_v25, %v3142_v58  ;;  %v3156_v20 = vld [vmem:[#allocation2 + $0x50] sm:$0x1] }
 0x327   : > { %v2840_v7 = vsel %vm9641_vm14, %v2832_v31, %v2839_v30  ;;  %v3136_v18 = vsel %vm9647_vm15, %v2841_v51, %v3135_v42  ;;  %3141 = vst.msk [vmem:[#allocation2 + $0x34] sm:$0xf] %vm2700_vm6, %v2857_v47  ;;  %3144 = vst [vmem:[#allocation2 + $0x38] sm:$0x1] %v3143_v56  ;;  %v3153_v1 = vsel %vm9632_vm13, %v2882_v46, %v3152_v16  ;;  %v2554_v31 = vmax.f32 %v2470_v29, 0.0 }
 0x328   : > { %3134 = vst.msk [vmem:[#allocation2 + $0x28] sm:$0xf] %vm2700_vm6, %v2840_v7  ;;  %3137 = vst [vmem:[#allocation2 + $0x2c] sm:$0x1] %v3136_v18  ;;  %v3146_v60 = vsel %vm9632_vm13, %v2865_v35, %v3145_v3  ;;  %v6546_v2 = vpack.c.bf16 %v2551_v38, %v2551_v38  ;;  %v6544_v59 = vpack.c.bf16 %v2549_v53, %v2549_v53  ;;  %v2552_v48 = vmax.f32 %v2462_v43, 0.0 }
 0x329   : > { %3154 = vst [vmem:[#allocation2 + $0x48] sm:$0xf] %v3153_v1  ;;  %3147 = vst [vmem:[#allocation2 + $0x3c] sm:$0xf] %v3146_v60  ;;  %v2473_v52 = vadd.f32 %v7224_v22, %v9561_v61  ;;  %v2465_v17 = vadd.f32 %v2464_v9, %v9550_v39  ;;  %v7227_v62 = vpop.f32.mrb[16].mxu0  ;;  %v6549_v26 = vpack.c.bf16 %v2554_v31, %v2554_v31 }
 0x32a   : > { %2712 = vst.msk [vmem:[%s9620_s26 + $0x2c] sm:$0xf] %vm2700_vm6, %v6546_v2  ;;  %v2885_v58 = vshrl.u32 %v6546_v2, 16  ;;  %v2888_v42 = vshll.u32 %v6546_v2, 16  ;;  %2710 = vst.msk [vmem:[%s9620_s26 + $0x24] sm:$0xf] %vm2700_vm6, %v6544_v59  ;;  %v6547_v19 = vpack.c.bf16 %v2552_v48, %v2552_v48  ;;  %v2486_v11 = vadd.f32 %v7227_v62, %v9572_v32 }
 0x32b   : > { %v2868_v49 = vshrl.u32 %v6544_v59, 16  ;;  %v2871_v21 = vshll.u32 %v6544_v59, 16  ;;  %v2555_v40 = vmax.f32 %v2473_v52, 0.0  ;;  %v2553_v38 = vmax.f32 %v2465_v17, 0.0  ;;  %v2477_v53 = vpop.f32.mrb[17].mxu0 }
 0x32c   : > { %v2887_v61 = vrot.slane %v2885_v58, 7  ;;  %v3149_v39 = vld [vmem:[#allocation2 + $0x44] sm:$0x1]  ;;  %v2478_v16 = vadd.f32 %v2477_v53, %v9566_v37  ;;  %v7228_v13 = vpop.f32.mrb[18].mxu0  ;;  %2715 = vst.msk [vmem:[%s9620_s26 + $0x38] sm:$0xf] %vm2700_vm6, %v6549_v26 }
 0x32d   : > { %v2870_v23 = vrot.slane %v2868_v49, 7  ;;  %v2911_v29 = vshrl.u32 %v6549_v26, 16  ;;  %v2914_v43 = vshll.u32 %v6549_v26, 16  ;;  %2713 = vst.msk [vmem:[%s9620_s26 + $0x30] sm:$0xf] %vm2700_vm6, %v6547_v19  ;;  %v2894_v22 = vshrl.u32 %v6547_v19, 16 }
 0x32e   : > { %v2897_v55 = vshll.u32 %v6547_v19, 16  ;;  %v2480_v25 = vpop.f32.mrb[19].mxu0  ;;  %v2890_v30 = vor.u32 %v2888_v42, %v2887_v61  ;;  %v2892_v51 = vrot.slane %v2887_v61, 4  ;;  %v6550_v47 = vpack.c.bf16 %v2555_v40, %v2555_v40  ;;  %v3166_v1 = vld [vmem:[#allocation2 + $0x60] sm:$0xf] }
 0x32f   : > { %v2873_v3 = vor.u32 %v2871_v21, %v2870_v23  ;;  %v2875_v9 = vrot.slane %v2870_v23, 4  ;;  %v2913_v46 = vrot.slane %v2911_v29, 7  ;;  %v2896_v35 = vrot.slane %v2894_v22, 7  ;;  %v3159_v60 = vld [vmem:[#allocation2 + $0x54] sm:$0xf] }
 0x330   : > { %v6548_v32 = vpack.c.bf16 %v2553_v38, %v2553_v38  ;;  %v2891_v37 = vsel %vm9641_vm14, %v2883_v36, %v2890_v30  ;;  %v3157_v56 = vsel %vm9647_vm15, %v2892_v51, %v3156_v20  ;;  %2716 = vst.msk [vmem:[%s9620_s26 + $0x3c] sm:$0xf] %vm2700_vm6, %v6550_v47  ;;  %v2919_v48 = vshrl.u32 %v6550_v47, 16  ;;  %v3170_v40 = vld [vmem:[#allocation2 + $0x68] sm:$0x1] }
 0x331   : > { %v2874_v7 = vsel %vm9641_vm14, %v2866_v45, %v2873_v3  ;;  %v3150_v18 = vsel %vm9647_vm15, %v2875_v9, %v3149_v39  ;;  %3155 = vst.msk [vmem:[#allocation2 + $0x4c] sm:$0xf] %vm2700_vm6, %v2891_v37  ;;  %3158 = vst [vmem:[#allocation2 + $0x50] sm:$0x1] %v3157_v56  ;;  %v2916_v2 = vor.u32 %v2914_v43, %v2913_v46  ;;  %v2917_v59 = vrot.slane %v2913_v46, 4  ;;  %v9745_v42 = vpop.f32.mrb[20].mxu0 }
 0x332   : > { %3148 = vst.msk [vmem:[#allocation2 + $0x40] sm:$0xf] %vm2700_vm6, %v2874_v7  ;;  %3151 = vst [vmem:[#allocation2 + $0x44] sm:$0x1] %v3150_v18  ;;  %v2899_v36 = vor.u32 %v2897_v55, %v2896_v35  ;;  %v2900_v31 = vrot.slane %v2896_v35, 4  ;;  %v2922_v52 = vshll.u32 %v6550_v47, 16  ;;  %v2489_v53 = vadd.f32 %v7228_v13, %v9575_v54 }
 0x333   : > { %2714 = vst.msk [vmem:[%s9620_s26 + $0x34] sm:$0xf] %vm2700_vm6, %v6548_v32  ;;  %v3232_v45 = vld [vmem:[#allocation2 + $0xc] sm:$0xf]  ;;  %v2902_v17 = vshrl.u32 %v6548_v32, 16  ;;  %v2905_v58 = vshll.u32 %v6548_v32, 16  ;;  %v3167_v49 = vsel %vm9632_vm13, %v2916_v2, %v3166_v1  ;;  %v2481_v61 = vadd.f32 %v2480_v25, %v9569_v57 }
 0x334   : > { %v3160_v21 = vsel %vm9632_vm13, %v2899_v36, %v3159_v60  ;;  %v2558_v62 = vmax.f32 %v2486_v11, 0.0  ;;  %v2556_v20 = vmax.f32 %v2478_v16, 0.0  ;;  %v9751_v26 = vpop.f32.mrb[21].mxu0  ;;  %3168 = vst [vmem:[#allocation2 + $0x60] sm:$0xf] %v3167_v49  ;;  %v2921_v19 = vrot.slane %v2919_v48, 7 }
 0x335   : > { %3161 = vst [vmem:[#allocation2 + $0x54] sm:$0xf] %v3160_v21  ;;  %v2904_v38 = vrot.slane %v2902_v17, 7  ;;  %v9755_v23 = vpop.f32.mrb[22].mxu0  ;;  %v3163_v39 = vld [vmem:[#allocation2 + $0x5c] sm:$0x1] }
 0x336   : > { %v6553_v29 = vpack.c.bf16 %v2558_v62, %v2558_v62  ;;  %v6551_v43 = vpack.c.bf16 %v2556_v20, %v2556_v20  ;;  %v3309_v11 = vshrl.u32 %v3232_v45, 16  ;;  %v3312_v16 = vshll.u32 %v3232_v45, 16  ;;  %v9757_v22 = vpop.f32.mrb[23].mxu0  ;;  %v3233_v25 = vld [vmem:[#allocation2 + $0x10] sm:$0xf] }
 0x337   : > { %v2924_v55 = vor.u32 %v2922_v52, %v2921_v19  ;;  %v2926_v30 = vrot.slane %v2921_v19, 4  ;;  %v2907_v51 = vor.u32 %v2905_v58, %v2904_v38  ;;  %v2909_v3 = vrot.slane %v2904_v38, 4  ;;  %v3180_v37 = vld [vmem:[#allocation2 + $0x78] sm:$0xf]  ;;  %v3173_v56 = vld [vmem:[#allocation2 + $0x6c] sm:$0xf] }
 0x338   : > { %2719 = vst.msk [vmem:[%s9620_s26 + $0x48] sm:$0xf] %vm2700_vm6, %v6553_v29  ;;  %v2945_v9 = vshrl.u32 %v6553_v29, 16  ;;  %v2948_v54 = vshll.u32 %v6553_v29, 16  ;;  %2717 = vst.msk [vmem:[%s9620_s26 + $0x40] sm:$0xf] %vm2700_vm6, %v6551_v43 }
 0x339   : > { %v2928_v57 = vshrl.u32 %v6551_v43, 16  ;;  %v2931_v13 = vshll.u32 %v6551_v43, 16  ;;  %v2925_v46 = vsel %vm9641_vm14, %v2917_v59, %v2924_v55  ;;  %v3171_v35 = vsel %vm9647_vm15, %v2926_v30, %v3170_v40  ;;  %v3234_v2 = vld [vmem:[#allocation2 + $0x14] sm:$0x1]  ;;  %v9773_v48 = vpop.f32.mrb[24].mxu0 }
 0x33a   : > { %v2908_v47 = vsel %vm9641_vm14, %v2900_v31, %v2907_v51  ;;  %v3164_v32 = vsel %vm9647_vm15, %v2909_v3, %v3163_v39  ;;  %3169 = vst.msk [vmem:[#allocation2 + $0x64] sm:$0xf] %vm2700_vm6, %v2925_v46  ;;  %3172 = vst [vmem:[#allocation2 + $0x68] sm:$0x1] %v3171_v35  ;;  %v2947_v7 = vrot.slane %v2945_v9, 7  ;;  %v2559_v1 = vmax.f32 %v2489_v53, 0.0 }
 0x33b   : > { %3162 = vst.msk [vmem:[#allocation2 + $0x58] sm:$0xf] %vm2700_vm6, %v2908_v47  ;;  %3165 = vst [vmem:[#allocation2 + $0x5c] sm:$0x1] %v3164_v32  ;;  %v2930_v18 = vrot.slane %v2928_v57, 7  ;;  %v2557_v60 = vmax.f32 %v2481_v61, 0.0 }
 0x33c   : > { %v3311_v59 = vrot.slane %v3309_v11, 4  ;;  %v3314_v36 = vrot.slane %v3312_v16, 5  ;;  %v3318_v45 = vshll.u32 %v3233_v25, 16  ;;  %v3322_v31 = vshrl.u32 %v3233_v25, 16  ;;  %v9779_v49 = vpop.f32.mrb[25].mxu0 }
 0x33d   : > { %v2950_v52 = vor.u32 %v2948_v54, %v2947_v7  ;;  %v2933_v17 = vor.u32 %v2931_v13, %v2930_v18  ;;  %v9777_v58 = vsel %vm3767_vm8, %v9558_v4, 0  ;;  %v6554_v21 = vpack.c.bf16 %v2559_v1, %v2559_v1  ;;  %v9781_v40 = vpop.f32.mrb[26].mxu0  ;;  %v9787_v4 = vld [vmem:[#allocation2 + $0x18] sm:$0xf]  ;;  %v9795_v30 = vld [vmem:[#allocation2 + $0x1c] sm:$0xf] }
 0x33e   : > { %v6552_v62 = vpack.c.bf16 %v2557_v60, %v2557_v60  ;;  %v3315_v20 = vor.u32 %v3314_v36, %v3311_v59  ;;  %v3320_v19 = vrot.slane %v3318_v45, 5  ;;  %v3324_v61 = vrot.slane %v3322_v31, 4  ;;  %v9789_v29 = vpop.f32.mrb[27].mxu0  ;;  %v3184_v13 = vld [vmem:[#allocation2 + $0x80] sm:$0x1] }
 0x33f   : > { %v3181_v38 = vsel %vm9632_vm13, %v2950_v52, %v3180_v37  ;;  %v3174_v53 = vsel %vm9632_vm13, %v2933_v17, %v3173_v56  ;;  %v3328_v39 = vshll.u32 %v3234_v2, 16  ;;  %v2951_v43 = vrot.slane %v2947_v7, 4  ;;  %2720 = vst.msk [vmem:[%s9620_s26 + $0x4c] sm:$0xf] %vm2700_vm6, %v6554_v21  ;;  %v3177_v47 = vld [vmem:[#allocation2 + $0x74] sm:$0x1] }
 0x340   : > { %3182 = vst [vmem:[#allocation2 + $0x78] sm:$0xf] %v3181_v38  ;;  %v2934_v11 = vrot.slane %v2930_v18, 4  ;;  %3175 = vst [vmem:[#allocation2 + $0x6c] sm:$0xf] %v3174_v53  ;;  %v2953_v16 = vshrl.u32 %v6554_v21, 16  ;;  %v3325_v54 = vor.u32 %v3324_v61, %v3320_v19 }
 0x341   : > { %2718 = vst.msk [vmem:[%s9620_s26 + $0x44] sm:$0xf] %vm2700_vm6, %v6552_v62  ;;  %v2936_v55 = vshrl.u32 %v6552_v62, 16  ;;  %v2956_v51 = vshll.u32 %v6554_v21, 16  ;;  %v2939_v3 = vshll.u32 %v6552_v62, 16  ;;  %v3316_v9 = vrot.slane %v3315_v20, 4 }
 0x342   : > { %v2955_v57 = vrot.slane %v2953_v16, 7  ;;  %v3330_v46 = vrot.slane %v3328_v39, 5  ;;  %v3333_v35 = vshrl.u32 %v9787_v4, 16  ;;  %v3326_v37 = vrot.slane %v3325_v54, 4  ;;  %v3237_v59 = vld [vmem:[#allocation2 + $0x20] sm:$0x1] }
 0x343   : > { %v2938_v25 = vrot.slane %v2936_v55, 7  ;;  %v3321_v32 = vsel %vm8204_vm5, %v3316_v9, %v3320_v19  ;;  %v3336_v56 = vshll.u32 %v9787_v4, 16  ;;  %v3342_v7 = vshll.u32 %v9795_v30, 16  ;;  %v9802_v36 = vpop.f32.mrb[28].mxu0  ;;  %v9816_v53 = vld [vmem:[#allocation2 + $0x24] sm:$0xf] }
 0x344   : > { %v2958_v18 = vor.u32 %v2956_v51, %v2955_v57  ;;  %v2960_v1 = vrot.slane %v2955_v57, 4  ;;  %v3331_v45 = vsel %vm8204_vm5, %v3326_v37, %v3330_v46  ;;  %v3335_v31 = vrot.slane %v3333_v35, 4  ;;  %v9806_v21 = vpop.f32.mrb[29].mxu0  ;;  %v9838_v57 = vld [vmem:[%s10862_s3 + $0x8] sm:$0xf] }
 0x345   : > { %v2941_v60 = vor.u32 %v2939_v3, %v2938_v25  ;;  %v2943_v2 = vrot.slane %v2938_v25, 4  ;;  %v3338_v52 = vrot.slane %v3336_v56, 5  ;;  %v3344_v17 = vrot.slane %v3342_v7, 5  ;;  %v9818_v61 = vpop.f32.mrb[30].mxu0 }
 0x346   : > { %v2959_v62 = vsel %vm9641_vm14, %v2951_v43, %v2958_v18  ;;  %v3185_v20 = vsel %vm9647_vm15, %v2960_v1, %v3184_v13  ;;  %v9822_v39 = vcombine.low %v3321_v32, %v3331_v45  ;;  %v3346_v16 = vshrl.u32 %v9795_v30, 16 }
 0x347   : > { %v2942_v19 = vsel %vm9641_vm14, %v2934_v11, %v2941_v60  ;;  %v3178_v38 = vsel %vm9647_vm15, %v2943_v2, %v3177_v47  ;;  %3183 = vst.msk [vmem:[#allocation2 + $0x7c] sm:$0xf] %vm2700_vm6, %v2959_v62  ;;  %3186 = vst [vmem:[#allocation2 + $0x80] sm:$0x1] %v3185_v20  ;;  %v3339_v43 = vor.u32 %v3338_v52, %v3335_v31  ;;  %v3352_v55 = vshll.u32 %v3237_v59, 16  ;;  %v9825_v11 = vpop.f32.mrb[31].mxu0 }
 0x348   : > { %3176 = vst.msk [vmem:[#allocation2 + $0x70] sm:$0xf] %vm2700_vm6, %v2942_v19  ;;  %3179 = vst [vmem:[#allocation2 + $0x74] sm:$0x1] %v3178_v38  ;;  %v2502_v51 = vadd.f32 %v9745_v42, %v9584_v28  ;;  %v2494_v3 = vadd.f32 %v9751_v26, %v9578_v12  ;;  %v2505_v9 = vadd.f32 %v9755_v23, %v9587_v50  ;;  %7244 = vmatmul.mubr.msk.bf16.vlgmr.msra.gmra.mrb[0].mxu1 %vm3718_vm9, %v9822_v39  ;;  %v9844_v23 = vld [vmem:[#allocation2 + $0x28] sm:$0xf] }
 0x349   : > { %11080 = vst [vmem:[#allocation22_spill] sm:$0xff] %v9822_v39  ;;  %v2497_v54 = vadd.f32 %v9757_v22, %v9581_v34  ;;  %v3340_v13 = vrot.slane %v3339_v43, 4  ;;  %v3348_v25 = vrot.slane %v3346_v16, 4  ;;  %v3354_v28 = vrot.slane %v3352_v55, 5  ;;  %7276 = vmatpush3.bf16.msra.mxu1 %v9777_v58  ;;  %v3194_v43 = vld [vmem:[#allocation2 + $0x90] sm:$0xf] }
 0x34a   : > { %v3357_v42 = vshrl.u32 %v9816_v53, 16  ;;  %v2562_v12 = vmax.f32 %v2502_v51, 0.0  ;;  %v2560_v50 = vmax.f32 %v2494_v3, 0.0  ;;  %v2563_v26 = vmax.f32 %v2505_v9, 0.0  ;;  %7805 = vmatprep.subr.msk.bf16.mxu1 %vm3767_vm8, %v9838_v57  ;;  %v3187_v51 = vld [vmem:[#allocation2 + $0x84] sm:$0xf] }
 0x34b   : > { %v2561_v34 = vmax.f32 %v2497_v54, 0.0  ;;  %v3345_v22 = vsel %vm8204_vm5, %v3340_v13, %v3344_v17  ;;  %v3349_v46 = vor.u32 %v3348_v25, %v3344_v17  ;;  %v3360_v47 = vshll.u32 %v9816_v53, 16  ;;  %v10017_v63 = vld [vmem:[#allocation2 + $0x6c] sm:$0xf] }
 0x34c   : > { %v3359_v35 = vrot.slane %v3357_v42, 4  ;;  %v6557_v58 = vpack.c.bf16 %v2562_v12, %v2562_v12  ;;  %v6555_v32 = vpack.c.bf16 %v2560_v50, %v2560_v50  ;;  %v6558_v37 = vpack.c.bf16 %v2563_v26, %v2563_v26  ;;  %v3198_v50 = vld [vmem:[#allocation2 + $0x98] sm:$0x1]  ;;  %v3191_v26 = vld [vmem:[#allocation2 + $0x8c] sm:$0x1] }
 0x34d   : > { %v6556_v56 = vpack.c.bf16 %v2561_v34, %v2561_v34  ;;  %v3350_v7 = vrot.slane %v3349_v46, 4  ;;  %v3362_v18 = vrot.slane %v3360_v47, 5  ;;  %v3366_v1 = vshll.u32 %v9844_v23, 16 }
 0x34e   : > { %v3370_v60 = vshrl.u32 %v9844_v23, 16  ;;  %2723 = vst.msk [vmem:[%s9620_s26 + $0x58] sm:$0xf] %vm2700_vm6, %v6557_v58  ;;  %v2979_v2 = vshrl.u32 %v6557_v58, 16  ;;  %v2982_v59 = vshll.u32 %v6557_v58, 16  ;;  %v2962_v45 = vshrl.u32 %v6555_v32, 16 }
 0x34f   : > { %2721 = vst.msk [vmem:[%s9620_s26 + $0x50] sm:$0xf] %vm2700_vm6, %v6555_v32  ;;  %v2965_v31 = vshll.u32 %v6555_v32, 16  ;;  %2724 = vst.msk [vmem:[%s9620_s26 + $0x5c] sm:$0xf] %vm2700_vm6, %v6558_v37  ;;  %v3355_v52 = vsel %vm8204_vm5, %v3350_v7, %v3354_v28  ;;  %v2987_v17 = vshrl.u32 %v6558_v37, 16  ;;  %v3363_v54 = vor.u32 %v3362_v18, %v3359_v35 }
 0x350   : > { %2722 = vst.msk [vmem:[%s9620_s26 + $0x54] sm:$0xf] %vm2700_vm6, %v6556_v56  ;;  %v2990_v62 = vshll.u32 %v6558_v37, 16  ;;  %v2970_v20 = vshrl.u32 %v6556_v56, 16  ;;  %v9863_v19 = vcombine.low %v3345_v22, %v3355_v52  ;;  %v2981_v38 = vrot.slane %v2979_v2, 7 }
 0x351   : > { %v2964_v16 = vrot.slane %v2962_v45, 7  ;;  %v2973_v55 = vshll.u32 %v6556_v56, 16  ;;  %v2989_v3 = vrot.slane %v2987_v17, 7  ;;  %v3368_v13 = vrot.slane %v3366_v1, 5  ;;  %v3240_v58 = vld [vmem:[#allocation2 + $0x2c] sm:$0x1] }
 0x352   : > { %11081 = vst [vmem:[#allocation12_spill] sm:$0xff] %v9863_v19  ;;  %v2972_v9 = vrot.slane %v2970_v20, 7  ;;  %7247 = vmatprep.mubr.msk.bf16.mxu1 %vm3718_vm9, %v9863_v19  ;;  %v2984_v25 = vor.u32 %v2982_v59, %v2981_v38  ;;  %v2985_v42 = vrot.slane %v2981_v38, 4  ;;  %v9867_v32 = vld [vmem:[#allocation2 + $0x30] sm:$0xf]  ;;  %v3364_v56 = vrot.slane %v3363_v54, 4 }
 0x353   : > { %v2967_v28 = vor.u32 %v2965_v31, %v2964_v16  ;;  %v2968_v12 = vrot.slane %v2964_v16, 4  ;;  %v2992_v34 = vor.u32 %v2990_v62, %v2989_v3  ;;  %v2994_v22 = vrot.slane %v2989_v3, 4  ;;  %v9873_v18 = vld [vmem:[#allocation2 + $0x34] sm:$0xf]  ;;  %v3243_v1 = vld [vmem:[#allocation2 + $0x38] sm:$0x1] }
 0x354   : > { %v2975_v46 = vor.u32 %v2973_v55, %v2972_v9  ;;  %v2977_v47 = vrot.slane %v2972_v9, 4  ;;  %v3195_v35 = vsel %vm9632_vm13, %v2984_v25, %v3194_v43  ;;  %v3372_v7 = vrot.slane %v3370_v60, 4 }
 0x355   : > { %v3188_v37 = vsel %vm9632_vm13, %v2967_v28, %v3187_v51  ;;  %3196 = vst [vmem:[#allocation2 + $0x90] sm:$0xf] %v3195_v35  ;;  %v2993_v2 = vsel %vm9641_vm14, %v2985_v42, %v2992_v34  ;;  %v3199_v59 = vsel %vm9647_vm15, %v2994_v22, %v3198_v50  ;;  %v3369_v60 = vsel %vm8204_vm5, %v3364_v56, %v3368_v13  ;;  %v9893_v28 = vld [vmem:[#allocation2 + $0x3c] sm:$0xf] }
 0x356   : > { %3189 = vst [vmem:[#allocation2 + $0x84] sm:$0xf] %v3188_v37  ;;  %v2976_v45 = vsel %vm9641_vm14, %v2968_v12, %v2975_v46  ;;  %v3192_v31 = vsel %vm9647_vm15, %v2977_v47, %v3191_v26  ;;  %3197 = vst.msk [vmem:[#allocation2 + $0x94] sm:$0xf] %vm2700_vm6, %v2993_v2  ;;  %v3373_v52 = vor.u32 %v3372_v7, %v3368_v13  ;;  %v3376_v17 = vshll.u32 %v3240_v58, 16 }
 0x357   : > { %3200 = vst [vmem:[#allocation2 + $0x98] sm:$0x1] %v3199_v59  ;;  %3190 = vst.msk [vmem:[#allocation2 + $0x88] sm:$0xf] %vm2700_vm6, %v2976_v45  ;;  %v3381_v62 = vshrl.u32 %v9867_v32, 16  ;;  %v3384_v20 = vshll.u32 %v9867_v32, 16  ;;  %v2518_v9 = vadd.f32 %v9773_v48, %v9596_v0  ;;  %v2510_v26 = vadd.f32 %v9779_v49, %v9590_v41 }
 0x358   : > { %3193 = vst [vmem:[#allocation2 + $0x8c] sm:$0x1] %v3192_v31  ;;  %v3390_v38 = vshll.u32 %v9873_v18, 16  ;;  %v3394_v43 = vshrl.u32 %v9873_v18, 16  ;;  %v3400_v16 = vshll.u32 %v3243_v1, 16  ;;  %v3374_v55 = vrot.slane %v3373_v52, 4 }
 0x359   : > { %v3378_v51 = vrot.slane %v3376_v17, 5  ;;  %v3383_v3 = vrot.slane %v3381_v62, 4  ;;  %v3386_v54 = vrot.slane %v3384_v20, 5  ;;  %v2566_v50 = vmax.f32 %v2518_v9, 0.0  ;;  %v9921_v62 = vld [vmem:[#allocation2 + $0x40] sm:$0xf] }
 0x35a   : > { %v3392_v25 = vrot.slane %v3390_v38, 5  ;;  %v3396_v42 = vrot.slane %v3394_v43, 4  ;;  %v3402_v13 = vrot.slane %v3400_v16, 5  ;;  %v2521_v34 = vadd.f32 %v9781_v40, %v9599_v44  ;;  %v3208_v20 = vld [vmem:[#allocation2 + $0xa8] sm:$0xf] }
 0x35b   : > { %v3379_v12 = vsel %vm8204_vm5, %v3374_v55, %v3378_v51  ;;  %v3387_v0 = vor.u32 %v3386_v54, %v3383_v3  ;;  %v2513_v46 = vadd.f32 %v9789_v29, %v9593_v5  ;;  %v6561_v47 = vpack.c.bf16 %v2566_v50, %v2566_v50  ;;  %v3201_v54 = vld [vmem:[#allocation2 + $0x9c] sm:$0xf] }
 0x35c   : > { %v9901_v22 = vcombine.low %v3369_v60, %v3379_v12  ;;  %v3397_v48 = vor.u32 %v3396_v42, %v3392_v25  ;;  %v2564_v58 = vmax.f32 %v2510_v26, 0.0  ;;  %v2567_v35 = vmax.f32 %v2521_v34, 0.0 }
 0x35d   : > { %v3405_v37 = vshrl.u32 %v9893_v28, 16  ;;  %v3388_v41 = vrot.slane %v3387_v0, 4  ;;  %v2565_v56 = vmax.f32 %v2513_v46, 0.0  ;;  %v3408_v44 = vshll.u32 %v9893_v28, 16  ;;  %2727 = vst.msk [vmem:[%s9620_s26 + $0x68] sm:$0xf] %vm2700_vm6, %v6561_v47 }
 0x35e   : > { %11082 = vst [vmem:[#allocation14_spill] sm:$0xff] %v9901_v22  ;;  %7248 = vmatmul.mubr.msk.bf16.gmra.mrb[4].mxu1 %vm3718_vm9, %v9901_v22  ;;  %v3398_v49 = vrot.slane %v3397_v48, 4  ;;  %v3013_v40 = vshrl.u32 %v6561_v47, 16  ;;  %v3016_v7 = vshll.u32 %v6561_v47, 16  ;;  %v6559_v5 = vpack.c.bf16 %v2564_v58, %v2564_v58  ;;  %v3205_v46 = vld [vmem:[#allocation2 + $0xa4] sm:$0x1] }
 0x35f   : > { %v6562_v29 = vpack.c.bf16 %v2567_v35, %v2567_v35  ;;  %v3393_v1 = vsel %vm8204_vm5, %v3388_v41, %v3392_v25  ;;  %v6560_v59 = vpack.c.bf16 %v2565_v56, %v2565_v56  ;;  %v3407_v45 = vrot.slane %v3405_v37, 4  ;;  %v9931_v58 = vld [vmem:[#allocation2 + $0x48] sm:$0xf]  ;;  %v9933_v56 = vld [vmem:[#allocation2 + $0x44] sm:$0x1] }
 0x360   : > { %v3403_v2 = vsel %vm8204_vm5, %v3398_v49, %v3402_v13  ;;  %v3015_v60 = vrot.slane %v3013_v40, 7  ;;  %2725 = vst.msk [vmem:[%s9620_s26 + $0x60] sm:$0xf] %vm2700_vm6, %v6559_v5  ;;  %v2996_v52 = vshrl.u32 %v6559_v5, 16  ;;  %v2999_v17 = vshll.u32 %v6559_v5, 16 }
 0x361   : > { %v9915_v31 = vcombine.low %v3393_v1, %v3403_v2  ;;  %2728 = vst.msk [vmem:[%s9620_s26 + $0x6c] sm:$0xf] %vm2700_vm6, %v6562_v29  ;;  %v3021_v38 = vshrl.u32 %v6562_v29, 16  ;;  %v3024_v43 = vshll.u32 %v6562_v29, 16  ;;  %2726 = vst.msk [vmem:[%s9620_s26 + $0x64] sm:$0xf] %vm2700_vm6, %v6560_v59 }
 0x362   : > { %v3004_v16 = vshrl.u32 %v6560_v59, 16  ;;  %v3007_v55 = vshll.u32 %v6560_v59, 16  ;;  %v3018_v51 = vor.u32 %v3016_v7, %v3015_v60  ;;  %v3019_v3 = vrot.slane %v3015_v60, 4  ;;  %v3212_v13 = vld [vmem:[#allocation2 + $0xb0] sm:$0x1] }
 0x363   : > { %11083 = vst [vmem:[#allocation25_spill] sm:$0xff] %v9915_v31  ;;  %7251 = vmatprep.mubr.msk.bf16.mxu1 %vm3718_vm9, %v9915_v31  ;;  %v2998_v9 = vrot.slane %v2996_v52, 7  ;;  %v3410_v25 = vrot.slane %v3408_v44, 5  ;;  %v3023_v42 = vrot.slane %v3021_v38, 7  ;;  %v3414_v50 = vshll.u32 %v9921_v62, 16 }
 0x364   : > { %v3006_v12 = vrot.slane %v3004_v16, 7  ;;  %v3418_v26 = vshrl.u32 %v9921_v62, 16  ;;  %v3209_v34 = vsel %vm9632_vm13, %v3018_v51, %v3208_v20  ;;  %v9935_v44 = vld [vmem:[#allocation2 + $0x4c] sm:$0xf]  ;;  %v9939_v1 = vld [vmem:[#allocation2 + $0x50] sm:$0x1] }
 0x365   : > { %v3001_v0 = vor.u32 %v2999_v17, %v2998_v9  ;;  %v3002_v48 = vrot.slane %v2998_v9, 4  ;;  %v3411_v47 = vor.u32 %v3410_v25, %v3407_v45  ;;  %3210 = vst [vmem:[#allocation2 + $0xa8] sm:$0xf] %v3209_v34  ;;  %v3026_v35 = vor.u32 %v3024_v43, %v3023_v42  ;;  %11084 = vst [vmem:[#allocation16_spill] sm:$0xff] %v9939_v1 }
 0x366   : > { %v3028_v37 = vrot.slane %v3023_v42, 4  ;;  %v3009_v41 = vor.u32 %v3007_v55, %v3006_v12  ;;  %v3011_v49 = vrot.slane %v3006_v12, 4  ;;  %v3416_v5 = vrot.slane %v3414_v50, 5 }
 0x367   : > { %v3202_v40 = vsel %vm9632_vm13, %v3001_v0, %v3201_v54  ;;  %v3412_v7 = vrot.slane %v3411_v47, 4  ;;  %v3420_v29 = vrot.slane %v3418_v26, 4  ;;  %v3027_v2 = vsel %vm9641_vm14, %v3019_v3, %v3026_v35  ;;  %v9961_v26 = vld [vmem:[#allocation2 + $0x54] sm:$0xf] }
 0x368   : > { %3203 = vst [vmem:[#allocation2 + $0x9c] sm:$0xf] %v3202_v40  ;;  %v3213_v59 = vsel %vm9647_vm15, %v3028_v37, %v3212_v13  ;;  %v3010_v45 = vsel %vm9641_vm14, %v3002_v48, %v3009_v41  ;;  %v3206_v60 = vsel %vm9647_vm15, %v3011_v49, %v3205_v46  ;;  %3211 = vst.msk [vmem:[#allocation2 + $0xac] sm:$0xf] %vm2700_vm6, %v3027_v2  ;;  %v3424_v20 = vshll.u32 %v9933_v56, 16 }
 0x369   : > { %3214 = vst [vmem:[#allocation2 + $0xb0] sm:$0x1] %v3213_v59  ;;  %3204 = vst.msk [vmem:[#allocation2 + $0xa0] sm:$0xf] %vm2700_vm6, %v3010_v45  ;;  %v3417_v52 = vsel %vm8204_vm5, %v3412_v7, %v3416_v5  ;;  %v3421_v17 = vor.u32 %v3420_v29, %v3416_v5  ;;  %v3429_v38 = vshrl.u32 %v9931_v58, 16  ;;  %v3432_v43 = vshll.u32 %v9931_v58, 16 }
 0x36a   : > { %3207 = vst [vmem:[#allocation2 + $0xa4] sm:$0x1] %v3206_v60  ;;  %v3438_v16 = vshll.u32 %v9935_v44, 16  ;;  %v3442_v55 = vshrl.u32 %v9935_v44, 16  ;;  %v3448_v51 = vshll.u32 %v9939_v1, 16  ;;  %v3426_v9 = vrot.slane %v3424_v20, 5 }
 0x36b   : > { %v3422_v3 = vrot.slane %v3421_v17, 4  ;;  %v3431_v54 = vrot.slane %v3429_v38, 4  ;;  %v2534_v25 = vadd.f32 %v9802_v36, %v9608_v8  ;;  %v3434_v42 = vrot.slane %v3432_v43, 5  ;;  %v9989_v38 = vld [vmem:[#allocation2 + $0x58] sm:$0xf] }
 0x36c   : > { %v3440_v13 = vrot.slane %v3438_v16, 5  ;;  %v3444_v12 = vrot.slane %v3442_v55, 4  ;;  %v3450_v50 = vrot.slane %v3448_v51, 5  ;;  %v2526_v48 = vadd.f32 %v9806_v21, %v9602_v15  ;;  %v3222_v43 = vld [vmem:[#allocation2 + $0xc0] sm:$0xf] }
 0x36d   : > { %v3427_v34 = vsel %vm8204_vm5, %v3422_v3, %v3426_v9  ;;  %v2570_v0 = vmax.f32 %v2534_v25, 0.0  ;;  %v2537_v46 = vadd.f32 %v9818_v61, %v9611_v14  ;;  %v3435_v8 = vor.u32 %v3434_v42, %v3431_v54  ;;  %v3215_v42 = vld [vmem:[#allocation2 + $0xb4] sm:$0xf] }
 0x36e   : > { %v9969_v47 = vcombine.low %v3417_v52, %v3427_v34  ;;  %v3445_v36 = vor.u32 %v3444_v12, %v3440_v13  ;;  %v2529_v35 = vadd.f32 %v9825_v11, %v9605_v10  ;;  %v2568_v41 = vmax.f32 %v2526_v48, 0.0 }
 0x36f   : > { %v6565_v37 = vpack.c.bf16 %v2570_v0, %v2570_v0  ;;  %v2571_v49 = vmax.f32 %v2537_v46, 0.0  ;;  %v3453_v40 = vshrl.u32 %v9961_v26, 16  ;;  %v3436_v15 = vrot.slane %v3435_v8, 4 }
 0x370   : > { %11085 = vst [vmem:[#allocation26_spill] sm:$0xff] %v9969_v47  ;;  %7252 = vmatmul.mubr.msk.bf16.gmra.mrb[8].mxu1 %vm3718_vm9, %v9969_v47  ;;  %v3446_v21 = vrot.slane %v3445_v36, 4  ;;  %v2569_v7 = vmax.f32 %v2529_v35, 0.0  ;;  %v3456_v14 = vshll.u32 %v9961_v26, 16  ;;  %v6563_v10 = vpack.c.bf16 %v2568_v41, %v2568_v41  ;;  %v3219_v35 = vld [vmem:[#allocation2 + $0xbc] sm:$0x1] }
 0x371   : > { %2731 = vst.msk [vmem:[%s9620_s26 + $0x78] sm:$0xf] %vm2700_vm6, %v6565_v37  ;;  %v3047_v61 = vshrl.u32 %v6565_v37, 16  ;;  %v3050_v5 = vshll.u32 %v6565_v37, 16  ;;  %v6566_v11 = vpack.c.bf16 %v2571_v49, %v2571_v49  ;;  %v3441_v29 = vsel %vm8204_vm5, %v3436_v15, %v3440_v13  ;;  %v9999_v41 = vld [vmem:[#allocation2 + $0x60] sm:$0xf] }
 0x372   : > { %v3451_v2 = vsel %vm8204_vm5, %v3446_v21, %v3450_v50  ;;  %v6564_v59 = vpack.c.bf16 %v2569_v7, %v2569_v7  ;;  %v3455_v45 = vrot.slane %v3453_v40, 4  ;;  %2729 = vst.msk [vmem:[%s9620_s26 + $0x70] sm:$0xf] %vm2700_vm6, %v6563_v10  ;;  %v3030_v17 = vshrl.u32 %v6563_v10, 16  ;;  %v3226_v50 = vld [vmem:[#allocation2 + $0xc8] sm:$0x1] }
 0x373   : > { %v9983_v60 = vcombine.low %v3441_v29, %v3451_v2  ;;  %v3049_v52 = vrot.slane %v3047_v61, 7  ;;  %v3033_v20 = vshll.u32 %v6563_v10, 16  ;;  %2732 = vst.msk [vmem:[%s9620_s26 + $0x7c] sm:$0xf] %vm2700_vm6, %v6566_v11  ;;  %v3055_v16 = vshrl.u32 %v6566_v11, 16 }
 0x374   : > { %v3058_v55 = vshll.u32 %v6566_v11, 16  ;;  %2730 = vst.msk [vmem:[%s9620_s26 + $0x74] sm:$0xf] %vm2700_vm6, %v6564_v59  ;;  %v3038_v51 = vshrl.u32 %v6564_v59, 16  ;;  %v3041_v3 = vshll.u32 %v6564_v59, 16  ;;  %v3032_v25 = vrot.slane %v3030_v17, 7 }
 0x375   : > { %11086 = vst [vmem:[#allocation7_spill] sm:$0xff] %v9983_v60  ;;  %7255 = vmatprep.mubr.msk.bf16.mxu1 %vm3718_vm9, %v9983_v60  ;;  %v3052_v9 = vor.u32 %v3050_v5, %v3049_v52  ;;  %v3053_v54 = vrot.slane %v3049_v52, 4  ;;  %v3458_v13 = vrot.slane %v3456_v14, 5  ;;  %v3057_v12 = vrot.slane %v3055_v16, 7  ;;  %v10001_v7 = vld [vmem:[#allocation2 + $0x5c] sm:$0x1] }
 0x376   : > { %v3040_v34 = vrot.slane %v3038_v51, 7  ;;  %v3462_v0 = vshll.u32 %v9989_v38, 16  ;;  %v3466_v48 = vshrl.u32 %v9989_v38, 16  ;;  %v3035_v8 = vor.u32 %v3033_v20, %v3032_v25  ;;  %v10003_v14 = vld [vmem:[#allocation2 + $0x64] sm:$0xf]  ;;  %s250_s26 = sand.u32 1, %s8030_s22  }
 0x377   : > { %v3223_v46 = vsel %vm9632_vm13, %v3052_v9, %v3222_v43  ;;  %v3036_v36 = vrot.slane %v3032_v25, 4  ;;  %v3459_v37 = vor.u32 %v3458_v13, %v3455_v45  ;;  %v3060_v49 = vor.u32 %v3058_v55, %v3057_v12  ;;  %v10007_v29 = vld [vmem:[#allocation2 + $0x68] sm:$0x1]  ;;  %v10032_v13 = vld [vmem:[#allocation2 + $0x78] sm:$0xf]  ;;  %s6123_s19 = sshll.u32 %s250_s26, 8 }
 0x378   : > { %3224 = vst [vmem:[#allocation2 + $0xc0] sm:$0xf] %v3223_v46  ;;  %v3062_v40 = vrot.slane %v3057_v12, 4  ;;  %v3043_v15 = vor.u32 %v3041_v3, %v3040_v34  ;;  %v3045_v21 = vrot.slane %v3040_v34, 4  ;;  %v3216_v61 = vsel %vm9632_vm13, %v3035_v8, %v3215_v42  ;;  %v10029_v3 = vld [vmem:[#allocation2 + $0x70] sm:$0xf] }
 0x379   : > { %v3460_v5 = vrot.slane %v3459_v37, 4  ;;  %v3464_v10 = vrot.slane %v3462_v0, 5  ;;  %v3468_v11 = vrot.slane %v3466_v48, 4  ;;  %3217 = vst [vmem:[#allocation2 + $0xb4] sm:$0xf] %v3216_v61  ;;  %v3061_v2 = vsel %vm9641_vm14, %v3053_v54, %v3060_v49  ;;  %s10711_s9 = scalar_lea.vmem [#allocation3], %s6123_s19 }
 0x37a   : > { %v3227_v59 = vsel %vm9647_vm15, %v3062_v40, %v3226_v50  ;;  %v3044_v45 = vsel %vm9641_vm14, %v3036_v36, %v3043_v15  ;;  %v3220_v52 = vsel %vm9647_vm15, %v3045_v21, %v3219_v35  ;;  %3225 = vst.msk [vmem:[#allocation2 + $0xc4] sm:$0xf] %vm2700_vm6, %v3061_v2  ;;  %v3472_v43 = vshll.u32 %v10001_v7, 16  ;;  %v10034_v48 = vld [vmem:[#allocation2 + $0x74] sm:$0x1]  ;;  %s6032_s11 = sshll.u32 %s10711_s9, 4  ;;  %s10807_s11 = int_to_ptr.vmem [resolvable:$true] %s6032_s11 }
 0x37b   : > { %3228 = vst [vmem:[#allocation2 + $0xc8] sm:$0x1] %v3227_v59  ;;  %3218 = vst.msk [vmem:[#allocation2 + $0xb8] sm:$0xf] %vm2700_vm6, %v3044_v45  ;;  %v3465_v17 = vsel %vm8204_vm5, %v3460_v5, %v3464_v10  ;;  %v3469_v20 = vor.u32 %v3468_v11, %v3464_v10  ;;  %v3477_v24 = vshrl.u32 %v9999_v41, 16  ;;  %v3480_v16 = vshll.u32 %v9999_v41, 16  ;;  %p7983_p0 = scmp.lt.s32.totalorder %s10807_s11, %s7981_s17 }
 0x37c   : > { %3221 = vst [vmem:[#allocation2 + $0xbc] sm:$0x1] %v3220_v52  ;;  %v3486_v6 = vshll.u32 %v10003_v14, 16  ;;  %v3490_v55 = vshrl.u32 %v10003_v14, 16  ;;  %v3496_v51 = vshll.u32 %v10007_v29, 16  ;;  %v3474_v54 = vrot.slane %v3472_v43, 5 }
 0x37d   : > { %v3470_v9 = vrot.slane %v3469_v20, 4  ;;  %v3479_v25 = vrot.slane %v3477_v24, 4  ;;  %v3501_v42 = vshrl.u32 %v10017_v63, 16  ;;  %v3482_v12 = vrot.slane %v3480_v16, 5  ;;  %v10043_v21 = vld [vmem:[#allocation2 + $0x7c] sm:$0xf] }
 0x37e   : > { %v3488_v50 = vrot.slane %v3486_v6, 5  ;;  %v3492_v34 = vrot.slane %v3490_v55, 4  ;;  %v3498_v0 = vrot.slane %v3496_v51, 5  ;;  %v3504_v36 = vshll.u32 %v10017_v63, 16  ;;  %v10049_v52 = vld [vmem:[#allocation2 + $0x80] sm:$0x1] }
 0x37f   : > { %v3475_v46 = vsel %vm8204_vm5, %v3470_v9, %v3474_v54  ;;  %v3503_v8 = vrot.slane %v3501_v42, 4  ;;  %v3510_v35 = vshll.u32 %v10029_v3, 16  ;;  %v3483_v49 = vor.u32 %v3482_v12, %v3479_v25  ;;  %v10053_v6 = vld [vmem:[#allocation2 + $0x84] sm:$0xf]  ;;  %v10059_v25 = vld [vmem:[#allocation2 + $0x88] sm:$0xf] }
 0x380   : > { %v10040_v37 = vcombine.low %v3465_v17, %v3475_v46  ;;  %v3493_v40 = vor.u32 %v3492_v34, %v3488_v50  ;;  %v3514_v15 = vshrl.u32 %v10029_v3, 16  ;;  %v3506_v61 = vrot.slane %v3504_v36, 5  ;;  %s10818_s25 = scalar_lea.sflag [#allocation4], %s250_s26  ;;  %s7976_s14 = scalar_lea.vmem %s10807_s11, 4096 }
 0x381   : > { %v3512_v5 = vrot.slane %v3510_v35, 5  ;;  %v3520_v10 = vshll.u32 %v10034_v48, 16  ;;  %v3525_v11 = vshrl.u32 %v10032_v13, 16  ;;  %v3484_v2 = vrot.slane %v3483_v49, 4  ;;  %v10065_v49 = vld [vmem:[#allocation2 + $0x8c] sm:$0x1]  ;;  %p7977_p11 = scmp.ne.s32.totalorder %s10807_s11, %s7976_s14  ;;  %p7984_p1 = scmp.lt.s32.totalorder %s7982_s18, %s7976_s14 }
 0x382   : > { %11087 = vst [vmem:[#allocation27_spill] sm:$0xff] %v10040_v37  ;;  %7256 = vmatmul.mubr.msk.bf16.gmra.mrb[12].mxu1 %vm3718_vm9, %v10040_v37  ;;  %v3494_v59 = vrot.slane %v3493_v40, 4  ;;  %v3516_v45 = vrot.slane %v3514_v15, 4  ;;  %v3528_v17 = vshll.u32 %v10032_v13, 16  ;;  %v3507_v20 = vor.u32 %v3506_v61, %v3503_v8 }
 0x383   : > { %v3522_v43 = vrot.slane %v3520_v10, 5  ;;  %v3527_v24 = vrot.slane %v3525_v11, 4  ;;  %v3534_v16 = vshll.u32 %v10043_v21, 16  ;;  %v3489_v55 = vsel %vm8204_vm5, %v3484_v2, %v3488_v50  ;;  %v10074_v10 = vld [vmem:[#allocation2 + $0x90] sm:$0xf]  ;;  %p7978_p12 = pnand %p7977_p11, %p8117_p5  ;;  %p7985_p2 = por %p7984_p1, %p7983_p0 }
 0x384   : > { %v3499_v51 = vsel %vm8204_vm5, %v3494_v59, %v3498_v0  ;;  %v3517_v9 = vor.u32 %v3516_v45, %v3512_v5  ;;  %v3530_v54 = vrot.slane %v3528_v17, 5  ;;  %v3508_v12 = vrot.slane %v3507_v20, 4  ;;  %v10078_v17 = vld [vmem:[#allocation2 + $0x94] sm:$0xf] }
 0x385   : > { %v10061_v42 = vcombine.low %v3489_v55, %v3499_v51  ;;  %v3536_v34 = vrot.slane %v3534_v16, 5  ;;  %v3538_v46 = vshrl.u32 %v10043_v21, 16  ;;  %v3544_v35 = vshll.u32 %v10049_v52, 16  ;;  %p7979_p13 = pneg %p7978_p12 }
 0x386   : > { %v3518_v8 = vrot.slane %v3517_v9, 4  ;;  %v3531_v36 = vor.u32 %v3530_v54, %v3527_v24  ;;  %v3549_v50 = vshrl.u32 %v10053_v6, 16  ;;  %v3513_v0 = vsel %vm8204_vm5, %v3508_v12, %v3512_v5 }
 0x387   : > { %11088 = vst [vmem:[#allocation9_spill] sm:$0xff] %v10061_v42  ;;  %7259 = vmatprep.mubr.msk.bf16.mxu1 %vm3718_vm9, %v10061_v42  ;;  %v3540_v40 = vrot.slane %v3538_v46, 4  ;;  %v3552_v15 = vshll.u32 %v10053_v6, 16  ;;  %v3558_v61 = vshll.u32 %v10059_v25, 16  ;;  %v3546_v59 = vrot.slane %v3544_v35, 5  ;;  %p7986_p3 = pnand %p7985_p2, %p7979_p13 }
 0x388   : > { %v3523_v11 = vsel %vm8204_vm5, %v3518_v8, %v3522_v43  ;;  %v3532_v2 = vrot.slane %v3531_v36, 4  ;;  %v3551_v45 = vrot.slane %v3549_v50, 4  ;;  %v3562_v51 = vshrl.u32 %v10059_v25, 16  ;;  %v10089_v46 = vld [vmem:[#allocation2 + $0x98] sm:$0x1] }
 0x389   : > { %v10080_v20 = vcombine.low %v3513_v0, %v3523_v11  ;;  %v3541_v24 = vor.u32 %v3540_v40, %v3536_v34  ;;  %v3554_v16 = vrot.slane %v3552_v15, 5  ;;  %v3560_v5 = vrot.slane %v3558_v61, 5  ;;  %v10094_v40 = vld [vmem:[#allocation2 + $0x9c] sm:$0xf]  ;;  %v10105_v42 = vld [vmem:[#allocation2 + $0xa4] sm:$0x1] }
 0x38a   : > { %v3537_v55 = vsel %vm8204_vm5, %v3532_v2, %v3536_v34  ;;  %v3568_v9 = vshll.u32 %v10065_v49, 16  ;;  %v3573_v54 = vshrl.u32 %v10074_v10, 16  ;;  %v3576_v8 = vshll.u32 %v10074_v10, 16 }
 0x38b   : > { %11089 = vst [vmem:[#allocation21_spill] sm:$0xff] %v10080_v20  ;;  %7260 = vmatmul.mubr.msk.bf16.gmra.mrb[16].mxu1 %vm3718_vm9, %v10080_v20  ;;  %v3542_v43 = vrot.slane %v3541_v24, 4  ;;  %v3555_v12 = vor.u32 %v3554_v16, %v3551_v45  ;;  %v3582_v36 = vshll.u32 %v10078_v17, 16  ;;  %v3564_v35 = vrot.slane %v3562_v51, 4  ;;  %v10098_v45 = vld [vmem:[#allocation2 + $0xa0] sm:$0xf] }
 0x38c   : > { %v3570_v50 = vrot.slane %v3568_v9, 5  ;;  %v3575_v34 = vrot.slane %v3573_v54, 4  ;;  %v3586_v0 = vshrl.u32 %v10078_v17, 16  ;;  %v3578_v11 = vrot.slane %v3576_v8, 5 }
 0x38d   : > { %v3547_v15 = vsel %vm8204_vm5, %v3542_v43, %v3546_v59  ;;  %v3556_v61 = vrot.slane %v3555_v12, 4  ;;  %v3584_v2 = vrot.slane %v3582_v36, 5  ;;  %v3565_v16 = vor.u32 %v3564_v35, %v3560_v5 }
 0x38e   : > { %v10100_v24 = vcombine.low %v3537_v55, %v3547_v15  ;;  %v3588_v20 = vrot.slane %v3586_v0, 4  ;;  %v3592_v51 = vshll.u32 %v10089_v46, 16  ;;  %v3579_v54 = vor.u32 %v3578_v11, %v3575_v34  ;;  %v10113_v34 = vld [vmem:[#allocation2 + $0xa8] sm:$0xf] }
 0x38f   : > { %v3561_v9 = vsel %vm8204_vm5, %v3556_v61, %v3560_v5  ;;  %v3597_v37 = vshrl.u32 %v10094_v40, 16  ;;  %v3600_v59 = vshll.u32 %v10094_v40, 16  ;;  %v3566_v43 = vrot.slane %v3565_v16, 4 }
 0x390   : > { %11090 = vst [vmem:[#allocation11_spill] sm:$0xff] %v10100_v24  ;;  %7263 = vmatprep.mubr.msk.bf16.mxu1 %vm3718_vm9, %v10100_v24  ;;  %v3589_v55 = vor.u32 %v3588_v20, %v3584_v2  ;;  %v3594_v12 = vrot.slane %v3592_v51, 5  ;;  %v3606_v8 = vshll.u32 %v10098_v45, 16  ;;  %v3580_v36 = vrot.slane %v3579_v54, 4  ;;  %v10118_v24 = vld [vmem:[#allocation2 + $0xac] sm:$0xf] }
 0x391   : > { %v3599_v35 = vrot.slane %v3597_v37, 4  ;;  %v3602_v0 = vrot.slane %v3600_v59, 5  ;;  %v3610_v5 = vshrl.u32 %v10098_v45, 16  ;;  %v3571_v15 = vsel %vm8204_vm5, %v3566_v43, %v3570_v50  ;;  %v10126_v59 = vld [vmem:[#allocation2 + $0xb0] sm:$0x1] }
 0x392   : > { %v3590_v61 = vrot.slane %v3589_v55, 4  ;;  %v3608_v11 = vrot.slane %v3606_v8, 5  ;;  %v3616_v60 = vshll.u32 %v10105_v42, 16  ;;  %v10120_v20 = vcombine.low %v3561_v9, %v3571_v15  ;;  %v10130_v55 = vld [vmem:[#allocation2 + $0xb4] sm:$0xf] }
 0x393   : > { %v3603_v16 = vor.u32 %v3602_v0, %v3599_v35  ;;  %v3612_v51 = vrot.slane %v3610_v5, 4  ;;  %v3585_v37 = vsel %vm8204_vm5, %v3580_v36, %v3584_v2  ;;  %v3621_v50 = vshrl.u32 %v10113_v34, 16  ;;  %v10138_v15 = vld [vmem:[#allocation2 + $0xb8] sm:$0xf] }
 0x394   : > { %11091 = vst [vmem:[#allocation19_spill] sm:$0xff] %v10120_v20  ;;  %v3595_v54 = vsel %vm8204_vm5, %v3590_v61, %v3594_v12  ;;  %v3624_v43 = vshll.u32 %v10113_v34, 16  ;;  %7264 = vmatmul.mubr.msk.bf16.gmra.mrb[20].mxu1 %vm3718_vm9, %v10120_v20  ;;  %v3630_v2 = vshll.u32 %v10118_v24, 16  ;;  %v3618_v36 = vrot.slane %v3616_v60, 5 }
 0x395   : > { %v10134_v9 = vcombine.low %v3585_v37, %v3595_v54  ;;  %v3604_v8 = vrot.slane %v3603_v16, 4  ;;  %v3613_v35 = vor.u32 %v3612_v51, %v3608_v11  ;;  %v3623_v0 = vrot.slane %v3621_v50, 4  ;;  %v10146_v54 = vld [vmem:[#allocation2 + $0xbc] sm:$0x1] }
 0x396   : > { %v3626_v12 = vrot.slane %v3624_v43, 5  ;;  %v3634_v5 = vshrl.u32 %v10118_v24, 16  ;;  %v3632_v47 = vrot.slane %v3630_v2, 5  ;;  %v3640_v20 = vshll.u32 %v10126_v59, 16 }
 0x397   : > { %11092 = vst [vmem:[#allocation18_spill] sm:$0xff] %v10134_v9  ;;  %7267 = vmatprep.mubr.msk.bf16.mxu1 %vm3718_vm9, %v10134_v9  ;;  %v3614_v61 = vrot.slane %v3613_v35, 4  ;;  %v3645_v37 = vshrl.u32 %v10130_v55, 16  ;;  %v3609_v16 = vsel %vm8204_vm5, %v3604_v8, %v3608_v11  ;;  %v3648_v50 = vshll.u32 %v10130_v55, 16 }
 0x398   : > { %v3627_v51 = vor.u32 %v3626_v12, %v3623_v0  ;;  %v3636_v60 = vrot.slane %v3634_v5, 4  ;;  %v3654_v35 = vshll.u32 %v10138_v15, 16  ;;  %v3658_v2 = vshrl.u32 %v10138_v15, 16 }
 0x399   : > { %v3619_v43 = vsel %vm8204_vm5, %v3614_v61, %v3618_v36  ;;  %v3647_v31 = vrot.slane %v3645_v37, 4  ;;  %v3650_v39 = vrot.slane %v3648_v50, 5  ;;  %v3664_v0 = vshll.u32 %v10146_v54, 16 }
 0x39a   : > { %v10153_v9 = vcombine.low %v3609_v16, %v3619_v43  ;;  %v3628_v22 = vrot.slane %v3627_v51, 4  ;;  %v3637_v19 = vor.u32 %v3636_v60, %v3632_v47  ;;  %v3656_v11 = vrot.slane %v3654_v35, 5  ;;  %v10164_v43 = vld [vmem:[#allocation2] sm:$0xf] }
 0x39b   : > { %v3660_v8 = vrot.slane %v3658_v2, 4  ;;  %v3642_v5 = vrot.slane %v3640_v20, 5  ;;  %v3651_v1 = vor.u32 %v3650_v39, %v3647_v31  ;;  %v3666_v50 = vrot.slane %v3664_v0, 5 }
 0x39c   : > { %v3638_v12 = vrot.slane %v3637_v19, 4  ;;  %7268 = vmatmul.mubr.msk.bf16.gmra.mrb[24].mxu1 %vm3718_vm9, %v10153_v9  ;;  %v3633_v61 = vsel %vm8204_vm5, %v3628_v22, %v3632_v47  ;;  %v10166_v19 = vld [vmem:[#allocation2 + $0x4] sm:$0xf]  ;;  %v10174_v22 = vcombine.low %v9961_v26, %v9989_v38  ;;  %v10182_v47 = vcombine.low %v10017_v63, %v10029_v3 }
 0x39d   : > { %v3661_v36 = vor.u32 %v3660_v8, %v3656_v11  ;;  %v3652_v16 = vrot.slane %v3651_v1, 4  ;;  %v6337_v39 = vcombine.low %v10164_v43, %v10166_v19  ;;  %v10178_v1 = vcombine.low %v9999_v41, %v10003_v14 }
 0x39e   : > { %v3643_v37 = vsel %vm8204_vm5, %v3638_v12, %v3642_v5  ;;  %v10190_v35 = vcombine.low %v10032_v13, %v10043_v21  ;;  %v10194_v2 = vcombine.low %v10053_v6, %v10059_v25  ;;  %v10204_v0 = vcombine.low %v10094_v40, %v10098_v45 }
 0x39f   : > { %v10162_v51 = vcombine.low %v3633_v61, %v3643_v37  ;;  %v3662_v60 = vrot.slane %v3661_v36, 4  ;;  %v3657_v31 = vsel %vm8204_vm5, %v3652_v16, %v3656_v11  ;;  %v10198_v11 = vcombine.low %v10074_v10, %v10078_v17  ;;  %v10217_v36 = vld [vmem:[#allocation2 + $0xc] sm:$0xf]  ;;  %v10219_v61 = vld [vmem:[#allocation2 + $0x10] sm:$0xf] }
 0x3a0   : > { %v10208_v12 = vcombine.low %v10113_v34, %v10118_v24  ;;  %v10212_v5 = vcombine.low %v10130_v55, %v10138_v15  ;;  %v10223_v37 = vcombine.low %v10217_v36, %v10219_v61  ;;  %v4451_v16 = vsel %vm3767_vm8, %v9838_v57, 0 }
 0x3a1   : > { %11093 = vst [vmem:[#allocation13_spill] sm:$0xff] %v10162_v51  ;;  %7271 = vmatprep.mubr.msk.bf16.mxu1 %vm3718_vm9, %v10162_v51  ;;  %v3667_v20 = vsel %vm8204_vm5, %v3662_v60, %v3666_v50  ;;  %v10229_v60 = vcombine.low %v9787_v4, %v9795_v30  ;;  %v10234_v50 = vld [vmem:[%s10862_s3 + $0xc] sm:$0xf]  ;;  %v6376_v57 = vrot.slane %v9961_v26, 9  ;;  %v4291_v4 = vrot.slane %v9989_v38, 5 }
 0x3a2   : > { %v10200_v8 = vcombine.low %v3657_v31, %v3667_v20  ;;  %v10248_v30 = vcombine.low %v9867_v32, %v9873_v18  ;;  %v10252_v31 = vcombine.low %v9893_v28, %v9921_v62  ;;  %v6377_v20 = vrot.slane %v9999_v41, 9 }
 0x3a3   : > { %v4293_v26 = vrot.slane %v4291_v4, 4  ;;  %v4294_v38 = vrot.slane %v10001_v7, 5  ;;  %v4301_v32 = vrot.slane %v10007_v29, 5  ;;  %v4305_v51 = vrot.slane %v10029_v3, 5 }
 0x3a4   : > { %11094 = vst [vmem:[#allocation15_spill] sm:$0xff] %v10200_v8  ;;  %7272 = vmatmul.mubr.msk.bf16.gmra.mrb[28].mxu1 %vm3718_vm9, %v10200_v8  ;;  %v6378_v8 = vrot.slane %v10017_v63, 9 }
 0x3a5   : > { %7277 = vmatprep.mubr.msk.bf16.mxu1 %vm3718_vm9, %v6337_v39  ;;  %v10242_v39 = vcombine.low %v9816_v53, %v9844_v23  ;;  %v4298_v53 = vrot.slane %v10003_v14, 5  ;;  %v4292_v23 = vsel %vm8190_vm4, %v6376_v57, %v4291_v4  ;;  %v4295_v41 = vsel %vm8190_vm4, %v4293_v26, %v4294_v38 }
 0x3a6   : > { %v4308_v14 = vrot.slane %v10034_v48, 5  ;;  %v6379_v57 = vrot.slane %v10032_v13, 9  ;;  %v4312_v4 = vrot.slane %v10043_v21, 5  ;;  %v10271_v7 = vcombine.low %v4292_v23, %v4295_v41 }
 0x3a7   : > { %v4300_v33 = vrot.slane %v4298_v53, 4  ;;  %v4307_v63 = vrot.slane %v4305_v51, 4  ;;  %v4315_v48 = vrot.slane %v10049_v52, 5  ;;  %v4319_v21 = vrot.slane %v10059_v25, 5 }
 0x3a8   : > { %v4313_v3 = vsel %vm8190_vm4, %v6379_v57, %v4312_v4  ;;  %v4314_v26 = vrot.slane %v4312_v4, 4  ;;  %v6381_v23 = vrot.slane %v10074_v10, 9  ;;  %v4326_v38 = vrot.slane %v10078_v17, 5 }
 0x3a9   : > { %v4302_v29 = vsel %vm8190_vm4, %v4300_v33, %v4301_v32  ;;  %v4309_v13 = vsel %vm8190_vm4, %v4307_v63, %v4308_v14  ;;  %v6380_v33 = vrot.slane %v10053_v6, 9  ;;  %v4321_v25 = vrot.slane %v4319_v21, 4 }
 0x3aa   : > { %v4316_v52 = vsel %vm8190_vm4, %v4314_v26, %v4315_v48  ;;  %v4328_v41 = vrot.slane %v4326_v38, 4  ;;  %v6382_v14 = vrot.slane %v10094_v40, 9  ;;  %v4333_v57 = vrot.slane %v10098_v45, 5 }
 0x3ab   : > { %v10297_v32 = vcombine.low %v4313_v3, %v4316_v52  ;;  %v4320_v6 = vsel %vm8190_vm4, %v6380_v33, %v4319_v21  ;;  %v4336_v17 = vrot.slane %v10105_v42, 5  ;;  %v6383_v4 = vrot.slane %v10113_v34, 9 }
 0x3ac   : > { %7278 = vmatmul.mubr.msk.bf16.vlgmr.msra.gmra.mrb[0].mxu1 %vm3718_vm9, %v10223_v37  ;;  %v4334_v63 = vsel %vm8190_vm4, %v6382_v14, %v4333_v57  ;;  %v4335_v40 = vrot.slane %v4333_v57, 4  ;;  %v4343_v42 = vrot.slane %v10126_v59, 5  ;;  %v6384_v48 = vrot.slane %v10130_v55, 9  ;;  %v10336_v59 = vld [vmem:[#allocation2 + $0xc0] sm:$0xf] }
 0x3ad   : > { %7281 = vmatprep.mubr.msk.bf16.mxu1 %vm3718_vm9, %v10229_v60  ;;  %7310 = vmatpush3.bf16.msra.mxu1 %v4451_v16  ;;  %v4299_v16 = vsel %vm8190_vm4, %v6377_v20, %v4298_v53  ;;  %v4306_v20 = vsel %vm8190_vm4, %v6378_v8, %v4305_v51  ;;  %v4322_v51 = vrot.slane %v10065_v49, 5  ;;  %v4329_v49 = vrot.slane %v10089_v46, 5 }
 0x3ae   : > { %7806 = vmatprep.subr.msk.bf16.mxu1 %vm3767_vm8, %v10234_v50  ;;  %v10277_v53 = vcombine.low %v4299_v16, %v4302_v29  ;;  %v10291_v8 = vcombine.low %v4306_v20, %v4309_v13  ;;  %v4327_v16 = vsel %vm8190_vm4, %v6381_v23, %v4326_v38  ;;  %v4340_v29 = vrot.slane %v10118_v24, 5  ;;  %v10347_v38 = vld [vmem:[#allocation2 + $0xc8] sm:$0x1] }
 0x3af   : > { %v4323_v10 = vsel %vm8190_vm4, %v4321_v25, %v4322_v51  ;;  %v4330_v46 = vsel %vm8190_vm4, %v4328_v41, %v4329_v49  ;;  %v10324_v24 = vcombine.low %v9931_v58, %v9935_v44  ;;  %v4337_v34 = vsel %vm8190_vm4, %v4335_v40, %v4336_v17  ;;  %v10338_v51 = vld [vmem:[#allocation2 + $0xc4] sm:$0xf] }
 0x3b0   : > { %v10311_v20 = vcombine.low %v4320_v6, %v4323_v10  ;;  %v10317_v3 = vcombine.low %v4327_v16, %v4330_v46  ;;  %v4341_v45 = vsel %vm8190_vm4, %v6383_v4, %v4340_v29  ;;  %v4342_v26 = vrot.slane %v4340_v29, 4  ;;  %v7966_v4 = vld [vmem:[#allocation2 + $0x8] sm:$0x1] }
 0x3b1   : > { %v4347_v13 = vrot.slane %v10138_v15, 5  ;;  %v10332_v33 = vcombine.low %v4334_v63, %v4337_v34  ;;  %v4350_v23 = vrot.slane %v10146_v54, 5  ;;  %v6454_v25 = vrot.slane %v10336_v59, 9 }
 0x3b2   : > { %v4344_v21 = vsel %vm8190_vm4, %v4342_v26, %v4343_v42  ;;  %v5083_v49 = vrot.slane %v10338_v51, 5  ;;  %v5086_v57 = vrot.slane %v10347_v38, 5  ;;  %v4242_v17 = vrot.slane %v10166_v19, 5  ;;  %v7967_v19 = vld [vmem:[#allocation2 + $0x1c] sm:$0xf] }
 0x3b3   : > { %v10342_v52 = vcombine.low %v4341_v45, %v4344_v21  ;;  %v4348_v55 = vsel %vm8190_vm4, %v6384_v48, %v4347_v13  ;;  %v4349_v15 = vrot.slane %v4347_v13, 4  ;;  %v4245_v29 = vrot.slane %v7966_v4, 5  ;;  %v7968_v13 = vld [vmem:[#allocation2 + $0x14] sm:$0x1] }
 0x3b4   : > { %7282 = vmatmul.mubr.msk.bf16.gmra.mrb[4].mxu1 %vm3718_vm9, %v10242_v39  ;;  %v5084_v41 = vsel %vm8190_vm4, %v6454_v25, %v5083_v49  ;;  %v5085_v14 = vrot.slane %v5083_v49, 4  ;;  %v6369_v46 = vrot.slane %v10164_v43, 9  ;;  %v4244_v63 = vrot.slane %v4242_v17, 4  ;;  %v7971_v49 = vld [vmem:[#allocation2 + $0x18] sm:$0xf] }
 0x3b5   : > { %7285 = vmatprep.mubr.msk.bf16.mxu1 %vm3718_vm9, %v10248_v30  ;;  %v4351_v6 = vsel %vm8190_vm4, %v4349_v15, %v4350_v23  ;;  %v4249_v26 = vrot.slane %v10219_v61, 5  ;;  %v4256_v42 = vrot.slane %v7967_v19, 5  ;;  %v4252_v21 = vrot.slane %v7968_v13, 5  ;;  %v7970_v61 = vld [vmem:[#allocation2 + $0x28] sm:$0xf] }
 0x3b6   : > { %v10353_v16 = vcombine.low %v4348_v55, %v4351_v6  ;;  %v5087_v54 = vsel %vm8190_vm4, %v5085_v14, %v5086_v57  ;;  %v4243_v40 = vsel %vm8190_vm4, %v6369_v46, %v4242_v17  ;;  %v4246_v45 = vsel %vm8190_vm4, %v4244_v63, %v4245_v29  ;;  %v7969_v55 = vld [vmem:[#allocation2 + $0x20] sm:$0x1]  ;;  %v6436_v63 = vld [vmem:[%s10862_s3 + $0x10] sm:$0xf] }
 0x3b7   : > { %v10362_v10 = vcombine.low %v5084_v41, %v5087_v54  ;;  %v6386_v34 = vcombine.low %v4243_v40, %v4246_v45  ;;  %v4251_v48 = vrot.slane %v4249_v26, 4  ;;  %v4258_v43 = vrot.slane %v4256_v42, 4  ;;  %v7972_v40 = vld [vmem:[#allocation2 + $0x2c] sm:$0x1] }
 0x3b8   : > { %v4259_v15 = vrot.slane %v7969_v55, 5  ;;  %v6370_v23 = vrot.slane %v10217_v36, 9  ;;  %v4263_v25 = vrot.slane %v7970_v61, 5  ;;  %v6371_v41 = vrot.slane %v7971_v49, 9 }
 0x3b9   : > { %v4253_v6 = vsel %vm8190_vm4, %v4251_v48, %v4252_v21  ;;  %v4270_v57 = vrot.slane %v9873_v18, 5  ;;  %v4657_v4 = vsel %vm3767_vm8, %v10234_v50, 0  ;;  %v4266_v45 = vrot.slane %v7972_v40, 5  ;;  %v7974_v50 = vld [vmem:[#allocation2 + $0x24] sm:$0xf] }
 0x3ba   : > { %v4260_v14 = vsel %vm8190_vm4, %v4258_v43, %v4259_v15  ;;  %v4250_v54 = vsel %vm8190_vm4, %v6370_v23, %v4249_v26  ;;  %v4257_v36 = vsel %vm8190_vm4, %v6371_v41, %v4256_v42  ;;  %v4265_v46 = vrot.slane %v4263_v25, 4  ;;  %v7973_v26 = vld [vmem:[#allocation2 + $0x38] sm:$0x1]  ;;  %v7975_v43 = vld [vmem:[#allocation2 + $0x30] sm:$0xf]  ;;  %v11095_v41 = vld [vmem:[#allocation16_spill] sm:$0xff] }
 0x3bb   : > { %v10396_v17 = vcombine.low %v4250_v54, %v4253_v6  ;;  %v10402_v29 = vcombine.low %v4257_v36, %v4260_v14  ;;  %v4272_v18 = vrot.slane %v4270_v57, 4  ;;  %v4273_v19 = vrot.slane %v7973_v26, 5  ;;  %v11097_v26 = vld [vmem:[#allocation12_spill] sm:$0xff] }
 0x3bc   : > { %7286 = vmatmul.mubr.msk.bf16.gmra.mrb[8].mxu1 %vm3718_vm9, %v10252_v31  ;;  %v6372_v42 = vrot.slane %v7974_v50, 9  ;;  %v4277_v48 = vrot.slane %v9921_v62, 5  ;;  %v6373_v13 = vrot.slane %v7975_v43, 9  ;;  %v4284_v55 = vrot.slane %v9935_v44, 5  ;;  %v11099_v50 = vld [vmem:[#allocation25_spill] sm:$0xff] }
 0x3bd   : > { %7289 = vmatprep.mubr.msk.bf16.mxu1 %vm3718_vm9, %v10324_v24  ;;  %v4274_v21 = vsel %vm8190_vm4, %v4272_v18, %v4273_v19  ;;  %v4280_v44 = vrot.slane %v9933_v56, 5  ;;  %v4287_v14 = vrot.slane %v11095_v41, 5  ;;  %v11098_v19 = vld [vmem:[#allocation14_spill] sm:$0xff]  ;;  %v11103_v43 = vld [vmem:[#allocation9_spill] sm:$0xff] }
 0x3be   : > { %v4264_v15 = vsel %vm8190_vm4, %v6372_v42, %v4263_v25  ;;  %v4271_v6 = vsel %vm8190_vm4, %v6373_v13, %v4270_v57  ;;  %v4279_v49 = vrot.slane %v4277_v48, 4  ;;  %v4286_v62 = vrot.slane %v4284_v55, 4  ;;  %v11100_v42 = vld [vmem:[#allocation26_spill] sm:$0xff]  ;;  %v11104_v13 = vld [vmem:[#allocation21_spill] sm:$0xff] }
 0x3bf   : > { %v10424_v61 = vcombine.low %v4271_v6, %v4274_v21  ;;  %v6374_v25 = vrot.slane %v9893_v28, 9  ;;  %v6375_v57 = vrot.slane %v9931_v58, 9  ;;  %v4885_v28 = vsel %vm3767_vm8, %v6436_v63, 0  ;;  %v6455_v58 = vld [vmem:[%s10862_s3 + $0x14] sm:$0xf]  ;;  %v11105_v21 = vld [vmem:[#allocation11_spill] sm:$0xff] }
 0x3c0   : > { %v4281_v54 = vsel %vm8190_vm4, %v4279_v49, %v4280_v44  ;;  %v4288_v36 = vsel %vm8190_vm4, %v4286_v62, %v4287_v14  ;;  %v5097_v40 = vsel %vm3767_vm8, %v6455_v58, 0  ;;  %v4862_v6 = vshll.u32 %v10338_v51, 16  ;;  %v11107_v14 = vld [vmem:[#allocation18_spill] sm:$0xff] }
 0x3c1   : > { %v4285_v56 = vsel %vm8190_vm4, %v6375_v57, %v4284_v55  ;;  %v11106_v55 = vld [vmem:[#allocation19_spill] sm:$0xff]  ;;  %v4853_v49 = vshrl.u32 %v10336_v59, 16  ;;  %v4856_v62 = vshll.u32 %v10336_v59, 16 }
 0x3c2   : > { %v10444_v18 = vcombine.low %v4285_v56, %v4288_v36  ;;  %v4864_v44 = vrot.slane %v4862_v6, 5 }
 0x3c4   : > { %7290 = vmatmul.mubr.msk.bf16.gmra.mrb[12].mxu1 %vm3718_vm9, %v10174_v22 }
 0x3c5   : > { %7293 = vmatprep.mubr.msk.bf16.mxu1 %vm3718_vm9, %v10178_v1 }
 0x3cc   : > { %7294 = vmatmul.mubr.msk.bf16.gmra.mrb[16].mxu1 %vm3718_vm9, %v10182_v47 }
 0x3cd   : > { %7297 = vmatprep.mubr.msk.bf16.mxu1 %vm3718_vm9, %v10190_v35 }
 0x3d4   : > { %7298 = vmatmul.mubr.msk.bf16.gmra.mrb[20].mxu1 %vm3718_vm9, %v10194_v2 }
 0x3d5   : > { %7301 = vmatprep.mubr.msk.bf16.mxu1 %vm3718_vm9, %v10198_v11 }
 0x3dc   : > { %7302 = vmatmul.mubr.msk.bf16.gmra.mrb[24].mxu1 %vm3718_vm9, %v10204_v0 }
 0x3dd   : > { %7305 = vmatprep.mubr.msk.bf16.mxu1 %vm3718_vm9, %v10208_v12 }
 0x3e4   : > { %7306 = vmatmul.mubr.msk.bf16.gmra.mrb[28].mxu1 %vm3718_vm9, %v10212_v5 }
 0x3e5   : > { %7311 = vmatprep.mubr.msk.bf16.mxu1 %vm3718_vm9, %v6386_v34  ;;  %v4267_v34 = vsel %vm8190_vm4, %v4265_v46, %v4266_v45  ;;  %v6473_v45 = vld [vmem:[%s10862_s3 + $0x18] sm:$0xf] }
 0x3e6   : > { %v10420_v23 = vcombine.low %v4264_v15, %v4267_v34  ;;  %v11101_v34 = vld [vmem:[#allocation7_spill] sm:$0xff]  ;;  %v4866_v15 = vshrl.u32 %v10338_v51, 16 }
 0x3e8   : > { %v4868_v41 = vrot.slane %v4866_v15, 4 }
 0x3ea   : > { %v4869_v57 = vor.u32 %v4868_v41, %v4864_v44 }
 0x3ec   : > { %7312 = vmatmul.mubr.msk.bf16.vlgmr.msra.gmra.mrb[0].mxu1 %vm3718_vm9, %v10396_v17  ;;  %v4870_v56 = vrot.slane %v4869_v57, 4 }
 0x3ed   : > { %7315 = vmatprep.mubr.msk.bf16.mxu1 %vm3718_vm9, %v10402_v29  ;;  %7344 = vmatpush3.bf16.msra.mxu1 %v4657_v4  ;;  %v4278_v4 = vsel %vm8190_vm4, %v6374_v25, %v4277_v48  ;;  %v11102_v48 = vld [vmem:[#allocation27_spill] sm:$0xff]  ;;  %v4855_v25 = vrot.slane %v4853_v49, 4  ;;  %v6491_v49 = vld [vmem:[%s10862_s3 + $0x1c] sm:$0xf] }
 0x3ee   : > { %7807 = vmatprep.subr.msk.bf16.mxu1 %vm3767_vm8, %v6436_v63  ;;  %v10440_v46 = vcombine.low %v4278_v4, %v4281_v54  ;;  %v11096_v63 = vld [vmem:[#allocation22_spill] sm:$0xff]  ;;  %v4858_v54 = vrot.slane %v4856_v62, 5  ;;  %v4872_v4 = vshll.u32 %v10347_v38, 16  ;;  %v5303_v38 = vsel %vm3767_vm8, %v6473_v45, 0 }
 0x3f0   : > { %v4859_v36 = vor.u32 %v4858_v54, %v4855_v25 }
 0x3f4   : > { %7316 = vmatmul.mubr.msk.bf16.gmra.mrb[4].mxu1 %vm3718_vm9, %v10420_v23 }
 0x3f5   : > { %7319 = vmatprep.mubr.msk.bf16.mxu1 %vm3718_vm9, %v10424_v61 }
 0x3fc   : > { %7320 = vmatmul.mubr.msk.bf16.gmra.mrb[8].mxu1 %vm3718_vm9, %v10440_v46 }
 0x3fd   : > { %7323 = vmatprep.mubr.msk.bf16.mxu1 %vm3718_vm9, %v10444_v18 }
 0x404   : > { %7324 = vmatmul.mubr.msk.bf16.gmra.mrb[12].mxu1 %vm3718_vm9, %v10271_v7 }
 0x405   : > { %7327 = vmatprep.mubr.msk.bf16.mxu1 %vm3718_vm9, %v10277_v53 }
 0x40c   : > { %7328 = vmatmul.mubr.msk.bf16.gmra.mrb[16].mxu1 %vm3718_vm9, %v10291_v8 }
 0x40d   : > { %7331 = vmatprep.mubr.msk.bf16.mxu1 %vm3718_vm9, %v10297_v32 }
 0x414   : > { %7332 = vmatmul.mubr.msk.bf16.gmra.mrb[20].mxu1 %vm3718_vm9, %v10311_v20 }
 0x415   : > { %7335 = vmatprep.mubr.msk.bf16.mxu1 %vm3718_vm9, %v10317_v3 }
 0x41c   : > { %7336 = vmatmul.mubr.msk.bf16.gmra.mrb[24].mxu1 %vm3718_vm9, %v10332_v33 }
 0x41d   : > { %7339 = vmatprep.mubr.msk.bf16.mxu1 %vm3718_vm9, %v10342_v52 }
 0x424   : > { %7340 = vmatmul.mubr.msk.bf16.gmra.mrb[28].mxu1 %vm3718_vm9, %v10353_v16 }
 0x425   : > { %7345 = vmatprep.mubr.msk.bf16.mxu1 %vm3718_vm9, %v10223_v37  ;;  %v10505_v37 = vcombine.low %v10336_v59, %v10338_v51  ;;  %v11108_v51 = vld [vmem:[#allocation13_spill] sm:$0xff]  ;;  %v4860_v59 = vrot.slane %v4859_v36, 4 }
 0x427   : > { %v4865_v15 = vsel %vm8204_vm5, %v4860_v59, %v4864_v44 }
 0x42c   : > { %7346 = vmatmul.mubr.msk.bf16.vlgmr.msra.gmra.mrb[0].mxu1 %vm3718_vm9, %v10229_v60 }
 0x42d   : > { %7349 = vmatprep.mubr.msk.bf16.mxu1 %vm3718_vm9, %v10242_v39  ;;  %7378 = vmatpush3.bf16.msra.mxu1 %v4885_v28  ;;  %v11109_v28 = vld [vmem:[#allocation15_spill] sm:$0xff] }
 0x42e   : > { %7808 = vmatprep.subr.msk.bf16.mxu1 %vm3767_vm8, %v6455_v58  ;;  %v4874_v58 = vrot.slane %v4872_v4, 5 }
 0x434   : > { %7350 = vmatmul.mubr.msk.bf16.gmra.mrb[4].mxu1 %vm3718_vm9, %v10248_v30 }
 0x435   : > { %7353 = vmatprep.mubr.msk.bf16.mxu1 %vm3718_vm9, %v10252_v31 }
 0x43c   : > { %7354 = vmatmul.mubr.msk.bf16.gmra.mrb[8].mxu1 %vm3718_vm9, %v10324_v24 }
 0x43d   : > { %7357 = vmatprep.mubr.msk.bf16.mxu1 %vm3718_vm9, %v10174_v22 }
 0x444   : > { %7358 = vmatmul.mubr.msk.bf16.gmra.mrb[12].mxu1 %vm3718_vm9, %v10178_v1 }
 0x445   : > { %7361 = vmatprep.mubr.msk.bf16.mxu1 %vm3718_vm9, %v10182_v47 }
 0x44c   : > { %7362 = vmatmul.mubr.msk.bf16.gmra.mrb[16].mxu1 %vm3718_vm9, %v10190_v35 }
 0x44d   : > { %7365 = vmatprep.mubr.msk.bf16.mxu1 %vm3718_vm9, %v10194_v2 }
 0x454   : > { %7366 = vmatmul.mubr.msk.bf16.gmra.mrb[20].mxu1 %vm3718_vm9, %v10198_v11 }
 0x455   : > { %7369 = vmatprep.mubr.msk.bf16.mxu1 %vm3718_vm9, %v10204_v0 }
 0x45c   : > { %7370 = vmatmul.mubr.msk.bf16.gmra.mrb[24].mxu1 %vm3718_vm9, %v10208_v12 }
 0x45d   : > { %7373 = vmatprep.mubr.msk.bf16.mxu1 %vm3718_vm9, %v10212_v5 }
 0x464   : > { %7374 = vmatmul.mubr.msk.bf16.gmra.mrb[28].mxu1 %vm3718_vm9, %v10505_v37 }
 0x465   : > { %7379 = vmatprep.mubr.msk.bf16.mxu1 %vm3718_vm9, %v11096_v63 }
 0x46c   : > { %7380 = vmatmul.mubr.msk.bf16.vlgmr.msra.gmra.mrb[0].mxu1 %vm3718_vm9, %v11097_v26 }
 0x46d   : > { %7383 = vmatprep.mubr.msk.bf16.mxu1 %vm3718_vm9, %v11098_v19  ;;  %7412 = vmatpush3.bf16.msra.mxu1 %v5097_v40  ;;  %v4875_v40 = vsel %vm8204_vm5, %v4870_v56, %v4874_v58 }
 0x46e   : > { %7809 = vmatprep.subr.msk.bf16.mxu1 %vm3767_vm8, %v6473_v45  ;;  %v10553_v6 = vcombine.low %v4865_v15, %v4875_v40  ;;  %v6510_v45 = vld [vmem:[%s10862_s3 + $0x20] sm:$0xf] }
 0x474   : > { %7384 = vmatmul.mubr.msk.bf16.gmra.mrb[4].mxu1 %vm3718_vm9, %v11099_v50 }
 0x475   : > { %7387 = vmatprep.mubr.msk.bf16.mxu1 %vm3718_vm9, %v11100_v42 }
 0x47c   : > { %7388 = vmatmul.mubr.msk.bf16.gmra.mrb[8].mxu1 %vm3718_vm9, %v11101_v34 }
 0x47d   : > { %7391 = vmatprep.mubr.msk.bf16.mxu1 %vm3718_vm9, %v11102_v48 }
 0x484   : > { %7392 = vmatmul.mubr.msk.bf16.gmra.mrb[12].mxu1 %vm3718_vm9, %v11103_v43 }
 0x485   : > { %7395 = vmatprep.mubr.msk.bf16.mxu1 %vm3718_vm9, %v11104_v13 }
 0x48c   : > { %7396 = vmatmul.mubr.msk.bf16.gmra.mrb[16].mxu1 %vm3718_vm9, %v11105_v21 }
 0x48d   : > { %7399 = vmatprep.mubr.msk.bf16.mxu1 %vm3718_vm9, %v11106_v55 }
 0x494   : > { %7400 = vmatmul.mubr.msk.bf16.gmra.mrb[20].mxu1 %vm3718_vm9, %v11107_v14 }
 0x495   : > { %7403 = vmatprep.mubr.msk.bf16.mxu1 %vm3718_vm9, %v10153_v9 }
 0x49c   : > { %7404 = vmatmul.mubr.msk.bf16.gmra.mrb[24].mxu1 %vm3718_vm9, %v11108_v51 }
 0x49d   : > { %7407 = vmatprep.mubr.msk.bf16.mxu1 %vm3718_vm9, %v11109_v28 }
 0x4a4   : > { %7408 = vmatmul.mubr.msk.bf16.gmra.mrb[28].mxu1 %vm3718_vm9, %v10553_v6 }
 0x4a5   : > { %7413 = vmatprep.mubr.msk.bf16.mxu1 %vm3718_vm9, %v10396_v17  ;;  %v5531_v17 = vsel %vm3767_vm8, %v6491_v49, 0 }
 0x4ac   : > { %7414 = vmatmul.mubr.msk.bf16.vlgmr.msra.gmra.mrb[0].mxu1 %vm3718_vm9, %v10402_v29 }
 0x4ad   : > { %7417 = vmatprep.mubr.msk.bf16.mxu1 %vm3718_vm9, %v10420_v23  ;;  %7446 = vmatpush3.bf16.msra.mxu1 %v5303_v38 }
 0x4ae   : > { %7810 = vmatprep.subr.msk.bf16.mxu1 %vm3767_vm8, %v6491_v49 }
 0x4b4   : > { %7418 = vmatmul.mubr.msk.bf16.gmra.mrb[4].mxu1 %vm3718_vm9, %v10424_v61 }
 0x4b5   : > { %7421 = vmatprep.mubr.msk.bf16.mxu1 %vm3718_vm9, %v10440_v46 }
 0x4bc   : > { %7422 = vmatmul.mubr.msk.bf16.gmra.mrb[8].mxu1 %vm3718_vm9, %v10444_v18 }
 0x4bd   : > { %7425 = vmatprep.mubr.msk.bf16.mxu1 %vm3718_vm9, %v10271_v7 }
 0x4c4   : > { %7426 = vmatmul.mubr.msk.bf16.gmra.mrb[12].mxu1 %vm3718_vm9, %v10277_v53 }
 0x4c5   : > { %7429 = vmatprep.mubr.msk.bf16.mxu1 %vm3718_vm9, %v10291_v8 }
 0x4cc   : > { %7430 = vmatmul.mubr.msk.bf16.gmra.mrb[16].mxu1 %vm3718_vm9, %v10297_v32 }
 0x4cd   : > { %7433 = vmatprep.mubr.msk.bf16.mxu1 %vm3718_vm9, %v10311_v20 }
 0x4d4   : > { %7434 = vmatmul.mubr.msk.bf16.gmra.mrb[20].mxu1 %vm3718_vm9, %v10317_v3 }
 0x4d5   : > { %7437 = vmatprep.mubr.msk.bf16.mxu1 %vm3718_vm9, %v10332_v33 }
 0x4dc   : > { %7438 = vmatmul.mubr.msk.bf16.gmra.mrb[24].mxu1 %vm3718_vm9, %v10342_v52 }
 0x4dd   : > { %7441 = vmatprep.mubr.msk.bf16.mxu1 %vm3718_vm9, %v10353_v16 }
 0x4e4   : > { %7442 = vmatmul.mubr.msk.bf16.gmra.mrb[28].mxu1 %vm3718_vm9, %v10362_v10 }
 0x4e5   : > { %7447 = vmatprep.mubr.msk.bf16.mxu1 %vm3718_vm9, %v10229_v60 }
 0x4ec   : > { %7448 = vmatmul.mubr.msk.bf16.vlgmr.msra.gmra.mrb[0].mxu1 %vm3718_vm9, %v10242_v39 }
 0x4ed   : > { %7451 = vmatprep.mubr.msk.bf16.mxu1 %vm3718_vm9, %v10248_v30  ;;  %7480 = vmatpush3.bf16.msra.mxu1 %v5531_v17 }
 0x4ee   : > { %7811 = vmatprep.subr.msk.bf16.mxu1 %vm3767_vm8, %v6510_v45 }
 0x4f4   : > { %7452 = vmatmul.mubr.msk.bf16.gmra.mrb[4].mxu1 %vm3718_vm9, %v10252_v31  ;;  %v3282_v31 = vld [vmem:[#allocation2 + $0xd4] sm:$0x1] }
 0x4f5   : > { %7455 = vmatprep.mubr.msk.bf16.mxu1 %vm3718_vm9, %v10324_v24 }
 0x4fc   : > { %7456 = vmatmul.mubr.msk.bf16.gmra.mrb[8].mxu1 %vm3718_vm9, %v10174_v22  ;;  %v3280_v22 = vld [vmem:[#allocation2 + $0xcc] sm:$0xf] }
 0x4fd   : > { %7459 = vmatprep.mubr.msk.bf16.mxu1 %vm3718_vm9, %v10178_v1  ;;  %v3281_v1 = vld [vmem:[#allocation2 + $0xd0] sm:$0xf] }
 0x504   : > { %7460 = vmatmul.mubr.msk.bf16.gmra.mrb[12].mxu1 %vm3718_vm9, %v10182_v47  ;;  %v6474_v47 = vcombine.low %v3280_v22, %v3281_v1 }
 0x505   : > { %7463 = vmatprep.mubr.msk.bf16.mxu1 %vm3718_vm9, %v10190_v35  ;;  %v5743_v35 = vsel %vm3767_vm8, %v6510_v45, 0 }
 0x50c   : > { %7464 = vmatmul.mubr.msk.bf16.gmra.mrb[16].mxu1 %vm3718_vm9, %v10194_v2  ;;  %v5499_v2 = vshrl.u32 %v3280_v22, 16 }
 0x50d   : > { %7467 = vmatprep.mubr.msk.bf16.mxu1 %vm3718_vm9, %v10198_v11  ;;  %v5502_v11 = vshll.u32 %v3280_v22, 16 }
 0x50f   : > { %v5504_v60 = vrot.slane %v5502_v11, 5 }
 0x514   : > { %7468 = vmatmul.mubr.msk.bf16.gmra.mrb[20].mxu1 %vm3718_vm9, %v10204_v0  ;;  %v5512_v0 = vshrl.u32 %v3281_v1, 16 }
 0x515   : > { %7471 = vmatprep.mubr.msk.bf16.mxu1 %vm3718_vm9, %v10208_v12  ;;  %v5508_v12 = vshll.u32 %v3281_v1, 16 }
 0x516   : > { %v5514_v30 = vrot.slane %v5512_v0, 4 }
 0x517   : > { %v5510_v39 = vrot.slane %v5508_v12, 5 }
 0x51c   : > { %7472 = vmatmul.mubr.msk.bf16.gmra.mrb[24].mxu1 %vm3718_vm9, %v10212_v5  ;;  %v5501_v5 = vrot.slane %v5499_v2, 4 }
 0x51d   : > { %7475 = vmatprep.mubr.msk.bf16.mxu1 %vm3718_vm9, %v10505_v37  ;;  %v5515_v37 = vor.u32 %v5514_v30, %v5510_v39 }
 0x51e   : > { %v5505_v24 = vor.u32 %v5504_v60, %v5501_v5 }
 0x524   : > { %7476 = vmatmul.mubr.msk.bf16.gmra.mrb[28].mxu1 %vm3718_vm9, %v6474_v47 }
 0x525   : > { %7481 = vmatprep.mubr.msk.bf16.mxu1 %vm3718_vm9, %v11097_v26  ;;  %v5518_v26 = vshll.u32 %v3282_v31, 16 }
 0x52c   : > { %7482 = vmatmul.mubr.msk.bf16.vlgmr.msra.gmra.mrb[0].mxu1 %vm3718_vm9, %v11098_v19  ;;  %v5506_v19 = vrot.slane %v5505_v24, 4 }
 0x52d   : > { %7485 = vmatprep.mubr.msk.bf16.mxu1 %vm3718_vm9, %v11099_v50  ;;  %7514 = vmatpush3.bf16.msra.mxu1 %v5743_v35  ;;  %v5516_v50 = vrot.slane %v5515_v37, 4 }
 0x534   : > { %7486 = vmatmul.mubr.msk.bf16.gmra.mrb[4].mxu1 %vm3718_vm9, %v11100_v42  ;;  %v5520_v42 = vrot.slane %v5518_v26, 5 }
 0x535   : > { %7489 = vmatprep.mubr.msk.bf16.mxu1 %vm3718_vm9, %v11101_v34  ;;  %v5511_v34 = vsel %vm8204_vm5, %v5506_v19, %v5510_v39 }
 0x53c   : > { %7490 = vmatmul.mubr.msk.bf16.gmra.mrb[8].mxu1 %vm3718_vm9, %v11102_v48 }
 0x53d   : > { %7493 = vmatprep.mubr.msk.bf16.mxu1 %vm3718_vm9, %v11103_v43 }
 0x544   : > { %7494 = vmatmul.mubr.msk.bf16.gmra.mrb[12].mxu1 %vm3718_vm9, %v11104_v13 }
 0x545   : > { %7497 = vmatprep.mubr.msk.bf16.mxu1 %vm3718_vm9, %v11105_v21 }
 0x54c   : > { %7498 = vmatmul.mubr.msk.bf16.gmra.mrb[16].mxu1 %vm3718_vm9, %v11106_v55 }
 0x54d   : > { %7501 = vmatprep.mubr.msk.bf16.mxu1 %vm3718_vm9, %v11107_v14 }
 0x554   : > { %7502 = vmatmul.mubr.msk.bf16.gmra.mrb[20].mxu1 %vm3718_vm9, %v10153_v9  ;;  %v5521_v9 = vsel %vm8204_vm5, %v5516_v50, %v5520_v42 }
 0x555   : > { %7505 = vmatprep.mubr.msk.bf16.mxu1 %vm3718_vm9, %v11108_v51  ;;  %v6492_v48 = vcombine.low %v5511_v34, %v5521_v9 }
 0x55c   : > { %7506 = vmatmul.mubr.msk.bf16.gmra.mrb[24].mxu1 %vm3718_vm9, %v11109_v28 }
 0x55d   : > { %7509 = vmatprep.mubr.msk.bf16.mxu1 %vm3718_vm9, %v10553_v6 }
 0x564   : > { %7510 = vmatmul.mubr.msk.bf16.gmra.mrb[28].mxu1 %vm3718_vm9, %v6492_v48 }
 0x565   : > { %7515 = vmatprep.mubr.msk.bf16.mxu1 %vm3718_vm9, %v10402_v29  ;;  %v5732_v29 = vrot.slane %v3282_v31, 5 }
 0x56c   : > { %7516 = vmatmul.mubr.msk.bf16.vlgmr.msra.gmra.mrb[0].mxu1 %vm3718_vm9, %v10420_v23 }
 0x56d   : > { %7519 = vmatprep.mubr.msk.bf16.mxu1 %vm3718_vm9, %v10424_v61 }
 0x574   : > { %7520 = vmatmul.mubr.msk.bf16.gmra.mrb[4].mxu1 %vm3718_vm9, %v10440_v46 }
 0x575   : > { %7523 = vmatprep.mubr.msk.bf16.mxu1 %vm3718_vm9, %v10444_v18 }
 0x57c   : > { %7524 = vmatmul.mubr.msk.bf16.gmra.mrb[8].mxu1 %vm3718_vm9, %v10271_v7  ;;  %v5729_v7 = vrot.slane %v3281_v1, 5 }
 0x57d   : > { %7527 = vmatprep.mubr.msk.bf16.mxu1 %vm3718_vm9, %v10277_v53  ;;  %v6509_v53 = vrot.slane %v3280_v22, 9 }
 0x584   : > { %7528 = vmatmul.mubr.msk.bf16.gmra.mrb[12].mxu1 %vm3718_vm9, %v10291_v8  ;;  %v5731_v8 = vrot.slane %v5729_v7, 4 }
 0x585   : > { %7531 = vmatprep.mubr.msk.bf16.mxu1 %vm3718_vm9, %v10297_v32  ;;  %v5730_v32 = vsel %vm8190_vm4, %v6509_v53, %v5729_v7 }
 0x58c   : > { %7532 = vmatmul.mubr.msk.bf16.gmra.mrb[16].mxu1 %vm3718_vm9, %v10311_v20  ;;  %v5733_v20 = vsel %vm8190_vm4, %v5731_v8, %v5732_v29 }
 0x58d   : > { %7535 = vmatprep.mubr.msk.bf16.mxu1 %vm3718_vm9, %v10317_v3  ;;  %v6511_v3 = vcombine.low %v5730_v32, %v5733_v20 }
 0x594   : > { %7536 = vmatmul.mubr.msk.bf16.gmra.mrb[20].mxu1 %vm3718_vm9, %v10332_v33  ;;  %v10707_v33 = vld [vmem:[%s10863_s4] ss:$0 sm:$0xff] }
 0x595   : > { %7539 = vmatprep.mubr.msk.bf16.mxu1 %vm3718_vm9, %v10342_v52 }
 0x59c   : > { %7540 = vmatmul.mubr.msk.bf16.gmra.mrb[24].mxu1 %vm3718_vm9, %v10353_v16 }
 0x59d   : > { %7543 = vmatprep.mubr.msk.bf16.mxu1 %vm3718_vm9, %v10362_v10 }
 0x5a4   : > { %7544 = vmatmul.mubr.msk.bf16.gmra.mrb[28].mxu1 %vm3718_vm9, %v6511_v3 }
 0x63f   : > { %v7517_v52 = vpop.f32.mrb[0].mxu1 }
 0x640   : > { %v5947_v16 = vadd.f32 %v7517_v52, %v10707_v33  ;;  %v5779_v10 = vpop.f32.mrb[1].mxu1 }
 0x641   : > { %v5945_v23 = vadd.f32 %v10707_v33, %v5779_v10  ;;  %v7518_v27 = vpop.f32.mrb[2].mxu1 }
 0x642   : > { %5980 = vst.msk [vmem:[%s10711_s9 + $0x10] sm:$0xff] %vm5977_vm0, %v5947_v16  ;;  %v5948_v61 = vadd.f32 %v7518_v27, %v10707_v33  ;;  %v5782_v46 = vpop.f32.mrb[3].mxu1 }
 0x643   : > { %5978 = vst.msk [vmem:[%s10711_s9] sm:$0xff] %vm5977_vm0, %v5945_v23  ;;  %v5946_v18 = vadd.f32 %v10707_v33, %v5782_v46 }
 0x644   : > { %5981 = vst.msk [vmem:[%s10711_s9 + $0x18] sm:$0xff] %vm5977_vm0, %v5948_v61 }
 0x645   : > { %5979 = vst.msk [vmem:[%s10711_s9 + $0x8] sm:$0xff] %vm5977_vm0, %v5946_v18 }
 0x647   : > { %v7521_v43 = vpop.f32.mrb[4].mxu1 }
 0x648   : > { %v5951_v13 = vadd.f32 %v7521_v43, %v10707_v33  ;;  %v5795_v21 = vpop.f32.mrb[5].mxu1 }
 0x649   : > { %v5949_v55 = vadd.f32 %v10707_v33, %v5795_v21  ;;  %v7522_v62 = vpop.f32.mrb[6].mxu1 }
 0x64a   : > { %5984 = vst.msk [vmem:[%s10711_s9 + $0x30] sm:$0xff] %vm5977_vm0, %v5951_v13  ;;  %v5952_v44 = vadd.f32 %v7522_v62, %v10707_v33  ;;  %v5798_v41 = vpop.f32.mrb[7].mxu1 }
 0x64b   : > { %5982 = vst.msk [vmem:[%s10711_s9 + $0x20] sm:$0xff] %vm5977_vm0, %v5949_v55  ;;  %v5950_v14 = vadd.f32 %v10707_v33, %v5798_v41 }
 0x64c   : > { %5985 = vst.msk [vmem:[%s10711_s9 + $0x38] sm:$0xff] %vm5977_vm0, %v5952_v44 }
 0x64d   : > { %5983 = vst.msk [vmem:[%s10711_s9 + $0x28] sm:$0xff] %vm5977_vm0, %v5950_v14 }
 0x64f   : > { %v7525_v25 = vpop.f32.mrb[8].mxu1 }
 0x650   : > { %v5955_v54 = vadd.f32 %v7525_v25, %v10707_v33  ;;  %v5811_v57 = vpop.f32.mrb[9].mxu1 }
 0x651   : > { %v5953_v36 = vadd.f32 %v10707_v33, %v5811_v57  ;;  %v7526_v4 = vpop.f32.mrb[10].mxu1 }
 0x652   : > { %5988 = vst.msk [vmem:[%s10711_s9 + $0x50] sm:$0xff] %vm5977_vm0, %v5955_v54  ;;  %v5956_v56 = vadd.f32 %v7526_v4, %v10707_v33  ;;  %v5814_v51 = vpop.f32.mrb[11].mxu1 }
 0x653   : > { %5986 = vst.msk [vmem:[%s10711_s9 + $0x40] sm:$0xff] %vm5977_vm0, %v5953_v36  ;;  %v5954_v28 = vadd.f32 %v10707_v33, %v5814_v51 }
 0x654   : > { %5989 = vst.msk [vmem:[%s10711_s9 + $0x58] sm:$0xff] %vm5977_vm0, %v5956_v56 }
 0x655   : > { %5987 = vst.msk [vmem:[%s10711_s9 + $0x48] sm:$0xff] %vm5977_vm0, %v5954_v28 }
 0x657   : > { %v7529_v59 = vpop.f32.mrb[12].mxu1 }
 0x658   : > { %v5959_v58 = vadd.f32 %v7529_v59, %v10707_v33  ;;  %v5827_v63 = vpop.f32.mrb[13].mxu1 }
 0x659   : > { %v5957_v40 = vadd.f32 %v10707_v33, %v5827_v63  ;;  %v7530_v15 = vpop.f32.mrb[14].mxu1 }
 0x65a   : > { %5992 = vst.msk [vmem:[%s10711_s9 + $0x70] sm:$0xff] %vm5977_vm0, %v5959_v58  ;;  %v5960_v6 = vadd.f32 %v7530_v15, %v10707_v33  ;;  %v5830_v38 = vpop.f32.mrb[15].mxu1 }
 0x65b   : > { %5990 = vst.msk [vmem:[%s10711_s9 + $0x60] sm:$0xff] %vm5977_vm0, %v5957_v40  ;;  %v5958_v49 = vadd.f32 %v10707_v33, %v5830_v38 }
 0x65c   : > { %5993 = vst.msk [vmem:[%s10711_s9 + $0x78] sm:$0xff] %vm5977_vm0, %v5960_v6 }
 0x65d   : > { %5991 = vst.msk [vmem:[%s10711_s9 + $0x68] sm:$0xff] %vm5977_vm0, %v5958_v49 }
 0x65f   : > { %v7533_v17 = vpop.f32.mrb[16].mxu1 }
 0x660   : > { %v5963_v45 = vadd.f32 %v7533_v17, %v10707_v33  ;;  %v5843_v22 = vpop.f32.mrb[17].mxu1 }
 0x661   : > { %v5961_v1 = vadd.f32 %v10707_v33, %v5843_v22  ;;  %v7534_v47 = vpop.f32.mrb[18].mxu1 }
 0x662   : > { %5996 = vst.msk [vmem:[%s10711_s9 + $0x90] sm:$0xff] %vm5977_vm0, %v5963_v45  ;;  %v5964_v35 = vadd.f32 %v7534_v47, %v10707_v33  ;;  %v5846_v2 = vpop.f32.mrb[19].mxu1 }
 0x663   : > { %5994 = vst.msk [vmem:[%s10711_s9 + $0x80] sm:$0xff] %vm5977_vm0, %v5961_v1  ;;  %v5962_v11 = vadd.f32 %v10707_v33, %v5846_v2 }
 0x664   : > { %5997 = vst.msk [vmem:[%s10711_s9 + $0x98] sm:$0xff] %vm5977_vm0, %v5964_v35 }
 0x665   : > { %5995 = vst.msk [vmem:[%s10711_s9 + $0x88] sm:$0xff] %vm5977_vm0, %v5962_v11 }
 0x667   : > { %v7537_v0 = vpop.f32.mrb[20].mxu1 }
 0x668   : > { %v5967_v12 = vadd.f32 %v7537_v0, %v10707_v33  ;;  %v5859_v5 = vpop.f32.mrb[21].mxu1 }
 0x669   : > { %v5965_v60 = vadd.f32 %v10707_v33, %v5859_v5  ;;  %v7538_v39 = vpop.f32.mrb[22].mxu1 }
 0x66a   : > { %6000 = vst.msk [vmem:[%s10711_s9 + $0xb0] sm:$0xff] %vm5977_vm0, %v5967_v12  ;;  %v5968_v30 = vadd.f32 %v7538_v39, %v10707_v33  ;;  %v5862_v31 = vpop.f32.mrb[23].mxu1 }
 0x66b   : > { %5998 = vst.msk [vmem:[%s10711_s9 + $0xa0] sm:$0xff] %vm5977_vm0, %v5965_v60  ;;  %v5966_v24 = vadd.f32 %v10707_v33, %v5862_v31 }
 0x66c   : > { %6001 = vst.msk [vmem:[%s10711_s9 + $0xb8] sm:$0xff] %vm5977_vm0, %v5968_v30 }
 0x66d   : > { %5999 = vst.msk [vmem:[%s10711_s9 + $0xa8] sm:$0xff] %vm5977_vm0, %v5966_v24 }
 0x66f   : > { %v7541_v37 = vpop.f32.mrb[24].mxu1 }
 0x670   : > { %v5971_v26 = vadd.f32 %v7541_v37, %v10707_v33  ;;  %v5875_v19 = vpop.f32.mrb[25].mxu1 }
 0x671   : > { %v5969_v50 = vadd.f32 %v10707_v33, %v5875_v19  ;;  %v7542_v42 = vpop.f32.mrb[26].mxu1 }
 0x672   : > { %6004 = vst.msk [vmem:[%s10711_s9 + $0xd0] sm:$0xff] %vm5977_vm0, %v5971_v26  ;;  %v5972_v34 = vadd.f32 %v7542_v42, %v10707_v33  ;;  %v5878_v9 = vpop.f32.mrb[27].mxu1 }
 0x673   : > { %6002 = vst.msk [vmem:[%s10711_s9 + $0xc0] sm:$0xff] %vm5977_vm0, %v5969_v50  ;;  %v5970_v48 = vadd.f32 %v10707_v33, %v5878_v9 }
 0x674   : > { %6005 = vst.msk [vmem:[%s10711_s9 + $0xd8] sm:$0xff] %vm5977_vm0, %v5972_v34 }
 0x675   : > { %6003 = vst.msk [vmem:[%s10711_s9 + $0xc8] sm:$0xff] %vm5977_vm0, %v5970_v48 }
 0x677   : > { %v7545_v7 = vpop.f32.mrb[28].mxu1 }
 0x678   : > { %v5975_v53 = vadd.f32 %v7545_v7, %v10707_v33  ;;  %v5891_v8 = vpop.f32.mrb[29].mxu1 }
 0x679   : > { %v5973_v29 = vadd.f32 %v10707_v33, %v5891_v8  ;;  %v7546_v32 = vpop.f32.mrb[30].mxu1 }
 0x67a   : > { %6008 = vst.msk [vmem:[%s10711_s9 + $0xf0] sm:$0xff] %vm5977_vm0, %v5975_v53  ;;  %v5976_v20 = vadd.f32 %v7546_v32, %v10707_v33  ;;  %v5894_v3 = vpop.f32.mrb[31].mxu1 }
 0x67b   : > { %6006 = vst.msk [vmem:[%s10711_s9 + $0xe0] sm:$0xff] %vm5977_vm0, %v5973_v29  ;;  %v5974_v52 = vadd.f32 %v10707_v33, %v5894_v3 }
 0x67c   : > { %6009 = vst.msk [vmem:[%s10711_s9 + $0xf8] sm:$0xff] %vm5977_vm0, %v5976_v20 }
 0x67d   : > { %6007 = vst.msk [vmem:[%s10711_s9 + $0xe8] sm:$0xff] %vm5977_vm0, %v5974_v52 }
 0x67e   : > { %7989 = shalt.err (!%p7986_p3)
}
 0x67f   : > { %s7990_s20 = scalar_lea.hbm %s10805_s13, 4096  ;;  %s7994_s28 = scalar_lea.hbm %s10865_s6, 8192 }
 0x680   : > { %p7991_p4 = scmp.ne.s32.totalorder %s10805_s13, %s7990_s20  ;;  %p7995_p9 = scmp.lt.u32.totalorder %s10805_s13, %s10865_s6 }
 0x681   : > { %p7996_p10 = scmp.lt.u32.totalorder %s7994_s28, %s7990_s20  ;;  %p7998_p12 = scmp.lt.u32.totalorder %s7990_s20, %s10805_s13 }
 0x682   : > { %p7992_p7 = pnand %p7991_p4, %p8117_p5 }
 0x683   : > { %p7997_p11 = por %p7996_p10, %p7995_p9 }
 0x684   : > { %p7993_p8 = pneg %p7992_p7 }
 0x685   : > { %p7999_p13 = por %p7998_p12, %p7997_p11 }
 0x687   : > { %p8000_p0 = pnand %p7999_p13, %p7993_p8 }
 0x689   : > { %8003 = shalt.err (!%p8000_p0)
}
 0x68a   : > { %s8042_s10 = smov 128   ;;  %s8043_s12 = smov 8  }
 0x68b   : > { %7813 = dma.vmem_to_hbm [thread:$0]  (%p8117_p5), %s10807_s11, 4096, %s10805_s13, %s10818_s25, %s8042_s10, %s8042_s10, %s8043_s12  }
 0x68c PF: > { %p7819_p1 = scmp.ge.s32.totalorder %s8038_s24, 2  ;;  %s6055_s16 = sand.u32 1, %s8026_s21  }
 0x68d   : > { %s6056_s14 = scalar_lea.sflag [#allocation4], %s6055_s16 }
 0x68e   : > { %p7816_p2 = pnand %p7819_p1, %p8121_p6 }
 0x690   : > { %8021 = dma.done.wait (!%p7816_p2), %s6056_s14, 4096  }
 0x691   : > { %8023 = vsyncadd (!%p7816_p2), %s6056_s14, 4294963200  ;;  %p17_p3 = scmp.ge.s32.totalorder %s8104_s27, 4   ;;  %s11111_s21 = smov %s8030_s22 }
 0x692   : > { %s11112_s22 = smov %s8034_s23  ;;  %s11113_s23 = smov %s8115_s30 }
 0x693   : > { %s11114_s24 = smov %s8104_s27  ;;  %19 = sbr.rel (!%p17_p3) target bundleno = 3 (0x3), region = 96 }
 0x69a   :  { %6061 = vsyncpa [#allocation4], 1 }
 0x69b   :  { %6063 = vsyncpa [#allocation4 + $0x1], 1 }

</bundles_post_ra>
